<compile_context>
chip_gen: v7x
topology: tpu7x:2x2x1
jax: 0.10.0
libtpu: 0.0.40
codegen_flags: <defaults>
</compile_context>

<pallas_src>
import functools

import jax
import jax.numpy as jnp
from jax.experimental import pallas as pl
from jax.experimental.pallas import tpu as pltpu


# ---------------------------------------------------------------------------
# Kernel 1: fused conv (im2col matmul) + bias + ReLU + 2x2 max-pool
# ---------------------------------------------------------------------------
def _conv_relu_pool_kernel(p00_ref, p01_ref, p10_ref, p11_ref,
                           w_ref, b_ref, o_ref, *, trp):
    # p*_ref : [1, TRp, Wp, K*K*Cin]  bf16 im2col patches, one per 2x2 parity
    # w_ref  : [K*K*Cin, Cout]        bf16
    # b_ref  : [1, Cout]              f32
    # o_ref  : [1, TRp, Wp, Cout]     pooled + biased + ReLU'd output
    w = w_ref[...]
    b = b_ref[...]
    for r in range(trp):  # small static unroll
        m = None
        for p_ref in (p00_ref, p01_ref, p10_ref, p11_ref):
            z = jnp.dot(p_ref[0, r], w, preferred_element_type=jnp.float32)
            m = z if m is None else jnp.maximum(m, z)
        # per-channel bias and ReLU commute with the spatial max-pool
        o_ref[0, r] = jnp.maximum(m + b, 0.0).astype(o_ref.dtype)


def conv_relu_pool(x_nhwc, w_kkio, bias, *, ksize, trp=4):
    """x: [N,H,W,Cin] -> conv(k,valid) + bias -> ReLU -> maxpool2x2 -> [N,Hp,Wp,Cout]."""
    n, h, wd, cin = x_nhwc.shape
    kk = ksize
    cout = w_kkio.shape[-1]
    hc, wc = h - kk + 1, wd - kk + 1
    hp, wp = hc // 2, wc // 2
    kkc = kk * kk * cin
    assert hp % trp == 0

    # im2col in glue, pre-split into the 4 pooling parities (rh, rw) so the
    # kernel's pooling epilogue is a pure element-wise max over 4 matmuls.
    xb = x_nhwc.astype(jnp.bfloat16)
    parity_patches = []
    for rh in range(2):
        for rw in range(2):
            cols = []
            for kh in range(kk):
                for kw in range(kk):
                    cols.append(xb[:, rh + kh: rh + kh + 2 * hp: 2,
                                   rw + kw: rw + kw + 2 * wp: 2, :])
            parity_patches.append(jnp.concatenate(cols, axis=-1))  # [N,Hp,Wp,KKC]

    w_mat = w_kkio.reshape(kkc, cout).astype(jnp.bfloat16)
    b_mat = bias.reshape(1, cout).astype(jnp.float32)

    patch_spec = pl.BlockSpec((1, trp, wp, kkc), lambda i, t: (i, t, 0, 0))
    kern = functools.partial(_conv_relu_pool_kernel, trp=trp)
    return pl.pallas_call(
        kern,
        grid=(n, hp // trp),
        in_specs=[
            patch_spec, patch_spec, patch_spec, patch_spec,
            pl.BlockSpec((kkc, cout), lambda i, t: (0, 0)),
            pl.BlockSpec((1, cout), lambda i, t: (0, 0)),
        ],
        out_specs=pl.BlockSpec((1, trp, wp, cout), lambda i, t: (i, t, 0, 0)),
        out_shape=jax.ShapeDtypeStruct((n, hp, wp, cout), jnp.bfloat16),
        compiler_params=pltpu.CompilerParams(
            dimension_semantics=("parallel", "parallel"),
            vmem_limit_bytes=32 * 1024 * 1024),
    )(*parity_patches, w_mat, b_mat)


# ---------------------------------------------------------------------------
# Kernel 2: fused classifier head  fc1(K-tiled) -> ReLU -> fc2 -> ReLU -> fc3
# ---------------------------------------------------------------------------
def _mlp_head_kernel(x_ref, w1_ref, b1_ref, w2_ref, b2_ref, w3_ref, b3_ref,
                     o_ref, acc_ref):
    k = pl.program_id(0)

    @pl.when(k == 0)
    def _():
        acc_ref[...] = jnp.zeros_like(acc_ref)

    acc_ref[...] += jnp.dot(x_ref[...], w1_ref[...],
                            preferred_element_type=jnp.float32)

    @pl.when(k == pl.num_programs(0) - 1)
    def _():
        h1 = jnp.maximum(acc_ref[...] + b1_ref[...], 0.0)
        h2 = jnp.dot(h1.astype(jnp.bfloat16), w2_ref[...],
                     preferred_element_type=jnp.float32) + b2_ref[...]
        h2 = jnp.maximum(h2, 0.0)
        o_ref[...] = jnp.dot(h2.astype(jnp.bfloat16), w3_ref[...],
                             preferred_element_type=jnp.float32) + b3_ref[...]


def mlp_head(x, w1, b1, w2, b2, w3, b3, *, tk=4096):
    n, kdim = x.shape
    d1, d2, ncls = w1.shape[1], w2.shape[1], w3.shape[1]
    assert kdim % tk == 0
    return pl.pallas_call(
        _mlp_head_kernel,
        grid=(kdim // tk,),
        in_specs=[
            pl.BlockSpec((n, tk), lambda k: (0, k)),
            pl.BlockSpec((tk, d1), lambda k: (k, 0)),
            pl.BlockSpec((1, d1), lambda k: (0, 0)),
            pl.BlockSpec((d1, d2), lambda k: (0, 0)),
            pl.BlockSpec((1, d2), lambda k: (0, 0)),
            pl.BlockSpec((d2, ncls), lambda k: (0, 0)),
            pl.BlockSpec((1, ncls), lambda k: (0, 0)),
        ],
        out_specs=pl.BlockSpec((n, ncls), lambda k: (0, 0)),
        out_shape=jax.ShapeDtypeStruct((n, ncls), jnp.float32),
        scratch_shapes=[pltpu.VMEM((n, d1), jnp.float32)],
        compiler_params=pltpu.CompilerParams(
            dimension_semantics=("arbitrary",),
            vmem_limit_bytes=32 * 1024 * 1024),
    )(x.astype(jnp.bfloat16),
      w1.astype(jnp.bfloat16), b1.reshape(1, d1).astype(jnp.float32),
      w2.astype(jnp.bfloat16), b2.reshape(1, d2).astype(jnp.float32),
      w3.astype(jnp.bfloat16), b3.reshape(1, ncls).astype(jnp.float32))


# ---------------------------------------------------------------------------
# Parameters (deterministic synthetic weights; conv weights kept in
# [KH, KW, Cin, Cout] layout, equivalent to torch's [Cout, Cin, KH, KW]).
# ---------------------------------------------------------------------------
def build_params(key, n_classes=5):
    ks = jax.random.split(key, 10)

    def w(k, shape, scale=0.05):
        return (scale * jax.random.normal(k, shape)).astype(jnp.float32)

    return {
        "conv1_w": w(ks[0], (5, 5, 3, 6)),
        "conv1_b": w(ks[1], (6,)),
        "conv2_w": w(ks[2], (5, 5, 6, 16)),
        "conv2_b": w(ks[3], (16,)),
        "fc1_w": w(ks[4], (102400, 120), scale=0.01),
        "fc1_b": w(ks[5], (120,)),
        "fc2_w": w(ks[6], (120, 84)),
        "fc2_b": w(ks[7], (84,)),
        "fc3_w": w(ks[8], (84, n_classes)),
        "fc3_b": w(ks[9], (n_classes,)),
    }


# ---------------------------------------------------------------------------
# Forward pass (matches CNNModel.forward)
# ---------------------------------------------------------------------------
def cnn_forward(params, x_nchw):
    # PyTorch input is NCHW; compute in NHWC.
    x = jnp.transpose(x_nchw.astype(jnp.float32), (0, 2, 3, 1))
    x = conv_relu_pool(x, params["conv1_w"], params["conv1_b"], ksize=5, trp=4)
    x = conv_relu_pool(x, params["conv2_w"], params["conv2_b"], ksize=5, trp=4)
    # torch.flatten(x, 1) flattens in (C, H, W) order -> transpose back first.
    n = x.shape[0]
    feat = jnp.transpose(x, (0, 3, 1, 2)).reshape(n, -1)
    return mlp_head(feat,
                    params["fc1_w"], params["fc1_b"],
                    params["fc2_w"], params["fc2_b"],
                    params["fc3_w"], params["fc3_b"])


if __name__ == "__main__":
    key = jax.random.PRNGKey(0)
    kx, kp = jax.random.split(key)
    # fc1's hard-coded 102400 = 16*80*80 in-features implies 332x332 input:
    # 332 -conv5-> 328 -pool-> 164 -conv5-> 160 -pool-> 80.
    x = jax.random.normal(kx, (2, 3, 332, 332), dtype=jnp.float32)
    params = build_params(kp, n_classes=5)

    fwd = jax.jit(cnn_forward)
    logits = fwd(params, x)
    jax.block_until_ready(logits)
    assert logits.shape == (2, 5) and logits.dtype == jnp.float32
    print("KERNEL_OK")
</pallas_src>

<mosaic_0001>
module attributes {stable_mosaic.version = 11 : i64} {
  func.func @_conv_relu_pool_kernel(%arg0: i32, %arg1: i32, %arg2: memref<1x4x164x75xbf16, #tpu.memory_space<vmem>>, %arg3: memref<1x4x164x75xbf16, #tpu.memory_space<vmem>>, %arg4: memref<1x4x164x75xbf16, #tpu.memory_space<vmem>>, %arg5: memref<1x4x164x75xbf16, #tpu.memory_space<vmem>>, %arg6: memref<75x6xbf16, #tpu.memory_space<vmem>>, %arg7: memref<1x6xf32, #tpu.memory_space<vmem>>, %arg8: memref<1x4x164x6xbf16, #tpu.memory_space<vmem>>) attributes {dimension_semantics = [#tpu.dimension_semantics<parallel>, #tpu.dimension_semantics<parallel>], iteration_bounds = array<i64: 2, 41>, scalar_prefetch = 0 : i64, scratch_operands = 0 : i64, tpu.core_type = #tpu.core_type<tc>, window_params = [{transform_indices = @transform_0, window_bounds = array<i64: 1, 4, 164, 75>}, {transform_indices = @transform_1, window_bounds = array<i64: 1, 4, 164, 75>}, {transform_indices = @transform_2, window_bounds = array<i64: 1, 4, 164, 75>}, {transform_indices = @transform_3, window_bounds = array<i64: 1, 4, 164, 75>}, {pipeline_mode = #tpu.pipeline_mode<synchronous>, transform_indices = @transform_4, window_bounds = array<i64: 75, 6>}, {pipeline_mode = #tpu.pipeline_mode<synchronous>, transform_indices = @transform_5, window_bounds = array<i64: 1, 6>}, {transform_indices = @transform_6, window_bounds = array<i64: 1, 4, 164, 6>}]} {
    %c0 = arith.constant 0 : index
    %c0_0 = arith.constant 0 : index
    %0 = vector.load %arg6[%c0, %c0_0] : memref<75x6xbf16, #tpu.memory_space<vmem>>, vector<75x6xbf16>
    %c0_1 = arith.constant 0 : index
    %c0_2 = arith.constant 0 : index
    %1 = vector.load %arg7[%c0_1, %c0_2] : memref<1x6xf32, #tpu.memory_space<vmem>>, vector<1x6xf32>
    %c0_3 = arith.constant 0 : index
    %c0_4 = arith.constant 0 : index
    %c0_5 = arith.constant 0 : index
    %c0_6 = arith.constant 0 : index
    %2 = vector.load %arg2[%c0_3, %c0_4, %c0_5, %c0_6] : memref<1x4x164x75xbf16, #tpu.memory_space<vmem>>, vector<1x1x164x75xbf16>
    %3 = vector.shape_cast %2 : vector<1x1x164x75xbf16> to vector<164x75xbf16>
    %cst = arith.constant dense<0.000000e+00> : vector<164x6xf32>
    %4 = tpu.matmul %3, %0, %cst {dimension_numbers = #tpu.dot_dimension_numbers<[1], [0], [0], [1], [0, 0, 1, 1], [], []>} : vector<164x75xbf16>, vector<75x6xbf16>, vector<164x6xf32> -> vector<164x6xf32>
    %c0_7 = arith.constant 0 : index
    %c0_8 = arith.constant 0 : index
    %c0_9 = arith.constant 0 : index
    %c0_10 = arith.constant 0 : index
    %5 = vector.load %arg3[%c0_7, %c0_8, %c0_9, %c0_10] : memref<1x4x164x75xbf16, #tpu.memory_space<vmem>>, vector<1x1x164x75xbf16>
    %6 = vector.shape_cast %5 : vector<1x1x164x75xbf16> to vector<164x75xbf16>
    %cst_11 = arith.constant dense<0.000000e+00> : vector<164x6xf32>
    %7 = tpu.matmul %6, %0, %cst_11 {dimension_numbers = #tpu.dot_dimension_numbers<[1], [0], [0], [1], [0, 0, 1, 1], [], []>} : vector<164x75xbf16>, vector<75x6xbf16>, vector<164x6xf32> -> vector<164x6xf32>
    %8 = arith.maximumf %4, %7 : vector<164x6xf32>
    %c0_12 = arith.constant 0 : index
    %c0_13 = arith.constant 0 : index
    %c0_14 = arith.constant 0 : index
    %c0_15 = arith.constant 0 : index
    %9 = vector.load %arg4[%c0_12, %c0_13, %c0_14, %c0_15] : memref<1x4x164x75xbf16, #tpu.memory_space<vmem>>, vector<1x1x164x75xbf16>
    %10 = vector.shape_cast %9 : vector<1x1x164x75xbf16> to vector<164x75xbf16>
    %cst_16 = arith.constant dense<0.000000e+00> : vector<164x6xf32>
    %11 = tpu.matmul %10, %0, %cst_16 {dimension_numbers = #tpu.dot_dimension_numbers<[1], [0], [0], [1], [0, 0, 1, 1], [], []>} : vector<164x75xbf16>, vector<75x6xbf16>, vector<164x6xf32> -> vector<164x6xf32>
    %12 = arith.maximumf %8, %11 : vector<164x6xf32>
    %c0_17 = arith.constant 0 : index
    %c0_18 = arith.constant 0 : index
    %c0_19 = arith.constant 0 : index
    %c0_20 = arith.constant 0 : index
    %13 = vector.load %arg5[%c0_17, %c0_18, %c0_19, %c0_20] : memref<1x4x164x75xbf16, #tpu.memory_space<vmem>>, vector<1x1x164x75xbf16>
    %14 = vector.shape_cast %13 : vector<1x1x164x75xbf16> to vector<164x75xbf16>
    %cst_21 = arith.constant dense<0.000000e+00> : vector<164x6xf32>
    %15 = tpu.matmul %14, %0, %cst_21 {dimension_numbers = #tpu.dot_dimension_numbers<[1], [0], [0], [1], [0, 0, 1, 1], [], []>} : vector<164x75xbf16>, vector<75x6xbf16>, vector<164x6xf32> -> vector<164x6xf32>
    %16 = arith.maximumf %12, %15 : vector<164x6xf32>
    %17 = vector.broadcast %1 : vector<1x6xf32> to vector<164x6xf32>
    %18 = arith.addf %16, %17 : vector<164x6xf32>
    %cst_22 = arith.constant 0.000000e+00 : f32
    %19 = vector.broadcast %cst_22 : f32 to vector<164x6xf32>
    %20 = arith.maximumf %18, %19 : vector<164x6xf32>
    %21 = arith.truncf %20 : vector<164x6xf32> to vector<164x6xbf16>
    %c0_23 = arith.constant 0 : index
    %c0_24 = arith.constant 0 : index
    %c0_25 = arith.constant 0 : index
    %c0_26 = arith.constant 0 : index
    %22 = vector.load %arg8[%c0_23, %c0_24, %c0_25, %c0_26] : memref<1x4x164x6xbf16, #tpu.memory_space<vmem>>, vector<1x1x164x6xbf16>
    %23 = vector.shape_cast %22 : vector<1x1x164x6xbf16> to vector<164x6xbf16>
    %24 = vector.shape_cast %21 : vector<164x6xbf16> to vector<1x1x164x6xbf16>
    tpu.vector_store %arg8[%c0_23, %c0_24, %c0_25, %c0_26], %24 {strides = array<i32>} : memref<1x4x164x6xbf16, #tpu.memory_space<vmem>>, vector<1x1x164x6xbf16>,
    %c0_27 = arith.constant 0 : index
    %c1 = arith.constant 1 : index
    %c0_28 = arith.constant 0 : index
    %c0_29 = arith.constant 0 : index
    %25 = vector.load %arg2[%c0_27, %c1, %c0_28, %c0_29] : memref<1x4x164x75xbf16, #tpu.memory_space<vmem>>, vector<1x1x164x75xbf16>
    %26 = vector.shape_cast %25 : vector<1x1x164x75xbf16> to vector<164x75xbf16>
    %cst_30 = arith.constant dense<0.000000e+00> : vector<164x6xf32>
    %27 = tpu.matmul %26, %0, %cst_30 {dimension_numbers = #tpu.dot_dimension_numbers<[1], [0], [0], [1], [0, 0, 1, 1], [], []>} : vector<164x75xbf16>, vector<75x6xbf16>, vector<164x6xf32> -> vector<164x6xf32>
    %c0_31 = arith.constant 0 : index
    %c1_32 = arith.constant 1 : index
    %c0_33 = arith.constant 0 : index
    %c0_34 = arith.constant 0 : index
    %28 = vector.load %arg3[%c0_31, %c1_32, %c0_33, %c0_34] : memref<1x4x164x75xbf16, #tpu.memory_space<vmem>>, vector<1x1x164x75xbf16>
    %29 = vector.shape_cast %28 : vector<1x1x164x75xbf16> to vector<164x75xbf16>
    %cst_35 = arith.constant dense<0.000000e+00> : vector<164x6xf32>
    %30 = tpu.matmul %29, %0, %cst_35 {dimension_numbers = #tpu.dot_dimension_numbers<[1], [0], [0], [1], [0, 0, 1, 1], [], []>} : vector<164x75xbf16>, vector<75x6xbf16>, vector<164x6xf32> -> vector<164x6xf32>
    %31 = arith.maximumf %27, %30 : vector<164x6xf32>
    %c0_36 = arith.constant 0 : index
    %c1_37 = arith.constant 1 : index
    %c0_38 = arith.constant 0 : index
    %c0_39 = arith.constant 0 : index
    %32 = vector.load %arg4[%c0_36, %c1_37, %c0_38, %c0_39] : memref<1x4x164x75xbf16, #tpu.memory_space<vmem>>, vector<1x1x164x75xbf16>
    %33 = vector.shape_cast %32 : vector<1x1x164x75xbf16> to vector<164x75xbf16>
    %cst_40 = arith.constant dense<0.000000e+00> : vector<164x6xf32>
    %34 = tpu.matmul %33, %0, %cst_40 {dimension_numbers = #tpu.dot_dimension_numbers<[1], [0], [0], [1], [0, 0, 1, 1], [], []>} : vector<164x75xbf16>, vector<75x6xbf16>, vector<164x6xf32> -> vector<164x6xf32>
    %35 = arith.maximumf %31, %34 : vector<164x6xf32>
    %c0_41 = arith.constant 0 : index
    %c1_42 = arith.constant 1 : index
    %c0_43 = arith.constant 0 : index
    %c0_44 = arith.constant 0 : index
    %36 = vector.load %arg5[%c0_41, %c1_42, %c0_43, %c0_44] : memref<1x4x164x75xbf16, #tpu.memory_space<vmem>>, vector<1x1x164x75xbf16>
    %37 = vector.shape_cast %36 : vector<1x1x164x75xbf16> to vector<164x75xbf16>
    %cst_45 = arith.constant dense<0.000000e+00> : vector<164x6xf32>
    %38 = tpu.matmul %37, %0, %cst_45 {dimension_numbers = #tpu.dot_dimension_numbers<[1], [0], [0], [1], [0, 0, 1, 1], [], []>} : vector<164x75xbf16>, vector<75x6xbf16>, vector<164x6xf32> -> vector<164x6xf32>
    %39 = arith.maximumf %35, %38 : vector<164x6xf32>
    %40 = vector.broadcast %1 : vector<1x6xf32> to vector<164x6xf32>
    %41 = arith.addf %39, %40 : vector<164x6xf32>
    %cst_46 = arith.constant 0.000000e+00 : f32
    %42 = vector.broadcast %cst_46 : f32 to vector<164x6xf32>
    %43 = arith.maximumf %41, %42 : vector<164x6xf32>
    %44 = arith.truncf %43 : vector<164x6xf32> to vector<164x6xbf16>
    %c0_47 = arith.constant 0 : index
    %c1_48 = arith.constant 1 : index
    %c0_49 = arith.constant 0 : index
    %c0_50 = arith.constant 0 : index
    %45 = vector.load %arg8[%c0_47, %c1_48, %c0_49, %c0_50] : memref<1x4x164x6xbf16, #tpu.memory_space<vmem>>, vector<1x1x164x6xbf16>
    %46 = vector.shape_cast %45 : vector<1x1x164x6xbf16> to vector<164x6xbf16>
    %47 = vector.shape_cast %44 : vector<164x6xbf16> to vector<1x1x164x6xbf16>
    tpu.vector_store %arg8[%c0_47, %c1_48, %c0_49, %c0_50], %47 {strides = array<i32>} : memref<1x4x164x6xbf16, #tpu.memory_space<vmem>>, vector<1x1x164x6xbf16>,
    %c0_51 = arith.constant 0 : index
    %c2 = arith.constant 2 : index
    %c0_52 = arith.constant 0 : index
    %c0_53 = arith.constant 0 : index
    %48 = vector.load %arg2[%c0_51, %c2, %c0_52, %c0_53] : memref<1x4x164x75xbf16, #tpu.memory_space<vmem>>, vector<1x1x164x75xbf16>
    %49 = vector.shape_cast %48 : vector<1x1x164x75xbf16> to vector<164x75xbf16>
    %cst_54 = arith.constant dense<0.000000e+00> : vector<164x6xf32>
    %50 = tpu.matmul %49, %0, %cst_54 {dimension_numbers = #tpu.dot_dimension_numbers<[1], [0], [0], [1], [0, 0, 1, 1], [], []>} : vector<164x75xbf16>, vector<75x6xbf16>, vector<164x6xf32> -> vector<164x6xf32>
    %c0_55 = arith.constant 0 : index
    %c2_56 = arith.constant 2 : index
    %c0_57 = arith.constant 0 : index
    %c0_58 = arith.constant 0 : index
    %51 = vector.load %arg3[%c0_55, %c2_56, %c0_57, %c0_58] : memref<1x4x164x75xbf16, #tpu.memory_space<vmem>>, vector<1x1x164x75xbf16>
    %52 = vector.shape_cast %51 : vector<1x1x164x75xbf16> to vector<164x75xbf16>
    %cst_59 = arith.constant dense<0.000000e+00> : vector<164x6xf32>
    %53 = tpu.matmul %52, %0, %cst_59 {dimension_numbers = #tpu.dot_dimension_numbers<[1], [0], [0], [1], [0, 0, 1, 1], [], []>} : vector<164x75xbf16>, vector<75x6xbf16>, vector<164x6xf32> -> vector<164x6xf32>
    %54 = arith.maximumf %50, %53 : vector<164x6xf32>
    %c0_60 = arith.constant 0 : index
    %c2_61 = arith.constant 2 : index
    %c0_62 = arith.constant 0 : index
    %c0_63 = arith.constant 0 : index
    %55 = vector.load %arg4[%c0_60, %c2_61, %c0_62, %c0_63] : memref<1x4x164x75xbf16, #tpu.memory_space<vmem>>, vector<1x1x164x75xbf16>
    %56 = vector.shape_cast %55 : vector<1x1x164x75xbf16> to vector<164x75xbf16>
    %cst_64 = arith.constant dense<0.000000e+00> : vector<164x6xf32>
    %57 = tpu.matmul %56, %0, %cst_64 {dimension_numbers = #tpu.dot_dimension_numbers<[1], [0], [0], [1], [0, 0, 1, 1], [], []>} : vector<164x75xbf16>, vector<75x6xbf16>, vector<164x6xf32> -> vector<164x6xf32>
    %58 = arith.maximumf %54, %57 : vector<164x6xf32>
    %c0_65 = arith.constant 0 : index
    %c2_66 = arith.constant 2 : index
    %c0_67 = arith.constant 0 : index
    %c0_68 = arith.constant 0 : index
    %59 = vector.load %arg5[%c0_65, %c2_66, %c0_67, %c0_68] : memref<1x4x164x75xbf16, #tpu.memory_space<vmem>>, vector<1x1x164x75xbf16>
    %60 = vector.shape_cast %59 : vector<1x1x164x75xbf16> to vector<164x75xbf16>
    %cst_69 = arith.constant dense<0.000000e+00> : vector<164x6xf32>
    %61 = tpu.matmul %60, %0, %cst_69 {dimension_numbers = #tpu.dot_dimension_numbers<[1], [0], [0], [1], [0, 0, 1, 1], [], []>} : vector<164x75xbf16>, vector<75x6xbf16>, vector<164x6xf32> -> vector<164x6xf32>
    %62 = arith.maximumf %58, %61 : vector<164x6xf32>
    %63 = vector.broadcast %1 : vector<1x6xf32> to vector<164x6xf32>
    %64 = arith.addf %62, %63 : vector<164x6xf32>
    %cst_70 = arith.constant 0.000000e+00 : f32
    %65 = vector.broadcast %cst_70 : f32 to vector<164x6xf32>
    %66 = arith.maximumf %64, %65 : vector<164x6xf32>
    %67 = arith.truncf %66 : vector<164x6xf32> to vector<164x6xbf16>
    %c0_71 = arith.constant 0 : index
    %c2_72 = arith.constant 2 : index
    %c0_73 = arith.constant 0 : index
    %c0_74 = arith.constant 0 : index
    %68 = vector.load %arg8[%c0_71, %c2_72, %c0_73, %c0_74] : memref<1x4x164x6xbf16, #tpu.memory_space<vmem>>, vector<1x1x164x6xbf16>
    %69 = vector.shape_cast %68 : vector<1x1x164x6xbf16> to vector<164x6xbf16>
    %70 = vector.shape_cast %67 : vector<164x6xbf16> to vector<1x1x164x6xbf16>
    tpu.vector_store %arg8[%c0_71, %c2_72, %c0_73, %c0_74], %70 {strides = array<i32>} : memref<1x4x164x6xbf16, #tpu.memory_space<vmem>>, vector<1x1x164x6xbf16>,
    %c0_75 = arith.constant 0 : index
    %c3 = arith.constant 3 : index
    %c0_76 = arith.constant 0 : index
    %c0_77 = arith.constant 0 : index
    %71 = vector.load %arg2[%c0_75, %c3, %c0_76, %c0_77] : memref<1x4x164x75xbf16, #tpu.memory_space<vmem>>, vector<1x1x164x75xbf16>
    %72 = vector.shape_cast %71 : vector<1x1x164x75xbf16> to vector<164x75xbf16>
    %cst_78 = arith.constant dense<0.000000e+00> : vector<164x6xf32>
    %73 = tpu.matmul %72, %0, %cst_78 {dimension_numbers = #tpu.dot_dimension_numbers<[1], [0], [0], [1], [0, 0, 1, 1], [], []>} : vector<164x75xbf16>, vector<75x6xbf16>, vector<164x6xf32> -> vector<164x6xf32>
    %c0_79 = arith.constant 0 : index
    %c3_80 = arith.constant 3 : index
    %c0_81 = arith.constant 0 : index
    %c0_82 = arith.constant 0 : index
    %74 = vector.load %arg3[%c0_79, %c3_80, %c0_81, %c0_82] : memref<1x4x164x75xbf16, #tpu.memory_space<vmem>>, vector<1x1x164x75xbf16>
    %75 = vector.shape_cast %74 : vector<1x1x164x75xbf16> to vector<164x75xbf16>
    %cst_83 = arith.constant dense<0.000000e+00> : vector<164x6xf32>
    %76 = tpu.matmul %75, %0, %cst_83 {dimension_numbers = #tpu.dot_dimension_numbers<[1], [0], [0], [1], [0, 0, 1, 1], [], []>} : vector<164x75xbf16>, vector<75x6xbf16>, vector<164x6xf32> -> vector<164x6xf32>
    %77 = arith.maximumf %73, %76 : vector<164x6xf32>
    %c0_84 = arith.constant 0 : index
    %c3_85 = arith.constant 3 : index
    %c0_86 = arith.constant 0 : index
    %c0_87 = arith.constant 0 : index
    %78 = vector.load %arg4[%c0_84, %c3_85, %c0_86, %c0_87] : memref<1x4x164x75xbf16, #tpu.memory_space<vmem>>, vector<1x1x164x75xbf16>
    %79 = vector.shape_cast %78 : vector<1x1x164x75xbf16> to vector<164x75xbf16>
    %cst_88 = arith.constant dense<0.000000e+00> : vector<164x6xf32>
    %80 = tpu.matmul %79, %0, %cst_88 {dimension_numbers = #tpu.dot_dimension_numbers<[1], [0], [0], [1], [0, 0, 1, 1], [], []>} : vector<164x75xbf16>, vector<75x6xbf16>, vector<164x6xf32> -> vector<164x6xf32>
    %81 = arith.maximumf %77, %80 : vector<164x6xf32>
    %c0_89 = arith.constant 0 : index
    %c3_90 = arith.constant 3 : index
    %c0_91 = arith.constant 0 : index
    %c0_92 = arith.constant 0 : index
    %82 = vector.load %arg5[%c0_89, %c3_90, %c0_91, %c0_92] : memref<1x4x164x75xbf16, #tpu.memory_space<vmem>>, vector<1x1x164x75xbf16>
    %83 = vector.shape_cast %82 : vector<1x1x164x75xbf16> to vector<164x75xbf16>
    %cst_93 = arith.constant dense<0.000000e+00> : vector<164x6xf32>
    %84 = tpu.matmul %83, %0, %cst_93 {dimension_numbers = #tpu.dot_dimension_numbers<[1], [0], [0], [1], [0, 0, 1, 1], [], []>} : vector<164x75xbf16>, vector<75x6xbf16>, vector<164x6xf32> -> vector<164x6xf32>
    %85 = arith.maximumf %81, %84 : vector<164x6xf32>
    %86 = vector.broadcast %1 : vector<1x6xf32> to vector<164x6xf32>
    %87 = arith.addf %85, %86 : vector<164x6xf32>
    %cst_94 = arith.constant 0.000000e+00 : f32
    %88 = vector.broadcast %cst_94 : f32 to vector<164x6xf32>
    %89 = arith.maximumf %87, %88 : vector<164x6xf32>
    %90 = arith.truncf %89 : vector<164x6xf32> to vector<164x6xbf16>
    %c0_95 = arith.constant 0 : index
    %c3_96 = arith.constant 3 : index
    %c0_97 = arith.constant 0 : index
    %c0_98 = arith.constant 0 : index
    %91 = vector.load %arg8[%c0_95, %c3_96, %c0_97, %c0_98] : memref<1x4x164x6xbf16, #tpu.memory_space<vmem>>, vector<1x1x164x6xbf16>
    %92 = vector.shape_cast %91 : vector<1x1x164x6xbf16> to vector<164x6xbf16>
    %93 = vector.shape_cast %90 : vector<164x6xbf16> to vector<1x1x164x6xbf16>
    tpu.vector_store %arg8[%c0_95, %c3_96, %c0_97, %c0_98], %93 {strides = array<i32>} : memref<1x4x164x6xbf16, #tpu.memory_space<vmem>>, vector<1x1x164x6xbf16>,
    return
  }
  func.func @transform_0(%arg0: i32, %arg1: i32) -> (i32, i32, i32, i32) {
    %c0_i32 = arith.constant 0 : i32
    %c0_i32_0 = arith.constant 0 : i32
    %c0_i32_1 = arith.constant 0 : i32
    return %arg0, %arg1, %c0_i32, %c0_i32_0 : i32, i32, i32, i32
  }
  func.func @transform_1(%arg0: i32, %arg1: i32) -> (i32, i32, i32, i32) {
    %c0_i32 = arith.constant 0 : i32
    %c0_i32_0 = arith.constant 0 : i32
    %c0_i32_1 = arith.constant 0 : i32
    return %arg0, %arg1, %c0_i32, %c0_i32_0 : i32, i32, i32, i32
  }
  func.func @transform_2(%arg0: i32, %arg1: i32) -> (i32, i32, i32, i32) {
    %c0_i32 = arith.constant 0 : i32
    %c0_i32_0 = arith.constant 0 : i32
    %c0_i32_1 = arith.constant 0 : i32
    return %arg0, %arg1, %c0_i32, %c0_i32_0 : i32, i32, i32, i32
  }
  func.func @transform_3(%arg0: i32, %arg1: i32) -> (i32, i32, i32, i32) {
    %c0_i32 = arith.constant 0 : i32
    %c0_i32_0 = arith.constant 0 : i32
    %c0_i32_1 = arith.constant 0 : i32
    return %arg0, %arg1, %c0_i32, %c0_i32_0 : i32, i32, i32, i32
  }
  func.func @transform_4(%arg0: i32, %arg1: i32) -> (i32, i32) {
    %c0_i32 = arith.constant 0 : i32
    %c0_i32_0 = arith.constant 0 : i32
    %c0_i32_1 = arith.constant 0 : i32
    return %c0_i32, %c0_i32_0 : i32, i32
  }
  func.func @transform_5(%arg0: i32, %arg1: i32) -> (i32, i32) {
    %c0_i32 = arith.constant 0 : i32
    %c0_i32_0 = arith.constant 0 : i32
    %c0_i32_1 = arith.constant 0 : i32
    return %c0_i32, %c0_i32_0 : i32, i32
  }
  func.func @transform_6(%arg0: i32, %arg1: i32) -> (i32, i32, i32, i32) {
    %c0_i32 = arith.constant 0 : i32
    %c0_i32_0 = arith.constant 0 : i32
    %c0_i32_1 = arith.constant 0 : i32
    return %arg0, %arg1, %c0_i32, %c0_i32_0 : i32, i32, i32, i32
  }
}

module attributes {stable_mosaic.version = 11 : i64} {
  func.func @_conv_relu_pool_kernel(%arg0: i32, %arg1: i32, %arg2: memref<1x4x80x150xbf16, #tpu.memory_space<vmem>>, %arg3: memref<1x4x80x150xbf16, #tpu.memory_space<vmem>>, %arg4: memref<1x4x80x150xbf16, #tpu.memory_space<vmem>>, %arg5: memref<1x4x80x150xbf16, #tpu.memory_space<vmem>>, %arg6: memref<150x16xbf16, #tpu.memory_space<vmem>>, %arg7: memref<1x16xf32, #tpu.memory_space<vmem>>, %arg8: memref<1x4x80x16xbf16, #tpu.memory_space<vmem>>) attributes {dimension_semantics = [#tpu.dimension_semantics<parallel>, #tpu.dimension_semantics<parallel>], iteration_bounds = array<i64: 2, 20>, scalar_prefetch = 0 : i64, scratch_operands = 0 : i64, tpu.core_type = #tpu.core_type<tc>, window_params = [{transform_indices = @transform_0, window_bounds = array<i64: 1, 4, 80, 150>}, {transform_indices = @transform_1, window_bounds = array<i64: 1, 4, 80, 150>}, {transform_indices = @transform_2, window_bounds = array<i64: 1, 4, 80, 150>}, {transform_indices = @transform_3, window_bounds = array<i64: 1, 4, 80, 150>}, {pipeline_mode = #tpu.pipeline_mode<synchronous>, transform_indices = @transform_4, window_bounds = array<i64: 150, 16>}, {pipeline_mode = #tpu.pipeline_mode<synchronous>, transform_indices = @transform_5, window_bounds = array<i64: 1, 16>}, {transform_indices = @transform_6, window_bounds = array<i64: 1, 4, 80, 16>}]} {
    %c0 = arith.constant 0 : index
    %c0_0 = arith.constant 0 : index
    %0 = vector.load %arg6[%c0, %c0_0] : memref<150x16xbf16, #tpu.memory_space<vmem>>, vector<150x16xbf16>
    %c0_1 = arith.constant 0 : index
    %c0_2 = arith.constant 0 : index
    %1 = vector.load %arg7[%c0_1, %c0_2] : memref<1x16xf32, #tpu.memory_space<vmem>>, vector<1x16xf32>
    %c0_3 = arith.constant 0 : index
    %c0_4 = arith.constant 0 : index
    %c0_5 = arith.constant 0 : index
    %c0_6 = arith.constant 0 : index
    %2 = vector.load %arg2[%c0_3, %c0_4, %c0_5, %c0_6] : memref<1x4x80x150xbf16, #tpu.memory_space<vmem>>, vector<1x1x80x150xbf16>
    %3 = vector.shape_cast %2 : vector<1x1x80x150xbf16> to vector<80x150xbf16>
    %cst = arith.constant dense<0.000000e+00> : vector<80x16xf32>
    %4 = tpu.matmul %3, %0, %cst {dimension_numbers = #tpu.dot_dimension_numbers<[1], [0], [0], [1], [0, 0, 1, 1], [], []>} : vector<80x150xbf16>, vector<150x16xbf16>, vector<80x16xf32> -> vector<80x16xf32>
    %c0_7 = arith.constant 0 : index
    %c0_8 = arith.constant 0 : index
    %c0_9 = arith.constant 0 : index
    %c0_10 = arith.constant 0 : index
    %5 = vector.load %arg3[%c0_7, %c0_8, %c0_9, %c0_10] : memref<1x4x80x150xbf16, #tpu.memory_space<vmem>>, vector<1x1x80x150xbf16>
    %6 = vector.shape_cast %5 : vector<1x1x80x150xbf16> to vector<80x150xbf16>
    %cst_11 = arith.constant dense<0.000000e+00> : vector<80x16xf32>
    %7 = tpu.matmul %6, %0, %cst_11 {dimension_numbers = #tpu.dot_dimension_numbers<[1], [0], [0], [1], [0, 0, 1, 1], [], []>} : vector<80x150xbf16>, vector<150x16xbf16>, vector<80x16xf32> -> vector<80x16xf32>
    %8 = arith.maximumf %4, %7 : vector<80x16xf32>
    %c0_12 = arith.constant 0 : index
    %c0_13 = arith.constant 0 : index
    %c0_14 = arith.constant 0 : index
    %c0_15 = arith.constant 0 : index
    %9 = vector.load %arg4[%c0_12, %c0_13, %c0_14, %c0_15] : memref<1x4x80x150xbf16, #tpu.memory_space<vmem>>, vector<1x1x80x150xbf16>
    %10 = vector.shape_cast %9 : vector<1x1x80x150xbf16> to vector<80x150xbf16>
    %cst_16 = arith.constant dense<0.000000e+00> : vector<80x16xf32>
    %11 = tpu.matmul %10, %0, %cst_16 {dimension_numbers = #tpu.dot_dimension_numbers<[1], [0], [0], [1], [0, 0, 1, 1], [], []>} : vector<80x150xbf16>, vector<150x16xbf16>, vector<80x16xf32> -> vector<80x16xf32>
    %12 = arith.maximumf %8, %11 : vector<80x16xf32>
    %c0_17 = arith.constant 0 : index
    %c0_18 = arith.constant 0 : index
    %c0_19 = arith.constant 0 : index
    %c0_20 = arith.constant 0 : index
    %13 = vector.load %arg5[%c0_17, %c0_18, %c0_19, %c0_20] : memref<1x4x80x150xbf16, #tpu.memory_space<vmem>>, vector<1x1x80x150xbf16>
    %14 = vector.shape_cast %13 : vector<1x1x80x150xbf16> to vector<80x150xbf16>
    %cst_21 = arith.constant dense<0.000000e+00> : vector<80x16xf32>
    %15 = tpu.matmul %14, %0, %cst_21 {dimension_numbers = #tpu.dot_dimension_numbers<[1], [0], [0], [1], [0, 0, 1, 1], [], []>} : vector<80x150xbf16>, vector<150x16xbf16>, vector<80x16xf32> -> vector<80x16xf32>
    %16 = arith.maximumf %12, %15 : vector<80x16xf32>
    %17 = vector.broadcast %1 : vector<1x16xf32> to vector<80x16xf32>
    %18 = arith.addf %16, %17 : vector<80x16xf32>
    %cst_22 = arith.constant 0.000000e+00 : f32
    %19 = vector.broadcast %cst_22 : f32 to vector<80x16xf32>
    %20 = arith.maximumf %18, %19 : vector<80x16xf32>
    %21 = arith.truncf %20 : vector<80x16xf32> to vector<80x16xbf16>
    %c0_23 = arith.constant 0 : index
    %c0_24 = arith.constant 0 : index
    %c0_25 = arith.constant 0 : index
    %c0_26 = arith.constant 0 : index
    %22 = vector.load %arg8[%c0_23, %c0_24, %c0_25, %c0_26] : memref<1x4x80x16xbf16, #tpu.memory_space<vmem>>, vector<1x1x80x16xbf16>
    %23 = vector.shape_cast %22 : vector<1x1x80x16xbf16> to vector<80x16xbf16>
    %24 = vector.shape_cast %21 : vector<80x16xbf16> to vector<1x1x80x16xbf16>
    tpu.vector_store %arg8[%c0_23, %c0_24, %c0_25, %c0_26], %24 {strides = array<i32>} : memref<1x4x80x16xbf16, #tpu.memory_space<vmem>>, vector<1x1x80x16xbf16>,
    %c0_27 = arith.constant 0 : index
    %c1 = arith.constant 1 : index
    %c0_28 = arith.constant 0 : index
    %c0_29 = arith.constant 0 : index
    %25 = vector.load %arg2[%c0_27, %c1, %c0_28, %c0_29] : memref<1x4x80x150xbf16, #tpu.memory_space<vmem>>, vector<1x1x80x150xbf16>
    %26 = vector.shape_cast %25 : vector<1x1x80x150xbf16> to vector<80x150xbf16>
    %cst_30 = arith.constant dense<0.000000e+00> : vector<80x16xf32>
    %27 = tpu.matmul %26, %0, %cst_30 {dimension_numbers = #tpu.dot_dimension_numbers<[1], [0], [0], [1], [0, 0, 1, 1], [], []>} : vector<80x150xbf16>, vector<150x16xbf16>, vector<80x16xf32> -> vector<80x16xf32>
    %c0_31 = arith.constant 0 : index
    %c1_32 = arith.constant 1 : index
    %c0_33 = arith.constant 0 : index
    %c0_34 = arith.constant 0 : index
    %28 = vector.load %arg3[%c0_31, %c1_32, %c0_33, %c0_34] : memref<1x4x80x150xbf16, #tpu.memory_space<vmem>>, vector<1x1x80x150xbf16>
    %29 = vector.shape_cast %28 : vector<1x1x80x150xbf16> to vector<80x150xbf16>
    %cst_35 = arith.constant dense<0.000000e+00> : vector<80x16xf32>
    %30 = tpu.matmul %29, %0, %cst_35 {dimension_numbers = #tpu.dot_dimension_numbers<[1], [0], [0], [1], [0, 0, 1, 1], [], []>} : vector<80x150xbf16>, vector<150x16xbf16>, vector<80x16xf32> -> vector<80x16xf32>
    %31 = arith.maximumf %27, %30 : vector<80x16xf32>
    %c0_36 = arith.constant 0 : index
    %c1_37 = arith.constant 1 : index
    %c0_38 = arith.constant 0 : index
    %c0_39 = arith.constant 0 : index
    %32 = vector.load %arg4[%c0_36, %c1_37, %c0_38, %c0_39] : memref<1x4x80x150xbf16, #tpu.memory_space<vmem>>, vector<1x1x80x150xbf16>
    %33 = vector.shape_cast %32 : vector<1x1x80x150xbf16> to vector<80x150xbf16>
    %cst_40 = arith.constant dense<0.000000e+00> : vector<80x16xf32>
    %34 = tpu.matmul %33, %0, %cst_40 {dimension_numbers = #tpu.dot_dimension_numbers<[1], [0], [0], [1], [0, 0, 1, 1], [], []>} : vector<80x150xbf16>, vector<150x16xbf16>, vector<80x16xf32> -> vector<80x16xf32>
    %35 = arith.maximumf %31, %34 : vector<80x16xf32>
    %c0_41 = arith.constant 0 : index
    %c1_42 = arith.constant 1 : index
    %c0_43 = arith.constant 0 : index
    %c0_44 = arith.constant 0 : index
    %36 = vector.load %arg5[%c0_41, %c1_42, %c0_43, %c0_44] : memref<1x4x80x150xbf16, #tpu.memory_space<vmem>>, vector<1x1x80x150xbf16>
    %37 = vector.shape_cast %36 : vector<1x1x80x150xbf16> to vector<80x150xbf16>
    %cst_45 = arith.constant dense<0.000000e+00> : vector<80x16xf32>
    %38 = tpu.matmul %37, %0, %cst_45 {dimension_numbers = #tpu.dot_dimension_numbers<[1], [0], [0], [1], [0, 0, 1, 1], [], []>} : vector<80x150xbf16>, vector<150x16xbf16>, vector<80x16xf32> -> vector<80x16xf32>
    %39 = arith.maximumf %35, %38 : vector<80x16xf32>
    %40 = vector.broadcast %1 : vector<1x16xf32> to vector<80x16xf32>
    %41 = arith.addf %39, %40 : vector<80x16xf32>
    %cst_46 = arith.constant 0.000000e+00 : f32
    %42 = vector.broadcast %cst_46 : f32 to vector<80x16xf32>
    %43 = arith.maximumf %41, %42 : vector<80x16xf32>
    %44 = arith.truncf %43 : vector<80x16xf32> to vector<80x16xbf16>
    %c0_47 = arith.constant 0 : index
    %c1_48 = arith.constant 1 : index
    %c0_49 = arith.constant 0 : index
    %c0_50 = arith.constant 0 : index
    %45 = vector.load %arg8[%c0_47, %c1_48, %c0_49, %c0_50] : memref<1x4x80x16xbf16, #tpu.memory_space<vmem>>, vector<1x1x80x16xbf16>
    %46 = vector.shape_cast %45 : vector<1x1x80x16xbf16> to vector<80x16xbf16>
    %47 = vector.shape_cast %44 : vector<80x16xbf16> to vector<1x1x80x16xbf16>
    tpu.vector_store %arg8[%c0_47, %c1_48, %c0_49, %c0_50], %47 {strides = array<i32>} : memref<1x4x80x16xbf16, #tpu.memory_space<vmem>>, vector<1x1x80x16xbf16>,
    %c0_51 = arith.constant 0 : index
    %c2 = arith.constant 2 : index
    %c0_52 = arith.constant 0 : index
    %c0_53 = arith.constant 0 : index
    %48 = vector.load %arg2[%c0_51, %c2, %c0_52, %c0_53] : memref<1x4x80x150xbf16, #tpu.memory_space<vmem>>, vector<1x1x80x150xbf16>
    %49 = vector.shape_cast %48 : vector<1x1x80x150xbf16> to vector<80x150xbf16>
    %cst_54 = arith.constant dense<0.000000e+00> : vector<80x16xf32>
    %50 = tpu.matmul %49, %0, %cst_54 {dimension_numbers = #tpu.dot_dimension_numbers<[1], [0], [0], [1], [0, 0, 1, 1], [], []>} : vector<80x150xbf16>, vector<150x16xbf16>, vector<80x16xf32> -> vector<80x16xf32>
    %c0_55 = arith.constant 0 : index
    %c2_56 = arith.constant 2 : index
    %c0_57 = arith.constant 0 : index
    %c0_58 = arith.constant 0 : index
    %51 = vector.load %arg3[%c0_55, %c2_56, %c0_57, %c0_58] : memref<1x4x80x150xbf16, #tpu.memory_space<vmem>>, vector<1x1x80x150xbf16>
    %52 = vector.shape_cast %51 : vector<1x1x80x150xbf16> to vector<80x150xbf16>
    %cst_59 = arith.constant dense<0.000000e+00> : vector<80x16xf32>
    %53 = tpu.matmul %52, %0, %cst_59 {dimension_numbers = #tpu.dot_dimension_numbers<[1], [0], [0], [1], [0, 0, 1, 1], [], []>} : vector<80x150xbf16>, vector<150x16xbf16>, vector<80x16xf32> -> vector<80x16xf32>
    %54 = arith.maximumf %50, %53 : vector<80x16xf32>
    %c0_60 = arith.constant 0 : index
    %c2_61 = arith.constant 2 : index
    %c0_62 = arith.constant 0 : index
    %c0_63 = arith.constant 0 : index
    %55 = vector.load %arg4[%c0_60, %c2_61, %c0_62, %c0_63] : memref<1x4x80x150xbf16, #tpu.memory_space<vmem>>, vector<1x1x80x150xbf16>
    %56 = vector.shape_cast %55 : vector<1x1x80x150xbf16> to vector<80x150xbf16>
    %cst_64 = arith.constant dense<0.000000e+00> : vector<80x16xf32>
    %57 = tpu.matmul %56, %0, %cst_64 {dimension_numbers = #tpu.dot_dimension_numbers<[1], [0], [0], [1], [0, 0, 1, 1], [], []>} : vector<80x150xbf16>, vector<150x16xbf16>, vector<80x16xf32> -> vector<80x16xf32>
    %58 = arith.maximumf %54, %57 : vector<80x16xf32>
    %c0_65 = arith.constant 0 : index
    %c2_66 = arith.constant 2 : index
    %c0_67 = arith.constant 0 : index
    %c0_68 = arith.constant 0 : index
    %59 = vector.load %arg5[%c0_65, %c2_66, %c0_67, %c0_68] : memref<1x4x80x150xbf16, #tpu.memory_space<vmem>>, vector<1x1x80x150xbf16>
    %60 = vector.shape_cast %59 : vector<1x1x80x150xbf16> to vector<80x150xbf16>
    %cst_69 = arith.constant dense<0.000000e+00> : vector<80x16xf32>
    %61 = tpu.matmul %60, %0, %cst_69 {dimension_numbers = #tpu.dot_dimension_numbers<[1], [0], [0], [1], [0, 0, 1, 1], [], []>} : vector<80x150xbf16>, vector<150x16xbf16>, vector<80x16xf32> -> vector<80x16xf32>
    %62 = arith.maximumf %58, %61 : vector<80x16xf32>
    %63 = vector.broadcast %1 : vector<1x16xf32> to vector<80x16xf32>
    %64 = arith.addf %62, %63 : vector<80x16xf32>
    %cst_70 = arith.constant 0.000000e+00 : f32
    %65 = vector.broadcast %cst_70 : f32 to vector<80x16xf32>
    %66 = arith.maximumf %64, %65 : vector<80x16xf32>
    %67 = arith.truncf %66 : vector<80x16xf32> to vector<80x16xbf16>
    %c0_71 = arith.constant 0 : index
    %c2_72 = arith.constant 2 : index
    %c0_73 = arith.constant 0 : index
    %c0_74 = arith.constant 0 : index
    %68 = vector.load %arg8[%c0_71, %c2_72, %c0_73, %c0_74] : memref<1x4x80x16xbf16, #tpu.memory_space<vmem>>, vector<1x1x80x16xbf16>
    %69 = vector.shape_cast %68 : vector<1x1x80x16xbf16> to vector<80x16xbf16>
    %70 = vector.shape_cast %67 : vector<80x16xbf16> to vector<1x1x80x16xbf16>
    tpu.vector_store %arg8[%c0_71, %c2_72, %c0_73, %c0_74], %70 {strides = array<i32>} : memref<1x4x80x16xbf16, #tpu.memory_space<vmem>>, vector<1x1x80x16xbf16>,
    %c0_75 = arith.constant 0 : index
    %c3 = arith.constant 3 : index
    %c0_76 = arith.constant 0 : index
    %c0_77 = arith.constant 0 : index
    %71 = vector.load %arg2[%c0_75, %c3, %c0_76, %c0_77] : memref<1x4x80x150xbf16, #tpu.memory_space<vmem>>, vector<1x1x80x150xbf16>
    %72 = vector.shape_cast %71 : vector<1x1x80x150xbf16> to vector<80x150xbf16>
    %cst_78 = arith.constant dense<0.000000e+00> : vector<80x16xf32>
    %73 = tpu.matmul %72, %0, %cst_78 {dimension_numbers = #tpu.dot_dimension_numbers<[1], [0], [0], [1], [0, 0, 1, 1], [], []>} : vector<80x150xbf16>, vector<150x16xbf16>, vector<80x16xf32> -> vector<80x16xf32>
    %c0_79 = arith.constant 0 : index
    %c3_80 = arith.constant 3 : index
    %c0_81 = arith.constant 0 : index
    %c0_82 = arith.constant 0 : index
    %74 = vector.load %arg3[%c0_79, %c3_80, %c0_81, %c0_82] : memref<1x4x80x150xbf16, #tpu.memory_space<vmem>>, vector<1x1x80x150xbf16>
    %75 = vector.shape_cast %74 : vector<1x1x80x150xbf16> to vector<80x150xbf16>
    %cst_83 = arith.constant dense<0.000000e+00> : vector<80x16xf32>
    %76 = tpu.matmul %75, %0, %cst_83 {dimension_numbers = #tpu.dot_dimension_numbers<[1], [0], [0], [1], [0, 0, 1, 1], [], []>} : vector<80x150xbf16>, vector<150x16xbf16>, vector<80x16xf32> -> vector<80x16xf32>
    %77 = arith.maximumf %73, %76 : vector<80x16xf32>
    %c0_84 = arith.constant 0 : index
    %c3_85 = arith.constant 3 : index
    %c0_86 = arith.constant 0 : index
    %c0_87 = arith.constant 0 : index
    %78 = vector.load %arg4[%c0_84, %c3_85, %c0_86, %c0_87] : memref<1x4x80x150xbf16, #tpu.memory_space<vmem>>, vector<1x1x80x150xbf16>
    %79 = vector.shape_cast %78 : vector<1x1x80x150xbf16> to vector<80x150xbf16>
    %cst_88 = arith.constant dense<0.000000e+00> : vector<80x16xf32>
    %80 = tpu.matmul %79, %0, %cst_88 {dimension_numbers = #tpu.dot_dimension_numbers<[1], [0], [0], [1], [0, 0, 1, 1], [], []>} : vector<80x150xbf16>, vector<150x16xbf16>, vector<80x16xf32> -> vector<80x16xf32>
    %81 = arith.maximumf %77, %80 : vector<80x16xf32>
    %c0_89 = arith.constant 0 : index
    %c3_90 = arith.constant 3 : index
    %c0_91 = arith.constant 0 : index
    %c0_92 = arith.constant 0 : index
    %82 = vector.load %arg5[%c0_89, %c3_90, %c0_91, %c0_92] : memref<1x4x80x150xbf16, #tpu.memory_space<vmem>>, vector<1x1x80x150xbf16>
    %83 = vector.shape_cast %82 : vector<1x1x80x150xbf16> to vector<80x150xbf16>
    %cst_93 = arith.constant dense<0.000000e+00> : vector<80x16xf32>
    %84 = tpu.matmul %83, %0, %cst_93 {dimension_numbers = #tpu.dot_dimension_numbers<[1], [0], [0], [1], [0, 0, 1, 1], [], []>} : vector<80x150xbf16>, vector<150x16xbf16>, vector<80x16xf32> -> vector<80x16xf32>
    %85 = arith.maximumf %81, %84 : vector<80x16xf32>
    %86 = vector.broadcast %1 : vector<1x16xf32> to vector<80x16xf32>
    %87 = arith.addf %85, %86 : vector<80x16xf32>
    %cst_94 = arith.constant 0.000000e+00 : f32
    %88 = vector.broadcast %cst_94 : f32 to vector<80x16xf32>
    %89 = arith.maximumf %87, %88 : vector<80x16xf32>
    %90 = arith.truncf %89 : vector<80x16xf32> to vector<80x16xbf16>
    %c0_95 = arith.constant 0 : index
    %c3_96 = arith.constant 3 : index
    %c0_97 = arith.constant 0 : index
    %c0_98 = arith.constant 0 : index
    %91 = vector.load %arg8[%c0_95, %c3_96, %c0_97, %c0_98] : memref<1x4x80x16xbf16, #tpu.memory_space<vmem>>, vector<1x1x80x16xbf16>
    %92 = vector.shape_cast %91 : vector<1x1x80x16xbf16> to vector<80x16xbf16>
    %93 = vector.shape_cast %90 : vector<80x16xbf16> to vector<1x1x80x16xbf16>
    tpu.vector_store %arg8[%c0_95, %c3_96, %c0_97, %c0_98], %93 {strides = array<i32>} : memref<1x4x80x16xbf16, #tpu.memory_space<vmem>>, vector<1x1x80x16xbf16>,
    return
  }
  func.func @transform_0(%arg0: i32, %arg1: i32) -> (i32, i32, i32, i32) {
    %c0_i32 = arith.constant 0 : i32
    %c0_i32_0 = arith.constant 0 : i32
    %c0_i32_1 = arith.constant 0 : i32
    return %arg0, %arg1, %c0_i32, %c0_i32_0 : i32, i32, i32, i32
  }
  func.func @transform_1(%arg0: i32, %arg1: i32) -> (i32, i32, i32, i32) {
    %c0_i32 = arith.constant 0 : i32
    %c0_i32_0 = arith.constant 0 : i32
    %c0_i32_1 = arith.constant 0 : i32
    return %arg0, %arg1, %c0_i32, %c0_i32_0 : i32, i32, i32, i32
  }
  func.func @transform_2(%arg0: i32, %arg1: i32) -> (i32, i32, i32, i32) {
    %c0_i32 = arith.constant 0 : i32
    %c0_i32_0 = arith.constant 0 : i32
    %c0_i32_1 = arith.constant 0 : i32
    return %arg0, %arg1, %c0_i32, %c0_i32_0 : i32, i32, i32, i32
  }
  func.func @transform_3(%arg0: i32, %arg1: i32) -> (i32, i32, i32, i32) {
    %c0_i32 = arith.constant 0 : i32
    %c0_i32_0 = arith.constant 0 : i32
    %c0_i32_1 = arith.constant 0 : i32
    return %arg0, %arg1, %c0_i32, %c0_i32_0 : i32, i32, i32, i32
  }
  func.func @transform_4(%arg0: i32, %arg1: i32) -> (i32, i32) {
    %c0_i32 = arith.constant 0 : i32
    %c0_i32_0 = arith.constant 0 : i32
    %c0_i32_1 = arith.constant 0 : i32
    return %c0_i32, %c0_i32_0 : i32, i32
  }
  func.func @transform_5(%arg0: i32, %arg1: i32) -> (i32, i32) {
    %c0_i32 = arith.constant 0 : i32
    %c0_i32_0 = arith.constant 0 : i32
    %c0_i32_1 = arith.constant 0 : i32
    return %c0_i32, %c0_i32_0 : i32, i32
  }
  func.func @transform_6(%arg0: i32, %arg1: i32) -> (i32, i32, i32, i32) {
    %c0_i32 = arith.constant 0 : i32
    %c0_i32_0 = arith.constant 0 : i32
    %c0_i32_1 = arith.constant 0 : i32
    return %arg0, %arg1, %c0_i32, %c0_i32_0 : i32, i32, i32, i32
  }
}

module attributes {stable_mosaic.version = 11 : i64} {
  func.func @_mlp_head_kernel(%arg0: i32, %arg1: memref<2x4096xbf16, #tpu.memory_space<vmem>>, %arg2: memref<4096x120xbf16, #tpu.memory_space<vmem>>, %arg3: memref<1x120xf32, #tpu.memory_space<vmem>>, %arg4: memref<120x84xbf16, #tpu.memory_space<vmem>>, %arg5: memref<1x84xf32, #tpu.memory_space<vmem>>, %arg6: memref<84x5xbf16, #tpu.memory_space<vmem>>, %arg7: memref<1x5xf32, #tpu.memory_space<vmem>>, %arg8: memref<2x5xf32, #tpu.memory_space<vmem>>, %arg9: memref<2x120xf32, #tpu.memory_space<vmem>>) attributes {dimension_semantics = [#tpu.dimension_semantics<arbitrary>], iteration_bounds = array<i64: 25>, scalar_prefetch = 0 : i64, scratch_operands = 1 : i64, tpu.core_type = #tpu.core_type<tc>, window_params = [{transform_indices = @transform_0, window_bounds = array<i64: 2, 4096>}, {transform_indices = @transform_1, window_bounds = array<i64: 4096, 120>}, {pipeline_mode = #tpu.pipeline_mode<synchronous>, transform_indices = @transform_2, window_bounds = array<i64: 1, 120>}, {pipeline_mode = #tpu.pipeline_mode<synchronous>, transform_indices = @transform_3, window_bounds = array<i64: 120, 84>}, {pipeline_mode = #tpu.pipeline_mode<synchronous>, transform_indices = @transform_4, window_bounds = array<i64: 1, 84>}, {pipeline_mode = #tpu.pipeline_mode<synchronous>, transform_indices = @transform_5, window_bounds = array<i64: 84, 5>}, {pipeline_mode = #tpu.pipeline_mode<synchronous>, transform_indices = @transform_6, window_bounds = array<i64: 1, 5>}, {pipeline_mode = #tpu.pipeline_mode<synchronous>, transform_indices = @transform_7, window_bounds = array<i64: 2, 5>}]} {
    %c0_i32 = arith.constant 0 : i32
    %0 = arith.cmpi eq, %arg0, %c0_i32 : i32
    %1 = arith.extui %0 : i1 to i32
    %c0_i32_0 = arith.constant 0 : i32
    %2 = arith.cmpi ne, %1, %c0_i32_0 : i32
    scf.if %2 {
      %cst_9 = arith.constant 0.000000e+00 : f32
      %12 = vector.broadcast %cst_9 : f32 to vector<2x120xf32>
      %c0_10 = arith.constant 0 : index
      %c0_11 = arith.constant 0 : index
      %13 = vector.load %arg9[%c0_10, %c0_11] : memref<2x120xf32, #tpu.memory_space<vmem>>, vector<2x120xf32>
      tpu.vector_store %arg9[%c0_10, %c0_11], %12 {strides = array<i32>} : memref<2x120xf32, #tpu.memory_space<vmem>>, vector<2x120xf32>,
    } else {
    }
    %c0 = arith.constant 0 : index
    %c0_1 = arith.constant 0 : index
    %3 = vector.load %arg9[%c0, %c0_1] : memref<2x120xf32, #tpu.memory_space<vmem>>, vector<2x120xf32>
    %c0_2 = arith.constant 0 : index
    %c0_3 = arith.constant 0 : index
    %4 = vector.load %arg1[%c0_2, %c0_3] : memref<2x4096xbf16, #tpu.memory_space<vmem>>, vector<2x4096xbf16>
    %c0_4 = arith.constant 0 : index
    %c0_5 = arith.constant 0 : index
    %5 = vector.load %arg2[%c0_4, %c0_5] : memref<4096x120xbf16, #tpu.memory_space<vmem>>, vector<4096x120xbf16>
    %cst = arith.constant dense<0.000000e+00> : vector<2x120xf32>
    %6 = tpu.matmul %4, %5, %cst {dimension_numbers = #tpu.dot_dimension_numbers<[1], [0], [0], [1], [0, 0, 1, 1], [], []>} : vector<2x4096xbf16>, vector<4096x120xbf16>, vector<2x120xf32> -> vector<2x120xf32>
    %7 = arith.addf %3, %6 : vector<2x120xf32>
    %c0_6 = arith.constant 0 : index
    %c0_7 = arith.constant 0 : index
    %8 = vector.load %arg9[%c0_6, %c0_7] : memref<2x120xf32, #tpu.memory_space<vmem>>, vector<2x120xf32>
    tpu.vector_store %arg9[%c0_6, %c0_7], %7 {strides = array<i32>} : memref<2x120xf32, #tpu.memory_space<vmem>>, vector<2x120xf32>,
    %c24_i32 = arith.constant 24 : i32
    %9 = arith.cmpi eq, %arg0, %c24_i32 : i32
    %10 = arith.extui %9 : i1 to i32
    %c0_i32_8 = arith.constant 0 : i32
    %11 = arith.cmpi ne, %10, %c0_i32_8 : i32
    scf.if %11 {
      %c0_9 = arith.constant 0 : index
      %c0_10 = arith.constant 0 : index
      %12 = vector.load %arg9[%c0_9, %c0_10] : memref<2x120xf32, #tpu.memory_space<vmem>>, vector<2x120xf32>
      %c0_11 = arith.constant 0 : index
      %c0_12 = arith.constant 0 : index
      %13 = vector.load %arg3[%c0_11, %c0_12] : memref<1x120xf32, #tpu.memory_space<vmem>>, vector<1x120xf32>
      %14 = vector.broadcast %13 : vector<1x120xf32> to vector<2x120xf32>
      %15 = arith.addf %12, %14 : vector<2x120xf32>
      %cst_13 = arith.constant 0.000000e+00 : f32
      %16 = vector.broadcast %cst_13 : f32 to vector<2x120xf32>
      %17 = arith.maximumf %15, %16 : vector<2x120xf32>
      %18 = arith.truncf %17 : vector<2x120xf32> to vector<2x120xbf16>
      %c0_14 = arith.constant 0 : index
      %c0_15 = arith.constant 0 : index
      %19 = vector.load %arg4[%c0_14, %c0_15] : memref<120x84xbf16, #tpu.memory_space<vmem>>, vector<120x84xbf16>
      %cst_16 = arith.constant dense<0.000000e+00> : vector<2x84xf32>
      %20 = tpu.matmul %18, %19, %cst_16 {dimension_numbers = #tpu.dot_dimension_numbers<[1], [0], [0], [1], [0, 0, 1, 1], [], []>} : vector<2x120xbf16>, vector<120x84xbf16>, vector<2x84xf32> -> vector<2x84xf32>
      %c0_17 = arith.constant 0 : index
      %c0_18 = arith.constant 0 : index
      %21 = vector.load %arg5[%c0_17, %c0_18] : memref<1x84xf32, #tpu.memory_space<vmem>>, vector<1x84xf32>
      %22 = vector.broadcast %21 : vector<1x84xf32> to vector<2x84xf32>
      %23 = arith.addf %20, %22 : vector<2x84xf32>
      %cst_19 = arith.constant 0.000000e+00 : f32
      %24 = vector.broadcast %cst_19 : f32 to vector<2x84xf32>
      %25 = arith.maximumf %23, %24 : vector<2x84xf32>
      %26 = arith.truncf %25 : vector<2x84xf32> to vector<2x84xbf16>
      %c0_20 = arith.constant 0 : index
      %c0_21 = arith.constant 0 : index
      %27 = vector.load %arg6[%c0_20, %c0_21] : memref<84x5xbf16, #tpu.memory_space<vmem>>, vector<84x5xbf16>
      %cst_22 = arith.constant dense<0.000000e+00> : vector<2x5xf32>
      %28 = tpu.matmul %26, %27, %cst_22 {dimension_numbers = #tpu.dot_dimension_numbers<[1], [0], [0], [1], [0, 0, 1, 1], [], []>} : vector<2x84xbf16>, vector<84x5xbf16>, vector<2x5xf32> -> vector<2x5xf32>
      %c0_23 = arith.constant 0 : index
      %c0_24 = arith.constant 0 : index
      %29 = vector.load %arg7[%c0_23, %c0_24] : memref<1x5xf32, #tpu.memory_space<vmem>>, vector<1x5xf32>
      %30 = vector.broadcast %29 : vector<1x5xf32> to vector<2x5xf32>
      %31 = arith.addf %28, %30 : vector<2x5xf32>
      %c0_25 = arith.constant 0 : index
      %c0_26 = arith.constant 0 : index
      %32 = vector.load %arg8[%c0_25, %c0_26] : memref<2x5xf32, #tpu.memory_space<vmem>>, vector<2x5xf32>
      tpu.vector_store %arg8[%c0_25, %c0_26], %31 {strides = array<i32>} : memref<2x5xf32, #tpu.memory_space<vmem>>, vector<2x5xf32>,
    } else {
    }
    return
  }
  func.func @transform_0(%arg0: i32) -> (i32, i32) {
    %c0_i32 = arith.constant 0 : i32
    %c0_i32_0 = arith.constant 0 : i32
    return %c0_i32, %arg0 : i32, i32
  }
  func.func @transform_1(%arg0: i32) -> (i32, i32) {
    %c0_i32 = arith.constant 0 : i32
    %c0_i32_0 = arith.constant 0 : i32
    return %arg0, %c0_i32 : i32, i32
  }
  func.func @transform_2(%arg0: i32) -> (i32, i32) {
    %c0_i32 = arith.constant 0 : i32
    %c0_i32_0 = arith.constant 0 : i32
    %c0_i32_1 = arith.constant 0 : i32
    return %c0_i32, %c0_i32_0 : i32, i32
  }
  func.func @transform_3(%arg0: i32) -> (i32, i32) {
    %c0_i32 = arith.constant 0 : i32
    %c0_i32_0 = arith.constant 0 : i32
    %c0_i32_1 = arith.constant 0 : i32
    return %c0_i32, %c0_i32_0 : i32, i32
  }
  func.func @transform_4(%arg0: i32) -> (i32, i32) {
    %c0_i32 = arith.constant 0 : i32
    %c0_i32_0 = arith.constant 0 : i32
    %c0_i32_1 = arith.constant 0 : i32
    return %c0_i32, %c0_i32_0 : i32, i32
  }
  func.func @transform_5(%arg0: i32) -> (i32, i32) {
    %c0_i32 = arith.constant 0 : i32
    %c0_i32_0 = arith.constant 0 : i32
    %c0_i32_1 = arith.constant 0 : i32
    return %c0_i32, %c0_i32_0 : i32, i32
  }
  func.func @transform_6(%arg0: i32) -> (i32, i32) {
    %c0_i32 = arith.constant 0 : i32
    %c0_i32_0 = arith.constant 0 : i32
    %c0_i32_1 = arith.constant 0 : i32
    return %c0_i32, %c0_i32_0 : i32, i32
  }
  func.func @transform_7(%arg0: i32) -> (i32, i32) {
    %c0_i32 = arith.constant 0 : i32
    %c0_i32_0 = arith.constant 0 : i32
    %c0_i32_1 = arith.constant 0 : i32
    return %c0_i32, %c0_i32_0 : i32, i32
  }
}

</mosaic_0001>

<bundles_post_ra>
// kernel: cnn_forward.3
= control target key start
LH: loop header
LB: loop body
LE: loop exit
PB: predicated region body
PF: predicated region fallthrough
CT: control target
= control target key end

     0   :  { %s9931_s0 = inlined_call_operand.hbm [shape: bf16[2,164,164,75], index: 0, kind: input, shape index: {}]   ;;  %s9932_s1 = inlined_call_operand.hbm [shape: bf16[2,164,164,75], index: 1, kind: input, shape index: {}]   ;;  %s9933_s2 = inlined_call_operand.hbm [shape: bf16[2,164,164,75], index: 2, kind: input, shape index: {}]   ;;  %s9934_s3 = inlined_call_operand.hbm [shape: bf16[2,164,164,75], index: 3, kind: input, shape index: {}]   ;;  %s9935_s4 = inlined_call_operand.vmem [shape: bf16[75,6], index: 4, kind: input, shape index: {}]   ;;  %s9936_s5 = inlined_call_operand.vmem [shape: f32[1,6], index: 5, kind: input, shape index: {}]   ;;  %s9937_s6 = inlined_call_operand.vmem [shape: bf16[2,164,164,6], index: 6, kind: output, shape index: {}]  }
   0x1   :  { %9952 = sst [smem:[#allocation19_spill]] %s9931_s0 }
   0x2   :  { %9953 = sst [smem:[#allocation20_spill]] %s9932_s1 }
   0x3   :  { %11 = vsyncpa [#allocation3], 0 }
   0x4   :  { %13 = vsyncpa [#allocation3 + $0x1], 0 }
   0x5   :  { %14 = vsyncpa [#allocation5], 0 }
   0x6   :  { %16 = vsyncpa [#allocation5 + $0x1], 0 }
   0x7   :  { %17 = vsyncpa [#allocation8], 0 }
   0x8   :  { %19 = vsyncpa [#allocation8 + $0x1], 0  ;;  %s7684_s21 = smov 0   ;;  %s7686_s22 = smov 0  }
   0x9   :  { %s7688_s23 = smov 0   ;;  %s7690_s24 = smov 0  }
   0xa   :  { %s7692_s25 = smov 0   ;;  %s7694_s26 = smov 0  }
   0xb   :  { %s7696_s27 = smov 0   ;;  %s7698_s28 = smov 0  }
   0xc LB: > { %9954 = sst [smem:[#allocation12_spill]] %s7618_s23  ;;  %s9938_s29 = sadd.s32 4294967295, %s7638_s28   ;;  %s7638_s28 = sphi %s7698_s28, %s25_s28   ;;  %s7634_s27 = sphi %s7696_s27, %s10049_s27   ;;  %s7630_s26 = sphi %s7694_s26, %s10048_s26   ;;  %s7626_s25 = sphi %s7692_s25, %s10047_s25   ;;  %s7622_s24 = sphi %s7690_s24, %s10046_s24   ;;  %s7618_s23 = sphi %s7688_s23, %s10045_s23   ;;  %s7614_s22 = sphi %s7686_s22, %s10051_s22   ;;  %s7610_s21 = sphi %s7684_s21, %s10050_s21  }
   0xd   : > { %9955 = sst [smem:[#allocation13_spill]] %s7630_s26  ;;  %s34_s30 = sadd.s32 1, %s7630_s26 }
   0xe   : > { %9956 = sst [smem:[#allocation14_spill]] %s7634_s27  ;;  %p35_p0 = scmp.ge.s32.totalorder %s34_s30, 41 }
   0xf   : > { %s37_s7 = sadd.s32 1, %s7634_s27  ;;  %s46_s8 = sadd.s32 1, %s7618_s23 }
  0x10   : > { %p53_p1 = scmp.ne.s32.totalorder %s7618_s23, %s7614_s22  ;;  %s10053_s30 = smov (%p35_p0, %s34_s30), 0 }
  0x11   : > { %9957 = sst [smem:[#allocation15_spill]] %s10053_s30  ;;  %s10055_s7 = smov (!%p35_p0, %s37_s7), %s7634_s27 }
  0x12   : > { %s42_s9 = ssub.s32 %s7630_s26, %s10053_s30  ;;  %p54_p2 = scmp.eq.s32.totalorder %s7638_s28, 0 }
  0x13   : > { %p39_p3 = scmp.ge.s32.totalorder %s10055_s7, 2  ;;  %p59_p4 = scmp.ne.s32.totalorder %s7614_s22, %s7610_s21 }
  0x14   : > { %p55_p5 = por %p54_p2, %p53_p1  ;;  %p60_p6 = scmp.eq.s32.totalorder %s9938_s29, 0 }
  0x15   : > { %s10057_s7 = smov (%p39_p3, %s10055_s7), 0  ;;  %p7183_p8 = scmp.lt.s32.totalorder %s7638_s28, 82 }
  0x16   : > { %9958 = sst [smem:[#allocation16_spill]] %s10057_s7  ;;  %p7739_p7 = por %p60_p6, %p59_p4 }
  0x17   : > { %s41_s11 = ssub.s32 %s7634_s27, %s10057_s7  ;;  %s7747_s13 = sand.u32 1, %s7618_s23  }
  0x18   : > { %s9959_s10 = scalar_select %p7739_p7, 1, 0 }
  0x19   : > { %s43_s12 = sor.u32 %s42_s9, %s41_s11  ;;  %s7750_s14 = smul.u32 336, %s7747_s13 }
  0x1a   : > { %p44_p9 = scmp.eq.s32.totalorder %s43_s12, 0  ;;  %s7148_s15 = smul.u32 84, %s7630_s26 }
  0x1b   : > { %p7753_p10 = pnand %p7183_p8, %p55_p5  ;;  %s7149_s18 = smul.u32 3444, %s7634_s27 }
  0x1c   : > { %s7758_s17 = scalar_select %p44_p9, %s7618_s23, %s46_s8  }
  0x1d   : > { %s254_s19 = sadd.s32 %s7149_s18, %s7148_s15  ;;  %s267_s20 = sand.u32 1, %s7638_s28  }
  0x1e   : > { %9961 = sst [smem:[#allocation17_spill]] %s7758_s17  ;;  %s7762_s21 = sshll.u32 %s254_s19, 6 }
  0x1f   : > { %s9962_s1 = sld [smem:[#allocation20_spill]]  ;;  %s271_s29 = scalar_lea.vmem [#allocation4], %s7750_s14 }
  0x20   : > { %s281_s7 = sshll.u32 %s271_s29, 4  ;;  %s7775_s8 = scalar_lea.sflag [#allocation5], %s267_s20  ;;  %s7772_s7 = int_to_ptr.vmem [resolvable:$true] %s281_s7 }
  0x21   : > { %p7781_p0 = pneg %p7753_p10 }
  0x25   : > { %s7768_s12 = scalar_lea.hbm %s9962_s1, %s7762_s21  ;;  %s7449_s29 = scalar_lea.hbm %s9962_s1, 440832 }
  0x26   : > { %s7444_s15 = scalar_lea.hbm %s7768_s12, 5376  ;;  %p7450_p3 = scmp.lt.u32.totalorder %s7768_s12, %s9962_s1 }
  0x27   : > { %p7445_p13 = scmp.ne.s32.totalorder %s7768_s12, %s7444_s15  ;;  %p7451_p4 = scmp.lt.u32.totalorder %s7449_s29, %s7444_s15 }
  0x28   : > { %p7453_p6 = scmp.lt.u32.totalorder %s7444_s15, %s7768_s12 }
  0x29   : > { %p7447_p1 = pnand %p7781_p0, %p7445_p13  ;;  %p7452_p5 = por %p7451_p4, %p7450_p3 }
  0x2b   : > { %p7448_p2 = pneg %p7447_p1  ;;  %p7454_p8 = por %p7453_p6, %p7452_p5 }
  0x2d   : > { %p7455_p9 = pnand %p7454_p8, %p7448_p2 }
  0x2f   : > { %7458 = shalt.err (!%p7455_p9)
}
  0x30   : > { %s7459_s20 = scalar_lea.vmem %s7772_s7, 5376  ;;  %s7640_s19 = smov [#allocation4]  }
  0x31   : > { %p7460_p13 = scmp.ne.s32.totalorder %s7772_s7, %s7459_s20  ;;  %s7464_s9 = sshll.u32 %s7640_s19, 4  ;;  %s7465_s9 = int_to_ptr.vmem [resolvable:$false] %s7464_s9 }
  0x32   : > { %s7466_s30 = scalar_lea.vmem %s7465_s9, 10752  ;;  %p7467_p12 = scmp.lt.s32.totalorder %s7772_s7, %s7465_s9 }
  0x33   : > { %p7462_p1 = pnand %p7460_p13, %p7781_p0  ;;  %p7468_p7 = scmp.lt.s32.totalorder %s7466_s30, %s7459_s20 }
  0x35   : > { %p7463_p11 = pneg %p7462_p1  ;;  %p7469_p3 = por %p7468_p7, %p7467_p12 }
  0x37   : > { %p7470_p4 = pnand %p7469_p3, %p7463_p11 }
  0x39   : > { %7473 = shalt.err (!%p7470_p4)
}
  0x3a   : > { %s9942_s15 = smov 64   ;;  %s9944_s29 = smov 4  }
  0x3b   : > { %7176 = dma.hbm_to_vmem [thread:$0]  (!%p7753_p10), %s7768_s12, 5376, %s7772_s7, %s7775_s8, %s9942_s15, %s9942_s15, %s9944_s29  }
  0x3c   : > { %p9964_p7 = scmp.lt.s32.totalorder %s7638_s28, 83  ;;  %p9965_p11 = scmp.ge.s32.totalorder %s7638_s28, 1 }
  0x3d   : > { %s9967_s0 = sld [smem:[#allocation19_spill]]  ;;  %s247_s30 = scalar_lea.vmem [#allocation2], %s7750_s14 }
  0x3e   : > { %p7812_p12 = pnand %p9965_p11, %p9964_p7  ;;  %s257_s1 = sshll.u32 %s247_s30, 4  ;;  %s7823_s1 = int_to_ptr.vmem [resolvable:$true] %s257_s1 }
  0x3f   : > { %s7829_s15 = scalar_lea.hbm %s9933_s2, %s7762_s21  ;;  %s244_s29 = scalar_lea.sflag [#allocation3], %s7747_s13 }
  0x40   : > { %s9966_s11 = scalar_select %p7812_p12, 1, 0 }
  0x43   : > { %s7820_s9 = scalar_lea.hbm %s9967_s0, %s7762_s21  ;;  %s7479_s26 = scalar_lea.hbm %s9967_s0, 440832 }
  0x44   : > { %s7474_s27 = scalar_lea.hbm %s7820_s9, 5376  ;;  %p7480_p8 = scmp.lt.u32.totalorder %s7820_s9, %s9967_s0 }
  0x45   : > { %p7475_p2 = scmp.ne.s32.totalorder %s7820_s9, %s7474_s27  ;;  %p7481_p9 = scmp.lt.u32.totalorder %s7479_s26, %s7474_s27 }
  0x46   : > { %p7483_p1 = scmp.lt.u32.totalorder %s7474_s27, %s7820_s9 }
  0x47   : > { %p7477_p5 = pnand %p7475_p2, %p7781_p0  ;;  %p7482_p13 = por %p7481_p9, %p7480_p8 }
  0x49   : > { %p7478_p6 = pneg %p7477_p5  ;;  %p7484_p3 = por %p7483_p1, %p7482_p13 }
  0x4b   : > { %p7485_p4 = pnand %p7484_p3, %p7478_p6 }
  0x4d   : > { %7488 = shalt.err (!%p7485_p4)
}
  0x4e   : > { %s7489_s30 = scalar_lea.vmem %s7823_s1, 5376  ;;  %s7643_s7 = smov [#allocation2]  }
  0x4f   : > { %p7490_p7 = scmp.ne.s32.totalorder %s7823_s1, %s7489_s30  ;;  %s7494_s12 = sshll.u32 %s7643_s7, 4  ;;  %s7495_s12 = int_to_ptr.vmem [resolvable:$false] %s7494_s12 }
  0x50   : > { %s7496_s23 = scalar_lea.vmem %s7495_s12, 10752  ;;  %p7497_p5 = scmp.lt.s32.totalorder %s7823_s1, %s7495_s12 }
  0x51   : > { %p7492_p11 = pnand %p7490_p7, %p7781_p0  ;;  %p7498_p12 = scmp.lt.s32.totalorder %s7496_s23, %s7489_s30 }
  0x53   : > { %p7493_p2 = pneg %p7492_p11  ;;  %p7499_p8 = por %p7498_p12, %p7497_p5 }
  0x55   : > { %p7500_p9 = pnand %p7499_p8, %p7493_p2 }
  0x57   : > { %7503 = shalt.err (!%p7500_p9)
}
  0x58   : > { %s9968_s26 = smov 4   ;;  %s9969_s27 = smov 64  }
  0x59   : > { %7173 = dma.hbm_to_vmem [thread:$0]  (!%p7753_p10), %s7820_s9, 5376, %s7823_s1, %s244_s29, %s9969_s27, %s9969_s27, %s9968_s26  }
  0x5a   : > { %s295_s17 = scalar_lea.vmem [#allocation6], %s7750_s14  ;;  %s7504_s19 = scalar_lea.hbm %s7829_s15, 5376 }
  0x5b   : > { %s305_s20 = sshll.u32 %s295_s17, 4  ;;  %p7505_p12 = scmp.ne.s32.totalorder %s7829_s15, %s7504_s19  ;;  %s7859_s20 = int_to_ptr.vmem [resolvable:$true] %s305_s20 }
  0x5c   : > { %s7509_s12 = scalar_lea.hbm %s9933_s2, 440832  ;;  %p7510_p1 = scmp.lt.u32.totalorder %s7829_s15, %s9933_s2 }
  0x5d   : > { %p7507_p6 = pnand %p7505_p12, %p7781_p0  ;;  %p7511_p3 = scmp.lt.u32.totalorder %s7509_s12, %s7504_s19 }
  0x5e   : > { %p7513_p7 = scmp.lt.u32.totalorder %s7504_s19, %s7829_s15 }
  0x5f   : > { %p7508_p13 = pneg %p7507_p6  ;;  %p7512_p4 = por %p7511_p3, %p7510_p1 }
  0x61   : > { %p7514_p11 = por %p7513_p7, %p7512_p4 }
  0x63   : > { %p7515_p2 = pnand %p7514_p11, %p7508_p13 }
  0x65   : > { %7518 = shalt.err (!%p7515_p2)
}
  0x66   : > { %s7519_s1 = scalar_lea.vmem %s7859_s20, 5376  ;;  %s7644_s29 = smov [#allocation6]  }
  0x67   : > { %p7520_p5 = scmp.ne.s32.totalorder %s7859_s20, %s7519_s1  ;;  %s7524_s9 = sshll.u32 %s7644_s29, 4  ;;  %s7525_s9 = int_to_ptr.vmem [resolvable:$false] %s7524_s9 }
  0x68   : > { %s7526_s0 = scalar_lea.vmem %s7525_s9, 10752  ;;  %p7527_p12 = scmp.lt.s32.totalorder %s7859_s20, %s7525_s9 }
  0x69   : > { %p7522_p8 = pnand %p7520_p5, %p7781_p0  ;;  %p7528_p6 = scmp.lt.s32.totalorder %s7526_s0, %s7519_s1 }
  0x6b   : > { %p7523_p9 = pneg %p7522_p8  ;;  %p7529_p1 = por %p7528_p6, %p7527_p12 }
  0x6d   : > { %p7530_p3 = pnand %p7529_p1, %p7523_p9 }
  0x6f   : > { %7533 = shalt.err (!%p7530_p3)
}
  0x70   : > { %7179 = dma.hbm_to_vmem [thread:$0]  (!%p7753_p10), %s7829_s15, 5376, %s7859_s20, %s7775_s8, %s9969_s27, %s9969_s27, %s9968_s26  }
  0x71   : > { %s7890_s30 = scalar_lea.hbm %s9934_s3, %s7762_s21  ;;  %s319_s7 = scalar_lea.vmem [#allocation7], %s7750_s14 }
  0x72   : > { %s329_s12 = sshll.u32 %s319_s7, 4  ;;  %s316_s23 = scalar_lea.sflag [#allocation8], %s7747_s13  ;;  %s7893_s12 = int_to_ptr.vmem [resolvable:$true] %s329_s12 }
  0x73   : > { %s7534_s1 = scalar_lea.hbm %s7890_s30, 5376  ;;  %s7539_s20 = scalar_lea.hbm %s9934_s3, 440832 }
  0x74   : > { %p7535_p13 = scmp.ne.s32.totalorder %s7890_s30, %s7534_s1  ;;  %p7540_p11 = scmp.lt.u32.totalorder %s7890_s30, %s9934_s3 }
  0x75   : > { %p7541_p2 = scmp.lt.u32.totalorder %s7539_s20, %s7534_s1  ;;  %p7543_p8 = scmp.lt.u32.totalorder %s7534_s1, %s7890_s30 }
  0x76   : > { %p7537_p4 = pnand %p7535_p13, %p7781_p0 }
  0x77   : > { %p7542_p5 = por %p7541_p2, %p7540_p11 }
  0x78   : > { %p7538_p7 = pneg %p7537_p4 }
  0x79   : > { %p7544_p9 = por %p7543_p8, %p7542_p5 }
  0x7b   : > { %p7545_p12 = pnand %p7544_p9, %p7538_p7 }
  0x7d   : > { %7548 = shalt.err (!%p7545_p12)
}
  0x7e   : > { %s7549_s14 = scalar_lea.vmem %s7893_s12, 5376  ;;  %s7645_s9 = smov [#allocation7]  }
  0x7f   : > { %p7550_p6 = scmp.ne.s32.totalorder %s7893_s12, %s7549_s14  ;;  %s7554_s0 = sshll.u32 %s7645_s9, 4  ;;  %s7555_s0 = int_to_ptr.vmem [resolvable:$false] %s7554_s0 }
  0x80   : > { %s7556_s17 = scalar_lea.vmem %s7555_s0, 10752  ;;  %p7557_p13 = scmp.lt.s32.totalorder %s7893_s12, %s7555_s0 }
  0x81   : > { %p7552_p1 = pnand %p7550_p6, %p7781_p0  ;;  %p7558_p4 = scmp.lt.s32.totalorder %s7556_s17, %s7549_s14 }
  0x83   : > { %p7553_p3 = pneg %p7552_p1  ;;  %p7559_p11 = por %p7558_p4, %p7557_p13 }
  0x85   : > { %p7560_p2 = pnand %p7559_p11, %p7553_p3 }
  0x87   : > { %7563 = shalt.err (!%p7560_p2)
}
  0x88   : > { %7182 = dma.hbm_to_vmem [thread:$0]  (!%p7753_p10), %s7890_s30, 5376, %s7893_s12, %s316_s23, %s9969_s27, %s9969_s27, %s9968_s26  }
  0x89   : > { %p9970_p0 = scmp.ne.s32.totalorder %s9966_s11, 0 }
  0x8b   : > { %341 = sbr.rel (%p9970_p0) target bundleno = 1099 (0x44b), region = 44 }
  0x92   : > { %s343_s18 = sand.u32 1, %s7614_s22   ;;  %p9971_p7 = scmp.ne.s32.totalorder %s9959_s10, 0 }
  0x93   : > { %s7159_s19 = smul.u32 336, %s343_s18  ;;  %s344_s7 = scalar_lea.sflag [#allocation3], %s343_s18 }
  0x95   : > { %s7925_s1 = scalar_lea.vmem [#allocation2], %s7159_s19 }
  0x96   : > { %7597 = dma.done.wait (%p9971_p7), %s344_s7, 5376  }
  0x97   : > { %7599 = vsyncadd (%p9971_p7), %s344_s7, 4294961920  ;;  %s9972_s13 = sadd.s32 4294967295, %s7638_s28   ;;  %s7933_s27 = scalar_lea.vmem [#allocation4], %s7159_s19 }
  0x98   : > { %s352_s16 = sand.u32 1, %s9972_s13  }
  0x99   : > { %s353_s26 = scalar_lea.sflag [#allocation5], %s352_s16 }
  0x9a   : > { %7601 = dma.done.wait (%p9971_p7), %s353_s26, 10752  }
  0x9b   : > { %7603 = vsyncadd (%p9971_p7), %s353_s26, 4294956544  ;;  %s7939_s11 = scalar_lea.vmem [#allocation6], %s7159_s19  ;;  %s371_s30 = scalar_lea.sflag [#allocation8], %s343_s18 }
  0x9c   : > { %s7941_s12 = scalar_lea.vmem [#allocation7], %s7159_s19 }
  0x9d   : > { %7605 = dma.done.wait (%p9971_p7), %s371_s30, 5376  }
  0x9e   : > { %7607 = vsyncadd (%p9971_p7), %s371_s30, 4294961920  ;;  %v9949_v0 = vmov 0.0   ;;  %vm7647_vm0 = vmmov 0   ;;  %v7956_v1 = vld [vmem:[%s9935_s4] sm:$0xff]   ;;  %v7963_v2 = vld [vmem:[%s9935_s4 + $0x8] sm:$0xff]   ;;  %vm587_vm1 = vcmask 1044480  }
  0x9f   : > { %6283 = vmatprep.subr.bf16.mxu0 %v9949_v0  ;;  %6337 = vmatprep.subr.bf16.mxu1 %v9949_v0  ;;  %v7972_v3 = vld [vmem:[%s9935_s4 + $0x10] sm:$0xff]   ;;  %vm588_vm2 = vcmask 1045504   ;;  %v7648_v4 = vmov 65535   ;;  %v7979_v6 = vld [vmem:[%s9935_s4 + $0x18] sm:$0xff]   ;;  %v7257_v7 = vld [vmem:[%s9935_s4 + $0x20] sm:$0x3f]  }
  0xa0   : > { %6293 = vmatprep.mubr.msk.bf16.mxu0 %vm7647_vm0, %v9949_v0  ;;  %6347 = vmatprep.mubr.msk.bf16.mxu1 %vm7647_vm0, %v9949_v0  ;;  %v589_v5 = vsel %vm587_vm1, 4294967295, %v7648_v4  ;;  %v7258_v10 = vld [vmem:[%s7925_s1] sm:$0xff]   ;;  %vm553_vm3 = vcmask 613376   ;;  %v7260_v12 = vld [vmem:[%s7925_s1 + $0x8] sm:$0xff]   ;;  %v7262_v14 = vld [vmem:[%s7925_s1 + $0x10] sm:$0xff]   ;;  %s5182_s23 = sshll.u32 %s7622_s24, 2 }
  0xa1   : > { %6284 = vmatpush3.bf16.msra.mxu0 %v7956_v1  ;;  %6338 = vmatpush3.bf16.msra.mxu1 %v7956_v1  ;;  %v590_v8 = vsel %vm588_vm2, %v589_v5, 0  ;;  %v7259_v11 = vld [vmem:[%s7933_s27] sm:$0xff]   ;;  %v7261_v13 = vld [vmem:[%s7933_s27 + $0x8] sm:$0xff]   ;;  %v7263_v15 = vld [vmem:[%s7933_s27 + $0x10] sm:$0xff]   ;;  %p428_p10 = scmp.lt.s32.totalorder %s7626_s25, 1  ;;  %p430_p5 = scmp.lt.s32.totalorder %s5182_s23, 163 }
  0xa2   : > { %6285 = vmatprep.subr.bf16.mxu0 %v9949_v0  ;;  %6339 = vmatprep.subr.bf16.mxu1 %v9949_v0  ;;  %v7990_v9 = vand.u32 %v7257_v7, %v590_v8  ;;  %v7264_v16 = vld [vmem:[%s7925_s1 + $0x18] sm:$0xff]   ;;  %v7266_v18 = vld [vmem:[%s7925_s1 + $0x20] sm:$0xff]   ;;  %v7268_v20 = vld [vmem:[%s7925_s1 + $0x28] sm:$0xff]   ;;  %vm1591_vm4 = vcmask 44032   ;;  %vm1612_vm5 = vcmask 41984  }
  0xa3   : > { %v7265_v17 = vld [vmem:[%s7933_s27 + $0x18] sm:$0xff]   ;;  %v7267_v19 = vld [vmem:[%s7933_s27 + $0x20] sm:$0xff]   ;;  %v7269_v21 = vld [vmem:[%s7933_s27 + $0x28] sm:$0xff]   ;;  %s10059_s25 = smov (!%p428_p10, %s7626_s25), 1  ;;  %s10061_s23 = smov (!%p430_p5, %s5182_s23), 163 }
  0xa4   : > { %v7270_v22 = vld [vmem:[%s7925_s1 + $0x30] sm:$0xff]   ;;  %v7272_v24 = vld [vmem:[%s7925_s1 + $0x38] sm:$0xff]   ;;  %v7274_v26 = vld [vmem:[%s7925_s1 + $0x40] sm:$0xff]   ;;  %s7161_s24 = smul.u32 3444, %s10059_s25 }
  0xa5   : > { %6286 = vmatpush3.bf16.msra.mxu0 %v7963_v2  ;;  %6340 = vmatpush3.bf16.msra.mxu1 %v7963_v2  ;;  %v7271_v23 = vld [vmem:[%s7933_s27 + $0x30] sm:$0xff]   ;;  %v7273_v25 = vld [vmem:[%s7933_s27 + $0x38] sm:$0xff]   ;;  %v7275_v27 = vld [vmem:[%s7933_s27 + $0x40] sm:$0xff]   ;;  %s7160_s8 = smul.u32 21, %s10061_s23 }
  0xa6   : > { %6287 = vmatprep.subr.bf16.mxu0 %v9949_v0  ;;  %6341 = vmatprep.subr.bf16.mxu1 %v9949_v0  ;;  %v7276_v28 = vld [vmem:[%s7925_s1 + $0x48] sm:$0xff]   ;;  %v7278_v30 = vld [vmem:[%s7925_s1 + $0x50] ss:$0 sps:$4 sm:$0x33]   ;;  %v7280_v32 = vld [vmem:[%s7939_s11] sm:$0xff]  }
  0xa7   : > { %v7277_v29 = vld [vmem:[%s7933_s27 + $0x48] sm:$0xff]   ;;  %v7279_v31 = vld [vmem:[%s7933_s27 + $0x50] ss:$0 sps:$4 sm:$0x33]   ;;  %v7281_v33 = vld [vmem:[%s7941_s12] sm:$0xff]   ;;  %s434_s10 = sadd.s32 %s7161_s24, %s7160_s8 }
  0xa8   : > { %v7282_v34 = vld [vmem:[%s7939_s11 + $0x8] sm:$0xff]   ;;  %v7284_v36 = vld [vmem:[%s7939_s11 + $0x10] sm:$0xff]   ;;  %v7286_v38 = vld [vmem:[%s7939_s11 + $0x18] sm:$0xff]   ;;  %s5183_s20 = sshll.u32 %s434_s10, 2 }
  0xa9   : > { %6288 = vmatpush3.bf16.msra.mxu0 %v7972_v3  ;;  %6342 = vmatpush3.bf16.msra.mxu1 %v7972_v3  ;;  %v7283_v35 = vld [vmem:[%s7941_s12 + $0x8] sm:$0xff]   ;;  %v7285_v37 = vld [vmem:[%s7941_s12 + $0x10] sm:$0xff]   ;;  %v7287_v39 = vld [vmem:[%s7941_s12 + $0x18] sm:$0xff]   ;;  %s8555_s14 = scalar_lea.vmem %s9937_s6, %s5183_s20 }
  0xaa   : > { %6289 = vmatprep.subr.bf16.mxu0 %v9949_v0  ;;  %6343 = vmatprep.subr.bf16.mxu1 %v9949_v0  ;;  %v7288_v40 = vld [vmem:[%s7939_s11 + $0x20] sm:$0xff]   ;;  %v7290_v42 = vld [vmem:[%s7939_s11 + $0x28] sm:$0xff]   ;;  %v7292_v44 = vld [vmem:[%s7939_s11 + $0x30] sm:$0xff]  }
  0xab   : > { %v7289_v41 = vld [vmem:[%s7941_s12 + $0x20] sm:$0xff]   ;;  %v7291_v43 = vld [vmem:[%s7941_s12 + $0x28] sm:$0xff]   ;;  %v7293_v45 = vld [vmem:[%s7941_s12 + $0x30] sm:$0xff]  }
  0xac   : > { %v7294_v46 = vld [vmem:[%s7939_s11 + $0x38] sm:$0xff]   ;;  %v7296_v48 = vld [vmem:[%s7939_s11 + $0x40] sm:$0xff]   ;;  %v7298_v50 = vld [vmem:[%s7939_s11 + $0x48] sm:$0xff]  }
  0xad   : > { %6290 = vmatpush3.bf16.msra.mxu0 %v7979_v6  ;;  %6344 = vmatpush3.bf16.msra.mxu1 %v7979_v6  ;;  %v7295_v47 = vld [vmem:[%s7941_s12 + $0x38] sm:$0xff]   ;;  %v7297_v49 = vld [vmem:[%s7941_s12 + $0x40] sm:$0xff]   ;;  %v7299_v51 = vld [vmem:[%s7941_s12 + $0x48] sm:$0xff]  }
  0xae   : > { %6291 = vmatprep.subr.bf16.mxu0 %v9949_v0  ;;  %6345 = vmatprep.subr.bf16.mxu1 %v9949_v0  ;;  %v7300_v52 = vld [vmem:[%s7939_s11 + $0x50] ss:$0 sps:$4 sm:$0x33]   ;;  %v7302_v54 = vld [vmem:[%s7925_s1 + $0x54] sm:$0xff]   ;;  %v7304_v57 = vld [vmem:[%s7925_s1 + $0x5c] sm:$0xff]  }
  0xaf   : > { %v7301_v53 = vld [vmem:[%s7941_s12 + $0x50] ss:$0 sps:$4 sm:$0x33]   ;;  %v7303_v55 = vld [vmem:[%s7933_s27 + $0x54] sm:$0xff]   ;;  %v7305_v58 = vld [vmem:[%s7933_s27 + $0x5c] sm:$0xff]  }
  0xb0   : > { %v8221_v56 = vld [vmem:[%s9935_s4] sm:$0xff]   ;;  %v8236_v59 = vld [vmem:[%s9935_s4 + $0x8] sm:$0xff]   ;;  %v8251_v60 = vld [vmem:[%s9935_s4 + $0x10] sm:$0xff]  }
  0xb1   : > { %6292 = vmatpush3.bf16.msra.mxu0 %v7990_v9  ;;  %6346 = vmatpush3.bf16.msra.mxu1 %v7990_v9  ;;  %v7306_v61 = vld [vmem:[%s7925_s1 + $0x64] sm:$0xff]   ;;  %v7311_v4 = vld [vmem:[%s7933_s27 + $0x74] sm:$0xff]  }
  0xb2   : > { %6391 = vmatprep.subr.bf16.mxu0 %v9949_v0  ;;  %6445 = vmatprep.subr.bf16.mxu1 %v9949_v0  ;;  %v7307_v62 = vld [vmem:[%s7933_s27 + $0x64] sm:$0xff]  }
  0xb3   : > { %v8262_v63 = vld [vmem:[%s9935_s4 + $0x18] sm:$0xff]  }
  0xb4   : > { %6294 = vmatmul.mubr.msk.bf16.vlgmr.msra.gmra.mrb[0].mxu0 %vm553_vm3, %v7258_v10  ;;  %6348 = vmatmul.mubr.msk.bf16.vlgmr.msra.gmra.mrb[0].mxu1 %vm553_vm3, %v7259_v11  ;;  %v7312_v11 = vld [vmem:[%s7925_s1 + $0x7c] sm:$0xff]  }
  0xb5   : > { %6392 = vmatpush3.bf16.msra.mxu0 %v7956_v1  ;;  %6446 = vmatpush3.bf16.msra.mxu1 %v7956_v1 }
  0xb6   : > { %6297 = vmatprep.mubr.msk.bf16.mxu0 %vm7647_vm0, %v9949_v0  ;;  %6351 = vmatprep.mubr.msk.bf16.mxu1 %vm7647_vm0, %v9949_v0 }
  0xb7   : > { %6393 = vmatprep.subr.bf16.mxu0 %v9949_v0  ;;  %6447 = vmatprep.subr.bf16.mxu1 %v9949_v0 }
  0xb9   : > { %6394 = vmatpush3.bf16.msra.mxu0 %v7963_v2  ;;  %6448 = vmatpush3.bf16.msra.mxu1 %v7963_v2 }
  0xba   : > { %6395 = vmatprep.subr.bf16.mxu0 %v9949_v0  ;;  %6449 = vmatprep.subr.bf16.mxu1 %v9949_v0 }
  0xbc   : > { %6298 = vmatmul.mubr.msk.bf16.gmra.mrb[4].mxu0 %vm553_vm3, %v7260_v12  ;;  %6352 = vmatmul.mubr.msk.bf16.gmra.mrb[4].mxu1 %vm553_vm3, %v7261_v13  ;;  %v7313_v12 = vld [vmem:[%s7933_s27 + $0x7c] sm:$0xff]  }
  0xbd   : > { %6301 = vmatprep.mubr.msk.bf16.mxu0 %vm7647_vm0, %v9949_v0  ;;  %6355 = vmatprep.mubr.msk.bf16.mxu1 %vm7647_vm0, %v9949_v0 }
  0xbe   : > { %6396 = vmatpush3.bf16.msra.mxu0 %v7972_v3  ;;  %6450 = vmatpush3.bf16.msra.mxu1 %v7972_v3 }
  0xbf   : > { %6397 = vmatprep.subr.bf16.mxu0 %v9949_v0  ;;  %6451 = vmatprep.subr.bf16.mxu1 %v9949_v0 }
  0xc2   : > { %6398 = vmatpush3.bf16.msra.mxu0 %v7979_v6  ;;  %6452 = vmatpush3.bf16.msra.mxu1 %v7979_v6 }
  0xc3   : > { %6399 = vmatprep.subr.bf16.mxu0 %v9949_v0  ;;  %6453 = vmatprep.subr.bf16.mxu1 %v9949_v0 }
  0xc4   : > { %6302 = vmatmul.mubr.msk.bf16.gmra.mrb[8].mxu0 %vm553_vm3, %v7262_v14  ;;  %6356 = vmatmul.mubr.msk.bf16.gmra.mrb[8].mxu1 %vm553_vm3, %v7263_v15 }
  0xc5   : > { %6305 = vmatprep.mubr.msk.bf16.mxu0 %vm7647_vm0, %v9949_v0  ;;  %6359 = vmatprep.mubr.msk.bf16.mxu1 %vm7647_vm0, %v9949_v0 }
  0xc6   : > { %6400 = vmatpush3.bf16.msra.mxu0 %v7990_v9  ;;  %6454 = vmatpush3.bf16.msra.mxu1 %v7990_v9 }
  0xc7   : > { %6499 = vmatprep.subr.bf16.mxu0 %v9949_v0  ;;  %6553 = vmatprep.subr.bf16.mxu1 %v9949_v0 }
  0xcc   : > { %6306 = vmatmul.mubr.msk.bf16.gmra.mrb[12].mxu0 %vm553_vm3, %v7264_v16  ;;  %6360 = vmatmul.mubr.msk.bf16.gmra.mrb[12].mxu1 %vm553_vm3, %v7265_v17 }
  0xcd   : > { %6309 = vmatprep.mubr.msk.bf16.mxu0 %vm7647_vm0, %v9949_v0  ;;  %6363 = vmatprep.mubr.msk.bf16.mxu1 %vm7647_vm0, %v9949_v0 }
  0xd4   : > { %6310 = vmatmul.mubr.msk.bf16.gmra.mrb[16].mxu0 %vm553_vm3, %v7266_v18  ;;  %6364 = vmatmul.mubr.msk.bf16.gmra.mrb[16].mxu1 %vm553_vm3, %v7267_v19 }
  0xd5   : > { %6313 = vmatprep.mubr.msk.bf16.mxu0 %vm7647_vm0, %v9949_v0  ;;  %6367 = vmatprep.mubr.msk.bf16.mxu1 %vm7647_vm0, %v9949_v0 }
  0xdc   : > { %6314 = vmatmul.mubr.msk.bf16.gmra.mrb[20].mxu0 %vm553_vm3, %v7268_v20  ;;  %6368 = vmatmul.mubr.msk.bf16.gmra.mrb[20].mxu1 %vm553_vm3, %v7269_v21 }
  0xdd   : > { %6317 = vmatprep.mubr.msk.bf16.mxu0 %vm7647_vm0, %v9949_v0  ;;  %6371 = vmatprep.mubr.msk.bf16.mxu1 %vm7647_vm0, %v9949_v0 }
  0xe4   : > { %6318 = vmatmul.mubr.msk.bf16.gmra.mrb[24].mxu0 %vm553_vm3, %v7270_v22  ;;  %6372 = vmatmul.mubr.msk.bf16.gmra.mrb[24].mxu1 %vm553_vm3, %v7271_v23  ;;  %v7314_v23 = vld [vmem:[%s7925_s1 + $0x84] sm:$0xff]  }
  0xe5   : > { %6321 = vmatprep.mubr.msk.bf16.mxu0 %vm7647_vm0, %v9949_v0  ;;  %6375 = vmatprep.mubr.msk.bf16.mxu1 %vm7647_vm0, %v9949_v0 }
  0xec   : > { %6322 = vmatmul.mubr.msk.bf16.gmra.mrb[28].mxu0 %vm553_vm3, %v7272_v24  ;;  %6376 = vmatmul.mubr.msk.bf16.gmra.mrb[28].mxu1 %vm553_vm3, %v7273_v25  ;;  %v7315_v24 = vld [vmem:[%s7933_s27 + $0x84] sm:$0xff]  }
  0xed   : > { %6325 = vmatprep.mubr.msk.bf16.mxu0 %vm7647_vm0, %v9949_v0  ;;  %6379 = vmatprep.mubr.msk.bf16.mxu1 %vm7647_vm0, %v9949_v0 }
  0xf4   : > { %6326 = vmatmul.mubr.msk.bf16.gmra.mrb[32].mxu0 %vm553_vm3, %v7274_v26  ;;  %6380 = vmatmul.mubr.msk.bf16.gmra.mrb[32].mxu1 %vm553_vm3, %v7275_v27 }
  0xf5   : > { %6329 = vmatprep.mubr.msk.bf16.mxu0 %vm7647_vm0, %v9949_v0  ;;  %6383 = vmatprep.mubr.msk.bf16.mxu1 %vm7647_vm0, %v9949_v0 }
  0xfc   : > { %6330 = vmatmul.mubr.msk.bf16.gmra.mrb[36].mxu0 %vm553_vm3, %v7276_v28  ;;  %6384 = vmatmul.mubr.msk.bf16.gmra.mrb[36].mxu1 %vm553_vm3, %v7277_v29 }
  0xfd   : > { %6333 = vmatprep.mubr.msk.bf16.mxu0 %vm7647_vm0, %v9949_v0  ;;  %6387 = vmatprep.mubr.msk.bf16.mxu1 %vm7647_vm0, %v9949_v0 }
 0x104   : > { %6334 = vmatmul.mubr.msk.bf16.gmra.mrb[40].mxu0 %vm553_vm3, %v7278_v30  ;;  %6388 = vmatmul.mubr.msk.bf16.gmra.mrb[40].mxu1 %vm553_vm3, %v7279_v31 }
 0x105   : > { %6401 = vmatprep.mubr.msk.bf16.mxu0 %vm7647_vm0, %v9949_v0  ;;  %6455 = vmatprep.mubr.msk.bf16.mxu1 %vm7647_vm0, %v9949_v0 }
 0x10c   : > { %6402 = vmatmul.mubr.msk.bf16.vlgmr.msra.gmra.mrb[44].mxu0 %vm553_vm3, %v7280_v32  ;;  %6456 = vmatmul.mubr.msk.bf16.vlgmr.msra.gmra.mrb[44].mxu1 %vm553_vm3, %v7281_v33 }
 0x10d   : > { %6500 = vmatpush3.bf16.msra.mxu0 %v7956_v1  ;;  %6554 = vmatpush3.bf16.msra.mxu1 %v7956_v1  ;;  %v7308_v1 = vld [vmem:[%s7925_s1 + $0x6c] sm:$0xff]  }
 0x10e   : > { %6405 = vmatprep.mubr.msk.bf16.mxu0 %vm7647_vm0, %v9949_v0  ;;  %6459 = vmatprep.mubr.msk.bf16.mxu1 %vm7647_vm0, %v9949_v0 }
 0x10f   : > { %6501 = vmatprep.subr.bf16.mxu0 %v9949_v0  ;;  %6555 = vmatprep.subr.bf16.mxu1 %v9949_v0 }
 0x111   : > { %6502 = vmatpush3.bf16.msra.mxu0 %v7963_v2  ;;  %6556 = vmatpush3.bf16.msra.mxu1 %v7963_v2  ;;  %v7309_v2 = vld [vmem:[%s7933_s27 + $0x6c] sm:$0xff]  }
 0x112   : > { %6503 = vmatprep.subr.bf16.mxu0 %v9949_v0  ;;  %6557 = vmatprep.subr.bf16.mxu1 %v9949_v0 }
 0x114   : > { %6406 = vmatmul.mubr.msk.bf16.gmra.mrb[48].mxu0 %vm553_vm3, %v7282_v34  ;;  %6460 = vmatmul.mubr.msk.bf16.gmra.mrb[48].mxu1 %vm553_vm3, %v7283_v35  ;;  %v7316_v35 = vld [vmem:[%s7925_s1 + $0x8c] sm:$0xff]  }
 0x115   : > { %6409 = vmatprep.mubr.msk.bf16.mxu0 %vm7647_vm0, %v9949_v0  ;;  %6463 = vmatprep.mubr.msk.bf16.mxu1 %vm7647_vm0, %v9949_v0 }
 0x116   : > { %6504 = vmatpush3.bf16.msra.mxu0 %v7972_v3  ;;  %6558 = vmatpush3.bf16.msra.mxu1 %v7972_v3  ;;  %v7310_v3 = vld [vmem:[%s7925_s1 + $0x74] sm:$0xff]  }
 0x117   : > { %6505 = vmatprep.subr.bf16.mxu0 %v9949_v0  ;;  %6559 = vmatprep.subr.bf16.mxu1 %v9949_v0 }
 0x11a   : > { %6506 = vmatpush3.bf16.msra.mxu0 %v7979_v6  ;;  %6560 = vmatpush3.bf16.msra.mxu1 %v7979_v6 }
 0x11b   : > { %6507 = vmatprep.subr.bf16.mxu0 %v9949_v0  ;;  %6561 = vmatprep.subr.bf16.mxu1 %v9949_v0 }
 0x11c   : > { %6410 = vmatmul.mubr.msk.bf16.gmra.mrb[52].mxu0 %vm553_vm3, %v7284_v36  ;;  %6464 = vmatmul.mubr.msk.bf16.gmra.mrb[52].mxu1 %vm553_vm3, %v7285_v37  ;;  %v7317_v36 = vld [vmem:[%s7933_s27 + $0x8c] sm:$0xff]  }
 0x11d   : > { %6413 = vmatprep.mubr.msk.bf16.mxu0 %vm7647_vm0, %v9949_v0  ;;  %6467 = vmatprep.mubr.msk.bf16.mxu1 %vm7647_vm0, %v9949_v0 }
 0x11e   : > { %6508 = vmatpush3.bf16.msra.mxu0 %v7990_v9  ;;  %6562 = vmatpush3.bf16.msra.mxu1 %v7990_v9 }
 0x11f   : > { %6607 = vmatprep.subr.bf16.mxu0 %v9949_v0  ;;  %6661 = vmatprep.subr.bf16.mxu1 %v9949_v0 }
 0x124   : > { %6414 = vmatmul.mubr.msk.bf16.gmra.mrb[56].mxu0 %vm553_vm3, %v7286_v38  ;;  %6468 = vmatmul.mubr.msk.bf16.gmra.mrb[56].mxu1 %vm553_vm3, %v7287_v39 }
 0x125   : > { %6417 = vmatprep.mubr.msk.bf16.mxu0 %vm7647_vm0, %v9949_v0  ;;  %6471 = vmatprep.mubr.msk.bf16.mxu1 %vm7647_vm0, %v9949_v0 }
 0x12c   : > { %6418 = vmatmul.mubr.msk.bf16.gmra.mrb[60].mxu0 %vm553_vm3, %v7288_v40  ;;  %6472 = vmatmul.mubr.msk.bf16.gmra.mrb[60].mxu1 %vm553_vm3, %v7289_v41 }
 0x12d   : > { %6421 = vmatprep.mubr.msk.bf16.mxu0 %vm7647_vm0, %v9949_v0  ;;  %6475 = vmatprep.mubr.msk.bf16.mxu1 %vm7647_vm0, %v9949_v0 }
 0x134   : > { %6422 = vmatmul.mubr.msk.bf16.gmra.mrb[64].mxu0 %vm553_vm3, %v7290_v42  ;;  %6476 = vmatmul.mubr.msk.bf16.gmra.mrb[64].mxu1 %vm553_vm3, %v7291_v43 }
 0x135   : > { %6425 = vmatprep.mubr.msk.bf16.mxu0 %vm7647_vm0, %v9949_v0  ;;  %6479 = vmatprep.mubr.msk.bf16.mxu1 %vm7647_vm0, %v9949_v0 }
 0x13c   : > { %6426 = vmatmul.mubr.msk.bf16.gmra.mrb[68].mxu0 %vm553_vm3, %v7292_v44  ;;  %6480 = vmatmul.mubr.msk.bf16.gmra.mrb[68].mxu1 %vm553_vm3, %v7293_v45 }
 0x13d   : > { %6429 = vmatprep.mubr.msk.bf16.mxu0 %vm7647_vm0, %v9949_v0  ;;  %6483 = vmatprep.mubr.msk.bf16.mxu1 %vm7647_vm0, %v9949_v0 }
 0x144   : > { %6430 = vmatmul.mubr.msk.bf16.gmra.mrb[72].mxu0 %vm553_vm3, %v7294_v46  ;;  %6484 = vmatmul.mubr.msk.bf16.gmra.mrb[72].mxu1 %vm553_vm3, %v7295_v47  ;;  %v7318_v47 = vld [vmem:[%s7925_s1 + $0x94] sm:$0xff]  }
 0x145   : > { %6433 = vmatprep.mubr.msk.bf16.mxu0 %vm7647_vm0, %v9949_v0  ;;  %6487 = vmatprep.mubr.msk.bf16.mxu1 %vm7647_vm0, %v9949_v0 }
 0x14c   : > { %6434 = vmatmul.mubr.msk.bf16.gmra.mrb[76].mxu0 %vm553_vm3, %v7296_v48  ;;  %6488 = vmatmul.mubr.msk.bf16.gmra.mrb[76].mxu1 %vm553_vm3, %v7297_v49  ;;  %v7319_v48 = vld [vmem:[%s7933_s27 + $0x94] sm:$0xff]  }
 0x14d   : > { %6437 = vmatprep.mubr.msk.bf16.mxu0 %vm7647_vm0, %v9949_v0  ;;  %6491 = vmatprep.mubr.msk.bf16.mxu1 %vm7647_vm0, %v9949_v0 }
 0x154   : > { %6438 = vmatmul.mubr.msk.bf16.gmra.mrb[80].mxu0 %vm553_vm3, %v7298_v50  ;;  %6492 = vmatmul.mubr.msk.bf16.gmra.mrb[80].mxu1 %vm553_vm3, %v7299_v51 }
 0x155   : > { %6441 = vmatprep.mubr.msk.bf16.mxu0 %vm7647_vm0, %v9949_v0  ;;  %6495 = vmatprep.mubr.msk.bf16.mxu1 %vm7647_vm0, %v9949_v0 }
 0x15c   : > { %6442 = vmatmul.mubr.msk.bf16.gmra.mrb[84].mxu0 %vm553_vm3, %v7300_v52  ;;  %6496 = vmatmul.mubr.msk.bf16.gmra.mrb[84].mxu1 %vm553_vm3, %v7301_v53 }
 0x15d   : > { %6509 = vmatprep.mubr.msk.bf16.mxu0 %vm7647_vm0, %v9949_v0  ;;  %6563 = vmatprep.mubr.msk.bf16.mxu1 %vm7647_vm0, %v9949_v0 }
 0x164   : > { %6510 = vmatmul.mubr.msk.bf16.vlgmr.msra.gmra.mrb[88].mxu0 %vm553_vm3, %v7302_v54  ;;  %6564 = vmatmul.mubr.msk.bf16.vlgmr.msra.gmra.mrb[88].mxu1 %vm553_vm3, %v7303_v55 }
 0x165   : > { %6608 = vmatpush3.bf16.msra.mxu0 %v8221_v56  ;;  %6662 = vmatpush3.bf16.msra.mxu1 %v8221_v56 }
 0x166   : > { %6513 = vmatprep.mubr.msk.bf16.mxu0 %vm7647_vm0, %v9949_v0  ;;  %6567 = vmatprep.mubr.msk.bf16.mxu1 %vm7647_vm0, %v9949_v0 }
 0x167   : > { %6609 = vmatprep.subr.bf16.mxu0 %v9949_v0  ;;  %6663 = vmatprep.subr.bf16.mxu1 %v9949_v0 }
 0x169   : > { %6610 = vmatpush3.bf16.msra.mxu0 %v8236_v59  ;;  %6664 = vmatpush3.bf16.msra.mxu1 %v8236_v59 }
 0x16a   : > { %6611 = vmatprep.subr.bf16.mxu0 %v9949_v0  ;;  %6665 = vmatprep.subr.bf16.mxu1 %v9949_v0 }
 0x16c   : > { %6514 = vmatmul.mubr.msk.bf16.gmra.mrb[92].mxu0 %vm553_vm3, %v7304_v57  ;;  %6568 = vmatmul.mubr.msk.bf16.gmra.mrb[92].mxu1 %vm553_vm3, %v7305_v58 }
 0x16d   : > { %6517 = vmatprep.mubr.msk.bf16.mxu0 %vm7647_vm0, %v9949_v0  ;;  %6571 = vmatprep.mubr.msk.bf16.mxu1 %vm7647_vm0, %v9949_v0 }
 0x16e   : > { %6612 = vmatpush3.bf16.msra.mxu0 %v8251_v60  ;;  %6666 = vmatpush3.bf16.msra.mxu1 %v8251_v60 }
 0x16f   : > { %6613 = vmatprep.subr.bf16.mxu0 %v9949_v0  ;;  %6667 = vmatprep.subr.bf16.mxu1 %v9949_v0 }
 0x172   : > { %6614 = vmatpush3.bf16.msra.mxu0 %v8262_v63  ;;  %6668 = vmatpush3.bf16.msra.mxu1 %v8262_v63 }
 0x173   : > { %6615 = vmatprep.subr.bf16.mxu0 %v9949_v0  ;;  %6669 = vmatprep.subr.bf16.mxu1 %v9949_v0 }
 0x174   : > { %6518 = vmatmul.mubr.msk.bf16.gmra.mrb[96].mxu0 %vm553_vm3, %v7306_v61  ;;  %6572 = vmatmul.mubr.msk.bf16.gmra.mrb[96].mxu1 %vm553_vm3, %v7307_v62  ;;  %v7320_v62 = vld [vmem:[%s7925_s1 + $0x9c] sm:$0xff]  }
 0x175   : > { %6521 = vmatprep.mubr.msk.bf16.mxu0 %vm7647_vm0, %v9949_v0  ;;  %6575 = vmatprep.mubr.msk.bf16.mxu1 %vm7647_vm0, %v9949_v0 }
 0x176   : > { %6616 = vmatpush3.bf16.msra.mxu0 %v7990_v9  ;;  %6670 = vmatpush3.bf16.msra.mxu1 %v7990_v9 }
 0x177   : > { %6715 = vmatprep.subr.bf16.mxu0 %v9949_v0  ;;  %6769 = vmatprep.subr.bf16.mxu1 %v9949_v0 }
 0x17c   : > { %6522 = vmatmul.mubr.msk.bf16.gmra.mrb[100].mxu0 %vm553_vm3, %v7308_v1  ;;  %6576 = vmatmul.mubr.msk.bf16.gmra.mrb[100].mxu1 %vm553_vm3, %v7309_v2  ;;  %v7321_v1 = vld [vmem:[%s7933_s27 + $0x9c] sm:$0xff]  }
 0x17d   : > { %6525 = vmatprep.mubr.msk.bf16.mxu0 %vm7647_vm0, %v9949_v0  ;;  %6579 = vmatprep.mubr.msk.bf16.mxu1 %vm7647_vm0, %v9949_v0 }
 0x184   : > { %6526 = vmatmul.mubr.msk.bf16.gmra.mrb[104].mxu0 %vm553_vm3, %v7310_v3  ;;  %6580 = vmatmul.mubr.msk.bf16.gmra.mrb[104].mxu1 %vm553_vm3, %v7311_v4 }
 0x185   : > { %6529 = vmatprep.mubr.msk.bf16.mxu0 %vm7647_vm0, %v9949_v0  ;;  %6583 = vmatprep.mubr.msk.bf16.mxu1 %vm7647_vm0, %v9949_v0 }
 0x187   : > { %v8294_v5 = vpop.f32.mrb[0].mxu0  ;;  %v8296_v6 = vpop.f32.mrb[0].mxu1 }
 0x188   : > { %v941_v7 = vmax.f32 %v8294_v5, %v8296_v6  ;;  %v6295_v8 = vpop.f32.mrb[1].mxu0  ;;  %v6349_v10 = vpop.f32.mrb[1].mxu1 }
 0x189   : > { %v8302_v13 = vpop.f32.mrb[2].mxu0  ;;  %v8304_v14 = vpop.f32.mrb[2].mxu1 }
 0x18a   : > { %v942_v15 = vmax.f32 %v8302_v13, %v8304_v14  ;;  %v6296_v16 = vpop.f32.mrb[3].mxu0  ;;  %v6350_v17 = vpop.f32.mrb[3].mxu1 }
 0x18b   : > { %v7322_v16 = vld [vmem:[%s7925_s1 + $0xa4] ss:$0 sps:$4 sm:$0x33]  }
 0x18c   : > { %6530 = vmatmul.mubr.msk.bf16.gmra.mrb[108].mxu0 %vm553_vm3, %v7312_v11  ;;  %6584 = vmatmul.mubr.msk.bf16.gmra.mrb[108].mxu1 %vm553_vm3, %v7313_v12 }
 0x18d   : > { %6533 = vmatprep.mubr.msk.bf16.mxu0 %vm7647_vm0, %v9949_v0  ;;  %6587 = vmatprep.mubr.msk.bf16.mxu1 %vm7647_vm0, %v9949_v0 }
 0x18f   : > { %v8314_v18 = vpop.f32.mrb[4].mxu0  ;;  %v8316_v19 = vpop.f32.mrb[4].mxu1 }
 0x190   : > { %v943_v20 = vmax.f32 %v8314_v18, %v8316_v19  ;;  %v6299_v21 = vpop.f32.mrb[5].mxu0  ;;  %v6353_v22 = vpop.f32.mrb[5].mxu1 }
 0x191   : > { %v8322_v25 = vpop.f32.mrb[6].mxu0  ;;  %v8324_v26 = vpop.f32.mrb[6].mxu1 }
 0x192   : > { %v6300_v28 = vpop.f32.mrb[7].mxu0  ;;  %v6354_v29 = vpop.f32.mrb[7].mxu1 }
 0x194   : > { %6534 = vmatmul.mubr.msk.bf16.gmra.mrb[112].mxu0 %vm553_vm3, %v7314_v23  ;;  %6588 = vmatmul.mubr.msk.bf16.gmra.mrb[112].mxu1 %vm553_vm3, %v7315_v24  ;;  %v7323_v23 = vld [vmem:[%s7933_s27 + $0xa4] ss:$0 sps:$4 sm:$0x33]  }
 0x195   : > { %6537 = vmatprep.mubr.msk.bf16.mxu0 %vm7647_vm0, %v9949_v0  ;;  %6591 = vmatprep.mubr.msk.bf16.mxu1 %vm7647_vm0, %v9949_v0 }
 0x197   : > { %v8334_v30 = vpop.f32.mrb[8].mxu0  ;;  %v8336_v31 = vpop.f32.mrb[8].mxu1 }
 0x198   : > { %v6303_v33 = vpop.f32.mrb[9].mxu0  ;;  %v6357_v34 = vpop.f32.mrb[9].mxu1 }
 0x199   : > { %v8342_v37 = vpop.f32.mrb[10].mxu0  ;;  %v8344_v38 = vpop.f32.mrb[10].mxu1 }
 0x19a   : > { %v6304_v40 = vpop.f32.mrb[11].mxu0  ;;  %v6358_v41 = vpop.f32.mrb[11].mxu1 }
 0x19c   : > { %6538 = vmatmul.mubr.msk.bf16.gmra.mrb[116].mxu0 %vm553_vm3, %v7316_v35  ;;  %6592 = vmatmul.mubr.msk.bf16.gmra.mrb[116].mxu1 %vm553_vm3, %v7317_v36 }
 0x19d   : > { %6541 = vmatprep.mubr.msk.bf16.mxu0 %vm7647_vm0, %v9949_v0  ;;  %6595 = vmatprep.mubr.msk.bf16.mxu1 %vm7647_vm0, %v9949_v0 }
 0x19f   : > { %v8354_v42 = vpop.f32.mrb[12].mxu0  ;;  %v8356_v43 = vpop.f32.mrb[12].mxu1 }
 0x1a0   : > { %v6307_v45 = vpop.f32.mrb[13].mxu0  ;;  %v6361_v46 = vpop.f32.mrb[13].mxu1 }
 0x1a1   : > { %v8362_v49 = vpop.f32.mrb[14].mxu0  ;;  %v8364_v50 = vpop.f32.mrb[14].mxu1  ;;  %v7324_v46 = vld [vmem:[%s7939_s11 + $0x54] sm:$0xff]  }
 0x1a2   : > { %v6308_v52 = vpop.f32.mrb[15].mxu0  ;;  %v6362_v53 = vpop.f32.mrb[15].mxu1 }
 0x1a4   : > { %6542 = vmatmul.mubr.msk.bf16.gmra.mrb[120].mxu0 %vm553_vm3, %v7318_v47  ;;  %6596 = vmatmul.mubr.msk.bf16.gmra.mrb[120].mxu1 %vm553_vm3, %v7319_v48  ;;  %v7325_v47 = vld [vmem:[%s7941_s12 + $0x54] sm:$0xff]  }
 0x1a5   : > { %6545 = vmatprep.mubr.msk.bf16.mxu0 %vm7647_vm0, %v9949_v0  ;;  %6599 = vmatprep.mubr.msk.bf16.mxu1 %vm7647_vm0, %v9949_v0 }
 0x1a7   : > { %v8374_v54 = vpop.f32.mrb[16].mxu0  ;;  %v8376_v55 = vpop.f32.mrb[16].mxu1 }
 0x1a8   : > { %v6311_v58 = vpop.f32.mrb[17].mxu0  ;;  %v6365_v61 = vpop.f32.mrb[17].mxu1 }
 0x1a9   : > { %v8382_v2 = vpop.f32.mrb[18].mxu0  ;;  %v8384_v3 = vpop.f32.mrb[18].mxu1 }
 0x1aa   : > { %v6312_v8 = vpop.f32.mrb[19].mxu0  ;;  %v6366_v10 = vpop.f32.mrb[19].mxu1 }
 0x1ac   : > { %6546 = vmatmul.mubr.msk.bf16.gmra.mrb[124].mxu0 %vm553_vm3, %v7320_v62  ;;  %6600 = vmatmul.mubr.msk.bf16.gmra.mrb[124].mxu1 %vm553_vm3, %v7321_v1 }
 0x1ad   : > { %6549 = vmatprep.mubr.msk.bf16.mxu0 %vm7647_vm0, %v9949_v0  ;;  %6603 = vmatprep.mubr.msk.bf16.mxu1 %vm7647_vm0, %v9949_v0 }
 0x1af   : > { %v8394_v11 = vpop.f32.mrb[20].mxu0  ;;  %v8396_v12 = vpop.f32.mrb[20].mxu1 }
 0x1b0   : > { %v6315_v21 = vpop.f32.mrb[21].mxu0  ;;  %v6369_v22 = vpop.f32.mrb[21].mxu1 }
 0x1b1   : > { %v8402_v24 = vpop.f32.mrb[22].mxu0  ;;  %v8404_v28 = vpop.f32.mrb[22].mxu1  ;;  %v7326_v21 = vld [vmem:[%s7939_s11 + $0x5c] sm:$0xff]  }
 0x1b2   : > { %v6316_v33 = vpop.f32.mrb[23].mxu0  ;;  %v6370_v34 = vpop.f32.mrb[23].mxu1  ;;  %v7327_v22 = vld [vmem:[%s7941_s12 + $0x5c] sm:$0xff]  }
 0x1b4   : > { %6550 = vmatmul.mubr.msk.bf16.gmra.mrb[128].mxu0 %vm553_vm3, %v7322_v16  ;;  %6604 = vmatmul.mubr.msk.bf16.gmra.mrb[128].mxu1 %vm553_vm3, %v7323_v23 }
 0x1b5   : > { %6617 = vmatprep.mubr.msk.bf16.mxu0 %vm7647_vm0, %v9949_v0  ;;  %6671 = vmatprep.mubr.msk.bf16.mxu1 %vm7647_vm0, %v9949_v0 }
 0x1b7   : > { %v8414_v35 = vpop.f32.mrb[24].mxu0  ;;  %v8416_v36 = vpop.f32.mrb[24].mxu1 }
 0x1b8   : > { %v6319_v41 = vpop.f32.mrb[25].mxu0  ;;  %v6373_v45 = vpop.f32.mrb[25].mxu1 }
 0x1b9   : > { %v8422_v48 = vpop.f32.mrb[26].mxu0  ;;  %v8424_v52 = vpop.f32.mrb[26].mxu1 }
 0x1ba   : > { %v6320_v58 = vpop.f32.mrb[27].mxu0  ;;  %v6374_v61 = vpop.f32.mrb[27].mxu1 }
 0x1bc   : > { %6618 = vmatmul.mubr.msk.bf16.vlgmr.msra.gmra.mrb[132].mxu0 %vm553_vm3, %v7324_v46  ;;  %6672 = vmatmul.mubr.msk.bf16.vlgmr.msra.gmra.mrb[132].mxu1 %vm553_vm3, %v7325_v47 }
 0x1bd   : > { %6716 = vmatpush3.bf16.msra.mxu0 %v8221_v56  ;;  %6770 = vmatpush3.bf16.msra.mxu1 %v8221_v56 }
 0x1be   : > { %6621 = vmatprep.mubr.msk.bf16.mxu0 %vm7647_vm0, %v9949_v0  ;;  %6675 = vmatprep.mubr.msk.bf16.mxu1 %vm7647_vm0, %v9949_v0 }
 0x1bf   : > { %v8436_v62 = vpop.f32.mrb[28].mxu0  ;;  %v8438_v1 = vpop.f32.mrb[28].mxu1  ;;  %6717 = vmatprep.subr.bf16.mxu0 %v9949_v0  ;;  %6771 = vmatprep.subr.bf16.mxu1 %v9949_v0 }
 0x1c0   : > { %v6323_v10 = vpop.f32.mrb[29].mxu0  ;;  %v6377_v16 = vpop.f32.mrb[29].mxu1 }
 0x1c1   : > { %v8446_v23 = vpop.f32.mrb[30].mxu0  ;;  %v8448_v33 = vpop.f32.mrb[30].mxu1  ;;  %6718 = vmatpush3.bf16.msra.mxu0 %v8236_v59  ;;  %6772 = vmatpush3.bf16.msra.mxu1 %v8236_v59  ;;  %v7328_v16 = vld [vmem:[%s7939_s11 + $0x64] sm:$0xff]  }
 0x1c2   : > { %v6324_v41 = vpop.f32.mrb[31].mxu0  ;;  %v6378_v45 = vpop.f32.mrb[31].mxu1  ;;  %6719 = vmatprep.subr.bf16.mxu0 %v9949_v0  ;;  %6773 = vmatprep.subr.bf16.mxu1 %v9949_v0 }
 0x1c3   : > { %v7331_v45 = vld [vmem:[%s7941_s12 + $0x6c] sm:$0xff]  }
 0x1c4   : > { %6622 = vmatmul.mubr.msk.bf16.gmra.mrb[136].mxu0 %vm553_vm3, %v7326_v21  ;;  %6676 = vmatmul.mubr.msk.bf16.gmra.mrb[136].mxu1 %vm553_vm3, %v7327_v22  ;;  %v7329_v21 = vld [vmem:[%s7941_s12 + $0x64] sm:$0xff]  }
 0x1c5   : > { %6625 = vmatprep.mubr.msk.bf16.mxu0 %vm7647_vm0, %v9949_v0  ;;  %6679 = vmatprep.mubr.msk.bf16.mxu1 %vm7647_vm0, %v9949_v0 }
 0x1c6   : > { %6720 = vmatpush3.bf16.msra.mxu0 %v8251_v60  ;;  %6774 = vmatpush3.bf16.msra.mxu1 %v8251_v60 }
 0x1c7   : > { %v8464_v46 = vpop.f32.mrb[32].mxu0  ;;  %v8466_v47 = vpop.f32.mrb[32].mxu1  ;;  %6721 = vmatprep.subr.bf16.mxu0 %v9949_v0  ;;  %6775 = vmatprep.subr.bf16.mxu1 %v9949_v0 }
 0x1c8   : > { %v6327_v61 = vpop.f32.mrb[33].mxu0  ;;  %v6381_v10 = vpop.f32.mrb[33].mxu1 }
 0x1c9   : > { %v8474_v22 = vpop.f32.mrb[34].mxu0  ;;  %v8476_v41 = vpop.f32.mrb[34].mxu1  ;;  %v7333_v61 = vld [vmem:[%s7941_s12 + $0x74] sm:$0xff]  }
 0x1ca   : > { %v6328_v34 = vpop.f32.mrb[35].mxu0  ;;  %v6382_v8 = vpop.f32.mrb[35].mxu1  ;;  %6722 = vmatpush3.bf16.msra.mxu0 %v8262_v63  ;;  %6776 = vmatpush3.bf16.msra.mxu1 %v8262_v63 }
 0x1cb   : > { %6723 = vmatprep.subr.bf16.mxu0 %v9949_v0  ;;  %6777 = vmatprep.subr.bf16.mxu1 %v9949_v0 }
 0x1cc   : > { %6626 = vmatmul.mubr.msk.bf16.gmra.mrb[140].mxu0 %vm553_vm3, %v7328_v16  ;;  %6680 = vmatmul.mubr.msk.bf16.gmra.mrb[140].mxu1 %vm553_vm3, %v7329_v21  ;;  %v7330_v21 = vld [vmem:[%s7939_s11 + $0x6c] sm:$0xff]  }
 0x1cd   : > { %6629 = vmatprep.mubr.msk.bf16.mxu0 %vm7647_vm0, %v9949_v0  ;;  %6683 = vmatprep.mubr.msk.bf16.mxu1 %vm7647_vm0, %v9949_v0 }
 0x1ce   : > { %6724 = vmatpush3.bf16.msra.mxu0 %v7990_v9  ;;  %6778 = vmatpush3.bf16.msra.mxu1 %v7990_v9 }
 0x1cf   : > { %v8492_v8 = vpop.f32.mrb[36].mxu0  ;;  %v8494_v34 = vpop.f32.mrb[36].mxu1  ;;  %6823 = vmatprep.subr.bf16.mxu0 %v9949_v0  ;;  %6877 = vmatprep.subr.bf16.mxu1 %v9949_v0 }
 0x1d0   : > { %v6331_v10 = vpop.f32.mrb[37].mxu0  ;;  %v6385_v16 = vpop.f32.mrb[37].mxu1 }
 0x1d1   : > { %v8502_v58 = vpop.f32.mrb[38].mxu0  ;;  %v8504_v53 = vpop.f32.mrb[38].mxu1 }
 0x1d2   : > { %v6332_v29 = vpop.f32.mrb[39].mxu0  ;;  %v6386_v17 = vpop.f32.mrb[39].mxu1 }
 0x1d4   : > { %6630 = vmatmul.mubr.msk.bf16.gmra.mrb[144].mxu0 %vm553_vm3, %v7330_v21  ;;  %6684 = vmatmul.mubr.msk.bf16.gmra.mrb[144].mxu1 %vm553_vm3, %v7331_v45  ;;  %v7332_v21 = vld [vmem:[%s7939_s11 + $0x74] sm:$0xff]  }
 0x1d5   : > { %6633 = vmatprep.mubr.msk.bf16.mxu0 %vm7647_vm0, %v9949_v0  ;;  %6687 = vmatprep.mubr.msk.bf16.mxu1 %vm7647_vm0, %v9949_v0 }
 0x1d7   : > { %v8516_v10 = vpop.f32.mrb[40].mxu0  ;;  %v8518_v16 = vpop.f32.mrb[40].mxu1 }
 0x1d8   : > { %v6335_v29 = vpop.f32.mrb[41].mxu0  ;;  %v6389_v40 = vpop.f32.mrb[41].mxu1 }
 0x1d9   : > { %v711_v45 = vpop.f32.mrb[42].mxu0  ;;  %v938_v4 = vpop.f32.mrb[42].mxu1 }
 0x1da   : > { %v6336_v57 = vpop.f32.mrb[43].mxu0  ;;  %v6390_v51 = vpop.f32.mrb[43].mxu1  ;;  %v7334_v45 = vld [vmem:[%s7939_s11 + $0x7c] sm:$0xff]  }
 0x1dc   : > { %6634 = vmatmul.mubr.msk.bf16.gmra.mrb[148].mxu0 %vm553_vm3, %v7332_v21  ;;  %6688 = vmatmul.mubr.msk.bf16.gmra.mrb[148].mxu1 %vm553_vm3, %v7333_v61  ;;  %v7335_v21 = vld [vmem:[%s7941_s12 + $0x7c] sm:$0xff]  }
 0x1dd   : > { %6637 = vmatprep.mubr.msk.bf16.mxu0 %vm7647_vm0, %v9949_v0  ;;  %6691 = vmatprep.mubr.msk.bf16.mxu1 %vm7647_vm0, %v9949_v0  ;;  %v8539_v61 = vld [vmem:[%s9936_s5] ss:$0 sm:$0xff] }
 0x1df   : > { %v1103_v40 = vpop.f32.mrb[44].mxu0  ;;  %v1351_v29 = vpop.f32.mrb[44].mxu1 }
 0x1e0   : > { %v1189_v4 = vmax.f32 %v941_v7, %v1103_v40  ;;  %v6403_v57 = vpop.f32.mrb[45].mxu0  ;;  %v6457_v51 = vpop.f32.mrb[45].mxu1 }
 0x1e1   : > { %v1106_v17 = vpop.f32.mrb[46].mxu0  ;;  %v1354_v44 = vpop.f32.mrb[46].mxu1 }
 0x1e2   : > { %v1437_v39 = vmax.f32 %v1189_v4, %v1351_v29  ;;  %v1190_v32 = vmax.f32 %v942_v15, %v1106_v17  ;;  %v6404_v27 = vpop.f32.mrb[47].mxu0  ;;  %v6458_v5 = vpop.f32.mrb[47].mxu1  ;;  %v7336_v29 = vld [vmem:[%s7939_s11 + $0x84] sm:$0xff]  }
 0x1e3   : > { %v7337_v4 = vld [vmem:[%s7941_s12 + $0x84] sm:$0xff]   ;;  %v9973_v5 = vmax.f32 %v8322_v25, %v8324_v26 }
 0x1e4   : > { %v1464_v6 = vadd.f32 %v8539_v61, %v1437_v39  ;;  %v1438_v7 = vmax.f32 %v1190_v32, %v1354_v44  ;;  %6638 = vmatmul.mubr.msk.bf16.gmra.mrb[152].mxu0 %vm553_vm3, %v7334_v45  ;;  %6692 = vmatmul.mubr.msk.bf16.gmra.mrb[152].mxu1 %vm553_vm3, %v7335_v21 }
 0x1e5   : > { %6641 = vmatprep.mubr.msk.bf16.mxu0 %vm7647_vm0, %v9949_v0  ;;  %6695 = vmatprep.mubr.msk.bf16.mxu1 %vm7647_vm0, %v9949_v0 }
 0x1e6   : > { %v1485_v13 = vmax.f32 %v1464_v6, 0.0  ;;  %v1465_v14 = vadd.f32 %v8539_v61, %v1438_v7 }
 0x1e7   : > { %v1111_v15 = vpop.f32.mrb[48].mxu0  ;;  %v1359_v27 = vpop.f32.mrb[48].mxu1 }
 0x1e8   : > { %v5943_v32 = vpack.c.bf16 %v1485_v13, %v1485_v13  ;;  %v1486_v39 = vmax.f32 %v1465_v14, 0.0  ;;  %v1191_v44 = vmax.f32 %v943_v20, %v1111_v15  ;;  %v6407_v17 = vpop.f32.mrb[49].mxu0  ;;  %v6461_v40 = vpop.f32.mrb[49].mxu1 }
 0x1e9   : > { %v1114_v57 = vpop.f32.mrb[50].mxu0  ;;  %v1362_v51 = vpop.f32.mrb[50].mxu1  ;;  %v7338_v40 = vld [vmem:[%s7939_s11 + $0x8c] sm:$0xff]  }
 0x1ea   : > { %1592 = vst.msk [vmem:[%s8555_s14] sm:$0xf] %vm1591_vm4, %v5943_v32  ;;  %v5944_v45 = vpack.c.bf16 %v1486_v39, %v1486_v39  ;;  %v1439_v21 = vmax.f32 %v1191_v44, %v1359_v27  ;;  %v1192_v6 = vmax.f32 %v9973_v5, %v1114_v57  ;;  %v6408_v7 = vpop.f32.mrb[51].mxu0  ;;  %v6462_v13 = vpop.f32.mrb[51].mxu1  ;;  %v9974_v32 = vmax.f32 %v8334_v30, %v8336_v31 }
 0x1ec   : > { %1593 = vst.msk [vmem:[%s8555_s14 + $0x4] sm:$0xf] %vm1591_vm4, %v5944_v45  ;;  %v1466_v18 = vadd.f32 %v8539_v61, %v1439_v21  ;;  %v1440_v19 = vmax.f32 %v1192_v6, %v1362_v51  ;;  %6642 = vmatmul.mubr.msk.bf16.gmra.mrb[156].mxu0 %vm553_vm3, %v7336_v29  ;;  %6696 = vmatmul.mubr.msk.bf16.gmra.mrb[156].mxu1 %vm553_vm3, %v7337_v4  ;;  %v7339_v29 = vld [vmem:[%s7941_s12 + $0x8c] sm:$0xff]  }
 0x1ed   : > { %6645 = vmatprep.mubr.msk.bf16.mxu0 %vm7647_vm0, %v9949_v0  ;;  %6699 = vmatprep.mubr.msk.bf16.mxu1 %vm7647_vm0, %v9949_v0  ;;  %v9975_v21 = vmax.f32 %v8342_v37, %v8344_v38 }
 0x1ee   : > { %v1487_v20 = vmax.f32 %v1466_v18, 0.0  ;;  %v1467_v25 = vadd.f32 %v8539_v61, %v1440_v19 }
 0x1ef   : > { %v1119_v26 = vpop.f32.mrb[52].mxu0  ;;  %v1367_v14 = vpop.f32.mrb[52].mxu1 }
 0x1f0   : > { %v5945_v15 = vpack.c.bf16 %v1487_v20, %v1487_v20  ;;  %v1488_v27 = vmax.f32 %v1467_v25, 0.0  ;;  %v1193_v39 = vmax.f32 %v9974_v32, %v1119_v26  ;;  %v6411_v44 = vpop.f32.mrb[53].mxu0  ;;  %v6465_v17 = vpop.f32.mrb[53].mxu1  ;;  %v9976_v25 = vmax.f32 %v8354_v42, %v8356_v43  ;;  %v7341_v32 = vld [vmem:[%s7941_s12 + $0x94] sm:$0xff]  }
 0x1f1   : > { %v1122_v4 = vpop.f32.mrb[54].mxu0  ;;  %v1370_v57 = vpop.f32.mrb[54].mxu1 }
 0x1f2   : > { %1594 = vst.msk [vmem:[%s8555_s14 + $0x8] sm:$0xf] %vm1591_vm4, %v5945_v15  ;;  %v5946_v51 = vpack.c.bf16 %v1488_v27, %v1488_v27  ;;  %v1441_v45 = vmax.f32 %v1193_v39, %v1367_v14  ;;  %v1194_v5 = vmax.f32 %v9975_v21, %v1122_v4  ;;  %v6412_v6 = vpop.f32.mrb[55].mxu0  ;;  %v6466_v7 = vpop.f32.mrb[55].mxu1  ;;  %v7340_v27 = vld [vmem:[%s7939_s11 + $0x94] sm:$0xff]  }
 0x1f3   : > { %v9978_v7 = vmax.f32 %v8374_v54, %v8376_v55 }
 0x1f4   : > { %1595 = vst.msk [vmem:[%s8555_s14 + $0xc] sm:$0xf] %vm1591_vm4, %v5946_v51  ;;  %v1468_v30 = vadd.f32 %v8539_v61, %v1441_v45  ;;  %v1442_v31 = vmax.f32 %v1194_v5, %v1370_v57  ;;  %6646 = vmatmul.mubr.msk.bf16.gmra.mrb[160].mxu0 %vm553_vm3, %v7338_v40  ;;  %6700 = vmatmul.mubr.msk.bf16.gmra.mrb[160].mxu1 %vm553_vm3, %v7339_v29 }
 0x1f5   : > { %6649 = vmatprep.mubr.msk.bf16.mxu0 %vm7647_vm0, %v9949_v0  ;;  %6703 = vmatprep.mubr.msk.bf16.mxu1 %vm7647_vm0, %v9949_v0  ;;  %v9977_v29 = vmax.f32 %v8362_v49, %v8364_v50 }
 0x1f6   : > { %v1489_v37 = vmax.f32 %v1468_v30, 0.0  ;;  %v1469_v38 = vadd.f32 %v8539_v61, %v1442_v31 }
 0x1f7   : > { %v1127_v13 = vpop.f32.mrb[56].mxu0  ;;  %v1375_v18 = vpop.f32.mrb[56].mxu1 }
 0x1f8   : > { %v5947_v19 = vpack.c.bf16 %v1489_v37, %v1489_v37  ;;  %v1490_v20 = vmax.f32 %v1469_v38, 0.0  ;;  %v1195_v26 = vmax.f32 %v9976_v25, %v1127_v13  ;;  %v6415_v14 = vpop.f32.mrb[57].mxu0  ;;  %v6469_v15 = vpop.f32.mrb[57].mxu1  ;;  %v7342_v38 = vld [vmem:[%s7939_s11 + $0x9c] sm:$0xff]  }
 0x1f9   : > { %v1130_v39 = vpop.f32.mrb[58].mxu0  ;;  %v1378_v44 = vpop.f32.mrb[58].mxu1  ;;  %v7343_v13 = vld [vmem:[%s7941_s12 + $0x9c] sm:$0xff]  }
 0x1fa   : > { %1596 = vst.msk [vmem:[%s8555_s14 + $0x10] sm:$0xf] %vm1591_vm4, %v5947_v19  ;;  %v5948_v17 = vpack.c.bf16 %v1490_v20, %v1490_v20  ;;  %v1443_v40 = vmax.f32 %v1195_v26, %v1375_v18  ;;  %v1196_v4 = vmax.f32 %v9977_v29, %v1130_v39  ;;  %v6416_v57 = vpop.f32.mrb[59].mxu0  ;;  %v6470_v51 = vpop.f32.mrb[59].mxu1  ;;  %v9979_v26 = vmax.f32 %v8382_v2, %v8384_v3 }
 0x1fb   : > { %v9980_v29 = vmax.f32 %v8394_v11, %v8396_v12 }
 0x1fc   : > { %1597 = vst.msk [vmem:[%s8555_s14 + $0x14] sm:$0xf] %vm1591_vm4, %v5948_v17  ;;  %v1470_v42 = vadd.f32 %v8539_v61, %v1443_v40  ;;  %v1444_v43 = vmax.f32 %v1196_v4, %v1378_v44  ;;  %6650 = vmatmul.mubr.msk.bf16.gmra.mrb[164].mxu0 %vm553_vm3, %v7340_v27  ;;  %6704 = vmatmul.mubr.msk.bf16.gmra.mrb[164].mxu1 %vm553_vm3, %v7341_v32  ;;  %v7344_v44 = vld [vmem:[%s7939_s11 + $0xa4] ss:$0 sps:$4 sm:$0x33]  }
 0x1fd   : > { %6653 = vmatprep.mubr.msk.bf16.mxu0 %vm7647_vm0, %v9949_v0  ;;  %6707 = vmatprep.mubr.msk.bf16.mxu1 %vm7647_vm0, %v9949_v0 }
 0x1fe   : > { %v1491_v49 = vmax.f32 %v1470_v42, 0.0  ;;  %v1471_v50 = vadd.f32 %v8539_v61, %v1444_v43  ;;  %v7345_v42 = vld [vmem:[%s7941_s12 + $0xa4] ss:$0 sps:$4 sm:$0x33]  }
 0x1ff   : > { %v1135_v45 = vpop.f32.mrb[60].mxu0  ;;  %v1383_v21 = vpop.f32.mrb[60].mxu1 }
 0x200   : > { %v5949_v5 = vpack.c.bf16 %v1491_v49, %v1491_v49  ;;  %v1492_v6 = vmax.f32 %v1471_v50, 0.0  ;;  %v1197_v30 = vmax.f32 %v9978_v7, %v1135_v45  ;;  %v6419_v31 = vpop.f32.mrb[61].mxu0  ;;  %v6473_v37 = vpop.f32.mrb[61].mxu1 }
 0x201   : > { %v1138_v18 = vpop.f32.mrb[62].mxu0  ;;  %v1386_v19 = vpop.f32.mrb[62].mxu1 }
 0x202   : > { %1598 = vst.msk [vmem:[%s8555_s14 + $0x18] sm:$0xf] %vm1591_vm4, %v5949_v5  ;;  %v5950_v20 = vpack.c.bf16 %v1492_v6, %v1492_v6  ;;  %v1445_v25 = vmax.f32 %v1197_v30, %v1383_v21  ;;  %v1198_v14 = vmax.f32 %v9979_v26, %v1138_v18  ;;  %v6420_v15 = vpop.f32.mrb[63].mxu0  ;;  %v6474_v27 = vpop.f32.mrb[63].mxu1  ;;  %v9981_v21 = vmax.f32 %v8402_v24, %v8404_v28  ;;  %v7347_v26 = vld [vmem:[%s7933_s27 + $0xa8] sm:$0xff]  }
 0x204   : > { %1599 = vst.msk [vmem:[%s8555_s14 + $0x1c] sm:$0xf] %vm1591_vm4, %v5950_v20  ;;  %v1472_v54 = vadd.f32 %v8539_v61, %v1445_v25  ;;  %v1446_v55 = vmax.f32 %v1198_v14, %v1386_v19  ;;  %6654 = vmatmul.mubr.msk.bf16.gmra.mrb[168].mxu0 %vm553_vm3, %v7342_v38  ;;  %6708 = vmatmul.mubr.msk.bf16.gmra.mrb[168].mxu1 %vm553_vm3, %v7343_v13  ;;  %v7346_v25 = vld [vmem:[%s7925_s1 + $0xa8] sm:$0xff]  }
 0x205   : > { %6657 = vmatprep.mubr.msk.bf16.mxu0 %vm7647_vm0, %v9949_v0  ;;  %6711 = vmatprep.mubr.msk.bf16.mxu1 %vm7647_vm0, %v9949_v0  ;;  %v9982_v13 = vmax.f32 %v8414_v35, %v8416_v36 }
 0x206   : > { %v1493_v2 = vmax.f32 %v1472_v54, 0.0  ;;  %v1473_v3 = vadd.f32 %v8539_v61, %v1446_v55  ;;  %v9983_v55 = vmax.f32 %v8422_v48, %v8424_v52 }
 0x207   : > { %v1143_v32 = vpop.f32.mrb[64].mxu0  ;;  %v1391_v39 = vpop.f32.mrb[64].mxu1 }
 0x208   : > { %v5951_v17 = vpack.c.bf16 %v1493_v2, %v1493_v2  ;;  %v1494_v40 = vmax.f32 %v1473_v3, 0.0  ;;  %v1199_v4 = vmax.f32 %v9980_v29, %v1143_v32  ;;  %v6423_v57 = vpop.f32.mrb[65].mxu0  ;;  %v6477_v51 = vpop.f32.mrb[65].mxu1 }
 0x209   : > { %v1146_v43 = vpop.f32.mrb[66].mxu0  ;;  %v1394_v49 = vpop.f32.mrb[66].mxu1  ;;  %v7348_v51 = vld [vmem:[%s7925_s1 + $0xb0] sm:$0xff]  }
 0x20a   : > { %1600 = vst.msk [vmem:[%s8555_s14 + $0x20] sm:$0xf] %vm1591_vm4, %v5951_v17  ;;  %v5952_v50 = vpack.c.bf16 %v1494_v40, %v1494_v40  ;;  %v1447_v45 = vmax.f32 %v1199_v4, %v1391_v39  ;;  %v1200_v5 = vmax.f32 %v9981_v21, %v1146_v43  ;;  %v6424_v6 = vpop.f32.mrb[67].mxu0  ;;  %v6478_v7 = vpop.f32.mrb[67].mxu1  ;;  %v9985_v21 = vmax.f32 %v8446_v23, %v8448_v33 }
 0x20c   : > { %1601 = vst.msk [vmem:[%s8555_s14 + $0x24] sm:$0xf] %vm1591_vm4, %v5952_v50  ;;  %v1474_v11 = vadd.f32 %v8539_v61, %v1447_v45  ;;  %v1448_v12 = vmax.f32 %v1200_v5, %v1394_v49  ;;  %6658 = vmatmul.mubr.msk.bf16.gmra.mrb[172].mxu0 %vm553_vm3, %v7344_v44  ;;  %6712 = vmatmul.mubr.msk.bf16.gmra.mrb[172].mxu1 %vm553_vm3, %v7345_v42  ;;  %v7349_v42 = vld [vmem:[%s7933_s27 + $0xb0] sm:$0xff]  }
 0x20d   : > { %6725 = vmatprep.mubr.msk.bf16.mxu0 %vm7647_vm0, %v9949_v0  ;;  %6779 = vmatprep.mubr.msk.bf16.mxu1 %vm7647_vm0, %v9949_v0 }
 0x20e   : > { %v1495_v24 = vmax.f32 %v1474_v11, 0.0  ;;  %v1475_v28 = vadd.f32 %v8539_v61, %v1448_v12 }
 0x20f   : > { %v1151_v30 = vpop.f32.mrb[68].mxu0  ;;  %v1399_v31 = vpop.f32.mrb[68].mxu1 }
 0x210   : > { %v5953_v37 = vpack.c.bf16 %v1495_v24, %v1495_v24  ;;  %v1496_v38 = vmax.f32 %v1475_v28, 0.0  ;;  %v1201_v18 = vmax.f32 %v9982_v13, %v1151_v30  ;;  %v6427_v19 = vpop.f32.mrb[69].mxu0  ;;  %v6481_v20 = vpop.f32.mrb[69].mxu1  ;;  %v9986_v28 = vmax.f32 %v8464_v46, %v8466_v47  ;;  %v7351_v13 = vld [vmem:[%s7933_s27 + $0xb8] sm:$0xff]  }
 0x211   : > { %v1154_v14 = vpop.f32.mrb[70].mxu0  ;;  %v1402_v15 = vpop.f32.mrb[70].mxu1 }
 0x212   : > { %1602 = vst.msk [vmem:[%s8555_s14 + $0x28] sm:$0xf] %vm1591_vm4, %v5953_v37  ;;  %v5954_v27 = vpack.c.bf16 %v1496_v38, %v1496_v38  ;;  %v1449_v54 = vmax.f32 %v1201_v18, %v1399_v31  ;;  %v1202_v2 = vmax.f32 %v9983_v55, %v1154_v14  ;;  %v6428_v3 = vpop.f32.mrb[71].mxu0  ;;  %v6482_v32 = vpop.f32.mrb[71].mxu1  ;;  %v7350_v38 = vld [vmem:[%s7925_s1 + $0xb8] sm:$0xff]  }
 0x214   : > { %1603 = vst.msk [vmem:[%s8555_s14 + $0x2c] sm:$0xf] %vm1591_vm4, %v5954_v27  ;;  %v1476_v35 = vadd.f32 %v8539_v61, %v1449_v54  ;;  %v1450_v36 = vmax.f32 %v1202_v2, %v1402_v15  ;;  %6726 = vmatmul.mubr.msk.bf16.vlgmr.msra.gmra.mrb[176].mxu0 %vm553_vm3, %v7346_v25  ;;  %6780 = vmatmul.mubr.msk.bf16.vlgmr.msra.gmra.mrb[176].mxu1 %vm553_vm3, %v7347_v26 }
 0x215   : > { %6824 = vmatpush3.bf16.msra.mxu0 %v8221_v56  ;;  %6878 = vmatpush3.bf16.msra.mxu1 %v8221_v56  ;;  %v9984_v56 = vmax.f32 %v8436_v62, %v8438_v1  ;;  %v9987_v25 = vmax.f32 %v8474_v22, %v8476_v41  ;;  %v9988_v2 = vmax.f32 %v8492_v8, %v8494_v34 }
 0x216   : > { %v1497_v39 = vmax.f32 %v1476_v35, 0.0  ;;  %v1477_v48 = vadd.f32 %v8539_v61, %v1450_v36  ;;  %6729 = vmatprep.mubr.msk.bf16.mxu0 %vm7647_vm0, %v9949_v0  ;;  %6783 = vmatprep.mubr.msk.bf16.mxu1 %vm7647_vm0, %v9949_v0  ;;  %v7352_v36 = vld [vmem:[%s7925_s1 + $0xc0] sm:$0xff]  }
 0x217   : > { %v1159_v52 = vpop.f32.mrb[72].mxu0  ;;  %v1407_v44 = vpop.f32.mrb[72].mxu1  ;;  %6825 = vmatprep.subr.bf16.mxu0 %v9949_v0  ;;  %6879 = vmatprep.subr.bf16.mxu1 %v9949_v0 }
 0x218   : > { %v5955_v17 = vpack.c.bf16 %v1497_v39, %v1497_v39  ;;  %v1498_v40 = vmax.f32 %v1477_v48, 0.0  ;;  %v1203_v29 = vmax.f32 %v9984_v56, %v1159_v52  ;;  %v6431_v4 = vpop.f32.mrb[73].mxu0  ;;  %v6485_v57 = vpop.f32.mrb[73].mxu1  ;;  %v7353_v39 = vld [vmem:[%s7933_s27 + $0xc0] sm:$0xff]  }
 0x219   : > { %v1162_v43 = vpop.f32.mrb[74].mxu0  ;;  %v1410_v49 = vpop.f32.mrb[74].mxu1  ;;  %6826 = vmatpush3.bf16.msra.mxu0 %v8236_v59  ;;  %6880 = vmatpush3.bf16.msra.mxu1 %v8236_v59 }
 0x21a   : > { %1604 = vst.msk [vmem:[%s8555_s14 + $0x30] sm:$0xf] %vm1591_vm4, %v5955_v17  ;;  %v5956_v50 = vpack.c.bf16 %v1498_v40, %v1498_v40  ;;  %v1451_v45 = vmax.f32 %v1203_v29, %v1407_v44  ;;  %v1204_v62 = vmax.f32 %v9985_v21, %v1162_v43  ;;  %v6432_v1 = vpop.f32.mrb[75].mxu0  ;;  %v6486_v5 = vpop.f32.mrb[75].mxu1  ;;  %6827 = vmatprep.subr.bf16.mxu0 %v9949_v0 }
 0x21b   : > { %6881 = vmatprep.subr.bf16.mxu1 %v9949_v0  ;;  %v9989_v40 = vmax.f32 %v8502_v58, %v8504_v53  ;;  %v7355_v1 = vld [vmem:[%s7933_s27 + $0xc8] sm:$0xff]  }
 0x21c   : > { %1605 = vst.msk [vmem:[%s8555_s14 + $0x34] sm:$0xf] %vm1591_vm4, %v5956_v50  ;;  %v1478_v6 = vadd.f32 %v8539_v61, %v1451_v45  ;;  %v1452_v7 = vmax.f32 %v1204_v62, %v1410_v49  ;;  %6730 = vmatmul.mubr.msk.bf16.gmra.mrb[180].mxu0 %vm553_vm3, %v7348_v51  ;;  %6784 = vmatmul.mubr.msk.bf16.gmra.mrb[180].mxu1 %vm553_vm3, %v7349_v42  ;;  %v7354_v62 = vld [vmem:[%s7925_s1 + $0xc8] sm:$0xff]  }
 0x21d   : > { %6733 = vmatprep.mubr.msk.bf16.mxu0 %vm7647_vm0, %v9949_v0  ;;  %6787 = vmatprep.mubr.msk.bf16.mxu1 %vm7647_vm0, %v9949_v0  ;;  %v9990_v49 = vmax.f32 %v8516_v10, %v8518_v16 }
 0x21e   : > { %v1499_v59 = vmax.f32 %v1478_v6, 0.0  ;;  %v1479_v23 = vadd.f32 %v8539_v61, %v1452_v7  ;;  %6828 = vmatpush3.bf16.msra.mxu0 %v8251_v60  ;;  %6882 = vmatpush3.bf16.msra.mxu1 %v8251_v60 }
 0x21f   : > { %v1167_v33 = vpop.f32.mrb[76].mxu0  ;;  %v1415_v11 = vpop.f32.mrb[76].mxu1  ;;  %6829 = vmatprep.subr.bf16.mxu0 %v9949_v0  ;;  %6883 = vmatprep.subr.bf16.mxu1 %v9949_v0 }
 0x220   : > { %v5957_v12 = vpack.c.bf16 %v1499_v59, %v1499_v59  ;;  %v1500_v24 = vmax.f32 %v1479_v23, 0.0  ;;  %v1205_v30 = vmax.f32 %v9986_v28, %v1167_v33  ;;  %v6435_v31 = vpop.f32.mrb[77].mxu0  ;;  %v6489_v37 = vpop.f32.mrb[77].mxu1 }
 0x221   : > { %v1170_v18 = vpop.f32.mrb[78].mxu0  ;;  %v1418_v19 = vpop.f32.mrb[78].mxu1  ;;  %v7356_v31 = vld [vmem:[%s7925_s1 + $0xd0] sm:$0xff]  }
 0x222   : > { %1606 = vst.msk [vmem:[%s8555_s14 + $0x38] sm:$0xf] %vm1591_vm4, %v5957_v12  ;;  %v5958_v60 = vpack.c.bf16 %v1500_v24, %v1500_v24  ;;  %v1453_v20 = vmax.f32 %v1205_v30, %v1415_v11  ;;  %v1206_v26 = vmax.f32 %v9987_v25, %v1170_v18  ;;  %v6436_v14 = vpop.f32.mrb[79].mxu0  ;;  %v6490_v15 = vpop.f32.mrb[79].mxu1  ;;  %6830 = vmatpush3.bf16.msra.mxu0 %v8262_v63  ;;  %v7357_v37 = vld [vmem:[%s7933_s27 + $0xd0] sm:$0xff]  }
 0x223   : > { %6884 = vmatpush3.bf16.msra.mxu1 %v8262_v63  ;;  %6831 = vmatprep.subr.bf16.mxu0 %v9949_v0 }
 0x224   : > { %6885 = vmatprep.subr.bf16.mxu1 %v9949_v0  ;;  %1607 = vst.msk [vmem:[%s8555_s14 + $0x3c] sm:$0xf] %vm1591_vm4, %v5958_v60  ;;  %v1480_v46 = vadd.f32 %v8539_v61, %v1453_v20  ;;  %v1454_v47 = vmax.f32 %v1206_v26, %v1418_v19  ;;  %6734 = vmatmul.mubr.msk.bf16.gmra.mrb[184].mxu0 %vm553_vm3, %v7350_v38 }
 0x225   : > { %6788 = vmatmul.mubr.msk.bf16.gmra.mrb[184].mxu1 %vm553_vm3, %v7351_v13  ;;  %6737 = vmatprep.mubr.msk.bf16.mxu0 %vm7647_vm0, %v9949_v0 }
 0x226   : > { %6791 = vmatprep.mubr.msk.bf16.mxu1 %vm7647_vm0, %v9949_v0  ;;  %v1501_v63 = vmax.f32 %v1480_v46, 0.0  ;;  %v1481_v22 = vadd.f32 %v8539_v61, %v1454_v47  ;;  %6832 = vmatpush3.bf16.msra.mxu0 %v7990_v9  ;;  %v7358_v46 = vld [vmem:[%s7925_s1 + $0xd8] sm:$0xff]  }
 0x227   : > { %6886 = vmatpush3.bf16.msra.mxu1 %v7990_v9  ;;  %v1175_v41 = vpop.f32.mrb[80].mxu0  ;;  %v1423_v27 = vpop.f32.mrb[80].mxu1  ;;  %6931 = vmatprep.subr.bf16.mxu0 %v9949_v0  ;;  %v7359_v47 = vld [vmem:[%s7933_s27 + $0xd8] sm:$0xff]  }
 0x228   : > { %6985 = vmatprep.subr.bf16.mxu1 %v9949_v0  ;;  %v5959_v54 = vpack.c.bf16 %v1501_v63, %v1501_v63  ;;  %v1502_v55 = vmax.f32 %v1481_v22, 0.0  ;;  %v1207_v3 = vmax.f32 %v9988_v2, %v1175_v41  ;;  %v6439_v32 = vpop.f32.mrb[81].mxu0  ;;  %v6493_v35 = vpop.f32.mrb[81].mxu1 }
 0x229   : > { %v1178_v48 = vpop.f32.mrb[82].mxu0  ;;  %v1426_v52 = vpop.f32.mrb[82].mxu1 }
 0x22a   : > { %1608 = vst.msk [vmem:[%s8555_s14 + $0x40] sm:$0xf] %vm1591_vm4, %v5959_v54  ;;  %v5960_v44 = vpack.c.bf16 %v1502_v55, %v1502_v55  ;;  %v1455_v17 = vmax.f32 %v1207_v3, %v1423_v27  ;;  %v1208_v56 = vmax.f32 %v9989_v40, %v1178_v48  ;;  %v6440_v29 = vpop.f32.mrb[83].mxu0  ;;  %v6494_v4 = vpop.f32.mrb[83].mxu1  ;;  %v7361_v48 = vld [vmem:[%s7933_s27 + $0xe0] sm:$0xff]  }
 0x22c   : > { %1609 = vst.msk [vmem:[%s8555_s14 + $0x44] sm:$0xf] %vm1591_vm4, %v5960_v44  ;;  %v1482_v8 = vadd.f32 %v8539_v61, %v1455_v17  ;;  %v1456_v34 = vmax.f32 %v1208_v56, %v1426_v52  ;;  %6738 = vmatmul.mubr.msk.bf16.gmra.mrb[188].mxu0 %vm553_vm3, %v7352_v36 }
 0x22d   : > { %6792 = vmatmul.mubr.msk.bf16.gmra.mrb[188].mxu1 %vm553_vm3, %v7353_v39  ;;  %6741 = vmatprep.mubr.msk.bf16.mxu0 %vm7647_vm0, %v9949_v0  ;;  %v7360_v39 = vld [vmem:[%s7925_s1 + $0xe0] sm:$0xff]  }
 0x22e   : > { %6795 = vmatprep.mubr.msk.bf16.mxu1 %vm7647_vm0, %v9949_v0  ;;  %v1503_v53 = vmax.f32 %v1482_v8, 0.0  ;;  %v1483_v58 = vadd.f32 %v8539_v61, %v1456_v34 }
 0x22f   : > { %v1183_v57 = vpop.f32.mrb[84].mxu0  ;;  %v1431_v51 = vpop.f32.mrb[84].mxu1 }
 0x230   : > { %v5961_v42 = vpack.c.bf16 %v1503_v53, %v1503_v53  ;;  %v1504_v43 = vmax.f32 %v1483_v58, 0.0  ;;  %v1209_v50 = vmax.f32 %v9990_v49, %v1183_v57  ;;  %v6443_v45 = vpop.f32.mrb[85].mxu0  ;;  %v6497_v21 = vpop.f32.mrb[85].mxu1  ;;  %v7362_v58 = vld [vmem:[%s7925_s1 + $0xe8] sm:$0xff]  }
 0x231   : > { %v1186_v5 = vpop.f32.mrb[86].mxu0  ;;  %v1434_v6 = vpop.f32.mrb[86].mxu1  ;;  %v7363_v57 = vld [vmem:[%s7933_s27 + $0xe8] sm:$0xff]  }
 0x232   : > { %1610 = vst.msk [vmem:[%s8555_s14 + $0x48] sm:$0xf] %vm1591_vm4, %v5961_v42  ;;  %v5962_v7 = vpack.c.bf16 %v1504_v43, %v1504_v43  ;;  %v1457_v59 = vmax.f32 %v1209_v50, %v1431_v51  ;;  %v6444_v23 = vpop.f32.mrb[87].mxu0  ;;  %v6498_v33 = vpop.f32.mrb[87].mxu1  ;;  %v7364_v6 = vld [vmem:[%s7925_s1 + $0xf0] sm:$0xff]  }
 0x234   : > { %1611 = vst.msk [vmem:[%s8555_s14 + $0x4c] sm:$0xf] %vm1591_vm4, %v5962_v7  ;;  %v1484_v11 = vadd.f32 %v8539_v61, %v1457_v59  ;;  %6742 = vmatmul.mubr.msk.bf16.gmra.mrb[192].mxu0 %vm553_vm3, %v7354_v62  ;;  %v7365_v7 = vld [vmem:[%s7933_s27 + $0xf0] sm:$0xff]  }
 0x235   : > { %6796 = vmatmul.mubr.msk.bf16.gmra.mrb[192].mxu1 %vm553_vm3, %v7355_v1  ;;  %6745 = vmatprep.mubr.msk.bf16.mxu0 %vm7647_vm0, %v9949_v0 }
 0x236   : > { %6799 = vmatprep.mubr.msk.bf16.mxu1 %vm7647_vm0, %v9949_v0  ;;  %v1505_v10 = vmax.f32 %v1484_v11, 0.0 }
 0x237   : > { %v8773_v16 = vpop.f32.mrb[88].mxu0  ;;  %v8775_v12 = vpop.f32.mrb[88].mxu1 }
 0x238   : > { %v5963_v24 = vpack.c.bf16 %v1505_v10, %v1505_v10  ;;  %v6511_v28 = vpop.f32.mrb[89].mxu0  ;;  %v6565_v30 = vpop.f32.mrb[89].mxu1  ;;  %v2070_v38 = vmax.f32 %v8773_v16, %v8775_v12  ;;  %v9992_v16 = vmov 0.0  }
 0x239   : > { %v8781_v13 = vpop.f32.mrb[90].mxu0  ;;  %v8783_v18 = vpop.f32.mrb[90].mxu1  ;;  %v7366_v30 = vld [vmem:[%s7925_s1 + $0xf8] ss:$0 sps:$4 sm:$0x33]  }
 0x23a   : > { %1613 = vst.msk [vmem:[%s8555_s14 + $0x50] sm:$0x3] %vm1612_vm5, %v5963_v24  ;;  %v6512_v19 = vpop.f32.mrb[91].mxu0  ;;  %v6566_v60 = vpop.f32.mrb[91].mxu1  ;;  %v2071_v20 = vmax.f32 %v8781_v13, %v8783_v18 }
 0x23b   : > { %v7367_v60 = vld [vmem:[%s7933_s27 + $0xf8] ss:$0 sps:$4 sm:$0x33]  }
 0x23c   : > { %6746 = vmatmul.mubr.msk.bf16.gmra.mrb[196].mxu0 %vm553_vm3, %v7356_v31 }
 0x23d   : > { %6800 = vmatmul.mubr.msk.bf16.gmra.mrb[196].mxu1 %vm553_vm3, %v7357_v37  ;;  %6749 = vmatprep.mubr.msk.bf16.mxu0 %vm7647_vm0, %v9949_v0 }
 0x23e   : > { %6803 = vmatprep.mubr.msk.bf16.mxu1 %vm7647_vm0, %v9949_v0 }
 0x23f   : > { %v8795_v25 = vpop.f32.mrb[92].mxu0  ;;  %v8797_v26 = vpop.f32.mrb[92].mxu1 }
 0x240   : > { %v6515_v14 = vpop.f32.mrb[93].mxu0  ;;  %v6569_v15 = vpop.f32.mrb[93].mxu1 }
 0x241   : > { %v8803_v22 = vpop.f32.mrb[94].mxu0  ;;  %v8805_v41 = vpop.f32.mrb[94].mxu1 }
 0x242   : > { %v6516_v27 = vpop.f32.mrb[95].mxu0  ;;  %v6570_v54 = vpop.f32.mrb[95].mxu1 }
 0x244   : > { %6750 = vmatmul.mubr.msk.bf16.gmra.mrb[200].mxu0 %vm553_vm3, %v7358_v46 }
 0x245   : > { %6804 = vmatmul.mubr.msk.bf16.gmra.mrb[200].mxu1 %vm553_vm3, %v7359_v47  ;;  %6753 = vmatprep.mubr.msk.bf16.mxu0 %vm7647_vm0, %v9949_v0 }
 0x246   : > { %6807 = vmatprep.mubr.msk.bf16.mxu1 %vm7647_vm0, %v9949_v0 }
 0x247   : > { %v8815_v2 = vpop.f32.mrb[96].mxu0  ;;  %v8817_v3 = vpop.f32.mrb[96].mxu1 }
 0x248   : > { %v6519_v35 = vpop.f32.mrb[97].mxu0  ;;  %v6573_v36 = vpop.f32.mrb[97].mxu1 }
 0x249   : > { %v8823_v52 = vpop.f32.mrb[98].mxu0  ;;  %v8825_v44 = vpop.f32.mrb[98].mxu1 }
 0x24a   : > { %v6520_v40 = vpop.f32.mrb[99].mxu0  ;;  %v6574_v56 = vpop.f32.mrb[99].mxu1 }
 0x24b   : > { %v7368_v40 = vld [vmem:[%s7939_s11 + $0xa8] sm:$0xff]  }
 0x24c   : > { %6754 = vmatmul.mubr.msk.bf16.gmra.mrb[204].mxu0 %vm553_vm3, %v7360_v39  ;;  %v7369_v56 = vld [vmem:[%s7941_s12 + $0xa8] sm:$0xff]  }
 0x24d   : > { %6808 = vmatmul.mubr.msk.bf16.gmra.mrb[204].mxu1 %vm553_vm3, %v7361_v48  ;;  %6757 = vmatprep.mubr.msk.bf16.mxu0 %vm7647_vm0, %v9949_v0 }
 0x24e   : > { %6811 = vmatprep.mubr.msk.bf16.mxu1 %vm7647_vm0, %v9949_v0 }
 0x24f   : > { %v8835_v29 = vpop.f32.mrb[100].mxu0  ;;  %v8837_v4 = vpop.f32.mrb[100].mxu1 }
 0x250   : > { %v6523_v34 = vpop.f32.mrb[101].mxu0  ;;  %v6577_v53 = vpop.f32.mrb[101].mxu1 }
 0x251   : > { %v8843_v51 = vpop.f32.mrb[102].mxu0  ;;  %v8845_v42 = vpop.f32.mrb[102].mxu1 }
 0x252   : > { %v6524_v49 = vpop.f32.mrb[103].mxu0  ;;  %v6578_v50 = vpop.f32.mrb[103].mxu1 }
 0x253   : > { %v8914_v50 = vld [vmem:[%s9935_s4] sm:$0xff]  }
 0x254   : > { %6758 = vmatmul.mubr.msk.bf16.gmra.mrb[208].mxu0 %vm553_vm3, %v7362_v58  ;;  %v8979_v58 = vld [vmem:[%s9935_s4 + $0x18] sm:$0xff]  }
 0x255   : > { %6812 = vmatmul.mubr.msk.bf16.gmra.mrb[208].mxu1 %vm553_vm3, %v7363_v57  ;;  %6761 = vmatprep.mubr.msk.bf16.mxu0 %vm7647_vm0, %v9949_v0 }
 0x256   : > { %6815 = vmatprep.mubr.msk.bf16.mxu1 %vm7647_vm0, %v9949_v0 }
 0x257   : > { %v8855_v45 = vpop.f32.mrb[104].mxu0  ;;  %v8857_v21 = vpop.f32.mrb[104].mxu1 }
 0x258   : > { %v6527_v1 = vpop.f32.mrb[105].mxu0  ;;  %v6581_v5 = vpop.f32.mrb[105].mxu1 }
 0x259   : > { %v8863_v59 = vpop.f32.mrb[106].mxu0  ;;  %v8865_v23 = vpop.f32.mrb[106].mxu1 }
 0x25a   : > { %v6528_v11 = vpop.f32.mrb[107].mxu0  ;;  %v6582_v10 = vpop.f32.mrb[107].mxu1 }
 0x25b   : > { %v7370_v10 = vld [vmem:[%s7939_s11 + $0xb0] sm:$0xff]  }
 0x25c   : > { %6762 = vmatmul.mubr.msk.bf16.gmra.mrb[212].mxu0 %vm553_vm3, %v7364_v6 }
 0x25d   : > { %6816 = vmatmul.mubr.msk.bf16.gmra.mrb[212].mxu1 %vm553_vm3, %v7365_v7  ;;  %6765 = vmatprep.mubr.msk.bf16.mxu0 %vm7647_vm0, %v9949_v0 }
 0x25e   : > { %6819 = vmatprep.mubr.msk.bf16.mxu1 %vm7647_vm0, %v9949_v0 }
 0x25f   : > { %v8875_v24 = vpop.f32.mrb[108].mxu0  ;;  %v8877_v28 = vpop.f32.mrb[108].mxu1 }
 0x260   : > { %v6531_v37 = vpop.f32.mrb[109].mxu0  ;;  %v6585_v19 = vpop.f32.mrb[109].mxu1 }
 0x261   : > { %v8883_v14 = vpop.f32.mrb[110].mxu0  ;;  %v8885_v15 = vpop.f32.mrb[110].mxu1 }
 0x262   : > { %v6532_v47 = vpop.f32.mrb[111].mxu0  ;;  %v6586_v27 = vpop.f32.mrb[111].mxu1 }
 0x264   : > { %6766 = vmatmul.mubr.msk.bf16.gmra.mrb[216].mxu0 %vm553_vm3, %v7366_v30  ;;  %v7371_v30 = vld [vmem:[%s7941_s12 + $0xb0] sm:$0xff]  }
 0x265   : > { %6820 = vmatmul.mubr.msk.bf16.gmra.mrb[216].mxu1 %vm553_vm3, %v7367_v60  ;;  %6833 = vmatprep.mubr.msk.bf16.mxu0 %vm7647_vm0, %v9949_v0  ;;  %v8939_v60 = vld [vmem:[%s9935_s4 + $0x8] sm:$0xff]  }
 0x266   : > { %6887 = vmatprep.mubr.msk.bf16.mxu1 %vm7647_vm0, %v9949_v0 }
 0x267   : > { %v8895_v54 = vpop.f32.mrb[112].mxu0  ;;  %v8897_v35 = vpop.f32.mrb[112].mxu1 }
 0x268   : > { %v6535_v39 = vpop.f32.mrb[113].mxu0  ;;  %v6589_v48 = vpop.f32.mrb[113].mxu1 }
 0x269   : > { %v8903_v34 = vpop.f32.mrb[114].mxu0  ;;  %v8905_v53 = vpop.f32.mrb[114].mxu1  ;;  %v8956_v48 = vld [vmem:[%s9935_s4 + $0x10] sm:$0xff]  }
 0x26a   : > { %v6536_v57 = vpop.f32.mrb[115].mxu0  ;;  %v6590_v49 = vpop.f32.mrb[115].mxu1 }
 0x26c   : > { %6834 = vmatmul.mubr.msk.bf16.vlgmr.msra.gmra.mrb[220].mxu0 %vm553_vm3, %v7368_v40 }
 0x26d   : > { %6888 = vmatmul.mubr.msk.bf16.vlgmr.msra.gmra.mrb[220].mxu1 %vm553_vm3, %v7369_v56  ;;  %6932 = vmatpush3.bf16.msra.mxu0 %v8914_v50 }
 0x26e   : > { %6986 = vmatpush3.bf16.msra.mxu1 %v8914_v50  ;;  %6837 = vmatprep.mubr.msk.bf16.mxu0 %vm7647_vm0, %v9949_v0 }
 0x26f   : > { %6891 = vmatprep.mubr.msk.bf16.mxu1 %vm7647_vm0, %v9949_v0  ;;  %v8922_v1 = vpop.f32.mrb[116].mxu0  ;;  %v8924_v5 = vpop.f32.mrb[116].mxu1  ;;  %6933 = vmatprep.subr.bf16.mxu0 %v9949_v0 }
 0x270   : > { %6987 = vmatprep.subr.bf16.mxu1 %v9949_v0  ;;  %v6539_v7 = vpop.f32.mrb[117].mxu0  ;;  %v6593_v11 = vpop.f32.mrb[117].mxu1 }
 0x271   : > { %v8932_v37 = vpop.f32.mrb[118].mxu0  ;;  %v8934_v19 = vpop.f32.mrb[118].mxu1  ;;  %6934 = vmatpush3.bf16.msra.mxu0 %v8939_v60  ;;  %v7372_v11 = vld [vmem:[%s7939_s11 + $0xb8] sm:$0xff]  }
 0x272   : > { %6988 = vmatpush3.bf16.msra.mxu1 %v8939_v60  ;;  %v6540_v27 = vpop.f32.mrb[119].mxu0  ;;  %v6594_v39 = vpop.f32.mrb[119].mxu1  ;;  %6935 = vmatprep.subr.bf16.mxu0 %v9949_v0 }
 0x273   : > { %6989 = vmatprep.subr.bf16.mxu1 %v9949_v0  ;;  %v7375_v39 = vld [vmem:[%s7941_s12 + $0xc0] sm:$0xff]  }
 0x274   : > { %6838 = vmatmul.mubr.msk.bf16.gmra.mrb[224].mxu0 %vm553_vm3, %v7370_v10  ;;  %v7373_v10 = vld [vmem:[%s7941_s12 + $0xb8] sm:$0xff]  }
 0x275   : > { %6892 = vmatmul.mubr.msk.bf16.gmra.mrb[224].mxu1 %vm553_vm3, %v7371_v30  ;;  %6841 = vmatprep.mubr.msk.bf16.mxu0 %vm7647_vm0, %v9949_v0 }
 0x276   : > { %6895 = vmatprep.mubr.msk.bf16.mxu1 %vm7647_vm0, %v9949_v0  ;;  %6936 = vmatpush3.bf16.msra.mxu0 %v8956_v48 }
 0x277   : > { %6990 = vmatpush3.bf16.msra.mxu1 %v8956_v48  ;;  %v8960_v40 = vpop.f32.mrb[120].mxu0  ;;  %v8962_v56 = vpop.f32.mrb[120].mxu1  ;;  %6937 = vmatprep.subr.bf16.mxu0 %v9949_v0 }
 0x278   : > { %6991 = vmatprep.subr.bf16.mxu1 %v9949_v0  ;;  %v6543_v49 = vpop.f32.mrb[121].mxu0  ;;  %v6597_v7 = vpop.f32.mrb[121].mxu1 }
 0x279   : > { %v8970_v30 = vpop.f32.mrb[122].mxu0  ;;  %v8972_v27 = vpop.f32.mrb[122].mxu1 }
 0x27a   : > { %v6544_v47 = vpop.f32.mrb[123].mxu0  ;;  %v6598_v6 = vpop.f32.mrb[123].mxu1  ;;  %6938 = vmatpush3.bf16.msra.mxu0 %v8979_v58 }
 0x27b   : > { %6992 = vmatpush3.bf16.msra.mxu1 %v8979_v58  ;;  %6939 = vmatprep.subr.bf16.mxu0 %v9949_v0 }
 0x27c   : > { %6993 = vmatprep.subr.bf16.mxu1 %v9949_v0  ;;  %6842 = vmatmul.mubr.msk.bf16.gmra.mrb[228].mxu0 %vm553_vm3, %v7372_v11 }
 0x27d   : > { %6896 = vmatmul.mubr.msk.bf16.gmra.mrb[228].mxu1 %vm553_vm3, %v7373_v10  ;;  %6845 = vmatprep.mubr.msk.bf16.mxu0 %vm7647_vm0, %v9949_v0  ;;  %v7374_v10 = vld [vmem:[%s7939_s11 + $0xc0] sm:$0xff]  }
 0x27e   : > { %6899 = vmatprep.mubr.msk.bf16.mxu1 %vm7647_vm0, %v9949_v0  ;;  %6940 = vmatpush3.bf16.msra.mxu0 %v7990_v9 }
 0x27f   : > { %6994 = vmatpush3.bf16.msra.mxu1 %v7990_v9  ;;  %v8993_v6 = vpop.f32.mrb[124].mxu0  ;;  %v8995_v47 = vpop.f32.mrb[124].mxu1  ;;  %7039 = vmatprep.subr.bf16.mxu0 %v9949_v0 }
 0x280   : > { %7093 = vmatprep.subr.bf16.mxu1 %v9949_v0  ;;  %v6547_v7 = vpop.f32.mrb[125].mxu0  ;;  %v6601_v11 = vpop.f32.mrb[125].mxu1 }
 0x281   : > { %v9003_v57 = vpop.f32.mrb[126].mxu0  ;;  %v9005_v36 = vpop.f32.mrb[126].mxu1 }
 0x282   : > { %v6548_v31 = vpop.f32.mrb[127].mxu0  ;;  %v6602_v33 = vpop.f32.mrb[127].mxu1 }
 0x283   : > { %v7376_v33 = vld [vmem:[%s7939_s11 + $0xc8] sm:$0xff]  }
 0x284   : > { %6846 = vmatmul.mubr.msk.bf16.gmra.mrb[232].mxu0 %vm553_vm3, %v7374_v10  ;;  %v7377_v10 = vld [vmem:[%s7941_s12 + $0xc8] sm:$0xff]  }
 0x285   : > { %6900 = vmatmul.mubr.msk.bf16.gmra.mrb[232].mxu1 %vm553_vm3, %v7375_v39  ;;  %6849 = vmatprep.mubr.msk.bf16.mxu0 %vm7647_vm0, %v9949_v0 }
 0x286   : > { %6903 = vmatprep.mubr.msk.bf16.mxu1 %vm7647_vm0, %v9949_v0 }
 0x287   : > { %v9015_v7 = vpop.f32.mrb[128].mxu0  ;;  %v9017_v11 = vpop.f32.mrb[128].mxu1 }
 0x288   : > { %9991 = vst [vmem:[#allocation18_spill] sm:$0xff] %v9017_v11  ;;  %v6551_v46 = vpop.f32.mrb[129].mxu0  ;;  %v6605_v31 = vpop.f32.mrb[129].mxu1 }
 0x289   : > { %v1839_v39 = vpop.f32.mrb[130].mxu0  ;;  %v2067_v62 = vpop.f32.mrb[130].mxu1 }
 0x28a   : > { %v6552_v43 = vpop.f32.mrb[131].mxu0  ;;  %v6606_v8 = vpop.f32.mrb[131].mxu1 }
 0x28b   : > { %v7378_v43 = vld [vmem:[%s7939_s11 + $0xd0] sm:$0xff]  }
 0x28c   : > { %6850 = vmatmul.mubr.msk.bf16.gmra.mrb[236].mxu0 %vm553_vm3, %v7376_v33  ;;  %v7379_v8 = vld [vmem:[%s7941_s12 + $0xd0] sm:$0xff]  }
 0x28d   : > { %6904 = vmatmul.mubr.msk.bf16.gmra.mrb[236].mxu1 %vm553_vm3, %v7377_v10  ;;  %6853 = vmatprep.mubr.msk.bf16.mxu0 %vm7647_vm0, %v9949_v0 }
 0x28e   : > { %6907 = vmatprep.mubr.msk.bf16.mxu1 %vm7647_vm0, %v9949_v0 }
 0x28f   : > { %v2233_v46 = vpop.f32.mrb[132].mxu0  ;;  %v2482_v31 = vpop.f32.mrb[132].mxu1 }
 0x290   : > { %v2319_v49 = vmax.f32 %v2070_v38, %v2233_v46  ;;  %v6619_v39 = vpop.f32.mrb[133].mxu0  ;;  %v6673_v62 = vpop.f32.mrb[133].mxu1  ;;  %v9047_v38 = vld [vmem:[%s9936_s5] ss:$0 sm:$0xff]  ;;  %v7380_v46 = vld [vmem:[%s7939_s11 + $0xd8] sm:$0xff]  }
 0x291   : > { %v2236_v17 = vpop.f32.mrb[134].mxu0  ;;  %v2485_v33 = vpop.f32.mrb[134].mxu1 }
 0x292   : > { %v2568_v32 = vmax.f32 %v2319_v49, %v2482_v31  ;;  %v2320_v10 = vmax.f32 %v2071_v20, %v2236_v17  ;;  %v6620_v55 = vpop.f32.mrb[135].mxu0  ;;  %v6674_v63 = vpop.f32.mrb[135].mxu1 }
 0x293   : > { %v9993_v55 = vmax.f32 %v8795_v25, %v8797_v26 }
 0x294   : > { %v2589_v0 = vadd.f32 %v8539_v61, %v2568_v32  ;;  %v2569_v11 = vmax.f32 %v2320_v10, %v2485_v33  ;;  %6854 = vmatmul.mubr.msk.bf16.gmra.mrb[240].mxu0 %vm553_vm3, %v7378_v43 }
 0x295   : > { %6908 = vmatmul.mubr.msk.bf16.gmra.mrb[240].mxu1 %vm553_vm3, %v7379_v8  ;;  %6857 = vmatprep.mubr.msk.bf16.mxu0 %vm7647_vm0, %v9992_v16 }
 0x296   : > { %6911 = vmatprep.mubr.msk.bf16.mxu1 %vm7647_vm0, %v9992_v16  ;;  %v2610_v12 = vmax.f32 %v2589_v0, 0.0  ;;  %v2590_v61 = vadd.f32 %v9047_v38, %v2569_v11  ;;  %v7381_v0 = vld [vmem:[%s7941_s12 + $0xd8] sm:$0xff]   ;;  %v9994_v11 = vmax.f32 %v8803_v22, %v8805_v41 }
 0x297   : > { %v2241_v13 = vpop.f32.mrb[136].mxu0  ;;  %v2490_v18 = vpop.f32.mrb[136].mxu1 }
 0x298   : > { %v5964_v20 = vpack.c.bf16 %v2610_v12, %v2610_v12  ;;  %v2611_v63 = vmax.f32 %v2590_v61, 0.0  ;;  %v2321_v32 = vmax.f32 %v9993_v55, %v2241_v13  ;;  %v6623_v17 = vpop.f32.mrb[137].mxu0  ;;  %v6677_v49 = vpop.f32.mrb[137].mxu1 }
 0x299   : > { %v2244_v31 = vpop.f32.mrb[138].mxu0  ;;  %v2493_v39 = vpop.f32.mrb[138].mxu1  ;;  %v7382_v17 = vld [vmem:[%s7939_s11 + $0xe0] sm:$0xff]  }
 0x29a   : > { %5492 = vst.msk [vmem:[%s8555_s14 + $0x54] sm:$0xf] %vm1591_vm4, %v5964_v20  ;;  %v5965_v62 = vpack.c.bf16 %v2611_v63, %v2611_v63  ;;  %v2570_v43 = vmax.f32 %v2321_v32, %v2490_v18  ;;  %v2322_v8 = vmax.f32 %v9994_v11, %v2244_v31  ;;  %v6624_v33 = vpop.f32.mrb[139].mxu0  ;;  %v6678_v10 = vpop.f32.mrb[139].mxu1  ;;  %v9995_v20 = vmax.f32 %v8815_v2, %v8817_v3  ;;  %v7383_v49 = vld [vmem:[%s7941_s12 + $0xe0] sm:$0xff]  }
 0x29c   : > { %5493 = vst.msk [vmem:[%s8555_s14 + $0x58] sm:$0xf] %vm1591_vm4, %v5965_v62  ;;  %v2591_v25 = vadd.f32 %v9047_v38, %v2570_v43  ;;  %v2571_v26 = vmax.f32 %v2322_v8, %v2493_v39  ;;  %6858 = vmatmul.mubr.msk.bf16.gmra.mrb[244].mxu0 %vm553_vm3, %v7380_v46  ;;  %v9996_v62 = vmax.f32 %v8823_v52, %v8825_v44 }
 0x29d   : > { %6912 = vmatmul.mubr.msk.bf16.gmra.mrb[244].mxu1 %vm553_vm3, %v7381_v0  ;;  %6861 = vmatprep.mubr.msk.bf16.mxu0 %vm7647_vm0, %v9992_v16 }
 0x29e   : > { %6915 = vmatprep.mubr.msk.bf16.mxu1 %vm7647_vm0, %v9992_v16  ;;  %v2612_v22 = vmax.f32 %v2591_v25, 0.0  ;;  %v2592_v41 = vadd.f32 %v9047_v38, %v2571_v26 }
 0x29f   : > { %v2249_v12 = vpop.f32.mrb[140].mxu0  ;;  %v2498_v61 = vpop.f32.mrb[140].mxu1 }
 0x2a0   : > { %v5966_v13 = vpack.c.bf16 %v2612_v22, %v2612_v22  ;;  %v2613_v18 = vmax.f32 %v2592_v41, 0.0  ;;  %v2323_v63 = vmax.f32 %v9995_v20, %v2249_v12  ;;  %v6627_v55 = vpop.f32.mrb[141].mxu0  ;;  %v6681_v32 = vpop.f32.mrb[141].mxu1  ;;  %v9997_v22 = vmax.f32 %v8835_v29, %v8837_v4 }
 0x2a1   : > { %v2252_v46 = vpop.f32.mrb[142].mxu0  ;;  %v2501_v0 = vpop.f32.mrb[142].mxu1 }
 0x2a2   : > { %5494 = vst.msk [vmem:[%s8555_s14 + $0x5c] sm:$0xf] %vm1591_vm4, %v5966_v13  ;;  %v5967_v31 = vpack.c.bf16 %v2613_v18, %v2613_v18  ;;  %v2572_v39 = vmax.f32 %v2323_v63, %v2498_v61  ;;  %v2324_v43 = vmax.f32 %v9996_v62, %v2252_v46  ;;  %v6628_v11 = vpop.f32.mrb[143].mxu0  ;;  %v6682_v8 = vpop.f32.mrb[143].mxu1  ;;  %v7384_v13 = vld [vmem:[%s7939_s11 + $0xe8] sm:$0xff]  }
 0x2a3   : > { %v7385_v18 = vld [vmem:[%s7941_s12 + $0xe8] sm:$0xff]   ;;  %v9999_v11 = vmax.f32 %v8855_v45, %v8857_v21 }
 0x2a4   : > { %5495 = vst.msk [vmem:[%s8555_s14 + $0x60] sm:$0xf] %vm1591_vm4, %v5967_v31  ;;  %v2593_v2 = vadd.f32 %v9047_v38, %v2572_v39  ;;  %v2573_v3 = vmax.f32 %v2324_v43, %v2501_v0  ;;  %6862 = vmatmul.mubr.msk.bf16.gmra.mrb[248].mxu0 %vm553_vm3, %v7382_v17  ;;  %v9998_v17 = vmax.f32 %v8843_v51, %v8845_v42 }
 0x2a5   : > { %6916 = vmatmul.mubr.msk.bf16.gmra.mrb[248].mxu1 %vm553_vm3, %v7383_v49  ;;  %6865 = vmatprep.mubr.msk.bf16.mxu0 %vm7647_vm0, %v9992_v16 }
 0x2a6   : > { %6919 = vmatprep.mubr.msk.bf16.mxu1 %vm7647_vm0, %v9992_v16  ;;  %v2614_v52 = vmax.f32 %v2593_v2, 0.0  ;;  %v2594_v44 = vadd.f32 %v9047_v38, %v2573_v3 }
 0x2a7   : > { %v2257_v33 = vpop.f32.mrb[144].mxu0  ;;  %v2506_v10 = vpop.f32.mrb[144].mxu1 }
 0x2a8   : > { %v5968_v25 = vpack.c.bf16 %v2614_v52, %v2614_v52  ;;  %v2615_v26 = vmax.f32 %v2594_v44, 0.0  ;;  %v2325_v41 = vmax.f32 %v9997_v22, %v2257_v33  ;;  %v6631_v12 = vpop.f32.mrb[145].mxu0  ;;  %v6685_v61 = vpop.f32.mrb[145].mxu1  ;;  %v7386_v52 = vld [vmem:[%s7939_s11 + $0xf0] sm:$0xff]   ;;  %v10000_v22 = vmax.f32 %v8863_v59, %v8865_v23 }
 0x2a9   : > { %v2260_v20 = vpop.f32.mrb[146].mxu0  ;;  %v2509_v63 = vpop.f32.mrb[146].mxu1  ;;  %v7387_v44 = vld [vmem:[%s7941_s12 + $0xf0] sm:$0xff]  }
 0x2aa   : > { %5496 = vst.msk [vmem:[%s8555_s14 + $0x64] sm:$0xf] %vm1591_vm4, %v5968_v25  ;;  %v5969_v55 = vpack.c.bf16 %v2615_v26, %v2615_v26  ;;  %v2574_v32 = vmax.f32 %v2325_v41, %v2506_v10  ;;  %v2326_v49 = vmax.f32 %v9998_v17, %v2260_v20  ;;  %v6632_v46 = vpop.f32.mrb[147].mxu0  ;;  %v6686_v0 = vpop.f32.mrb[147].mxu1 }
 0x2ab   : > { %v7388_v20 = vld [vmem:[%s7939_s11 + $0xf8] ss:$0 sps:$4 sm:$0x33]  }
 0x2ac   : > { %5497 = vst.msk [vmem:[%s8555_s14 + $0x68] sm:$0xf] %vm1591_vm4, %v5969_v55  ;;  %v2595_v29 = vadd.f32 %v9047_v38, %v2574_v32  ;;  %v2575_v4 = vmax.f32 %v2326_v49, %v2509_v63  ;;  %6866 = vmatmul.mubr.msk.bf16.gmra.mrb[252].mxu0 %vm553_vm3, %v7384_v13  ;;  %v10001_v32 = vmax.f32 %v8875_v24, %v8877_v28  ;;  %v7389_v0 = vld [vmem:[%s7941_s12 + $0xf8] ss:$0 sps:$4 sm:$0x33]  }
 0x2ad   : > { %6920 = vmatmul.mubr.msk.bf16.gmra.mrb[252].mxu1 %vm553_vm3, %v7385_v18  ;;  %6869 = vmatprep.mubr.msk.bf16.mxu0 %vm7647_vm0, %v9992_v16 }
 0x2ae   : > { %6923 = vmatprep.mubr.msk.bf16.mxu1 %vm7647_vm0, %v9992_v16  ;;  %v2616_v51 = vmax.f32 %v2595_v29, 0.0  ;;  %v2596_v42 = vadd.f32 %v9047_v38, %v2575_v4 }
 0x2af   : > { %v2265_v31 = vpop.f32.mrb[148].mxu0  ;;  %v2514_v39 = vpop.f32.mrb[148].mxu1 }
 0x2b0   : > { %v5970_v62 = vpack.c.bf16 %v2616_v51, %v2616_v51  ;;  %v2617_v43 = vmax.f32 %v2596_v42, 0.0  ;;  %v2327_v8 = vmax.f32 %v9999_v11, %v2265_v31  ;;  %v6635_v2 = vpop.f32.mrb[149].mxu0  ;;  %v6689_v3 = vpop.f32.mrb[149].mxu1  ;;  %v10002_v31 = vmax.f32 %v8883_v14, %v8885_v15 }
 0x2b1   : > { %v2268_v33 = vpop.f32.mrb[150].mxu0  ;;  %v2517_v10 = vpop.f32.mrb[150].mxu1 }
 0x2b2   : > { %5498 = vst.msk [vmem:[%s8555_s14 + $0x6c] sm:$0xf] %vm1591_vm4, %v5970_v62  ;;  %v5971_v25 = vpack.c.bf16 %v2617_v43, %v2617_v43  ;;  %v2576_v26 = vmax.f32 %v2327_v8, %v2514_v39  ;;  %v2328_v41 = vmax.f32 %v10000_v22, %v2268_v33  ;;  %v6636_v12 = vpop.f32.mrb[151].mxu0  ;;  %v6690_v61 = vpop.f32.mrb[151].mxu1 }
 0x2b4   : > { %5499 = vst.msk [vmem:[%s8555_s14 + $0x70] sm:$0xf] %vm1591_vm4, %v5971_v25  ;;  %v2597_v45 = vadd.f32 %v9047_v38, %v2576_v26  ;;  %v2577_v21 = vmax.f32 %v2328_v41, %v2517_v10  ;;  %6870 = vmatmul.mubr.msk.bf16.gmra.mrb[0].mxu0 %vm553_vm3, %v7386_v52  ;;  %v10003_v52 = vmax.f32 %v8895_v54, %v8897_v35  ;;  %v7390_v25 = vld [vmem:[%s7925_s1 + $0xfc] sm:$0xff]  }
 0x2b5   : > { %6924 = vmatmul.mubr.msk.bf16.gmra.mrb[0].mxu1 %vm553_vm3, %v7387_v44  ;;  %6873 = vmatprep.mubr.msk.bf16.mxu0 %vm7647_vm0, %v9992_v16  ;;  %v7391_v26 = vld [vmem:[%s7933_s27 + $0xfc] sm:$0xff]  }
 0x2b6   : > { %6927 = vmatprep.mubr.msk.bf16.mxu1 %vm7647_vm0, %v9992_v16  ;;  %v2618_v59 = vmax.f32 %v2597_v45, 0.0  ;;  %v2598_v23 = vadd.f32 %v9047_v38, %v2577_v21  ;;  %v10004_v45 = vmax.f32 %v8903_v34, %v8905_v53 }
 0x2b7   : > { %v2273_v13 = vpop.f32.mrb[152].mxu0  ;;  %v2522_v18 = vpop.f32.mrb[152].mxu1 }
 0x2b8   : > { %v5972_v63 = vpack.c.bf16 %v2618_v59, %v2618_v59  ;;  %v2619_v55 = vmax.f32 %v2598_v23, 0.0  ;;  %v2329_v17 = vmax.f32 %v10001_v32, %v2273_v13  ;;  %v6639_v49 = vpop.f32.mrb[153].mxu0  ;;  %v6693_v46 = vpop.f32.mrb[153].mxu1 }
 0x2b9   : > { %v2276_v29 = vpop.f32.mrb[154].mxu0  ;;  %v2525_v4 = vpop.f32.mrb[154].mxu1  ;;  %v7392_v49 = vld [vmem:[%s7925_s1 + $0x104] sm:$0xff]  }
 0x2ba   : > { %5500 = vst.msk [vmem:[%s8555_s14 + $0x74] sm:$0xf] %vm1591_vm4, %v5972_v63  ;;  %v5973_v51 = vpack.c.bf16 %v2619_v55, %v2619_v55  ;;  %v2578_v42 = vmax.f32 %v2329_v17, %v2522_v18  ;;  %v2330_v39 = vmax.f32 %v10002_v31, %v2276_v29  ;;  %v6640_v62 = vpop.f32.mrb[155].mxu0  ;;  %v6694_v43 = vpop.f32.mrb[155].mxu1  ;;  %v7393_v46 = vld [vmem:[%s7933_s27 + $0x104] sm:$0xff]  }
 0x2bc   : > { %5501 = vst.msk [vmem:[%s8555_s14 + $0x78] sm:$0xf] %vm1591_vm4, %v5973_v51  ;;  %v2599_v24 = vadd.f32 %v9047_v38, %v2578_v42  ;;  %v2579_v28 = vmax.f32 %v2330_v39, %v2525_v4  ;;  %6874 = vmatmul.mubr.msk.bf16.gmra.mrb[4].mxu0 %vm553_vm3, %v7388_v20  ;;  %v10006_v42 = vmax.f32 %v8932_v37, %v8934_v19 }
 0x2bd   : > { %6928 = vmatmul.mubr.msk.bf16.gmra.mrb[4].mxu1 %vm553_vm3, %v7389_v0  ;;  %6941 = vmatprep.mubr.msk.bf16.mxu0 %vm7647_vm0, %v9992_v16 }
 0x2be   : > { %6995 = vmatprep.mubr.msk.bf16.mxu1 %vm7647_vm0, %v9992_v16  ;;  %v2620_v14 = vmax.f32 %v2599_v24, 0.0  ;;  %v2600_v15 = vadd.f32 %v9047_v38, %v2579_v28 }
 0x2bf   : > { %v2281_v11 = vpop.f32.mrb[156].mxu0  ;;  %v2530_v8 = vpop.f32.mrb[156].mxu1 }
 0x2c0   : > { %v5974_v2 = vpack.c.bf16 %v2620_v14, %v2620_v14  ;;  %v2621_v3 = vmax.f32 %v2600_v15, 0.0  ;;  %v2331_v44 = vmax.f32 %v10003_v52, %v2281_v11  ;;  %v6643_v33 = vpop.f32.mrb[157].mxu0  ;;  %v6697_v10 = vpop.f32.mrb[157].mxu1  ;;  %v10007_v14 = vmax.f32 %v8960_v40, %v8962_v56 }
 0x2c1   : > { %v2284_v22 = vpop.f32.mrb[158].mxu0  ;;  %v2533_v41 = vpop.f32.mrb[158].mxu1  ;;  %v10008_v10 = vmax.f32 %v8970_v30, %v8972_v27 }
 0x2c2   : > { %5502 = vst.msk [vmem:[%s8555_s14 + $0x7c] sm:$0xf] %vm1591_vm4, %v5974_v2  ;;  %v5975_v12 = vpack.c.bf16 %v2621_v3, %v2621_v3  ;;  %v2580_v61 = vmax.f32 %v2331_v44, %v2530_v8  ;;  %v2332_v21 = vmax.f32 %v10004_v45, %v2284_v22  ;;  %v6644_v59 = vpop.f32.mrb[159].mxu0  ;;  %v6698_v23 = vpop.f32.mrb[159].mxu1  ;;  %v7394_v2 = vld [vmem:[%s7925_s1 + $0x10c] sm:$0xff]   ;;  %v10009_v45 = vmax.f32 %v8993_v6, %v8995_v47 }
 0x2c3   : > { %v7395_v3 = vld [vmem:[%s7933_s27 + $0x10c] sm:$0xff]  }
 0x2c4   : > { %5503 = vst.msk [vmem:[%s8555_s14 + $0x80] sm:$0xf] %vm1591_vm4, %v5975_v12  ;;  %v2601_v54 = vadd.f32 %v9047_v38, %v2580_v61  ;;  %v2581_v35 = vmax.f32 %v2332_v21, %v2533_v41  ;;  %6942 = vmatmul.mubr.msk.bf16.vlgmr.msra.gmra.mrb[8].mxu0 %vm553_vm3, %v7390_v25 }
 0x2c5   : > { %6996 = vmatmul.mubr.msk.bf16.vlgmr.msra.gmra.mrb[8].mxu1 %vm553_vm3, %v7391_v26  ;;  %7040 = vmatpush3.bf16.msra.mxu0 %v8914_v50 }
 0x2c6   : > { %7094 = vmatpush3.bf16.msra.mxu1 %v8914_v50  ;;  %v2622_v13 = vmax.f32 %v2601_v54, 0.0  ;;  %v2602_v34 = vadd.f32 %v9047_v38, %v2581_v35  ;;  %6945 = vmatprep.mubr.msk.bf16.mxu0 %vm7647_vm0, %v9992_v16  ;;  %v10005_v50 = vmax.f32 %v8922_v1, %v8924_v5  ;;  %v7396_v54 = vld [vmem:[%s7925_s1 + $0x114] sm:$0xff]  }
 0x2c7   : > { %6999 = vmatprep.mubr.msk.bf16.mxu1 %vm7647_vm0, %v9992_v16  ;;  %v2289_v53 = vpop.f32.mrb[160].mxu0  ;;  %v2538_v18 = vpop.f32.mrb[160].mxu1  ;;  %7041 = vmatprep.subr.bf16.mxu0 %v9992_v16  ;;  %v7397_v35 = vld [vmem:[%s7933_s27 + $0x114] sm:$0xff]  }
 0x2c8   : > { %7095 = vmatprep.subr.bf16.mxu1 %v9992_v16  ;;  %v5976_v20 = vpack.c.bf16 %v2622_v13, %v2622_v13  ;;  %v2623_v63 = vmax.f32 %v2602_v34, 0.0  ;;  %v2333_v55 = vmax.f32 %v10005_v50, %v2289_v53  ;;  %v6647_v32 = vpop.f32.mrb[161].mxu0  ;;  %v6701_v17 = vpop.f32.mrb[161].mxu1 }
 0x2c9   : > { %v2292_v0 = vpop.f32.mrb[162].mxu0  ;;  %v2541_v29 = vpop.f32.mrb[162].mxu1  ;;  %7042 = vmatpush3.bf16.msra.mxu0 %v8939_v60 }
 0x2ca   : > { %7096 = vmatpush3.bf16.msra.mxu1 %v8939_v60  ;;  %5504 = vst.msk [vmem:[%s8555_s14 + $0x84] sm:$0xf] %vm1591_vm4, %v5976_v20  ;;  %v5977_v4 = vpack.c.bf16 %v2623_v63, %v2623_v63  ;;  %v2582_v51 = vmax.f32 %v2333_v55, %v2538_v18  ;;  %v2334_v1 = vmax.f32 %v10006_v42, %v2292_v0  ;;  %v6648_v5 = vpop.f32.mrb[163].mxu0  ;;  %v6702_v31 = vpop.f32.mrb[163].mxu1  ;;  %v7398_v42 = vld [vmem:[%s7925_s1 + $0x11c] sm:$0xff]  }
 0x2cb   : > { %7043 = vmatprep.subr.bf16.mxu0 %v9992_v16  ;;  %7097 = vmatprep.subr.bf16.mxu1 %v9992_v16 }
 0x2cc   : > { %5505 = vst.msk [vmem:[%s8555_s14 + $0x88] sm:$0xf] %vm1591_vm4, %v5977_v4  ;;  %v2603_v39 = vadd.f32 %v9047_v38, %v2582_v51  ;;  %v2583_v62 = vmax.f32 %v2334_v1, %v2541_v29  ;;  %6946 = vmatmul.mubr.msk.bf16.gmra.mrb[12].mxu0 %vm553_vm3, %v7392_v49  ;;  %v7399_v1 = vld [vmem:[%s7933_s27 + $0x11c] sm:$0xff]  }
 0x2cd   : > { %7000 = vmatmul.mubr.msk.bf16.gmra.mrb[12].mxu1 %vm553_vm3, %v7393_v46  ;;  %6949 = vmatprep.mubr.msk.bf16.mxu0 %vm7647_vm0, %v9992_v16  ;;  %v10011_v46 = vld [vmem:[#allocation18_spill] sm:$0xff] }
 0x2ce   : > { %7003 = vmatprep.mubr.msk.bf16.mxu1 %vm7647_vm0, %v9992_v16  ;;  %v2624_v37 = vmax.f32 %v2603_v39, 0.0  ;;  %v2604_v19 = vadd.f32 %v9047_v38, %v2583_v62  ;;  %7044 = vmatpush3.bf16.msra.mxu0 %v8956_v48  ;;  %v10012_v0 = vmax.f32 %v9015_v7, %v10011_v46 }
 0x2cf   : > { %7098 = vmatpush3.bf16.msra.mxu1 %v8956_v48  ;;  %v2297_v60 = vpop.f32.mrb[164].mxu0  ;;  %v2546_v43 = vpop.f32.mrb[164].mxu1  ;;  %7045 = vmatprep.subr.bf16.mxu0 %v9992_v16 }
 0x2d0   : > { %7099 = vmatprep.subr.bf16.mxu1 %v9992_v16  ;;  %v5978_v24 = vpack.c.bf16 %v2624_v37, %v2624_v37  ;;  %v2625_v28 = vmax.f32 %v2604_v19, 0.0  ;;  %v2335_v15 = vmax.f32 %v10007_v14, %v2297_v60  ;;  %v6651_v11 = vpop.f32.mrb[165].mxu0  ;;  %v6705_v8 = vpop.f32.mrb[165].mxu1 }
 0x2d1   : > { %v2300_v52 = vpop.f32.mrb[166].mxu0  ;;  %v2549_v44 = vpop.f32.mrb[166].mxu1  ;;  %v7400_v8 = vld [vmem:[%s7925_s1 + $0x124] sm:$0xff]  }
 0x2d2   : > { %5506 = vst.msk [vmem:[%s8555_s14 + $0x8c] sm:$0xf] %vm1591_vm4, %v5978_v24  ;;  %v5979_v48 = vpack.c.bf16 %v2625_v28, %v2625_v28  ;;  %v2584_v33 = vmax.f32 %v2335_v15, %v2546_v43  ;;  %v2336_v25 = vmax.f32 %v10008_v10, %v2300_v52  ;;  %v6652_v26 = vpop.f32.mrb[167].mxu0  ;;  %v6706_v22 = vpop.f32.mrb[167].mxu1  ;;  %7046 = vmatpush3.bf16.msra.mxu0 %v8979_v58 }
 0x2d3   : > { %7100 = vmatpush3.bf16.msra.mxu1 %v8979_v58  ;;  %7047 = vmatprep.subr.bf16.mxu0 %v9992_v16 }
 0x2d4   : > { %7101 = vmatprep.subr.bf16.mxu1 %v9992_v16  ;;  %5507 = vst.msk [vmem:[%s8555_s14 + $0x90] sm:$0xf] %vm1591_vm4, %v5979_v48  ;;  %v2605_v40 = vadd.f32 %v9047_v38, %v2584_v33  ;;  %v2585_v56 = vmax.f32 %v2336_v25, %v2549_v44  ;;  %6950 = vmatmul.mubr.msk.bf16.gmra.mrb[16].mxu0 %vm553_vm3, %v7394_v2  ;;  %v7401_v2 = vld [vmem:[%s7933_s27 + $0x124] sm:$0xff]  }
 0x2d5   : > { %7004 = vmatmul.mubr.msk.bf16.gmra.mrb[16].mxu1 %vm553_vm3, %v7395_v3  ;;  %6953 = vmatprep.mubr.msk.bf16.mxu0 %vm7647_vm0, %v9992_v16 }
 0x2d6   : > { %7007 = vmatprep.mubr.msk.bf16.mxu1 %vm7647_vm0, %v9992_v16  ;;  %v2626_v58 = vmax.f32 %v2605_v40, 0.0  ;;  %v2606_v30 = vadd.f32 %v9047_v38, %v2585_v56  ;;  %7048 = vmatpush3.bf16.msra.mxu0 %v7990_v9  ;;  %v7402_v56 = vld [vmem:[%s7925_s1 + $0x12c] sm:$0xff]  }
 0x2d7   : > { %7102 = vmatpush3.bf16.msra.mxu1 %v7990_v9  ;;  %v2305_v27 = vpop.f32.mrb[168].mxu0  ;;  %v2554_v41 = vpop.f32.mrb[168].mxu1  ;;  %v10010_v9 = vmax.f32 %v9003_v57, %v9005_v36 }
 0x2d8   : > { %v5980_v12 = vpack.c.bf16 %v2626_v58, %v2626_v58  ;;  %v2627_v61 = vmax.f32 %v2606_v30, 0.0  ;;  %v2337_v21 = vmax.f32 %v10009_v45, %v2305_v27  ;;  %v6655_v59 = vpop.f32.mrb[169].mxu0  ;;  %v6709_v23 = vpop.f32.mrb[169].mxu1  ;;  %v7403_v58 = vld [vmem:[%s7933_s27 + $0x12c] sm:$0xff]  }
 0x2d9   : > { %v2308_v13 = vpop.f32.mrb[170].mxu0  ;;  %v2557_v34 = vpop.f32.mrb[170].mxu1 }
 0x2da   : > { %5508 = vst.msk [vmem:[%s8555_s14 + $0x94] sm:$0xf] %vm1591_vm4, %v5980_v12  ;;  %v5981_v53 = vpack.c.bf16 %v2627_v61, %v2627_v61  ;;  %v2586_v18 = vmax.f32 %v2337_v21, %v2554_v41  ;;  %v2338_v20 = vmax.f32 %v10010_v9, %v2308_v13  ;;  %v6656_v63 = vpop.f32.mrb[171].mxu0  ;;  %v6710_v50 = vpop.f32.mrb[171].mxu1  ;;  %v7405_v13 = vld [vmem:[%s7933_s27 + $0x134] sm:$0xff]  }
 0x2dc   : > { %5509 = vst.msk [vmem:[%s8555_s14 + $0x98] sm:$0xf] %vm1591_vm4, %v5981_v53  ;;  %v2607_v6 = vadd.f32 %v9047_v38, %v2586_v18  ;;  %v2587_v47 = vmax.f32 %v2338_v20, %v2557_v34  ;;  %6954 = vmatmul.mubr.msk.bf16.gmra.mrb[20].mxu0 %vm553_vm3, %v7396_v54 }
 0x2dd   : > { %7008 = vmatmul.mubr.msk.bf16.gmra.mrb[20].mxu1 %vm553_vm3, %v7397_v35  ;;  %6957 = vmatprep.mubr.msk.bf16.mxu0 %vm7647_vm0, %v9992_v16  ;;  %v7404_v35 = vld [vmem:[%s7925_s1 + $0x134] sm:$0xff]  }
 0x2de   : > { %7011 = vmatprep.mubr.msk.bf16.mxu1 %vm7647_vm0, %v9992_v16  ;;  %v2628_v36 = vmax.f32 %v2607_v6, 0.0  ;;  %v2608_v57 = vadd.f32 %v9047_v38, %v2587_v47 }
 0x2df   : > { %v2313_v55 = vpop.f32.mrb[172].mxu0  ;;  %v2562_v32 = vpop.f32.mrb[172].mxu1 }
 0x2e0   : > { %v5982_v17 = vpack.c.bf16 %v2628_v36, %v2628_v36  ;;  %v2629_v49 = vmax.f32 %v2608_v57, 0.0  ;;  %v2339_v29 = vmax.f32 %v10012_v0, %v2313_v55  ;;  %v6659_v4 = vpop.f32.mrb[173].mxu0  ;;  %v6713_v51 = vpop.f32.mrb[173].mxu1  ;;  %v7406_v57 = vld [vmem:[%s7925_s1 + $0x13c] sm:$0xff]  }
 0x2e1   : > { %v2316_v5 = vpop.f32.mrb[174].mxu0  ;;  %v2565_v31 = vpop.f32.mrb[174].mxu1  ;;  %v7407_v55 = vld [vmem:[%s7933_s27 + $0x13c] sm:$0xff]  }
 0x2e2   : > { %5510 = vst.msk [vmem:[%s8555_s14 + $0x9c] sm:$0xf] %vm1591_vm4, %v5982_v17  ;;  %v5983_v39 = vpack.c.bf16 %v2629_v49, %v2629_v49  ;;  %v2588_v62 = vmax.f32 %v2339_v29, %v2562_v32  ;;  %v6660_v37 = vpop.f32.mrb[175].mxu0  ;;  %v6714_v19 = vpop.f32.mrb[175].mxu1  ;;  %v7408_v5 = vld [vmem:[%s7925_s1 + $0x144] sm:$0xff]  }
 0x2e3   : > { %v7409_v31 = vld [vmem:[%s7933_s27 + $0x144] sm:$0xff]  }
 0x2e4   : > { %5511 = vst.msk [vmem:[%s8555_s14 + $0xa0] sm:$0xf] %vm1591_vm4, %v5983_v39  ;;  %v2609_v60 = vadd.f32 %v9047_v38, %v2588_v62  ;;  %6958 = vmatmul.mubr.msk.bf16.gmra.mrb[24].mxu0 %vm553_vm3, %v7398_v42 }
 0x2e5   : > { %7012 = vmatmul.mubr.msk.bf16.gmra.mrb[24].mxu1 %vm553_vm3, %v7399_v1  ;;  %6961 = vmatprep.mubr.msk.bf16.mxu0 %vm7647_vm0, %v9992_v16 }
 0x2e6   : > { %7015 = vmatprep.mubr.msk.bf16.mxu1 %vm7647_vm0, %v9992_v16  ;;  %v2630_v7 = vmax.f32 %v2609_v60, 0.0 }
 0x2e7   : > { %v9264_v43 = vpop.f32.mrb[176].mxu0  ;;  %v9266_v24 = vpop.f32.mrb[176].mxu1 }
 0x2e8   : > { %v5984_v28 = vpack.c.bf16 %v2630_v7, %v2630_v7  ;;  %v3194_v14 = vmax.f32 %v9264_v43, %v9266_v24  ;;  %v6727_v15 = vpop.f32.mrb[177].mxu0  ;;  %v6781_v11 = vpop.f32.mrb[177].mxu1 }
 0x2e9   : > { %v9272_v3 = vpop.f32.mrb[178].mxu0  ;;  %v9274_v52 = vpop.f32.mrb[178].mxu1  ;;  %v7410_v15 = vld [vmem:[%s7925_s1 + $0x14c] ss:$0 sps:$4 sm:$0x33]  }
 0x2ea   : > { %5512 = vst.msk [vmem:[%s8555_s14 + $0xa4] sm:$0x3] %vm1612_vm5, %v5984_v28  ;;  %v3195_v44 = vmax.f32 %v9272_v3, %v9274_v52  ;;  %v6728_v48 = vpop.f32.mrb[179].mxu0  ;;  %v6782_v33 = vpop.f32.mrb[179].mxu1 }
 0x2eb   : > { %v7411_v48 = vld [vmem:[%s7933_s27 + $0x14c] ss:$0 sps:$4 sm:$0x33]  }
 0x2ec   : > { %6962 = vmatmul.mubr.msk.bf16.gmra.mrb[28].mxu0 %vm553_vm3, %v7400_v8 }
 0x2ed   : > { %7016 = vmatmul.mubr.msk.bf16.gmra.mrb[28].mxu1 %vm553_vm3, %v7401_v2  ;;  %6965 = vmatprep.mubr.msk.bf16.mxu0 %vm7647_vm0, %v9992_v16 }
 0x2ee   : > { %7019 = vmatprep.mubr.msk.bf16.mxu1 %vm7647_vm0, %v9992_v16 }
 0x2ef   : > { %v9286_v10 = vpop.f32.mrb[180].mxu0  ;;  %v9288_v25 = vpop.f32.mrb[180].mxu1 }
 0x2f0   : > { %v3196_v26 = vmax.f32 %v9286_v10, %v9288_v25  ;;  %v6731_v22 = vpop.f32.mrb[181].mxu0  ;;  %v6785_v40 = vpop.f32.mrb[181].mxu1 }
 0x2f1   : > { %v9294_v30 = vpop.f32.mrb[182].mxu0  ;;  %v9296_v27 = vpop.f32.mrb[182].mxu1 }
 0x2f2   : > { %v3197_v41 = vmax.f32 %v9294_v30, %v9296_v27  ;;  %v6732_v12 = vpop.f32.mrb[183].mxu0  ;;  %v6786_v61 = vpop.f32.mrb[183].mxu1 }
 0x2f4   : > { %6966 = vmatmul.mubr.msk.bf16.gmra.mrb[32].mxu0 %vm553_vm3, %v7402_v56 }
 0x2f5   : > { %7020 = vmatmul.mubr.msk.bf16.gmra.mrb[32].mxu1 %vm553_vm3, %v7403_v58  ;;  %6969 = vmatprep.mubr.msk.bf16.mxu0 %vm7647_vm0, %v9992_v16 }
 0x2f6   : > { %7023 = vmatprep.mubr.msk.bf16.mxu1 %vm7647_vm0, %v9992_v16 }
 0x2f7   : > { %v9306_v45 = vpop.f32.mrb[184].mxu0 }
 0x2f8   : > { %v9308_v21 = vpop.f32.mrb[184].mxu1  ;;  %v6735_v23 = vpop.f32.mrb[185].mxu0 }
 0x2f9   : > { %v3198_v59 = vmax.f32 %v9306_v45, %v9308_v21  ;;  %v6789_v54 = vpop.f32.mrb[185].mxu1  ;;  %v9314_v34 = vpop.f32.mrb[186].mxu0  ;;  %v9531_v45 = vld [vmem:[%s9936_s5] ss:$0 sm:$0xff] }
 0x2fa   : > { %v9316_v53 = vpop.f32.mrb[186].mxu1  ;;  %v6736_v9 = vpop.f32.mrb[187].mxu0 }
 0x2fb   : > { %v6790_v20 = vpop.f32.mrb[187].mxu1  ;;  %v7413_v9 = vld [vmem:[%s7941_s12 + $0xfc] sm:$0xff]  }
 0x2fc   : > { %6970 = vmatmul.mubr.msk.bf16.gmra.mrb[36].mxu0 %vm553_vm3, %v7404_v35 }
 0x2fd   : > { %7024 = vmatmul.mubr.msk.bf16.gmra.mrb[36].mxu1 %vm553_vm3, %v7405_v13  ;;  %6973 = vmatprep.mubr.msk.bf16.mxu0 %vm7647_vm0, %v9992_v16  ;;  %v7412_v13 = vld [vmem:[%s7939_s11 + $0xfc] sm:$0xff]  }
 0x2fe   : > { %7027 = vmatprep.mubr.msk.bf16.mxu1 %vm7647_vm0, %v9992_v16 }
 0x2ff   : > { %v9326_v63 = vpop.f32.mrb[188].mxu0 }
 0x300   : > { %v9328_v50 = vpop.f32.mrb[188].mxu1  ;;  %v6739_v47 = vpop.f32.mrb[189].mxu0 }
 0x301   : > { %v6793_v36 = vpop.f32.mrb[189].mxu1  ;;  %v9334_v32 = vpop.f32.mrb[190].mxu0 }
 0x302   : > { %v9336_v17 = vpop.f32.mrb[190].mxu1  ;;  %v6740_v46 = vpop.f32.mrb[191].mxu0 }
 0x303   : > { %v6794_v0 = vpop.f32.mrb[191].mxu1 }
 0x304   : > { %6974 = vmatmul.mubr.msk.bf16.gmra.mrb[40].mxu0 %vm553_vm3, %v7406_v57 }
 0x305   : > { %7028 = vmatmul.mubr.msk.bf16.gmra.mrb[40].mxu1 %vm553_vm3, %v7407_v55  ;;  %6977 = vmatprep.mubr.msk.bf16.mxu0 %vm7647_vm0, %v9992_v16 }
 0x306   : > { %7031 = vmatprep.mubr.msk.bf16.mxu1 %vm7647_vm0, %v9992_v16 }
 0x307   : > { %v9346_v29 = vpop.f32.mrb[192].mxu0 }
 0x308   : > { %v9348_v4 = vpop.f32.mrb[192].mxu1  ;;  %v6743_v42 = vpop.f32.mrb[193].mxu0 }
 0x309   : > { %v6797_v1 = vpop.f32.mrb[193].mxu1  ;;  %v9354_v39 = vpop.f32.mrb[194].mxu0 }
 0x30a   : > { %v9356_v62 = vpop.f32.mrb[194].mxu1  ;;  %v6744_v19 = vpop.f32.mrb[195].mxu0 }
 0x30b   : > { %v6798_v60 = vpop.f32.mrb[195].mxu1  ;;  %v7415_v19 = vld [vmem:[%s7941_s12 + $0x104] sm:$0xff]  }
 0x30c   : > { %6978 = vmatmul.mubr.msk.bf16.gmra.mrb[44].mxu0 %vm553_vm3, %v7408_v5 }
 0x30d   : > { %7032 = vmatmul.mubr.msk.bf16.gmra.mrb[44].mxu1 %vm553_vm3, %v7409_v31  ;;  %6981 = vmatprep.mubr.msk.bf16.mxu0 %vm7647_vm0, %v9992_v16  ;;  %v7414_v31 = vld [vmem:[%s7939_s11 + $0x104] sm:$0xff]  }
 0x30e   : > { %7035 = vmatprep.mubr.msk.bf16.mxu1 %vm7647_vm0, %v9992_v16 }
 0x30f   : > { %v9366_v7 = vpop.f32.mrb[196].mxu0 }
 0x310   : > { %v9368_v28 = vpop.f32.mrb[196].mxu1  ;;  %v6747_v8 = vpop.f32.mrb[197].mxu0 }
 0x311   : > { %v6801_v2 = vpop.f32.mrb[197].mxu1  ;;  %v9374_v33 = vpop.f32.mrb[198].mxu0 }
 0x312   : > { %v9376_v22 = vpop.f32.mrb[198].mxu1  ;;  %v6748_v56 = vpop.f32.mrb[199].mxu0 }
 0x313   : > { %v6802_v58 = vpop.f32.mrb[199].mxu1 }
 0x314   : > { %6982 = vmatmul.mubr.msk.bf16.gmra.mrb[48].mxu0 %vm553_vm3, %v7410_v15 }
 0x315   : > { %7036 = vmatmul.mubr.msk.bf16.gmra.mrb[48].mxu1 %vm553_vm3, %v7411_v48  ;;  %7049 = vmatprep.mubr.msk.bf16.mxu0 %vm7647_vm0, %v9992_v16 }
 0x316   : > { %7103 = vmatprep.mubr.msk.bf16.mxu1 %vm7647_vm0, %v9992_v16 }
 0x317   : > { %v9386_v12 = vpop.f32.mrb[200].mxu0 }
 0x318   : > { %v9388_v61 = vpop.f32.mrb[200].mxu1  ;;  %v6751_v54 = vpop.f32.mrb[201].mxu0 }
 0x319   : > { %v6805_v35 = vpop.f32.mrb[201].mxu1  ;;  %v9394_v20 = vpop.f32.mrb[202].mxu0 }
 0x31a   : > { %v9396_v47 = vpop.f32.mrb[202].mxu1  ;;  %v6752_v57 = vpop.f32.mrb[203].mxu0 }
 0x31b   : > { %v6806_v55 = vpop.f32.mrb[203].mxu1  ;;  %v7417_v57 = vld [vmem:[%s7941_s12 + $0x10c] sm:$0xff]  }
 0x31c   : > { %7050 = vmatmul.mubr.msk.bf16.vlgmr.msra.gmra.mrb[52].mxu0 %vm553_vm3, %v7412_v13 }
 0x31d   : > { %7104 = vmatmul.mubr.msk.bf16.vlgmr.msra.gmra.mrb[52].mxu1 %vm553_vm3, %v7413_v9  ;;  %7053 = vmatprep.mubr.msk.bf16.mxu0 %vm7647_vm0, %v9992_v16  ;;  %v7416_v9 = vld [vmem:[%s7939_s11 + $0x10c] sm:$0xff]  }
 0x31e   : > { %7107 = vmatprep.mubr.msk.bf16.mxu1 %vm7647_vm0, %v9992_v16 }
 0x31f   : > { %v9406_v46 = vpop.f32.mrb[204].mxu0 }
 0x320   : > { %v9408_v0 = vpop.f32.mrb[204].mxu1  ;;  %v6755_v1 = vpop.f32.mrb[205].mxu0 }
 0x321   : > { %v6809_v5 = vpop.f32.mrb[205].mxu1  ;;  %v9414_v60 = vpop.f32.mrb[206].mxu0 }
 0x322   : > { %v9416_v15 = vpop.f32.mrb[206].mxu1  ;;  %v6756_v2 = vpop.f32.mrb[207].mxu0 }
 0x323   : > { %v6810_v48 = vpop.f32.mrb[207].mxu1 }
 0x324   : > { %7054 = vmatmul.mubr.msk.bf16.gmra.mrb[56].mxu0 %vm553_vm3, %v7414_v31 }
 0x325   : > { %7108 = vmatmul.mubr.msk.bf16.gmra.mrb[56].mxu1 %vm553_vm3, %v7415_v19  ;;  %7057 = vmatprep.mubr.msk.bf16.mxu0 %vm7647_vm0, %v9992_v16 }
 0x326   : > { %7111 = vmatprep.mubr.msk.bf16.mxu1 %vm7647_vm0, %v9992_v16 }
 0x327   : > { %v9426_v56 = vpop.f32.mrb[208].mxu0 }
 0x328   : > { %v9428_v58 = vpop.f32.mrb[208].mxu1  ;;  %v6759_v35 = vpop.f32.mrb[209].mxu0 }
 0x329   : > { %v6813_v13 = vpop.f32.mrb[209].mxu1  ;;  %v9434_v55 = vpop.f32.mrb[210].mxu0 }
 0x32a   : > { %v9436_v1 = vpop.f32.mrb[210].mxu1  ;;  %v6760_v31 = vpop.f32.mrb[211].mxu0 }
 0x32b   : > { %v6814_v19 = vpop.f32.mrb[211].mxu1 }
 0x32c   : > { %7058 = vmatmul.mubr.msk.bf16.gmra.mrb[60].mxu0 %vm553_vm3, %v7416_v9  ;;  %v7418_v19 = vld [vmem:[%s7939_s11 + $0x114] sm:$0xff]  }
 0x32d   : > { %7112 = vmatmul.mubr.msk.bf16.gmra.mrb[60].mxu1 %vm553_vm3, %v7417_v57  ;;  %7061 = vmatprep.mubr.msk.bf16.mxu0 %vm7647_vm0, %v9992_v16  ;;  %v7419_v9 = vld [vmem:[%s7941_s12 + $0x114] sm:$0xff]  }
 0x32e   : > { %7115 = vmatprep.mubr.msk.bf16.mxu1 %vm7647_vm0, %v9992_v16 }
 0x32f   : > { %v9446_v2 = vpop.f32.mrb[212].mxu0 }
 0x330   : > { %v9448_v48 = vpop.f32.mrb[212].mxu1  ;;  %v6763_v13 = vpop.f32.mrb[213].mxu0 }
 0x331   : > { %v6817_v31 = vpop.f32.mrb[213].mxu1  ;;  %v9454_v57 = vpop.f32.mrb[214].mxu0 }
 0x332   : > { %v9456_v5 = vpop.f32.mrb[214].mxu1  ;;  %v6764_v8 = vpop.f32.mrb[215].mxu0 }
 0x333   : > { %v6818_v42 = vpop.f32.mrb[215].mxu1 }
 0x334   : > { %7062 = vmatmul.mubr.msk.bf16.gmra.mrb[64].mxu0 %vm553_vm3, %v7418_v19  ;;  %v7420_v42 = vld [vmem:[%s7939_s11 + $0x11c] sm:$0xff]  }
 0x335   : > { %7116 = vmatmul.mubr.msk.bf16.gmra.mrb[64].mxu1 %vm553_vm3, %v7419_v9  ;;  %7065 = vmatprep.mubr.msk.bf16.mxu0 %vm7647_vm0, %v9992_v16  ;;  %v7421_v19 = vld [vmem:[%s7941_s12 + $0x11c] sm:$0xff]  }
 0x336   : > { %7119 = vmatprep.mubr.msk.bf16.mxu1 %vm7647_vm0, %v9992_v16 }
 0x337   : > { %v9466_v13 = vpop.f32.mrb[216].mxu0 }
 0x338   : > { %v9468_v31 = vpop.f32.mrb[216].mxu1  ;;  %v6767_v54 = vpop.f32.mrb[217].mxu0 }
 0x339   : > { %v6821_v8 = vpop.f32.mrb[217].mxu1  ;;  %v2963_v9 = vpop.f32.mrb[218].mxu0 }
 0x33a   : > { %v3191_v36 = vpop.f32.mrb[218].mxu1  ;;  %v6768_v23 = vpop.f32.mrb[219].mxu0 }
 0x33b   : > { %v6822_v40 = vpop.f32.mrb[219].mxu1  ;;  %v7422_v23 = vld [vmem:[%s7939_s11 + $0x124] sm:$0xff]  }
 0x33c   : > { %7066 = vmatmul.mubr.msk.bf16.gmra.mrb[68].mxu0 %vm553_vm3, %v7420_v42  ;;  %v7423_v40 = vld [vmem:[%s7941_s12 + $0x124] sm:$0xff]  }
 0x33d   : > { %7120 = vmatmul.mubr.msk.bf16.gmra.mrb[68].mxu1 %vm553_vm3, %v7421_v19  ;;  %7069 = vmatprep.mubr.msk.bf16.mxu0 %vm7647_vm0, %v9992_v16 }
 0x33e   : > { %7123 = vmatprep.mubr.msk.bf16.mxu1 %vm7647_vm0, %v9992_v16 }
 0x33f   : > { %v3357_v54 = vpop.f32.mrb[220].mxu0 }
 0x340   : > { %v3606_v8 = vpop.f32.mrb[220].mxu1  ;;  %v3443_v35 = vmax.f32 %v3194_v14, %v3357_v54  ;;  %v6835_v9 = vpop.f32.mrb[221].mxu0 }
 0x341   : > { %v6889_v36 = vpop.f32.mrb[221].mxu1  ;;  %v3360_v11 = vpop.f32.mrb[222].mxu0 }
 0x342   : > { %v3609_v42 = vpop.f32.mrb[222].mxu1  ;;  %v3692_v37 = vmax.f32 %v3443_v35, %v3606_v8  ;;  %v3444_v19 = vmax.f32 %v3195_v44, %v3360_v11  ;;  %v6836_v51 = vpop.f32.mrb[223].mxu0  ;;  %v7424_v11 = vld [vmem:[%s7939_s11 + $0x12c] sm:$0xff]  }
 0x343   : > { %v6890_v49 = vpop.f32.mrb[223].mxu1  ;;  %v7425_v35 = vld [vmem:[%s7941_s12 + $0x12c] sm:$0xff]  }
 0x344   : > { %v3713_v6 = vadd.f32 %v9047_v38, %v3692_v37  ;;  %v3693_v18 = vmax.f32 %v3444_v19, %v3609_v42  ;;  %7070 = vmatmul.mubr.msk.bf16.gmra.mrb[72].mxu0 %vm553_vm3, %v7422_v23 }
 0x345   : > { %7124 = vmatmul.mubr.msk.bf16.gmra.mrb[72].mxu1 %vm553_vm3, %v7423_v40  ;;  %7073 = vmatprep.mubr.msk.bf16.mxu0 %vm7647_vm0, %v9992_v16 }
 0x346   : > { %7127 = vmatprep.mubr.msk.bf16.mxu1 %vm7647_vm0, %v9992_v16  ;;  %v3734_v43 = vmax.f32 %v3713_v6, 0.0  ;;  %v3714_v24 = vadd.f32 %v9047_v38, %v3693_v18 }
 0x347   : > { %v3365_v14 = vpop.f32.mrb[224].mxu0 }
 0x348   : > { %v3614_v3 = vpop.f32.mrb[224].mxu1  ;;  %v5985_v52 = vpack.c.bf16 %v3734_v43, %v3734_v43  ;;  %v3735_v44 = vmax.f32 %v3714_v24, 0.0  ;;  %v3445_v49 = vmax.f32 %v3196_v26, %v3365_v14  ;;  %v6839_v51 = vpop.f32.mrb[225].mxu0  ;;  %v7426_v14 = vld [vmem:[%s7939_s11 + $0x134] sm:$0xff]  }
 0x349   : > { %v6893_v37 = vpop.f32.mrb[225].mxu1  ;;  %v3368_v54 = vpop.f32.mrb[226].mxu0 }
 0x34a   : > { %v3617_v8 = vpop.f32.mrb[226].mxu1  ;;  %5706 = vst.msk [vmem:[%s8555_s14 + $0xa8] sm:$0xf] %vm1591_vm4, %v5985_v52  ;;  %v5986_v6 = vpack.c.bf16 %v3735_v44, %v3735_v44  ;;  %v3694_v9 = vmax.f32 %v3445_v49, %v3614_v3  ;;  %v3446_v18 = vmax.f32 %v3197_v41, %v3368_v54  ;;  %v6840_v36 = vpop.f32.mrb[227].mxu0  ;;  %v7427_v3 = vld [vmem:[%s7941_s12 + $0x134] sm:$0xff]  }
 0x34b   : > { %v6894_v23 = vpop.f32.mrb[227].mxu1 }
 0x34c   : > { %5707 = vst.msk [vmem:[%s8555_s14 + $0xac] sm:$0xf] %vm1591_vm4, %v5986_v6  ;;  %v3715_v10 = vadd.f32 %v9047_v38, %v3694_v9  ;;  %v3695_v25 = vmax.f32 %v3446_v18, %v3617_v8  ;;  %7074 = vmatmul.mubr.msk.bf16.gmra.mrb[76].mxu0 %vm553_vm3, %v7424_v11  ;;  %v10014_v18 = vmax.f32 %v9326_v63, %v9328_v50 }
 0x34d   : > { %7128 = vmatmul.mubr.msk.bf16.gmra.mrb[76].mxu1 %vm553_vm3, %v7425_v35  ;;  %7077 = vmatprep.mubr.msk.bf16.mxu0 %vm7647_vm0, %v9992_v16 }
 0x34e   : > { %7131 = vmatprep.mubr.msk.bf16.mxu1 %vm7647_vm0, %v9992_v16  ;;  %v3736_v26 = vmax.f32 %v3715_v10, 0.0  ;;  %v3716_v30 = vadd.f32 %v9047_v38, %v3695_v25  ;;  %v10013_v38 = vmax.f32 %v9314_v34, %v9316_v53  ;;  %v7428_v25 = vld [vmem:[%s7939_s11 + $0x13c] sm:$0xff]  }
 0x34f   : > { %v3373_v27 = vpop.f32.mrb[228].mxu0 }
 0x350   : > { %v3622_v41 = vpop.f32.mrb[228].mxu1  ;;  %v5987_v40 = vpack.c.bf16 %v3736_v26, %v3736_v26  ;;  %v3737_v42 = vmax.f32 %v3716_v30, 0.0  ;;  %v3447_v19 = vmax.f32 %v3198_v59, %v3373_v27  ;;  %v6843_v43 = vpop.f32.mrb[229].mxu0  ;;  %v7429_v26 = vld [vmem:[%s7941_s12 + $0x13c] sm:$0xff]  }
 0x351   : > { %v6897_v24 = vpop.f32.mrb[229].mxu1  ;;  %v3376_v52 = vpop.f32.mrb[230].mxu0 }
 0x352   : > { %v3625_v44 = vpop.f32.mrb[230].mxu1  ;;  %5708 = vst.msk [vmem:[%s8555_s14 + $0xb0] sm:$0xf] %vm1591_vm4, %v5987_v40  ;;  %v5988_v49 = vpack.c.bf16 %v3737_v42, %v3737_v42  ;;  %v3696_v51 = vmax.f32 %v3447_v19, %v3622_v41  ;;  %v3448_v37 = vmax.f32 %v10013_v38, %v3376_v52  ;;  %v6844_v11 = vpop.f32.mrb[231].mxu0  ;;  %v10015_v42 = vmax.f32 %v9334_v32, %v9336_v17 }
 0x353   : > { %v6898_v35 = vpop.f32.mrb[231].mxu1  ;;  %v7430_v11 = vld [vmem:[%s7939_s11 + $0x144] sm:$0xff]  }
 0x354   : > { %5709 = vst.msk [vmem:[%s8555_s14 + $0xb4] sm:$0xf] %vm1591_vm4, %v5988_v49  ;;  %v3717_v21 = vadd.f32 %v9531_v45, %v3696_v51  ;;  %v3697_v59 = vmax.f32 %v3448_v37, %v3625_v44  ;;  %7078 = vmatmul.mubr.msk.bf16.gmra.mrb[80].mxu0 %vm553_vm3, %v7426_v14  ;;  %v10016_v49 = vmax.f32 %v9346_v29, %v9348_v4  ;;  %v7431_v35 = vld [vmem:[%s7941_s12 + $0x144] sm:$0xff]  }
 0x355   : > { %7132 = vmatmul.mubr.msk.bf16.gmra.mrb[80].mxu1 %vm553_vm3, %v7427_v3  ;;  %7081 = vmatprep.mubr.msk.bf16.mxu0 %vm7647_vm0, %v9992_v16 }
 0x356   : > { %7135 = vmatprep.mubr.msk.bf16.mxu1 %vm7647_vm0, %v9992_v16  ;;  %v3738_v34 = vmax.f32 %v3717_v21, 0.0  ;;  %v3718_v53 = vadd.f32 %v9531_v45, %v3697_v59 }
 0x357   : > { %v3381_v54 = vpop.f32.mrb[232].mxu0 }
 0x358   : > { %v3630_v8 = vpop.f32.mrb[232].mxu1  ;;  %v5989_v6 = vpack.c.bf16 %v3738_v34, %v3738_v34  ;;  %v3739_v9 = vmax.f32 %v3718_v53, 0.0  ;;  %v3449_v36 = vmax.f32 %v10014_v18, %v3381_v54  ;;  %v6847_v23 = vpop.f32.mrb[233].mxu0  ;;  %v10017_v54 = vmax.f32 %v9354_v39, %v9356_v62 }
 0x359   : > { %v6901_v10 = vpop.f32.mrb[233].mxu1  ;;  %v3384_v30 = vpop.f32.mrb[234].mxu0  ;;  %v7432_v23 = vld [vmem:[%s7939_s11 + $0x14c] ss:$0 sps:$4 sm:$0x33]  }
 0x35a   : > { %v3633_v27 = vpop.f32.mrb[234].mxu1  ;;  %5710 = vst.msk [vmem:[%s8555_s14 + $0xb8] sm:$0xf] %vm1591_vm4, %v5989_v6  ;;  %v5990_v41 = vpack.c.bf16 %v3739_v9, %v3739_v9  ;;  %v3698_v40 = vmax.f32 %v3449_v36, %v3630_v8  ;;  %v3450_v19 = vmax.f32 %v10015_v42, %v3384_v30  ;;  %v6848_v43 = vpop.f32.mrb[235].mxu0 }
 0x35b   : > { %v6902_v24 = vpop.f32.mrb[235].mxu1 }
 0x35c   : > { %5711 = vst.msk [vmem:[%s8555_s14 + $0xbc] sm:$0xf] %vm1591_vm4, %v5990_v41  ;;  %v3719_v63 = vadd.f32 %v9531_v45, %v3698_v40  ;;  %v3699_v50 = vmax.f32 %v3450_v19, %v3633_v27  ;;  %7082 = vmatmul.mubr.msk.bf16.gmra.mrb[84].mxu0 %vm553_vm3, %v7428_v25  ;;  %v7433_v40 = vld [vmem:[%s7941_s12 + $0x14c] ss:$0 sps:$4 sm:$0x33]   ;;  %v10019_v24 = vmax.f32 %v9374_v33, %v9376_v22 }
 0x35d   : > { %7136 = vmatmul.mubr.msk.bf16.gmra.mrb[84].mxu1 %vm553_vm3, %v7429_v26  ;;  %7085 = vmatprep.mubr.msk.bf16.mxu0 %vm7647_vm0, %v9992_v16  ;;  %v10018_v26 = vmax.f32 %v9366_v7, %v9368_v28 }
 0x35e   : > { %7139 = vmatprep.mubr.msk.bf16.mxu1 %vm7647_vm0, %v9992_v16  ;;  %v3740_v32 = vmax.f32 %v3719_v63, 0.0  ;;  %v3720_v17 = vadd.f32 %v9531_v45, %v3699_v50 }
 0x35f   : > { %v3389_v14 = vpop.f32.mrb[236].mxu0 }
 0x360   : > { %v3638_v3 = vpop.f32.mrb[236].mxu1  ;;  %v5991_v52 = vpack.c.bf16 %v3740_v32, %v3740_v32  ;;  %v3741_v44 = vmax.f32 %v3720_v17, 0.0  ;;  %v3451_v51 = vmax.f32 %v10016_v49, %v3389_v14  ;;  %v6851_v38 = vpop.f32.mrb[237].mxu0 }
 0x361   : > { %v6905_v37 = vpop.f32.mrb[237].mxu1  ;;  %v3392_v21 = vpop.f32.mrb[238].mxu0 }
 0x362   : > { %v3641_v59 = vpop.f32.mrb[238].mxu1  ;;  %5712 = vst.msk [vmem:[%s8555_s14 + $0xc0] sm:$0xf] %vm1591_vm4, %v5991_v52  ;;  %v5992_v34 = vpack.c.bf16 %v3741_v44, %v3741_v44  ;;  %v3700_v53 = vmax.f32 %v3451_v51, %v3638_v3  ;;  %v3452_v8 = vmax.f32 %v10017_v54, %v3392_v21  ;;  %v6852_v6 = vpop.f32.mrb[239].mxu0  ;;  %v10020_v44 = vmax.f32 %v9386_v12, %v9388_v61 }
 0x363   : > { %v6906_v9 = vpop.f32.mrb[239].mxu1 }
 0x364   : > { %5713 = vst.msk [vmem:[%s8555_s14 + $0xc4] sm:$0xf] %vm1591_vm4, %v5992_v34  ;;  %v3721_v29 = vadd.f32 %v9531_v45, %v3700_v53  ;;  %v3701_v4 = vmax.f32 %v3452_v8, %v3641_v59  ;;  %7086 = vmatmul.mubr.msk.bf16.gmra.mrb[88].mxu0 %vm553_vm3, %v7430_v11  ;;  %v10021_v59 = vmax.f32 %v9394_v20, %v9396_v47 }
 0x365   : > { %7140 = vmatmul.mubr.msk.bf16.gmra.mrb[88].mxu1 %vm553_vm3, %v7431_v35  ;;  %7089 = vmatprep.mubr.msk.bf16.mxu0 %vm7647_vm0, %v9992_v16  ;;  %v10022_v20 = vmax.f32 %v9406_v46, %v9408_v0 }
 0x366   : > { %7143 = vmatprep.mubr.msk.bf16.mxu1 %vm7647_vm0, %v9992_v16  ;;  %v3742_v39 = vmax.f32 %v3721_v29, 0.0  ;;  %v3722_v62 = vadd.f32 %v9531_v45, %v3701_v4 }
 0x367   : > { %v3397_v18 = vpop.f32.mrb[240].mxu0 }
 0x368   : > { %v3646_v36 = vpop.f32.mrb[240].mxu1  ;;  %v5993_v10 = vpack.c.bf16 %v3742_v39, %v3742_v39  ;;  %v3743_v25 = vmax.f32 %v3722_v62, 0.0  ;;  %v3453_v30 = vmax.f32 %v10018_v26, %v3397_v18  ;;  %v6855_v27 = vpop.f32.mrb[241].mxu0  ;;  %v10023_v26 = vmax.f32 %v9414_v60, %v9416_v15 }
 0x369   : > { %v6909_v41 = vpop.f32.mrb[241].mxu1  ;;  %v3400_v42 = vpop.f32.mrb[242].mxu0  ;;  %v10024_v60 = vmax.f32 %v9426_v56, %v9428_v58 }
 0x36a   : > { %v3649_v19 = vpop.f32.mrb[242].mxu1  ;;  %5714 = vst.msk [vmem:[%s8555_s14 + $0xc8] sm:$0xf] %vm1591_vm4, %v5993_v10  ;;  %v5994_v16 = vpack.c.bf16 %v3743_v25, %v3743_v25  ;;  %v3702_v43 = vmax.f32 %v3453_v30, %v3646_v36  ;;  %v3454_v63 = vmax.f32 %v10019_v24, %v3400_v42  ;;  %v6856_v50 = vpop.f32.mrb[243].mxu0 }
 0x36b   : > { %v6910_v32 = vpop.f32.mrb[243].mxu1 }
 0x36c   : > { %5715 = vst.msk [vmem:[%s8555_s14 + $0xcc] sm:$0xf] %vm1591_vm4, %v5994_v16  ;;  %v3723_v7 = vadd.f32 %v9531_v45, %v3702_v43  ;;  %v3703_v28 = vmax.f32 %v3454_v63, %v3649_v19  ;;  %7090 = vmatmul.mubr.msk.bf16.gmra.mrb[92].mxu0 %vm553_vm3, %v7432_v23 }
 0x36d   : > { %7144 = vmatmul.mubr.msk.bf16.gmra.mrb[92].mxu1 %vm553_vm3, %v7433_v40 }
 0x36e   : > { %v3744_v17 = vmax.f32 %v3723_v7, 0.0  ;;  %v3724_v14 = vadd.f32 %v9531_v45, %v3703_v28 }
 0x36f   : > { %v3405_v3 = vpop.f32.mrb[244].mxu0 }
 0x370   : > { %v3654_v52 = vpop.f32.mrb[244].mxu1  ;;  %v5995_v33 = vpack.c.bf16 %v3744_v17, %v3744_v17  ;;  %v3745_v22 = vmax.f32 %v3724_v14, 0.0  ;;  %v3455_v49 = vmax.f32 %v10020_v44, %v3405_v3  ;;  %v6859_v51 = vpop.f32.mrb[245].mxu0  ;;  %v10025_v14 = vmax.f32 %v9434_v55, %v9436_v1 }
 0x371   : > { %v6913_v38 = vpop.f32.mrb[245].mxu1  ;;  %v3408_v37 = vpop.f32.mrb[246].mxu0  ;;  %v10026_v55 = vmax.f32 %v9446_v2, %v9448_v48 }
 0x372   : > { %v3657_v11 = vpop.f32.mrb[246].mxu1  ;;  %5716 = vst.msk [vmem:[%s8555_s14 + $0xd0] sm:$0xf] %vm1591_vm4, %v5995_v33  ;;  %v5996_v35 = vpack.c.bf16 %v3745_v22, %v3745_v22  ;;  %v3704_v21 = vmax.f32 %v3455_v49, %v3654_v52  ;;  %v3456_v34 = vmax.f32 %v10021_v59, %v3408_v37  ;;  %v6860_v53 = vpop.f32.mrb[247].mxu0 }
 0x373   : > { %v6914_v54 = vpop.f32.mrb[247].mxu1 }
 0x374   : > { %5717 = vst.msk [vmem:[%s8555_s14 + $0xd4] sm:$0xf] %vm1591_vm4, %v5996_v35  ;;  %v3725_v12 = vadd.f32 %v9531_v45, %v3704_v21  ;;  %v3705_v61 = vmax.f32 %v3456_v34, %v3657_v11  ;;  %v10027_v54 = vmax.f32 %v9454_v57, %v9456_v5  ;;  %v10028_v5 = vmax.f32 %v9466_v13, %v9468_v31 }
 0x376   : > { %v3746_v8 = vmax.f32 %v3725_v12, 0.0  ;;  %v3726_v6 = vadd.f32 %v9531_v45, %v3705_v61 }
 0x377   : > { %v3413_v9 = vpop.f32.mrb[248].mxu0 }
 0x378   : > { %v3662_v29 = vpop.f32.mrb[248].mxu1  ;;  %v5997_v4 = vpack.c.bf16 %v3746_v8, %v3746_v8  ;;  %v3747_v39 = vmax.f32 %v3726_v6, 0.0  ;;  %v3457_v47 = vmax.f32 %v10022_v20, %v3413_v9  ;;  %v6863_v62 = vpop.f32.mrb[249].mxu0 }
 0x379   : > { %v6917_v18 = vpop.f32.mrb[249].mxu1  ;;  %v3416_v36 = vpop.f32.mrb[250].mxu0 }
 0x37a   : > { %v3665_v23 = vpop.f32.mrb[250].mxu1  ;;  %5718 = vst.msk [vmem:[%s8555_s14 + $0xd8] sm:$0xf] %vm1591_vm4, %v5997_v4  ;;  %v5998_v10 = vpack.c.bf16 %v3747_v39, %v3747_v39  ;;  %v3706_v25 = vmax.f32 %v3457_v47, %v3662_v29  ;;  %v3458_v30 = vmax.f32 %v10023_v26, %v3416_v36  ;;  %v6864_v27 = vpop.f32.mrb[251].mxu0 }
 0x37b   : > { %v6918_v41 = vpop.f32.mrb[251].mxu1 }
 0x37c   : > { %5719 = vst.msk [vmem:[%s8555_s14 + $0xdc] sm:$0xf] %vm1591_vm4, %v5998_v10  ;;  %v3727_v46 = vadd.f32 %v9531_v45, %v3706_v25  ;;  %v3707_v0 = vmax.f32 %v3458_v30, %v3665_v23 }
 0x37e   : > { %v3748_v40 = vmax.f32 %v3727_v46, 0.0  ;;  %v3728_v42 = vadd.f32 %v9531_v45, %v3707_v0 }
 0x37f   : > { %v3421_v19 = vpop.f32.mrb[252].mxu0 }
 0x380   : > { %v3670_v16 = vpop.f32.mrb[252].mxu1  ;;  %v5999_v43 = vpack.c.bf16 %v3748_v40, %v3748_v40  ;;  %v3749_v24 = vmax.f32 %v3728_v42, 0.0  ;;  %v3459_v15 = vmax.f32 %v10024_v60, %v3421_v19  ;;  %v6867_v63 = vpop.f32.mrb[253].mxu0 }
 0x381   : > { %v6921_v50 = vpop.f32.mrb[253].mxu1  ;;  %v3424_v32 = vpop.f32.mrb[254].mxu0 }
 0x382   : > { %v3673_v7 = vpop.f32.mrb[254].mxu1  ;;  %5720 = vst.msk [vmem:[%s8555_s14 + $0xe0] sm:$0xf] %vm1591_vm4, %v5999_v43  ;;  %v6000_v28 = vpack.c.bf16 %v3749_v24, %v3749_v24  ;;  %v3708_v17 = vmax.f32 %v3459_v15, %v3670_v16  ;;  %v3460_v3 = vmax.f32 %v10025_v14, %v3424_v32  ;;  %v6868_v52 = vpop.f32.mrb[255].mxu0 }
 0x383   : > { %v6922_v33 = vpop.f32.mrb[255].mxu1 }
 0x384   : > { %5721 = vst.msk [vmem:[%s8555_s14 + $0xe4] sm:$0xf] %vm1591_vm4, %v6000_v28  ;;  %v3729_v56 = vadd.f32 %v9531_v45, %v3708_v17  ;;  %v3709_v58 = vmax.f32 %v3460_v3, %v3673_v7 }
 0x386   : > { %v3750_v22 = vmax.f32 %v3729_v56, 0.0  ;;  %v3730_v44 = vadd.f32 %v9531_v45, %v3709_v58 }
 0x387   : > { %v3429_v49 = vpop.f32.mrb[0].mxu0 }
 0x388   : > { %v3678_v51 = vpop.f32.mrb[0].mxu1  ;;  %v6001_v38 = vpack.c.bf16 %v3750_v22, %v3750_v22  ;;  %v3751_v37 = vmax.f32 %v3730_v44, 0.0  ;;  %v3461_v1 = vmax.f32 %v10026_v55, %v3429_v49  ;;  %v6871_v11 = vpop.f32.mrb[1].mxu0 }
 0x389   : > { %v6925_v35 = vpop.f32.mrb[1].mxu1  ;;  %v3432_v21 = vpop.f32.mrb[2].mxu0 }
 0x38a   : > { %v3681_v59 = vpop.f32.mrb[2].mxu1  ;;  %5722 = vst.msk [vmem:[%s8555_s14 + $0xe8] sm:$0xf] %vm1591_vm4, %v6001_v38  ;;  %v6002_v34 = vpack.c.bf16 %v3751_v37, %v3751_v37  ;;  %v3710_v53 = vmax.f32 %v3461_v1, %v3678_v51  ;;  %v3462_v12 = vmax.f32 %v10027_v54, %v3432_v21  ;;  %v6872_v61 = vpop.f32.mrb[3].mxu0 }
 0x38b   : > { %v6926_v8 = vpop.f32.mrb[3].mxu1 }
 0x38c   : > { %5723 = vst.msk [vmem:[%s8555_s14 + $0xec] sm:$0xf] %vm1591_vm4, %v6002_v34  ;;  %v3731_v2 = vadd.f32 %v9531_v45, %v3710_v53  ;;  %v3711_v48 = vmax.f32 %v3462_v12, %v3681_v59 }
 0x38e   : > { %v3752_v6 = vmax.f32 %v3731_v2, 0.0  ;;  %v3732_v9 = vadd.f32 %v9531_v45, %v3711_v48 }
 0x38f   : > { %v3437_v29 = vpop.f32.mrb[4].mxu0 }
 0x390   : > { %v3686_v4 = vpop.f32.mrb[4].mxu1  ;;  %v6003_v39 = vpack.c.bf16 %v3752_v6, %v3752_v6  ;;  %v3753_v20 = vmax.f32 %v3732_v9, 0.0  ;;  %v3463_v57 = vmax.f32 %v10028_v5, %v3437_v29  ;;  %v6875_v47 = vpop.f32.mrb[5].mxu0 }
 0x391   : > { %v6929_v62 = vpop.f32.mrb[5].mxu1  ;;  %v3440_v18 = vpop.f32.mrb[6].mxu0 }
 0x392   : > { %v3689_v36 = vpop.f32.mrb[6].mxu1  ;;  %5724 = vst.msk [vmem:[%s8555_s14 + $0xf0] sm:$0xf] %vm1591_vm4, %v6003_v39  ;;  %v6004_v23 = vpack.c.bf16 %v3753_v20, %v3753_v20  ;;  %v3712_v10 = vmax.f32 %v3463_v57, %v3686_v4  ;;  %v6876_v25 = vpop.f32.mrb[7].mxu0 }
 0x393   : > { %v6930_v26 = vpop.f32.mrb[7].mxu1 }
 0x394   : > { %5725 = vst.msk [vmem:[%s8555_s14 + $0xf4] sm:$0xf] %vm1591_vm4, %v6004_v23  ;;  %v3733_v30 = vadd.f32 %v9531_v45, %v3712_v10 }
 0x396   : > { %v3754_v27 = vmax.f32 %v3733_v30, 0.0 }
 0x397   : > { %v9653_v41 = vpop.f32.mrb[8].mxu0 }
 0x398   : > { %v9655_v13 = vpop.f32.mrb[8].mxu1  ;;  %v6005_v31 = vpack.c.bf16 %v3754_v27, %v3754_v27  ;;  %v6943_v0 = vpop.f32.mrb[9].mxu0 }
 0x399   : > { %v4318_v46 = vmax.f32 %v9653_v41, %v9655_v13  ;;  %v6997_v40 = vpop.f32.mrb[9].mxu1  ;;  %v9659_v42 = vpop.f32.mrb[10].mxu0 }
 0x39a   : > { %v9661_v19 = vpop.f32.mrb[10].mxu1  ;;  %5726 = vst.msk [vmem:[%s8555_s14 + $0xf8] sm:$0x3] %vm1612_vm5, %v6005_v31  ;;  %v6944_v43 = vpop.f32.mrb[11].mxu0 }
 0x39b   : > { %v4319_v16 = vmax.f32 %v9659_v42, %v9661_v19  ;;  %v6998_v24 = vpop.f32.mrb[11].mxu1 }
 0x39f   : > { %v9667_v60 = vpop.f32.mrb[12].mxu0 }
 0x3a0   : > { %v9669_v15 = vpop.f32.mrb[12].mxu1  ;;  %v6947_v50 = vpop.f32.mrb[13].mxu0 }
 0x3a1   : > { %v4320_v63 = vmax.f32 %v9667_v60, %v9669_v15  ;;  %v7001_v32 = vpop.f32.mrb[13].mxu1  ;;  %v9673_v7 = vpop.f32.mrb[14].mxu0 }
 0x3a2   : > { %v9675_v28 = vpop.f32.mrb[14].mxu1  ;;  %v6948_v14 = vpop.f32.mrb[15].mxu0 }
 0x3a3   : > { %v4321_v17 = vmax.f32 %v9673_v7, %v9675_v28  ;;  %v7002_v3 = vpop.f32.mrb[15].mxu1 }
 0x3a7   : > { %v9679_v52 = vpop.f32.mrb[16].mxu0 }
 0x3a8   : > { %v9681_v33 = vpop.f32.mrb[16].mxu1  ;;  %v6951_v58 = vpop.f32.mrb[17].mxu0 }
 0x3a9   : > { %v4322_v56 = vmax.f32 %v9679_v52, %v9681_v33  ;;  %v7005_v22 = vpop.f32.mrb[17].mxu1  ;;  %v9685_v44 = vpop.f32.mrb[18].mxu0 }
 0x3aa   : > { %v9687_v49 = vpop.f32.mrb[18].mxu1  ;;  %v6952_v38 = vpop.f32.mrb[19].mxu0 }
 0x3ab   : > { %v4323_v51 = vmax.f32 %v9685_v44, %v9687_v49  ;;  %v7006_v37 = vpop.f32.mrb[19].mxu1 }
 0x3af   : > { %v9691_v55 = vpop.f32.mrb[20].mxu0 }
 0x3b0   : > { %v9693_v1 = vpop.f32.mrb[20].mxu1  ;;  %v6955_v35 = vpop.f32.mrb[21].mxu0 }
 0x3b1   : > { %v7009_v21 = vpop.f32.mrb[21].mxu1  ;;  %v9697_v59 = vpop.f32.mrb[22].mxu0  ;;  %v10029_v44 = vmax.f32 %v9691_v55, %v9693_v1 }
 0x3b2   : > { %v9699_v34 = vpop.f32.mrb[22].mxu1  ;;  %v6956_v54 = vpop.f32.mrb[23].mxu0 }
 0x3b3   : > { %v7010_v12 = vpop.f32.mrb[23].mxu1 }
 0x3b7   : > { %v9703_v61 = vpop.f32.mrb[24].mxu0 }
 0x3b8   : > { %v9705_v8 = vpop.f32.mrb[24].mxu1  ;;  %v6959_v48 = vpop.f32.mrb[25].mxu0 }
 0x3b9   : > { %v7013_v6 = vpop.f32.mrb[25].mxu1  ;;  %v9709_v9 = vpop.f32.mrb[26].mxu0 }
 0x3ba   : > { %v9711_v29 = vpop.f32.mrb[26].mxu1  ;;  %v6960_v39 = vpop.f32.mrb[27].mxu0 }
 0x3bb   : > { %v7014_v20 = vpop.f32.mrb[27].mxu1 }
 0x3bf   : > { %v9715_v5 = vpop.f32.mrb[28].mxu0 }
 0x3c0   : > { %v9717_v57 = vpop.f32.mrb[28].mxu1  ;;  %v6963_v62 = vpop.f32.mrb[29].mxu0 }
 0x3c1   : > { %v7017_v18 = vpop.f32.mrb[29].mxu1  ;;  %v9721_v36 = vpop.f32.mrb[30].mxu0 }
 0x3c2   : > { %v9723_v23 = vpop.f32.mrb[30].mxu1  ;;  %v6964_v25 = vpop.f32.mrb[31].mxu0 }
 0x3c3   : > { %v7018_v26 = vpop.f32.mrb[31].mxu1 }
 0x3c7   : > { %v9727_v30 = vpop.f32.mrb[32].mxu0 }
 0x3c8   : > { %v9729_v27 = vpop.f32.mrb[32].mxu1  ;;  %v6967_v0 = vpop.f32.mrb[33].mxu0 }
 0x3c9   : > { %v7021_v40 = vpop.f32.mrb[33].mxu1  ;;  %v9733_v43 = vpop.f32.mrb[34].mxu0 }
 0x3ca   : > { %v9735_v24 = vpop.f32.mrb[34].mxu1  ;;  %v6968_v32 = vpop.f32.mrb[35].mxu0 }
 0x3cb   : > { %v7022_v14 = vpop.f32.mrb[35].mxu1 }
 0x3cf   : > { %v9739_v3 = vpop.f32.mrb[36].mxu0 }
 0x3d0   : > { %v9741_v58 = vpop.f32.mrb[36].mxu1  ;;  %v6971_v38 = vpop.f32.mrb[37].mxu0 }
 0x3d1   : > { %v7025_v37 = vpop.f32.mrb[37].mxu1  ;;  %v9745_v35 = vpop.f32.mrb[38].mxu0 }
 0x3d2   : > { %v9747_v21 = vpop.f32.mrb[38].mxu1  ;;  %v6972_v12 = vpop.f32.mrb[39].mxu0 }
 0x3d3   : > { %v7026_v48 = vpop.f32.mrb[39].mxu1 }
 0x3d7   : > { %v9751_v6 = vpop.f32.mrb[40].mxu0 }
 0x3d8   : > { %v9753_v39 = vpop.f32.mrb[40].mxu1  ;;  %v6975_v62 = vpop.f32.mrb[41].mxu0 }
 0x3d9   : > { %v7029_v18 = vpop.f32.mrb[41].mxu1  ;;  %v9757_v25 = vpop.f32.mrb[42].mxu0 }
 0x3da   : > { %v9759_v26 = vpop.f32.mrb[42].mxu1  ;;  %v6976_v40 = vpop.f32.mrb[43].mxu0 }
 0x3db   : > { %v7030_v32 = vpop.f32.mrb[43].mxu1 }
 0x3df   : > { %v9763_v14 = vpop.f32.mrb[44].mxu0 }
 0x3e0   : > { %v9765_v38 = vpop.f32.mrb[44].mxu1  ;;  %v6979_v12 = vpop.f32.mrb[45].mxu0 }
 0x3e1   : > { %v7033_v48 = vpop.f32.mrb[45].mxu1  ;;  %v9769_v62 = vpop.f32.mrb[46].mxu0 }
 0x3e2   : > { %v9771_v18 = vpop.f32.mrb[46].mxu1  ;;  %v6980_v54 = vpop.f32.mrb[47].mxu0 }
 0x3e3   : > { %v7034_v0 = vpop.f32.mrb[47].mxu1 }
 0x3e7   : > { %v9775_v40 = vpop.f32.mrb[48].mxu0 }
 0x3e8   : > { %v9777_v32 = vpop.f32.mrb[48].mxu1  ;;  %v6983_v50 = vpop.f32.mrb[49].mxu0 }
 0x3e9   : > { %v7037_v37 = vpop.f32.mrb[49].mxu1  ;;  %v4087_v12 = vpop.f32.mrb[50].mxu0 }
 0x3ea   : > { %v4315_v48 = vpop.f32.mrb[50].mxu1  ;;  %v6984_v31 = vpop.f32.mrb[51].mxu0 }
 0x3eb   : > { %v7038_v10 = vpop.f32.mrb[51].mxu1 }
 0x3ef   : > { %v4481_v47 = vpop.f32.mrb[52].mxu0 }
 0x3f0   : > { %v4730_v4 = vpop.f32.mrb[52].mxu1  ;;  %v4567_v54 = vmax.f32 %v4318_v46, %v4481_v47  ;;  %v7051_v0 = vpop.f32.mrb[53].mxu0 }
 0x3f1   : > { %v7105_v20 = vpop.f32.mrb[53].mxu1  ;;  %v4484_v2 = vpop.f32.mrb[54].mxu0 }
 0x3f2   : > { %v4733_v53 = vpop.f32.mrb[54].mxu1  ;;  %v4816_v11 = vmax.f32 %v4567_v54, %v4730_v4  ;;  %v4568_v50 = vmax.f32 %v4319_v16, %v4484_v2  ;;  %v7052_v37 = vpop.f32.mrb[55].mxu0 }
 0x3f3   : > { %v7106_v12 = vpop.f32.mrb[55].mxu1 }
 0x3f4   : > { %v4837_v10 = vadd.f32 %v9531_v45, %v4816_v11  ;;  %v4817_v31 = vmax.f32 %v4568_v50, %v4733_v53 }
 0x3f6   : > { %v4858_v48 = vmax.f32 %v4837_v10, 0.0  ;;  %v4838_v22 = vadd.f32 %v9531_v45, %v4817_v31 }
 0x3f7   : > { %v4489_v41 = vpop.f32.mrb[56].mxu0 }
 0x3f8   : > { %v4738_v13 = vpop.f32.mrb[56].mxu1  ;;  %v6006_v46 = vpack.c.bf16 %v4858_v48, %v4858_v48  ;;  %v4859_v47 = vmax.f32 %v4838_v22, 0.0  ;;  %v4569_v4 = vmax.f32 %v4320_v63, %v4489_v41  ;;  %v7055_v42 = vpop.f32.mrb[57].mxu0 }
 0x3f9   : > { %v7109_v19 = vpop.f32.mrb[57].mxu1  ;;  %v4492_v16 = vpop.f32.mrb[58].mxu0 }
 0x3fa   : > { %v4741_v2 = vpop.f32.mrb[58].mxu1  ;;  %5920 = vst.msk [vmem:[%s8555_s14 + $0xfc] sm:$0xf] %vm1591_vm4, %v6006_v46  ;;  %v6007_v11 = vpack.c.bf16 %v4859_v47, %v4859_v47  ;;  %v4818_v53 = vmax.f32 %v4569_v4, %v4738_v13  ;;  %v4570_v20 = vmax.f32 %v4321_v17, %v4492_v16  ;;  %v7056_v54 = vpop.f32.mrb[59].mxu0 }
 0x3fb   : > { %v7110_v0 = vpop.f32.mrb[59].mxu1 }
 0x3fc   : > { %5921 = vst.msk [vmem:[%s8555_s14 + $0x100] sm:$0xf] %vm1591_vm4, %v6007_v11  ;;  %v4839_v60 = vadd.f32 %v9531_v45, %v4818_v53  ;;  %v4819_v15 = vmax.f32 %v4570_v20, %v4741_v2 }
 0x3fe   : > { %v4860_v63 = vmax.f32 %v4839_v60, 0.0  ;;  %v4840_v22 = vadd.f32 %v9531_v45, %v4819_v15  ;;  %v10030_v15 = vmax.f32 %v9697_v59, %v9699_v34  ;;  %v10031_v59 = vmax.f32 %v9703_v61, %v9705_v8 }
 0x3ff   : > { %v4497_v50 = vpop.f32.mrb[60].mxu0 }
 0x400   : > { %v4746_v37 = vpop.f32.mrb[60].mxu1  ;;  %v6008_v12 = vpack.c.bf16 %v4860_v63, %v4860_v63  ;;  %v4861_v10 = vmax.f32 %v4840_v22, 0.0  ;;  %v4571_v7 = vmax.f32 %v4322_v56, %v4497_v50  ;;  %v7059_v28 = vpop.f32.mrb[61].mxu0 }
 0x401   : > { %v7113_v17 = vpop.f32.mrb[61].mxu1  ;;  %v4500_v31 = vpop.f32.mrb[62].mxu0 }
 0x402   : > { %v4749_v48 = vpop.f32.mrb[62].mxu1  ;;  %5922 = vst.msk [vmem:[%s8555_s14 + $0x104] sm:$0xf] %vm1591_vm4, %v6008_v12  ;;  %v6009_v41 = vpack.c.bf16 %v4861_v10, %v4861_v10  ;;  %v4820_v13 = vmax.f32 %v4571_v7, %v4746_v37  ;;  %v4572_v46 = vmax.f32 %v4323_v51, %v4500_v31  ;;  %v7060_v47 = vpop.f32.mrb[63].mxu0 }
 0x403   : > { %v7114_v4 = vpop.f32.mrb[63].mxu1 }
 0x404   : > { %5923 = vst.msk [vmem:[%s8555_s14 + $0x108] sm:$0xf] %vm1591_vm4, %v6009_v41  ;;  %v4841_v52 = vadd.f32 %v9531_v45, %v4820_v13  ;;  %v4821_v33 = vmax.f32 %v4572_v46, %v4749_v48  ;;  %v10032_v4 = vmax.f32 %v9709_v9, %v9711_v29  ;;  %v10033_v9 = vmax.f32 %v9715_v5, %v9717_v57 }
 0x406   : > { %v4862_v56 = vmax.f32 %v4841_v52, 0.0  ;;  %v4842_v42 = vadd.f32 %v9531_v45, %v4821_v33 }
 0x407   : > { %v4505_v19 = vpop.f32.mrb[64].mxu0 }
 0x408   : > { %v4754_v16 = vpop.f32.mrb[64].mxu1  ;;  %v6010_v2 = vpack.c.bf16 %v4862_v56, %v4862_v56  ;;  %v4863_v11 = vmax.f32 %v4842_v42, 0.0  ;;  %v4573_v49 = vmax.f32 %v10029_v44, %v4505_v19  ;;  %v7063_v51 = vpop.f32.mrb[65].mxu0 }
 0x409   : > { %v7117_v53 = vpop.f32.mrb[65].mxu1  ;;  %v4508_v20 = vpop.f32.mrb[66].mxu0 }
 0x40a   : > { %v4757_v54 = vpop.f32.mrb[66].mxu1  ;;  %5924 = vst.msk [vmem:[%s8555_s14 + $0x10c] sm:$0xf] %vm1591_vm4, %v6010_v2  ;;  %v6011_v0 = vpack.c.bf16 %v4863_v11, %v4863_v11  ;;  %v4822_v60 = vmax.f32 %v4573_v49, %v4754_v16  ;;  %v4574_v63 = vmax.f32 %v10030_v15, %v4508_v20  ;;  %v7064_v22 = vpop.f32.mrb[67].mxu0 }
 0x40b   : > { %v7118_v50 = vpop.f32.mrb[67].mxu1 }
 0x40c   : > { %5925 = vst.msk [vmem:[%s8555_s14 + $0x110] sm:$0xf] %vm1591_vm4, %v6011_v0  ;;  %v4843_v55 = vadd.f32 %v9531_v45, %v4822_v60  ;;  %v4823_v1 = vmax.f32 %v4574_v63, %v4757_v54  ;;  %v10034_v60 = vmax.f32 %v9721_v36, %v9723_v23  ;;  %v10035_v36 = vmax.f32 %v9727_v30, %v9729_v27 }
 0x40e   : > { %v4864_v37 = vmax.f32 %v4843_v55, 0.0  ;;  %v4844_v12 = vadd.f32 %v9531_v45, %v4823_v1 }
 0x40f   : > { %v4513_v10 = vpop.f32.mrb[68].mxu0 }
 0x410   : > { %v4762_v7 = vpop.f32.mrb[68].mxu1  ;;  %v6012_v28 = vpack.c.bf16 %v4864_v37, %v4864_v37  ;;  %v4865_v17 = vmax.f32 %v4844_v12, 0.0  ;;  %v4575_v34 = vmax.f32 %v10031_v59, %v4513_v10  ;;  %v7067_v31 = vpop.f32.mrb[69].mxu0 }
 0x411   : > { %v7121_v48 = vpop.f32.mrb[69].mxu1  ;;  %v4516_v41 = vpop.f32.mrb[70].mxu0 }
 0x412   : > { %v4765_v13 = vpop.f32.mrb[70].mxu1  ;;  %5926 = vst.msk [vmem:[%s8555_s14 + $0x114] sm:$0xf] %vm1591_vm4, %v6012_v28  ;;  %v6013_v46 = vpack.c.bf16 %v4865_v17, %v4865_v17  ;;  %v4824_v47 = vmax.f32 %v4575_v34, %v4762_v7  ;;  %v4576_v52 = vmax.f32 %v10032_v4, %v4516_v41  ;;  %v7068_v33 = vpop.f32.mrb[71].mxu0  ;;  %v10036_v48 = vmax.f32 %v9733_v43, %v9735_v24 }
 0x413   : > { %v7122_v56 = vpop.f32.mrb[71].mxu1  ;;  %v10037_v43 = vmax.f32 %v9739_v3, %v9741_v58 }
 0x414   : > { %5927 = vst.msk [vmem:[%s8555_s14 + $0x118] sm:$0xf] %vm1591_vm4, %v6013_v46  ;;  %v4845_v61 = vadd.f32 %v9531_v45, %v4824_v47  ;;  %v4825_v8 = vmax.f32 %v4576_v52, %v4765_v13 }
 0x416   : > { %v4866_v42 = vmax.f32 %v4845_v61, 0.0  ;;  %v4846_v19 = vadd.f32 %v9531_v45, %v4825_v8 }
 0x417   : > { %v4521_v16 = vpop.f32.mrb[72].mxu0 }
 0x418   : > { %v4770_v2 = vpop.f32.mrb[72].mxu1  ;;  %v6014_v11 = vpack.c.bf16 %v4866_v42, %v4866_v42  ;;  %v4867_v44 = vmax.f32 %v4846_v19, 0.0  ;;  %v4577_v29 = vmax.f32 %v10033_v9, %v4521_v16  ;;  %v7071_v49 = vpop.f32.mrb[73].mxu0 }
 0x419   : > { %v7125_v51 = vpop.f32.mrb[73].mxu1  ;;  %v4524_v53 = vpop.f32.mrb[74].mxu0 }
 0x41a   : > { %v4773_v20 = vpop.f32.mrb[74].mxu1  ;;  %5928 = vst.msk [vmem:[%s8555_s14 + $0x11c] sm:$0xf] %vm1591_vm4, %v6014_v11  ;;  %v6015_v54 = vpack.c.bf16 %v4867_v44, %v4867_v44  ;;  %v4826_v0 = vmax.f32 %v4577_v29, %v4770_v2  ;;  %v4578_v15 = vmax.f32 %v10034_v60, %v4524_v53  ;;  %v7072_v63 = vpop.f32.mrb[75].mxu0  ;;  %v10038_v44 = vmax.f32 %v9745_v35, %v9747_v21 }
 0x41b   : > { %v7126_v22 = vpop.f32.mrb[75].mxu1  ;;  %v10039_v35 = vmax.f32 %v9751_v6, %v9753_v39 }
 0x41c   : > { %5929 = vst.msk [vmem:[%s8555_s14 + $0x120] sm:$0xf] %vm1591_vm4, %v6015_v54  ;;  %v4847_v5 = vadd.f32 %v9531_v45, %v4826_v0  ;;  %v4827_v57 = vmax.f32 %v4578_v15, %v4773_v20 }
 0x41e   : > { %v4868_v50 = vmax.f32 %v4847_v5, 0.0  ;;  %v4848_v55 = vadd.f32 %v9531_v45, %v4827_v57 }
 0x41f   : > { %v4529_v1 = vpop.f32.mrb[76].mxu0 }
 0x420   : > { %v4778_v37 = vpop.f32.mrb[76].mxu1  ;;  %v6016_v12 = vpack.c.bf16 %v4868_v50, %v4868_v50  ;;  %v4869_v10 = vmax.f32 %v4848_v55, 0.0  ;;  %v4579_v23 = vmax.f32 %v10035_v36, %v4529_v1  ;;  %v7075_v7 = vpop.f32.mrb[77].mxu0  ;;  %v10040_v55 = vmax.f32 %v9757_v25, %v9759_v26 }
 0x421   : > { %v7129_v28 = vpop.f32.mrb[77].mxu1  ;;  %v4532_v17 = vpop.f32.mrb[78].mxu0  ;;  %v10041_v25 = vmax.f32 %v9763_v14, %v9765_v38 }
 0x422   : > { %v4781_v59 = vpop.f32.mrb[78].mxu1  ;;  %5930 = vst.msk [vmem:[%s8555_s14 + $0x124] sm:$0xf] %vm1591_vm4, %v6016_v12  ;;  %v6017_v34 = vpack.c.bf16 %v4869_v10, %v4869_v10  ;;  %v4828_v31 = vmax.f32 %v4579_v23, %v4778_v37  ;;  %v4580_v41 = vmax.f32 %v10036_v48, %v4532_v17  ;;  %v7076_v13 = vpop.f32.mrb[79].mxu0 }
 0x423   : > { %v7130_v46 = vpop.f32.mrb[79].mxu1 }
 0x424   : > { %5931 = vst.msk [vmem:[%s8555_s14 + $0x128] sm:$0xf] %vm1591_vm4, %v6017_v34  ;;  %v4849_v30 = vadd.f32 %v9531_v45, %v4828_v31  ;;  %v4829_v27 = vmax.f32 %v4580_v41, %v4781_v59  ;;  %v10042_v46 = vmax.f32 %v9769_v62, %v9771_v18  ;;  %v10043_v62 = vmax.f32 %v9775_v40, %v9777_v32 }
 0x426   : > { %v4870_v47 = vmax.f32 %v4849_v30, 0.0  ;;  %v4850_v4 = vadd.f32 %v9531_v45, %v4829_v27 }
 0x427   : > { %v4537_v52 = vpop.f32.mrb[80].mxu0 }
 0x428   : > { %v4786_v33 = vpop.f32.mrb[80].mxu1  ;;  %v6018_v56 = vpack.c.bf16 %v4870_v47, %v4870_v47  ;;  %v4871_v61 = vmax.f32 %v4850_v4, 0.0  ;;  %v4581_v24 = vmax.f32 %v10037_v43, %v4537_v52  ;;  %v7079_v8 = vpop.f32.mrb[81].mxu0 }
 0x429   : > { %v7133_v42 = vpop.f32.mrb[81].mxu1  ;;  %v4540_v19 = vpop.f32.mrb[82].mxu0 }
 0x42a   : > { %v4789_v16 = vpop.f32.mrb[82].mxu1  ;;  %5932 = vst.msk [vmem:[%s8555_s14 + $0x12c] sm:$0xf] %vm1591_vm4, %v6018_v56  ;;  %v6019_v2 = vpack.c.bf16 %v4871_v61, %v4871_v61  ;;  %v4830_v11 = vmax.f32 %v4581_v24, %v4786_v33  ;;  %v4582_v9 = vmax.f32 %v10038_v44, %v4540_v19  ;;  %v7080_v29 = vpop.f32.mrb[83].mxu0 }
 0x42b   : > { %v7134_v49 = vpop.f32.mrb[83].mxu1 }
 0x42c   : > { %5933 = vst.msk [vmem:[%s8555_s14 + $0x130] sm:$0xf] %vm1591_vm4, %v6019_v2  ;;  %v4851_v3 = vadd.f32 %v9531_v45, %v4830_v11  ;;  %v4831_v58 = vmax.f32 %v4582_v9, %v4789_v16 }
 0x42e   : > { %v4872_v51 = vmax.f32 %v4851_v3, 0.0  ;;  %v4852_v53 = vadd.f32 %v9531_v45, %v4831_v58 }
 0x42f   : > { %v4545_v20 = vpop.f32.mrb[84].mxu0 }
 0x430   : > { %v4794_v54 = vpop.f32.mrb[84].mxu1  ;;  %v6020_v0 = vpack.c.bf16 %v4872_v51, %v4872_v51  ;;  %v4873_v60 = vmax.f32 %v4852_v53, 0.0  ;;  %v4583_v21 = vmax.f32 %v10039_v35, %v4545_v20  ;;  %v7083_v15 = vpop.f32.mrb[85].mxu0 }
 0x431   : > { %v7137_v63 = vpop.f32.mrb[85].mxu1  ;;  %v4548_v22 = vpop.f32.mrb[86].mxu0 }
 0x432   : > { %v4797_v5 = vpop.f32.mrb[86].mxu1  ;;  %5934 = vst.msk [vmem:[%s8555_s14 + $0x134] sm:$0xf] %vm1591_vm4, %v6020_v0  ;;  %v6021_v57 = vpack.c.bf16 %v4873_v60, %v4873_v60  ;;  %v4832_v50 = vmax.f32 %v4583_v21, %v4794_v54  ;;  %v4584_v1 = vmax.f32 %v10040_v55, %v4548_v22  ;;  %v7084_v37 = vpop.f32.mrb[87].mxu0 }
 0x433   : > { %v7138_v12 = vpop.f32.mrb[87].mxu1 }
 0x434   : > { %5935 = vst.msk [vmem:[%s8555_s14 + $0x138] sm:$0xf] %vm1591_vm4, %v6021_v57  ;;  %v4853_v6 = vadd.f32 %v9531_v45, %v4832_v50  ;;  %v4833_v39 = vmax.f32 %v4584_v1, %v4797_v5 }
 0x436   : > { %v4874_v10 = vmax.f32 %v4853_v6, 0.0  ;;  %v4854_v36 = vadd.f32 %v9531_v45, %v4833_v39 }
 0x437   : > { %v4553_v23 = vpop.f32.mrb[88].mxu0 }
 0x438   : > { %v4802_v7 = vpop.f32.mrb[88].mxu1  ;;  %v6022_v28 = vpack.c.bf16 %v4874_v10, %v4874_v10  ;;  %v4875_v17 = vmax.f32 %v4854_v36, 0.0  ;;  %v4585_v26 = vmax.f32 %v10041_v25, %v4553_v23  ;;  %v7087_v59 = vpop.f32.mrb[89].mxu0 }
 0x439   : > { %v7141_v34 = vpop.f32.mrb[89].mxu1  ;;  %v4556_v31 = vpop.f32.mrb[90].mxu0 }
 0x43a   : > { %v4805_v48 = vpop.f32.mrb[90].mxu1  ;;  %5936 = vst.msk [vmem:[%s8555_s14 + $0x13c] sm:$0xf] %vm1591_vm4, %v6022_v28  ;;  %v6023_v41 = vpack.c.bf16 %v4875_v17, %v4875_v17  ;;  %v4834_v13 = vmax.f32 %v4585_v26, %v4802_v7  ;;  %v4586_v30 = vmax.f32 %v10042_v46, %v4556_v31  ;;  %v7088_v27 = vpop.f32.mrb[91].mxu0 }
 0x43b   : > { %v7142_v47 = vpop.f32.mrb[91].mxu1 }
 0x43c   : > { %5937 = vst.msk [vmem:[%s8555_s14 + $0x140] sm:$0xf] %vm1591_vm4, %v6023_v41  ;;  %v4855_v14 = vadd.f32 %v9531_v45, %v4834_v13  ;;  %v4835_v38 = vmax.f32 %v4586_v30, %v4805_v48 }
 0x43e   : > { %v4876_v4 = vmax.f32 %v4855_v14, 0.0  ;;  %v4856_v52 = vadd.f32 %v9531_v45, %v4835_v38 }
 0x43f   : > { %v4561_v33 = vpop.f32.mrb[92].mxu0 }
 0x440   : > { %v4810_v56 = vpop.f32.mrb[92].mxu1  ;;  %v6024_v61 = vpack.c.bf16 %v4876_v4, %v4876_v4  ;;  %v4877_v43 = vmax.f32 %v4856_v52, 0.0  ;;  %v4587_v18 = vmax.f32 %v10043_v62, %v4561_v33  ;;  %v7091_v24 = vpop.f32.mrb[93].mxu0 }
 0x441   : > { %v7145_v8 = vpop.f32.mrb[93].mxu1  ;;  %v4564_v42 = vpop.f32.mrb[94].mxu0 }
 0x442   : > { %v4813_v19 = vpop.f32.mrb[94].mxu1  ;;  %5938 = vst.msk [vmem:[%s8555_s14 + $0x144] sm:$0xf] %vm1591_vm4, %v6024_v61  ;;  %v6025_v16 = vpack.c.bf16 %v4877_v43, %v4877_v43  ;;  %v4836_v2 = vmax.f32 %v4587_v18, %v4810_v56  ;;  %v7092_v11 = vpop.f32.mrb[95].mxu0 }
 0x443   : > { %v7146_v44 = vpop.f32.mrb[95].mxu1 }
 0x444   : > { %5939 = vst.msk [vmem:[%s8555_s14 + $0x148] sm:$0xf] %vm1591_vm4, %v6025_v16  ;;  %v4857_v9 = vadd.f32 %v9531_v45, %v4836_v2 }
 0x446   : > { %v4878_v29 = vmax.f32 %v4857_v9, 0.0 }
 0x448   : > { %v6026_v49 = vpack.c.bf16 %v4878_v29, %v4878_v29 }
 0x44a   : > { %5940 = vst.msk [vmem:[%s8555_s14 + $0x14c] sm:$0x3] %vm1612_vm5, %v6026_v49 }
 0x44b PF: > { %s25_s28 = sadd.s32 1, %s7638_s28   ;;  %s10044_s11 = sld [smem:[#allocation12_spill]] }
 0x44c   : > { %p22_p8 = scmp.ge.s32.totalorder %s25_s28, 84   ;;  %s10045_s23 = sld [smem:[#allocation17_spill]] }
 0x44d   : > { %s10046_s24 = sld [smem:[#allocation13_spill]]  ;;  %s10047_s25 = sld [smem:[#allocation14_spill]] }
 0x44e   : > { %s10048_s26 = sld [smem:[#allocation15_spill]]  ;;  %s10049_s27 = sld [smem:[#allocation16_spill]] }
 0x44f   : > { %s10050_s21 = smov %s7614_s22  ;;  %24 = sbr.rel (!%p22_p8) target bundleno = 12 (0xc), region = 136 }
 0x451   : > { %s10051_s22 = smov %s10044_s11 }
 0x456   :  { %5018 = vsyncpa [#allocation3], 1 }
 0x457   :  { %5020 = vsyncpa [#allocation3 + $0x1], 1 }
 0x458   :  { %5021 = vsyncpa [#allocation5], 1 }
 0x459   :  { %5023 = vsyncpa [#allocation5 + $0x1], 1 }
 0x45a   :  { %5024 = vsyncpa [#allocation8], 1 }
 0x45b   :  { %5026 = vsyncpa [#allocation8 + $0x1], 1 }

// kernel: cnn_forward.4
= control target key start
LH: loop header
LB: loop body
LE: loop exit
PB: predicated region body
PF: predicated region fallthrough
CT: control target
= control target key end

     0   :  { %s5727_s0 = inlined_call_operand.vmem [shape: bf16[2,80,80,150], index: 0, kind: input, shape index: {}]   ;;  %s5728_s1 = inlined_call_operand.vmem [shape: bf16[2,80,80,150], index: 1, kind: input, shape index: {}]   ;;  %s5729_s2 = inlined_call_operand.hbm [shape: bf16[2,80,80,150], index: 2, kind: input, shape index: {}]   ;;  %s5730_s3 = inlined_call_operand.hbm [shape: bf16[2,80,80,150], index: 3, kind: input, shape index: {}]   ;;  %s5731_s4 = inlined_call_operand.vmem [shape: bf16[150,16], index: 4, kind: input, shape index: {}]   ;;  %s5732_s5 = inlined_call_operand.vmem [shape: f32[1,16], index: 5, kind: input, shape index: {}]   ;;  %s5733_s6 = inlined_call_operand.vmem [shape: bf16[2,80,80,16], index: 6, kind: output, shape index: {}]  }
   0x1   :  { %5739 = sst [smem:[#allocation10_spill]] %s5729_s2 }
   0x2   :  { %11 = vsyncpa [#allocation3], 0 }
   0x3   :  { %13 = vsyncpa [#allocation3 + $0x1], 0 }
   0x4   :  { %14 = vsyncpa [#allocation5], 0 }
   0x5   :  { %16 = vsyncpa [#allocation5 + $0x1], 0  ;;  %s4414_s21 = smov 0   ;;  %s4416_s22 = smov 0  }
   0x6   :  { %s4418_s23 = smov 0   ;;  %s4420_s24 = smov 0  }
   0x7   :  { %s4422_s25 = smov 0   ;;  %s4424_s26 = smov 0  }
   0x8   :  { %s4426_s27 = smov 0   ;;  %s4428_s28 = smov 0  }
   0x9 LB: > { %s3392_s29 = sadd.s32 4294967295, %s4372_s28   ;;  %s31_s30 = sadd.s32 1, %s4364_s26  ;;  %s4372_s28 = sphi %s4428_s28, %s22_s28   ;;  %s4368_s27 = sphi %s4426_s27, %s5758_s27   ;;  %s4364_s26 = sphi %s4424_s26, %s5757_s26   ;;  %s4360_s25 = sphi %s4422_s25, %s5756_s25   ;;  %s4356_s24 = sphi %s4420_s24, %s5755_s24   ;;  %s4352_s23 = sphi %s4418_s23, %s5754_s23   ;;  %s4348_s22 = sphi %s4416_s22, %s5753_s22   ;;  %s4344_s21 = sphi %s4414_s21, %s5752_s21  }
   0xa   : > { %p32_p0 = scmp.ge.s32.totalorder %s31_s30, 20  ;;  %s34_s7 = sadd.s32 1, %s4368_s27 }
   0xb   : > { %s99_s8 = sadd.s32 1, %s4352_s23  ;;  %p106_p1 = scmp.ne.s32.totalorder %s4352_s23, %s4348_s22 }
   0xc   : > { %s5760_s30 = smov (%p32_p0, %s31_s30), 0  ;;  %s5762_s7 = smov (!%p32_p0, %s34_s7), %s4368_s27 }
   0xd   : > { %5740 = sst [smem:[#allocation8_spill]] %s5760_s30  ;;  %s95_s9 = ssub.s32 %s4364_s26, %s5760_s30 }
   0xe   : > { %p107_p2 = scmp.eq.s32.totalorder %s4372_s28, 0  ;;  %p36_p3 = scmp.ge.s32.totalorder %s5762_s7, 2 }
   0xf   : > { %p112_p4 = scmp.ne.s32.totalorder %s4348_s22, %s4344_s21  ;;  %p113_p6 = scmp.eq.s32.totalorder %s3392_s29, 0 }
  0x10   : > { %p108_p5 = por %p107_p2, %p106_p1  ;;  %s5764_s7 = smov (%p36_p3, %s5762_s7), 0 }
  0x11   : > { %5741 = sst [smem:[#allocation9_spill]] %s5764_s7  ;;  %p4467_p7 = por %p113_p6, %p112_p4 }
  0x12   : > { %s94_s11 = ssub.s32 %s4368_s27, %s5764_s7  ;;  %p3914_p8 = scmp.lt.s32.totalorder %s4372_s28, 40 }
  0x13   : > { %s5742_s10 = scalar_select %p4467_p7, 1, 0 }
  0x14   : > { %s96_s12 = sor.u32 %s95_s9, %s94_s11  ;;  %s4475_s13 = sand.u32 1, %s4352_s23  }
  0x15   : > { %p97_p9 = scmp.eq.s32.totalorder %s96_s12, 0  ;;  %s5734_s14 = smul.u32 320, %s4475_s13 }
  0x16   : > { %p4478_p10 = pnand %p3914_p8, %p108_p5  ;;  %s3893_s17 = smul.u32 80, %s4364_s26 }
  0x17   : > { %s4483_s16 = scalar_select %p97_p9, %s4352_s23, %s99_s8  }
  0x18   : > { %s3894_s18 = smul.u32 1600, %s4368_s27  ;;  %s272_s19 = scalar_lea.vmem [#allocation2], %s5734_s14 }
  0x19   : > { %s282_s20 = sshll.u32 %s272_s19, 4  ;;  %s5744_s2 = sld [smem:[#allocation10_spill]]  ;;  %s4489_s20 = int_to_ptr.vmem [resolvable:$true] %s282_s20 }
  0x1a   : > { %s4491_s21 = sadd.s32 %s3894_s18, %s3893_s17  ;;  %s269_s8 = scalar_lea.sflag [#allocation3], %s4475_s13 }
  0x1b   : > { %s5735_s29 = sshll.u32 %s4491_s21, 6  ;;  %p4244_p13 = pneg %p4478_p10 }
  0x1f   : > { %s4499_s12 = scalar_lea.hbm %s5744_s2, %s5735_s29  ;;  %s4247_s9 = scalar_lea.hbm %s5744_s2, 204800 }
  0x20   : > { %s4242_s19 = scalar_lea.hbm %s4499_s12, 5120  ;;  %p4248_p2 = scmp.lt.u32.totalorder %s4499_s12, %s5744_s2 }
  0x21   : > { %p4243_p12 = scmp.ne.s32.totalorder %s4499_s12, %s4242_s19  ;;  %p4249_p3 = scmp.lt.u32.totalorder %s4247_s9, %s4242_s19 }
  0x22   : > { %p4251_p5 = scmp.lt.u32.totalorder %s4242_s19, %s4499_s12 }
  0x23   : > { %p4245_p0 = pnand %p4244_p13, %p4243_p12  ;;  %p4250_p4 = por %p4249_p3, %p4248_p2 }
  0x25   : > { %p4246_p1 = pneg %p4245_p0  ;;  %p4252_p6 = por %p4251_p5, %p4250_p4 }
  0x27   : > { %p4253_p8 = pnand %p4252_p6, %p4246_p1 }
  0x29   : > { %4256 = shalt.err (!%p4253_p8)
}
  0x2a   : > { %s4257_s29 = scalar_lea.vmem %s4489_s20, 5120  ;;  %s4374_s17 = smov [#allocation2]  }
  0x2b   : > { %p4258_p9 = scmp.ne.s32.totalorder %s4489_s20, %s4257_s29  ;;  %s4262_s18 = sshll.u32 %s4374_s17, 4  ;;  %s4263_s18 = int_to_ptr.vmem [resolvable:$false] %s4262_s18 }
  0x2c   : > { %s4264_s14 = scalar_lea.vmem %s4263_s18, 10240  ;;  %p4265_p11 = scmp.lt.s32.totalorder %s4489_s20, %s4263_s18 }
  0x2d   : > { %p4260_p12 = pnand %p4258_p9, %p4244_p13  ;;  %p4266_p2 = scmp.lt.s32.totalorder %s4264_s14, %s4257_s29 }
  0x2f   : > { %p4261_p0 = pneg %p4260_p12  ;;  %p4267_p3 = por %p4266_p2, %p4265_p11 }
  0x31   : > { %p4268_p4 = pnand %p4267_p3, %p4261_p0 }
  0x33   : > { %4271 = shalt.err (!%p4268_p4)
}
  0x34   : > { %s4375_s19 = smov 128   ;;  %s4376_s9 = smov 8  }
  0x35   : > { %3910 = dma.hbm_to_vmem [thread:$0]  (!%p4478_p10), %s4499_s12, 5120, %s4489_s20, %s269_s8, %s4375_s19, %s4375_s19, %s4376_s9  }
  0x36   : > { %p314_p11 = scmp.lt.s32.totalorder %s4372_s28, 41  ;;  %s5745_s29 = sshll.u32 %s4491_s21, 6 }
  0x37   : > { %s4539_s18 = scalar_lea.hbm %s5730_s3, %s5745_s29  ;;  %p5746_p1 = scmp.ge.s32.totalorder %s4372_s28, 1 }
  0x38   : > { %s5748_s2 = smul.u32 320, %s4475_s13  ;;  %s293_s20 = scalar_lea.sflag [#allocation5], %s4475_s13 }
  0x39   : > { %p4543_p5 = pnand %p5746_p1, %p314_p11  ;;  %s4272_s21 = scalar_lea.hbm %s4539_s18, 5120 }
  0x3a   : > { %s296_s7 = scalar_lea.vmem [#allocation4], %s5748_s2  ;;  %p4273_p6 = scmp.ne.s32.totalorder %s4539_s18, %s4272_s21 }
  0x3b   : > { %s306_s30 = sshll.u32 %s296_s7, 4  ;;  %s4277_s29 = scalar_lea.hbm %s5730_s3, 204800  ;;  %s4549_s30 = int_to_ptr.vmem [resolvable:$true] %s306_s30 }
  0x3c   : > { %p4275_p8 = pnand %p4273_p6, %p4244_p13  ;;  %p4278_p12 = scmp.lt.u32.totalorder %s4539_s18, %s5730_s3 }
  0x3d   : > { %p4279_p0 = scmp.lt.u32.totalorder %s4277_s29, %s4272_s21  ;;  %p4281_p3 = scmp.lt.u32.totalorder %s4272_s21, %s4539_s18 }
  0x3e   : > { %p4276_p9 = pneg %p4275_p8 }
  0x3f   : > { %p4280_p2 = por %p4279_p0, %p4278_p12 }
  0x41   : > { %p4282_p4 = por %p4281_p3, %p4280_p2 }
  0x43   : > { %p4283_p11 = pnand %p4282_p4, %p4276_p9 }
  0x45   : > { %4286 = shalt.err (!%p4283_p11)
}
  0x46   : > { %s4287_s2 = scalar_lea.vmem %s4549_s30, 5120  ;;  %s4377_s7 = smov [#allocation4]  }
  0x47   : > { %p4288_p1 = scmp.ne.s32.totalorder %s4549_s30, %s4287_s2  ;;  %s4292_s12 = sshll.u32 %s4377_s7, 4  ;;  %s4293_s12 = int_to_ptr.vmem [resolvable:$false] %s4292_s12 }
  0x48   : > { %s4294_s8 = scalar_lea.vmem %s4293_s12, 10240  ;;  %p4295_p7 = scmp.lt.s32.totalorder %s4549_s30, %s4293_s12 }
  0x49   : > { %p4290_p6 = pnand %p4288_p1, %p4244_p13  ;;  %p4296_p12 = scmp.lt.s32.totalorder %s4294_s8, %s4287_s2 }
  0x4b   : > { %p4291_p8 = pneg %p4290_p6  ;;  %p4297_p0 = por %p4296_p12, %p4295_p7 }
  0x4d   : > { %p4298_p2 = pnand %p4297_p0, %p4291_p8 }
  0x4f   : > { %4301 = shalt.err (!%p4298_p2)
}
  0x50   : > { %3913 = dma.hbm_to_vmem [thread:$0]  (!%p4478_p10), %s4539_s18, 5120, %s4549_s30, %s293_s20, %s4375_s19, %s4375_s19, %s4376_s9  }
  0x51   : > { %318 = sbr.rel (%p4543_p5) target bundleno = 669 (0x29d), region = 44  ;;  %s320_s21 = sand.u32 (!%p4543_p5), 1, %s4348_s22  }
  0x52   : > { %s3898_s29 = smul.u32 (!%p4543_p5), 320, %s320_s21  ;;  %s321_s11 = scalar_lea.sflag (!%p4543_p5), [#allocation3], %s320_s21 }
  0x53   : > { %p5749_p7 = scmp.ne.s32.totalorder (!%p4543_p5), %s5742_s10, 0 }
  0x54   : > { %s4583_s17 = scalar_lea.vmem (!%p4543_p5), [#allocation2], %s3898_s29 }
  0x58   : > { %4335 = dma.done.wait (%p5749_p7), %s321_s11, 5120  }
  0x59   : > { %4337 = vsyncadd (%p5749_p7), %s321_s11, 4294962176  ;;  %s330_s13 = scalar_lea.sflag [#allocation5], %s320_s21  ;;  %s4589_s15 = scalar_lea.vmem [#allocation4], %s3898_s29 }
  0x5a   : > { %4339 = dma.done.wait (%p5749_p7), %s330_s13, 5120  }
  0x5b   : > { %4341 = vsyncadd (%p5749_p7), %s330_s13, 4294962176  ;;  %s3403_s30 = sshll.u32 %s4356_s24, 2  ;;  %p393_p10 = scmp.lt.s32.totalorder %s4360_s25, 1  ;;  %v4378_v0 = vmov 0   ;;  %v4609_v1 = vld [vmem:[%s5731_s4] sm:$0xff]   ;;  %v4616_v2 = vld [vmem:[%s5731_s4 + $0x8] sm:$0xff]  }
  0x5c   : > { %580 = vmatprep.subr.bf16.mxu0 %v4378_v0  ;;  %723 = vmatprep.subr.bf16.mxu1 %v4378_v0  ;;  %p395_p13 = scmp.lt.s32.totalorder %s3403_s30, 79  ;;  %v4625_v3 = vld [vmem:[%s5731_s4 + $0x10] sm:$0xff]   ;;  %vm560_vm0 = vcmask 179200   ;;  %v4644_v4 = vld [vmem:[%s5731_s4 + $0x18] sm:$0xff]   ;;  %v4656_v7 = vld [vmem:[%s5731_s4 + $0x20] sm:$0xff]   ;;  %vm576_vm1 = vcmask 1042432  }
  0x5d   : > { %s5766_s25 = smov (!%p393_p10, %s4360_s25), 1  ;;  %581 = vmatpush1.bf16.msra.mxu0 %v4609_v1  ;;  %724 = vmatpush1.bf16.msra.mxu1 %v4609_v1  ;;  %v4666_v8 = vld [vmem:[%s5731_s4 + $0x28] sm:$0xff]   ;;  %v4675_v9 = vld [vmem:[%s5731_s4 + $0x30] sm:$0xff]   ;;  %v4684_v10 = vld [vmem:[%s5731_s4 + $0x38] sm:$0xff]   ;;  %vm1178_vm2 = vcmask 125952  }
  0x5e   : > { %s5768_s30 = smov (!%p395_p13, %s3403_s30), 79  ;;  %s3900_s19 = smul.u32 1600, %s5766_s25  ;;  %582 = vmatprep.subr.bf16.mxu0 %v4378_v0  ;;  %725 = vmatprep.subr.bf16.mxu1 %v4378_v0  ;;  %v4693_v11 = vld [vmem:[%s5731_s4 + $0x40] sm:$0xff]   ;;  %v3991_v12 = vld [vmem:[%s5731_s4 + $0x48] ss:$0 sps:$4 sm:$0x77]  }
  0x5f   : > { %s3899_s10 = smul.u32 20, %s5768_s30  ;;  %v4704_v13 = vsel %vm576_vm1, %v3991_v12, 0  ;;  %v4024_v32 = vld [vmem:[%s4583_s17 + $0x4] ss:$8 sps:$4 sm:$0xff]   ;;  %v4022_v34 = vld [vmem:[%s4583_s17] ss:$8 sps:$4 sm:$0xff]  }
  0x60   : > { %v4027_v33 = vld [vmem:[%s4589_s15 + $0x4] ss:$8 sps:$4 sm:$0xff]   ;;  %v4025_v35 = vld [vmem:[%s4589_s15] ss:$8 sps:$4 sm:$0xff]   ;;  %v4028_v36 = vld [vmem:[%s4583_s17 + $0x14] ss:$8 sps:$4 sm:$0xff]  }
  0x61   : > { %s399_s24 = sadd.s32 %s3900_s19, %s3899_s10  ;;  %583 = vmatpush1.bf16.msra.mxu0 %v4616_v2  ;;  %726 = vmatpush1.bf16.msra.mxu1 %v4616_v2  ;;  %v4030_v37 = vld [vmem:[%s4589_s15 + $0x14] ss:$8 sps:$4 sm:$0xff]   ;;  %v4032_v38 = vld [vmem:[%s4583_s17 + $0x10] ss:$8 sps:$4 sm:$0xff]   ;;  %v4034_v40 = vld [vmem:[%s4583_s17 + $0x24] ss:$8 sps:$4 sm:$0xff]  }
  0x62   : > { %s3404_s2 = sshll.u32 %s399_s24, 2  ;;  %584 = vmatprep.subr.bf16.mxu0 %v4378_v0  ;;  %727 = vmatprep.subr.bf16.mxu1 %v4378_v0  ;;  %v4033_v39 = vld [vmem:[%s4589_s15 + $0x10] ss:$8 sps:$4 sm:$0xff]   ;;  %v4036_v41 = vld [vmem:[%s4589_s15 + $0x24] ss:$8 sps:$4 sm:$0xff]   ;;  %s3902_s7 = smul.u32 800, %s5766_s25 }
  0x63   : > { %s4632_s29 = scalar_lea.vmem %s5727_s0, %s3404_s2  ;;  %s4637_s19 = scalar_lea.vmem %s5728_s1, %s3404_s2  ;;  %v4038_v42 = vld [vmem:[%s4583_s17 + $0x20] ss:$8 sps:$4 sm:$0xff]   ;;  %v4040_v44 = vld [vmem:[%s4583_s17 + $0x34] ss:$8 sps:$4 sm:$0xff]   ;;  %v4044_v46 = vld [vmem:[%s4583_s17 + $0x30] ss:$8 sps:$4 sm:$0xff]  }
  0x64   : > { %v3994_v5 = vld [vmem:[%s4632_s29 + $0x4] ss:$8 sps:$4 sm:$0xff]   ;;  %v3992_v14 = vld [vmem:[%s4632_s29] ss:$8 sps:$4 sm:$0xff]   ;;  %v3998_v16 = vld [vmem:[%s4632_s29 + $0x14] ss:$8 sps:$4 sm:$0xff]  }
  0x65   : > { %585 = vmatpush1.bf16.msra.mxu0 %v4625_v3  ;;  %728 = vmatpush1.bf16.msra.mxu1 %v4625_v3  ;;  %v3997_v6 = vld [vmem:[%s4637_s19 + $0x4] ss:$8 sps:$4 sm:$0xff]   ;;  %v3995_v15 = vld [vmem:[%s4637_s19] ss:$8 sps:$4 sm:$0xff]   ;;  %v4000_v17 = vld [vmem:[%s4637_s19 + $0x14] ss:$8 sps:$4 sm:$0xff]  }
  0x66   : > { %586 = vmatprep.subr.bf16.mxu0 %v4378_v0  ;;  %729 = vmatprep.subr.bf16.mxu1 %v4378_v0  ;;  %v4002_v18 = vld [vmem:[%s4632_s29 + $0x10] ss:$8 sps:$4 sm:$0xff]   ;;  %v4004_v20 = vld [vmem:[%s4632_s29 + $0x24] ss:$8 sps:$4 sm:$0xff]   ;;  %v4008_v22 = vld [vmem:[%s4632_s29 + $0x20] ss:$8 sps:$4 sm:$0xff]  }
  0x67   : > { %3429 = vmatprep.mubr.msk.bf16.mxu0 %vm560_vm0, %v3994_v5  ;;  %3444 = vmatprep.mubr.msk.bf16.mxu1 %vm560_vm0, %v3997_v6  ;;  %v4003_v19 = vld [vmem:[%s4637_s19 + $0x10] ss:$8 sps:$4 sm:$0xff]   ;;  %v4006_v21 = vld [vmem:[%s4637_s19 + $0x24] ss:$8 sps:$4 sm:$0xff]   ;;  %v4009_v23 = vld [vmem:[%s4637_s19 + $0x20] ss:$8 sps:$4 sm:$0xff]  }
  0x68   : > { %v4010_v24 = vld [vmem:[%s4632_s29 + $0x34] ss:$8 sps:$4 sm:$0xff]   ;;  %v4014_v26 = vld [vmem:[%s4632_s29 + $0x30] ss:$8 sps:$4 sm:$0xff]   ;;  %v4016_v28 = vld [vmem:[%s4632_s29 + $0x44] ss:$8 sps:$4 sm:$0xff]  }
  0x69   : > { %587 = vmatpush1.bf16.msra.mxu0 %v4644_v4  ;;  %730 = vmatpush1.bf16.msra.mxu1 %v4644_v4  ;;  %v4012_v25 = vld [vmem:[%s4637_s19 + $0x34] ss:$8 sps:$4 sm:$0xff]   ;;  %v4015_v27 = vld [vmem:[%s4637_s19 + $0x30] ss:$8 sps:$4 sm:$0xff]   ;;  %v4018_v29 = vld [vmem:[%s4637_s19 + $0x44] ss:$8 sps:$4 sm:$0xff]  }
  0x6a   : > { %588 = vmatprep.subr.bf16.mxu0 %v4378_v0  ;;  %731 = vmatprep.subr.bf16.mxu1 %v4378_v0  ;;  %v4020_v30 = vld [vmem:[%s4632_s29 + $0x40] ss:$8 sps:$4 sm:$0xff]   ;;  %v4042_v45 = vld [vmem:[%s4589_s15 + $0x34] ss:$8 sps:$4 sm:$0xff]   ;;  %v4045_v47 = vld [vmem:[%s4589_s15 + $0x30] ss:$8 sps:$4 sm:$0xff]  }
  0x6b   : > { %v4021_v31 = vld [vmem:[%s4637_s19 + $0x40] ss:$8 sps:$4 sm:$0xff]   ;;  %v4046_v48 = vld [vmem:[%s4583_s17 + $0x44] ss:$8 sps:$4 sm:$0xff]   ;;  %v4054_v52 = vld [vmem:[%s4632_s29 + $0x54] ss:$8 sps:$4 sm:$0xff]  }
  0x6c   : > { %v4039_v43 = vld [vmem:[%s4589_s15 + $0x20] ss:$8 sps:$4 sm:$0xff]   ;;  %v4048_v49 = vld [vmem:[%s4589_s15 + $0x44] ss:$8 sps:$4 sm:$0xff]   ;;  %v4057_v53 = vld [vmem:[%s4637_s19 + $0x54] ss:$8 sps:$4 sm:$0xff]  }
  0x6d   : > { %589 = vmatpush1.bf16.msra.mxu0 %v4656_v7  ;;  %732 = vmatpush1.bf16.msra.mxu1 %v4656_v7  ;;  %v4050_v50 = vld [vmem:[%s4583_s17 + $0x40] ss:$8 sps:$4 sm:$0xff]   ;;  %v4052_v54 = vld [vmem:[%s4632_s29 + $0x50] ss:$8 sps:$4 sm:$0xff]   ;;  %v4058_v56 = vld [vmem:[%s4632_s29 + $0x64] ss:$8 sps:$4 sm:$0xff]  }
  0x6e   : > { %590 = vmatprep.subr.bf16.mxu0 %v4378_v0  ;;  %733 = vmatprep.subr.bf16.mxu1 %v4378_v0  ;;  %v4051_v51 = vld [vmem:[%s4589_s15 + $0x40] ss:$8 sps:$4 sm:$0xff]   ;;  %v4055_v55 = vld [vmem:[%s4637_s19 + $0x50] ss:$8 sps:$4 sm:$0xff]   ;;  %v4060_v57 = vld [vmem:[%s4637_s19 + $0x64] ss:$8 sps:$4 sm:$0xff]  }
  0x6f   : > { %v4062_v58 = vld [vmem:[%s4632_s29 + $0x60] ss:$8 sps:$4 sm:$0xff]   ;;  %v4064_v60 = vld [vmem:[%s4632_s29 + $0x74] ss:$8 sps:$4 sm:$0xff]   ;;  %v4068_v62 = vld [vmem:[%s4632_s29 + $0x70] ss:$8 sps:$4 sm:$0xff]  }
  0x70   : > { %v4063_v59 = vld [vmem:[%s4637_s19 + $0x60] ss:$8 sps:$4 sm:$0xff]   ;;  %v4066_v61 = vld [vmem:[%s4637_s19 + $0x74] ss:$8 sps:$4 sm:$0xff]   ;;  %v4069_v63 = vld [vmem:[%s4637_s19 + $0x70] ss:$8 sps:$4 sm:$0xff]  }
  0x71   : > { %591 = vmatpush1.bf16.msra.mxu0 %v4666_v8  ;;  %734 = vmatpush1.bf16.msra.mxu1 %v4666_v8  ;;  %v4070_v5 = vld [vmem:[%s4632_s29 + $0x84] ss:$8 sps:$4 sm:$0xff]   ;;  %v4074_v12 = vld [vmem:[%s4632_s29 + $0x80] ss:$8 sps:$4 sm:$0xff]   ;;  %s3901_s2 = smul.u32 10, %s5768_s30 }
  0x72   : > { %592 = vmatprep.subr.bf16.mxu0 %v4378_v0  ;;  %735 = vmatprep.subr.bf16.mxu1 %v4378_v0  ;;  %v4072_v6 = vld [vmem:[%s4637_s19 + $0x84] ss:$8 sps:$4 sm:$0xff]  }
  0x73   : > { %s423_s25 = sadd.s32 %s3902_s7, %s3901_s2 }
  0x74   : > { %s3408_s8 = sshll.u32 %s423_s25, 2 }
  0x75   : > { %593 = vmatpush1.bf16.msra.mxu0 %v4675_v9  ;;  %736 = vmatpush1.bf16.msra.mxu1 %v4675_v9  ;;  %s5289_s13 = scalar_lea.vmem %s5733_s6, %s3408_s8 }
  0x76   : > { %594 = vmatprep.subr.bf16.mxu0 %v4378_v0  ;;  %737 = vmatprep.subr.bf16.mxu1 %v4378_v0 }
  0x79   : > { %595 = vmatpush1.bf16.msra.mxu0 %v4684_v10  ;;  %738 = vmatpush1.bf16.msra.mxu1 %v4684_v10 }
  0x7a   : > { %596 = vmatprep.subr.bf16.mxu0 %v4378_v0  ;;  %739 = vmatprep.subr.bf16.mxu1 %v4378_v0 }
  0x7d   : > { %597 = vmatpush1.bf16.msra.mxu0 %v4693_v11  ;;  %740 = vmatpush1.bf16.msra.mxu1 %v4693_v11 }
  0x7e   : > { %598 = vmatprep.subr.bf16.mxu0 %v4378_v0  ;;  %741 = vmatprep.subr.bf16.mxu1 %v4378_v0 }
  0x81   : > { %599 = vmatpush1.bf16.msra.mxu0 %v4704_v13  ;;  %742 = vmatpush1.bf16.msra.mxu1 %v4704_v13 }
  0x82   : > { %876 = vmatprep.subr.bf16.mxu0 %v4378_v0  ;;  %1029 = vmatprep.subr.bf16.mxu1 %v4378_v0 }
  0x84   : > { %613 = vmatmul.mubr.bf16.vlgmr.msra.gmra.mrb[0].mxu0 %v3992_v14  ;;  %756 = vmatmul.mubr.bf16.vlgmr.msra.gmra.mrb[0].mxu1 %v3995_v15  ;;  %v4075_v14 = vld [vmem:[%s4637_s19 + $0x80] ss:$8 sps:$4 sm:$0xff]   ;;  %v4076_v15 = vld [vmem:[%s4632_s29 + $0x94] ss:$8 sps:$4 sm:$0xff]  }
  0x85   : > { %877 = vmatpush1.bf16.msra.mxu0 %v4609_v1  ;;  %1030 = vmatpush1.bf16.msra.mxu1 %v4609_v1 }
  0x86   : > { %878 = vmatprep.subr.bf16.mxu0 %v4378_v0  ;;  %1031 = vmatprep.subr.bf16.mxu1 %v4378_v0 }
  0x87   : > { %3430 = vmatprep.mubr.msk.bf16.mxu0 %vm560_vm0, %v3998_v16  ;;  %3445 = vmatprep.mubr.msk.bf16.mxu1 %vm560_vm0, %v4000_v17  ;;  %v4078_v16 = vld [vmem:[%s4637_s19 + $0x94] ss:$8 sps:$4 sm:$0xff]   ;;  %v4080_v17 = vld [vmem:[%s4632_s29 + $0x90] ss:$8 sps:$4 sm:$0xff]  }
  0x89   : > { %879 = vmatpush1.bf16.msra.mxu0 %v4616_v2  ;;  %1032 = vmatpush1.bf16.msra.mxu1 %v4616_v2 }
  0x8a   : > { %880 = vmatprep.subr.bf16.mxu0 %v4378_v0  ;;  %1033 = vmatprep.subr.bf16.mxu1 %v4378_v0 }
  0x8c   : > { %621 = vmatmul.mubr.bf16.gmra.mrb[4].mxu0 %v4002_v18  ;;  %764 = vmatmul.mubr.bf16.gmra.mrb[4].mxu1 %v4003_v19  ;;  %v4081_v18 = vld [vmem:[%s4637_s19 + $0x90] ss:$8 sps:$4 sm:$0xff]   ;;  %v4084_v19 = vld [vmem:[%s4583_s17 + $0x54] ss:$8 sps:$4 sm:$0xff]  }
  0x8d   : > { %881 = vmatpush1.bf16.msra.mxu0 %v4625_v3  ;;  %1034 = vmatpush1.bf16.msra.mxu1 %v4625_v3 }
  0x8e   : > { %882 = vmatprep.subr.bf16.mxu0 %v4378_v0  ;;  %1035 = vmatprep.subr.bf16.mxu1 %v4378_v0 }
  0x8f   : > { %3431 = vmatprep.mubr.msk.bf16.mxu0 %vm560_vm0, %v4004_v20  ;;  %3446 = vmatprep.mubr.msk.bf16.mxu1 %vm560_vm0, %v4006_v21  ;;  %v4087_v20 = vld [vmem:[%s4589_s15 + $0x54] ss:$8 sps:$4 sm:$0xff]   ;;  %v4082_v21 = vld [vmem:[%s4583_s17 + $0x50] ss:$8 sps:$4 sm:$0xff]  }
  0x91   : > { %883 = vmatpush1.bf16.msra.mxu0 %v4644_v4  ;;  %1036 = vmatpush1.bf16.msra.mxu1 %v4644_v4 }
  0x92   : > { %884 = vmatprep.subr.bf16.mxu0 %v4378_v0  ;;  %1037 = vmatprep.subr.bf16.mxu1 %v4378_v0 }
  0x94   : > { %629 = vmatmul.mubr.bf16.gmra.mrb[8].mxu0 %v4008_v22  ;;  %772 = vmatmul.mubr.bf16.gmra.mrb[8].mxu1 %v4009_v23  ;;  %v4085_v22 = vld [vmem:[%s4589_s15 + $0x50] ss:$8 sps:$4 sm:$0xff]   ;;  %v4088_v23 = vld [vmem:[%s4583_s17 + $0x64] ss:$8 sps:$4 sm:$0xff]  }
  0x95   : > { %885 = vmatpush1.bf16.msra.mxu0 %v4656_v7  ;;  %1038 = vmatpush1.bf16.msra.mxu1 %v4656_v7 }
  0x96   : > { %886 = vmatprep.subr.bf16.mxu0 %v4378_v0  ;;  %1039 = vmatprep.subr.bf16.mxu1 %v4378_v0 }
  0x97   : > { %3432 = vmatprep.mubr.msk.bf16.mxu0 %vm560_vm0, %v4010_v24  ;;  %3447 = vmatprep.mubr.msk.bf16.mxu1 %vm560_vm0, %v4012_v25  ;;  %v4090_v24 = vld [vmem:[%s4589_s15 + $0x64] ss:$8 sps:$4 sm:$0xff]   ;;  %v4092_v25 = vld [vmem:[%s4583_s17 + $0x60] ss:$8 sps:$4 sm:$0xff]  }
  0x99   : > { %887 = vmatpush1.bf16.msra.mxu0 %v4666_v8  ;;  %1040 = vmatpush1.bf16.msra.mxu1 %v4666_v8 }
  0x9a   : > { %888 = vmatprep.subr.bf16.mxu0 %v4378_v0  ;;  %1041 = vmatprep.subr.bf16.mxu1 %v4378_v0 }
  0x9c   : > { %637 = vmatmul.mubr.bf16.gmra.mrb[12].mxu0 %v4014_v26  ;;  %780 = vmatmul.mubr.bf16.gmra.mrb[12].mxu1 %v4015_v27  ;;  %v4093_v26 = vld [vmem:[%s4589_s15 + $0x60] ss:$8 sps:$4 sm:$0xff]   ;;  %v4096_v27 = vld [vmem:[%s4589_s15 + $0x74] ss:$8 sps:$4 sm:$0xff]  }
  0x9d   : > { %889 = vmatpush1.bf16.msra.mxu0 %v4675_v9  ;;  %1042 = vmatpush1.bf16.msra.mxu1 %v4675_v9 }
  0x9e   : > { %890 = vmatprep.subr.bf16.mxu0 %v4378_v0  ;;  %1043 = vmatprep.subr.bf16.mxu1 %v4378_v0 }
  0x9f   : > { %3433 = vmatprep.mubr.msk.bf16.mxu0 %vm560_vm0, %v4016_v28  ;;  %3448 = vmatprep.mubr.msk.bf16.mxu1 %vm560_vm0, %v4018_v29  ;;  %v4099_v28 = vld [vmem:[%s4589_s15 + $0x70] ss:$8 sps:$4 sm:$0xff]   ;;  %v4102_v29 = vld [vmem:[%s4589_s15 + $0x84] ss:$8 sps:$4 sm:$0xff]  }
  0xa1   : > { %891 = vmatpush1.bf16.msra.mxu0 %v4684_v10  ;;  %1044 = vmatpush1.bf16.msra.mxu1 %v4684_v10 }
  0xa2   : > { %892 = vmatprep.subr.bf16.mxu0 %v4378_v0  ;;  %1045 = vmatprep.subr.bf16.mxu1 %v4378_v0 }
  0xa4   : > { %645 = vmatmul.mubr.bf16.gmra.mrb[16].mxu0 %v4020_v30  ;;  %788 = vmatmul.mubr.bf16.gmra.mrb[16].mxu1 %v4021_v31  ;;  %v4105_v30 = vld [vmem:[%s4589_s15 + $0x80] ss:$8 sps:$4 sm:$0xff]   ;;  %v4108_v31 = vld [vmem:[%s4589_s15 + $0x94] ss:$8 sps:$4 sm:$0xff]  }
  0xa5   : > { %893 = vmatpush1.bf16.msra.mxu0 %v4693_v11  ;;  %1046 = vmatpush1.bf16.msra.mxu1 %v4693_v11 }
  0xa6   : > { %894 = vmatprep.subr.bf16.mxu0 %v4378_v0  ;;  %1047 = vmatprep.subr.bf16.mxu1 %v4378_v0 }
  0xa7   : > { %3459 = vmatprep.mubr.msk.bf16.mxu0 %vm560_vm0, %v4024_v32  ;;  %3474 = vmatprep.mubr.msk.bf16.mxu1 %vm560_vm0, %v4027_v33  ;;  %v4111_v32 = vld [vmem:[%s4589_s15 + $0x90] ss:$8 sps:$4 sm:$0xff]   ;;  %v4117_v33 = vld [vmem:[%s4637_s19 + $0xa4] ss:$8 sps:$4 sm:$0xff]  }
  0xa9   : > { %895 = vmatpush1.bf16.msra.mxu0 %v4704_v13  ;;  %1048 = vmatpush1.bf16.msra.mxu1 %v4704_v13 }
  0xaa   : > { %1260 = vmatprep.subr.bf16.mxu0 %v4378_v0  ;;  %1404 = vmatprep.subr.bf16.mxu1 %v4378_v0 }
  0xac   : > { %909 = vmatmul.mubr.bf16.vlgmr.msra.gmra.mrb[20].mxu0 %v4022_v34  ;;  %1062 = vmatmul.mubr.bf16.vlgmr.msra.gmra.mrb[20].mxu1 %v4025_v35  ;;  %v4115_v34 = vld [vmem:[%s4637_s19 + $0xa0] ss:$8 sps:$4 sm:$0xff]   ;;  %v4120_v35 = vld [vmem:[%s4637_s19 + $0xb4] ss:$8 sps:$4 sm:$0xff]  }
  0xad   : > { %1261 = vmatpush1.bf16.msra.mxu0 %v4609_v1  ;;  %1405 = vmatpush1.bf16.msra.mxu1 %v4609_v1 }
  0xae   : > { %1262 = vmatprep.subr.bf16.mxu0 %v4378_v0  ;;  %1406 = vmatprep.subr.bf16.mxu1 %v4378_v0 }
  0xaf   : > { %3460 = vmatprep.mubr.msk.bf16.mxu0 %vm560_vm0, %v4028_v36  ;;  %3475 = vmatprep.mubr.msk.bf16.mxu1 %vm560_vm0, %v4030_v37  ;;  %v4997_v36 = vld [vmem:[%s5731_s4] sm:$0xff]   ;;  %v4122_v37 = vld [vmem:[%s4632_s29 + $0xb0] ss:$8 sps:$4 sm:$0xff]  }
  0xb1   : > { %1263 = vmatpush1.bf16.msra.mxu0 %v4616_v2  ;;  %1407 = vmatpush1.bf16.msra.mxu1 %v4616_v2 }
  0xb2   : > { %1264 = vmatprep.subr.bf16.mxu0 %v4378_v0  ;;  %1408 = vmatprep.subr.bf16.mxu1 %v4378_v0 }
  0xb4   : > { %917 = vmatmul.mubr.bf16.gmra.mrb[24].mxu0 %v4032_v38  ;;  %1070 = vmatmul.mubr.bf16.gmra.mrb[24].mxu1 %v4033_v39  ;;  %v4123_v38 = vld [vmem:[%s4637_s19 + $0xb0] ss:$8 sps:$4 sm:$0xff]   ;;  %v5010_v39 = vld [vmem:[%s5731_s4 + $0x8] sm:$0xff]  }
  0xb5   : > { %1265 = vmatpush1.bf16.msra.mxu0 %v4625_v3  ;;  %1409 = vmatpush1.bf16.msra.mxu1 %v4625_v3 }
  0xb6   : > { %1266 = vmatprep.subr.bf16.mxu0 %v4378_v0  ;;  %1410 = vmatprep.subr.bf16.mxu1 %v4378_v0 }
  0xb7   : > { %3461 = vmatprep.mubr.msk.bf16.mxu0 %vm560_vm0, %v4034_v40  ;;  %3476 = vmatprep.mubr.msk.bf16.mxu1 %vm560_vm0, %v4036_v41  ;;  %v4124_v40 = vld [vmem:[%s4632_s29 + $0xc4] ss:$8 sps:$4 sm:$0xff]  }
  0xb8   : > { %v4126_v41 = vld [vmem:[%s4637_s19 + $0xc4] ss:$8 sps:$4 sm:$0xff]  }
  0xb9   : > { %1267 = vmatpush1.bf16.msra.mxu0 %v4644_v4  ;;  %1411 = vmatpush1.bf16.msra.mxu1 %v4644_v4 }
  0xba   : > { %1268 = vmatprep.subr.bf16.mxu0 %v4378_v0  ;;  %1412 = vmatprep.subr.bf16.mxu1 %v4378_v0 }
  0xbc   : > { %925 = vmatmul.mubr.bf16.gmra.mrb[28].mxu0 %v4038_v42  ;;  %1078 = vmatmul.mubr.bf16.gmra.mrb[28].mxu1 %v4039_v43  ;;  %v5021_v42 = vld [vmem:[%s5731_s4 + $0x10] sm:$0xff]   ;;  %v4128_v43 = vld [vmem:[%s4632_s29 + $0xc0] ss:$8 sps:$4 sm:$0xff]  }
  0xbd   : > { %1269 = vmatpush1.bf16.msra.mxu0 %v4656_v7  ;;  %1413 = vmatpush1.bf16.msra.mxu1 %v4656_v7 }
  0xbe   : > { %1270 = vmatprep.subr.bf16.mxu0 %v4378_v0  ;;  %1414 = vmatprep.subr.bf16.mxu1 %v4378_v0 }
  0xbf   : > { %3462 = vmatprep.mubr.msk.bf16.mxu0 %vm560_vm0, %v4040_v44  ;;  %3477 = vmatprep.mubr.msk.bf16.mxu1 %vm560_vm0, %v4042_v45  ;;  %v4129_v44 = vld [vmem:[%s4637_s19 + $0xc0] ss:$8 sps:$4 sm:$0xff]   ;;  %v5034_v45 = vld [vmem:[%s5731_s4 + $0x18] sm:$0xff]  }
  0xc1   : > { %1271 = vmatpush1.bf16.msra.mxu0 %v4666_v8  ;;  %1415 = vmatpush1.bf16.msra.mxu1 %v4666_v8 }
  0xc2   : > { %1272 = vmatprep.subr.bf16.mxu0 %v4378_v0  ;;  %1416 = vmatprep.subr.bf16.mxu1 %v4378_v0 }
  0xc4   : > { %933 = vmatmul.mubr.bf16.gmra.mrb[32].mxu0 %v4044_v46  ;;  %1086 = vmatmul.mubr.bf16.gmra.mrb[32].mxu1 %v4045_v47  ;;  %v4130_v46 = vld [vmem:[%s4632_s29 + $0xd4] ss:$8 sps:$4 sm:$0xff]  }
  0xc5   : > { %1273 = vmatpush1.bf16.msra.mxu0 %v4675_v9  ;;  %1417 = vmatpush1.bf16.msra.mxu1 %v4675_v9  ;;  %v4132_v47 = vld [vmem:[%s4637_s19 + $0xd4] ss:$8 sps:$4 sm:$0xff]  }
  0xc6   : > { %1274 = vmatprep.subr.bf16.mxu0 %v4378_v0  ;;  %1418 = vmatprep.subr.bf16.mxu1 %v4378_v0 }
  0xc7   : > { %3463 = vmatprep.mubr.msk.bf16.mxu0 %vm560_vm0, %v4046_v48  ;;  %3478 = vmatprep.mubr.msk.bf16.mxu1 %vm560_vm0, %v4048_v49  ;;  %v5045_v48 = vld [vmem:[%s5731_s4 + $0x20] sm:$0xff]   ;;  %v4134_v49 = vld [vmem:[%s4632_s29 + $0xd0] ss:$8 sps:$4 sm:$0xff]  }
  0xc9   : > { %1275 = vmatpush1.bf16.msra.mxu0 %v4684_v10  ;;  %1419 = vmatpush1.bf16.msra.mxu1 %v4684_v10 }
  0xca   : > { %1276 = vmatprep.subr.bf16.mxu0 %v4378_v0  ;;  %1420 = vmatprep.subr.bf16.mxu1 %v4378_v0 }
  0xcc   : > { %941 = vmatmul.mubr.bf16.gmra.mrb[36].mxu0 %v4050_v50  ;;  %1094 = vmatmul.mubr.bf16.gmra.mrb[36].mxu1 %v4051_v51  ;;  %v4135_v50 = vld [vmem:[%s4637_s19 + $0xd0] ss:$8 sps:$4 sm:$0xff]   ;;  %v5058_v51 = vld [vmem:[%s5731_s4 + $0x28] sm:$0xff]  }
  0xcd   : > { %1277 = vmatpush1.bf16.msra.mxu0 %v4693_v11  ;;  %1421 = vmatpush1.bf16.msra.mxu1 %v4693_v11 }
  0xce   : > { %1278 = vmatprep.subr.bf16.mxu0 %v4378_v0  ;;  %1422 = vmatprep.subr.bf16.mxu1 %v4378_v0 }
  0xcf   : > { %3510 = vmatprep.mubr.msk.bf16.mxu0 %vm560_vm0, %v4054_v52  ;;  %3535 = vmatprep.mubr.msk.bf16.mxu1 %vm560_vm0, %v4057_v53  ;;  %v4136_v52 = vld [vmem:[%s4632_s29 + $0xe4] ss:$8 sps:$4 sm:$0xff]  }
  0xd0   : > { %v4138_v53 = vld [vmem:[%s4637_s19 + $0xe4] ss:$8 sps:$4 sm:$0xff]  }
  0xd1   : > { %1279 = vmatpush1.bf16.msra.mxu0 %v4704_v13  ;;  %1423 = vmatpush1.bf16.msra.mxu1 %v4704_v13 }
  0xd2   : > { %1558 = vmatprep.subr.bf16.mxu0 %v4378_v0  ;;  %1712 = vmatprep.subr.bf16.mxu1 %v4378_v0 }
  0xd4   : > { %1293 = vmatmul.mubr.bf16.vlgmr.msra.gmra.mrb[40].mxu0 %v4052_v54  ;;  %1437 = vmatmul.mubr.bf16.vlgmr.msra.gmra.mrb[40].mxu1 %v4055_v55  ;;  %v5069_v54 = vld [vmem:[%s5731_s4 + $0x30] sm:$0xff]   ;;  %v4140_v55 = vld [vmem:[%s4632_s29 + $0xe0] ss:$8 sps:$4 sm:$0xff]  }
  0xd5   : > { %1559 = vmatpush1.bf16.msra.mxu0 %v4609_v1  ;;  %1713 = vmatpush1.bf16.msra.mxu1 %v4609_v1 }
  0xd6   : > { %1560 = vmatprep.subr.bf16.mxu0 %v4378_v0  ;;  %1714 = vmatprep.subr.bf16.mxu1 %v4378_v0 }
  0xd7   : > { %3511 = vmatprep.mubr.msk.bf16.mxu0 %vm560_vm0, %v4058_v56  ;;  %3536 = vmatprep.mubr.msk.bf16.mxu1 %vm560_vm0, %v4060_v57  ;;  %v4141_v56 = vld [vmem:[%s4637_s19 + $0xe0] ss:$8 sps:$4 sm:$0xff]   ;;  %v5082_v57 = vld [vmem:[%s5731_s4 + $0x38] sm:$0xff]  }
  0xd9   : > { %1561 = vmatpush1.bf16.msra.mxu0 %v4616_v2  ;;  %1715 = vmatpush1.bf16.msra.mxu1 %v4616_v2 }
  0xda   : > { %1562 = vmatprep.subr.bf16.mxu0 %v4378_v0  ;;  %1716 = vmatprep.subr.bf16.mxu1 %v4378_v0 }
  0xdc   : > { %1301 = vmatmul.mubr.bf16.gmra.mrb[44].mxu0 %v4062_v58  ;;  %1445 = vmatmul.mubr.bf16.gmra.mrb[44].mxu1 %v4063_v59  ;;  %v4144_v58 = vld [vmem:[%s4583_s17 + $0xa4] ss:$8 sps:$4 sm:$0xff]  }
  0xdd   : > { %1563 = vmatpush1.bf16.msra.mxu0 %v4625_v3  ;;  %1717 = vmatpush1.bf16.msra.mxu1 %v4625_v3  ;;  %v4147_v59 = vld [vmem:[%s4589_s15 + $0xa4] ss:$8 sps:$4 sm:$0xff]  }
  0xde   : > { %1564 = vmatprep.subr.bf16.mxu0 %v4378_v0  ;;  %1718 = vmatprep.subr.bf16.mxu1 %v4378_v0 }
  0xdf   : > { %3512 = vmatprep.mubr.msk.bf16.mxu0 %vm560_vm0, %v4064_v60  ;;  %3537 = vmatprep.mubr.msk.bf16.mxu1 %vm560_vm0, %v4066_v61  ;;  %v5093_v60 = vld [vmem:[%s5731_s4 + $0x40] sm:$0xff]  }
  0xe0   : > { %v4142_v61 = vld [vmem:[%s4583_s17 + $0xa0] ss:$8 sps:$4 sm:$0xff]  }
  0xe1   : > { %1565 = vmatpush1.bf16.msra.mxu0 %v4644_v4  ;;  %1719 = vmatpush1.bf16.msra.mxu1 %v4644_v4 }
  0xe2   : > { %1566 = vmatprep.subr.bf16.mxu0 %v4378_v0  ;;  %1720 = vmatprep.subr.bf16.mxu1 %v4378_v0 }
  0xe4   : > { %1309 = vmatmul.mubr.bf16.gmra.mrb[48].mxu0 %v4068_v62  ;;  %1453 = vmatmul.mubr.bf16.gmra.mrb[48].mxu1 %v4069_v63  ;;  %v4145_v62 = vld [vmem:[%s4589_s15 + $0xa0] ss:$8 sps:$4 sm:$0xff]   ;;  %v4148_v63 = vld [vmem:[%s4583_s17 + $0xb4] ss:$8 sps:$4 sm:$0xff]  }
  0xe5   : > { %1567 = vmatpush1.bf16.msra.mxu0 %v4656_v7  ;;  %1721 = vmatpush1.bf16.msra.mxu1 %v4656_v7 }
  0xe6   : > { %1568 = vmatprep.subr.bf16.mxu0 %v4378_v0  ;;  %1722 = vmatprep.subr.bf16.mxu1 %v4378_v0 }
  0xe7   : > { %3513 = vmatprep.mubr.msk.bf16.mxu0 %vm560_vm0, %v4070_v5  ;;  %3538 = vmatprep.mubr.msk.bf16.mxu1 %vm560_vm0, %v4072_v6  ;;  %v4150_v5 = vld [vmem:[%s4589_s15 + $0xb4] ss:$8 sps:$4 sm:$0xff]   ;;  %v4152_v6 = vld [vmem:[%s4583_s17 + $0xb0] ss:$8 sps:$4 sm:$0xff]  }
  0xe9   : > { %1569 = vmatpush1.bf16.msra.mxu0 %v4666_v8  ;;  %1723 = vmatpush1.bf16.msra.mxu1 %v4666_v8 }
  0xea   : > { %1570 = vmatprep.subr.bf16.mxu0 %v4378_v0  ;;  %1724 = vmatprep.subr.bf16.mxu1 %v4378_v0 }
  0xec   : > { %1317 = vmatmul.mubr.bf16.gmra.mrb[52].mxu0 %v4074_v12  ;;  %1461 = vmatmul.mubr.bf16.gmra.mrb[52].mxu1 %v4075_v14  ;;  %v4153_v12 = vld [vmem:[%s4589_s15 + $0xb0] ss:$8 sps:$4 sm:$0xff]   ;;  %v4154_v14 = vld [vmem:[%s4583_s17 + $0xc4] ss:$8 sps:$4 sm:$0xff]  }
  0xed   : > { %1571 = vmatpush1.bf16.msra.mxu0 %v4675_v9  ;;  %1725 = vmatpush1.bf16.msra.mxu1 %v4675_v9 }
  0xee   : > { %1572 = vmatprep.subr.bf16.mxu0 %v4378_v0  ;;  %1726 = vmatprep.subr.bf16.mxu1 %v4378_v0 }
  0xef   : > { %3514 = vmatprep.mubr.msk.bf16.mxu0 %vm560_vm0, %v4076_v15  ;;  %3539 = vmatprep.mubr.msk.bf16.mxu1 %vm560_vm0, %v4078_v16  ;;  %v4156_v15 = vld [vmem:[%s4589_s15 + $0xc4] ss:$8 sps:$4 sm:$0xff]  }
  0xf1   : > { %1573 = vmatpush1.bf16.msra.mxu0 %v4684_v10  ;;  %1727 = vmatpush1.bf16.msra.mxu1 %v4684_v10 }
  0xf2   : > { %1574 = vmatprep.subr.bf16.mxu0 %v4378_v0  ;;  %1728 = vmatprep.subr.bf16.mxu1 %v4378_v0 }
  0xf4   : > { %1325 = vmatmul.mubr.bf16.gmra.mrb[56].mxu0 %v4080_v17  ;;  %1469 = vmatmul.mubr.bf16.gmra.mrb[56].mxu1 %v4081_v18 }
  0xf5   : > { %1575 = vmatpush1.bf16.msra.mxu0 %v4693_v11  ;;  %1729 = vmatpush1.bf16.msra.mxu1 %v4693_v11 }
  0xf6   : > { %1576 = vmatprep.subr.bf16.mxu0 %v4378_v0  ;;  %1730 = vmatprep.subr.bf16.mxu1 %v4378_v0 }
  0xf7   : > { %3560 = vmatprep.mubr.msk.bf16.mxu0 %vm560_vm0, %v4084_v19  ;;  %3585 = vmatprep.mubr.msk.bf16.mxu1 %vm560_vm0, %v4087_v20 }
  0xf9   : > { %1577 = vmatpush1.bf16.msra.mxu0 %v4704_v13  ;;  %1731 = vmatpush1.bf16.msra.mxu1 %v4704_v13 }
  0xfa   : > { %1937 = vmatprep.subr.bf16.mxu0 %v4378_v0  ;;  %2081 = vmatprep.subr.bf16.mxu1 %v4378_v0 }
  0xfc   : > { %1591 = vmatmul.mubr.bf16.vlgmr.msra.gmra.mrb[60].mxu0 %v4082_v21  ;;  %1745 = vmatmul.mubr.bf16.vlgmr.msra.gmra.mrb[60].mxu1 %v4085_v22  ;;  %v4158_v21 = vld [vmem:[%s4583_s17 + $0xc0] ss:$8 sps:$4 sm:$0xff]  }
  0xfd   : > { %1938 = vmatpush1.bf16.msra.mxu0 %v4609_v1  ;;  %2082 = vmatpush1.bf16.msra.mxu1 %v4609_v1  ;;  %v4094_v1 = vld [vmem:[%s4583_s17 + $0x74] ss:$8 sps:$4 sm:$0xff]   ;;  %v4159_v22 = vld [vmem:[%s4589_s15 + $0xc0] ss:$8 sps:$4 sm:$0xff]  }
  0xfe   : > { %1939 = vmatprep.subr.bf16.mxu0 %v4378_v0  ;;  %2083 = vmatprep.subr.bf16.mxu1 %v4378_v0 }
  0xff   : > { %3561 = vmatprep.mubr.msk.bf16.mxu0 %vm560_vm0, %v4088_v23  ;;  %3586 = vmatprep.mubr.msk.bf16.mxu1 %vm560_vm0, %v4090_v24 }
 0x101   : > { %1940 = vmatpush1.bf16.msra.mxu0 %v4616_v2  ;;  %2084 = vmatpush1.bf16.msra.mxu1 %v4616_v2  ;;  %v4098_v2 = vld [vmem:[%s4583_s17 + $0x70] ss:$8 sps:$4 sm:$0xff]  }
 0x102   : > { %1941 = vmatprep.subr.bf16.mxu0 %v4378_v0  ;;  %2085 = vmatprep.subr.bf16.mxu1 %v4378_v0 }
 0x104   : > { %1599 = vmatmul.mubr.bf16.gmra.mrb[64].mxu0 %v4092_v25  ;;  %1753 = vmatmul.mubr.bf16.gmra.mrb[64].mxu1 %v4093_v26 }
 0x105   : > { %1942 = vmatpush1.bf16.msra.mxu0 %v4625_v3  ;;  %2086 = vmatpush1.bf16.msra.mxu1 %v4625_v3  ;;  %v4100_v3 = vld [vmem:[%s4583_s17 + $0x84] ss:$8 sps:$4 sm:$0xff]  }
 0x106   : > { %1943 = vmatprep.subr.bf16.mxu0 %v4378_v0  ;;  %2087 = vmatprep.subr.bf16.mxu1 %v4378_v0 }
 0x107   : > { %3562 = vmatprep.mubr.msk.bf16.mxu0 %vm560_vm0, %v4094_v1  ;;  %3587 = vmatprep.mubr.msk.bf16.mxu1 %vm560_vm0, %v4096_v27  ;;  %v4160_v27 = vld [vmem:[%s4583_s17 + $0xd4] ss:$8 sps:$4 sm:$0xff]  }
 0x109   : > { %1944 = vmatpush1.bf16.msra.mxu0 %v4644_v4  ;;  %2088 = vmatpush1.bf16.msra.mxu1 %v4644_v4  ;;  %v4104_v4 = vld [vmem:[%s4583_s17 + $0x80] ss:$8 sps:$4 sm:$0xff]  }
 0x10a   : > { %1945 = vmatprep.subr.bf16.mxu0 %v4378_v0  ;;  %2089 = vmatprep.subr.bf16.mxu1 %v4378_v0 }
 0x10c   : > { %1607 = vmatmul.mubr.bf16.gmra.mrb[68].mxu0 %v4098_v2  ;;  %1761 = vmatmul.mubr.bf16.gmra.mrb[68].mxu1 %v4099_v28  ;;  %v4162_v2 = vld [vmem:[%s4589_s15 + $0xd4] ss:$8 sps:$4 sm:$0xff]  }
 0x10d   : > { %1946 = vmatpush1.bf16.msra.mxu0 %v4656_v7  ;;  %2090 = vmatpush1.bf16.msra.mxu1 %v4656_v7  ;;  %v4106_v7 = vld [vmem:[%s4583_s17 + $0x94] ss:$8 sps:$4 sm:$0xff]  }
 0x10e   : > { %1947 = vmatprep.subr.bf16.mxu0 %v4378_v0  ;;  %2091 = vmatprep.subr.bf16.mxu1 %v4378_v0 }
 0x10f   : > { %3563 = vmatprep.mubr.msk.bf16.mxu0 %vm560_vm0, %v4100_v3  ;;  %3588 = vmatprep.mubr.msk.bf16.mxu1 %vm560_vm0, %v4102_v29 }
 0x111   : > { %1948 = vmatpush1.bf16.msra.mxu0 %v4666_v8  ;;  %2092 = vmatpush1.bf16.msra.mxu1 %v4666_v8  ;;  %v4110_v8 = vld [vmem:[%s4583_s17 + $0x90] ss:$8 sps:$4 sm:$0xff]  }
 0x112   : > { %1949 = vmatprep.subr.bf16.mxu0 %v4378_v0  ;;  %2093 = vmatprep.subr.bf16.mxu1 %v4378_v0 }
 0x114   : > { %1615 = vmatmul.mubr.bf16.gmra.mrb[72].mxu0 %v4104_v4  ;;  %1769 = vmatmul.mubr.bf16.gmra.mrb[72].mxu1 %v4105_v30 }
 0x115   : > { %1950 = vmatpush1.bf16.msra.mxu0 %v4675_v9  ;;  %2094 = vmatpush1.bf16.msra.mxu1 %v4675_v9  ;;  %v4114_v9 = vld [vmem:[%s4632_s29 + $0xa4] ss:$8 sps:$4 sm:$0xff]  }
 0x116   : > { %1951 = vmatprep.subr.bf16.mxu0 %v4378_v0  ;;  %2095 = vmatprep.subr.bf16.mxu1 %v4378_v0 }
 0x117   : > { %3564 = vmatprep.mubr.msk.bf16.mxu0 %vm560_vm0, %v4106_v7  ;;  %3589 = vmatprep.mubr.msk.bf16.mxu1 %vm560_vm0, %v4108_v31  ;;  %v4164_v7 = vld [vmem:[%s4583_s17 + $0xd0] ss:$8 sps:$4 sm:$0xff]  }
 0x118   : > { %v4165_v31 = vld [vmem:[%s4589_s15 + $0xd0] ss:$8 sps:$4 sm:$0xff]  }
 0x119   : > { %1952 = vmatpush1.bf16.msra.mxu0 %v4684_v10  ;;  %2096 = vmatpush1.bf16.msra.mxu1 %v4684_v10  ;;  %v4112_v10 = vld [vmem:[%s4632_s29 + $0xa0] ss:$8 sps:$4 sm:$0xff]  }
 0x11a   : > { %1953 = vmatprep.subr.bf16.mxu0 %v4378_v0  ;;  %2097 = vmatprep.subr.bf16.mxu1 %v4378_v0 }
 0x11c   : > { %1623 = vmatmul.mubr.bf16.gmra.mrb[76].mxu0 %v4110_v8  ;;  %1777 = vmatmul.mubr.bf16.gmra.mrb[76].mxu1 %v4111_v32 }
 0x11d   : > { %1954 = vmatpush1.bf16.msra.mxu0 %v4693_v11  ;;  %2098 = vmatpush1.bf16.msra.mxu1 %v4693_v11  ;;  %v4118_v11 = vld [vmem:[%s4632_s29 + $0xb4] ss:$8 sps:$4 sm:$0xff]  }
 0x11e   : > { %1955 = vmatprep.subr.bf16.mxu0 %v4378_v0  ;;  %2099 = vmatprep.subr.bf16.mxu1 %v4378_v0 }
 0x11f   : > { %3630 = vmatprep.mubr.msk.bf16.mxu0 %vm560_vm0, %v4114_v9  ;;  %3655 = vmatprep.mubr.msk.bf16.mxu1 %vm560_vm0, %v4117_v33 }
 0x121   : > { %1956 = vmatpush1.bf16.msra.mxu0 %v4704_v13  ;;  %2100 = vmatpush1.bf16.msra.mxu1 %v4704_v13 }
 0x122   : > { %2235 = vmatprep.subr.bf16.mxu0 %v4378_v0  ;;  %2389 = vmatprep.subr.bf16.mxu1 %v4378_v0 }
 0x124   : > { %1970 = vmatmul.mubr.bf16.vlgmr.msra.gmra.mrb[80].mxu0 %v4112_v10  ;;  %2114 = vmatmul.mubr.bf16.vlgmr.msra.gmra.mrb[80].mxu1 %v4115_v34  ;;  %v4166_v34 = vld [vmem:[%s4583_s17 + $0xe4] ss:$8 sps:$4 sm:$0xff]  }
 0x125   : > { %2236 = vmatpush1.bf16.msra.mxu0 %v4997_v36  ;;  %2390 = vmatpush1.bf16.msra.mxu1 %v4997_v36 }
 0x126   : > { %2237 = vmatprep.subr.bf16.mxu0 %v4378_v0  ;;  %2391 = vmatprep.subr.bf16.mxu1 %v4378_v0 }
 0x127   : > { %3631 = vmatprep.mubr.msk.bf16.mxu0 %vm560_vm0, %v4118_v11  ;;  %3656 = vmatprep.mubr.msk.bf16.mxu1 %vm560_vm0, %v4120_v35  ;;  %v4168_v11 = vld [vmem:[%s4589_s15 + $0xe4] ss:$8 sps:$4 sm:$0xff]  }
 0x129   : > { %2238 = vmatpush1.bf16.msra.mxu0 %v5010_v39  ;;  %2392 = vmatpush1.bf16.msra.mxu1 %v5010_v39 }
 0x12a   : > { %2239 = vmatprep.subr.bf16.mxu0 %v4378_v0  ;;  %2393 = vmatprep.subr.bf16.mxu1 %v4378_v0 }
 0x12c   : > { %1978 = vmatmul.mubr.bf16.gmra.mrb[84].mxu0 %v4122_v37  ;;  %2122 = vmatmul.mubr.bf16.gmra.mrb[84].mxu1 %v4123_v38 }
 0x12d   : > { %2240 = vmatpush1.bf16.msra.mxu0 %v5021_v42  ;;  %2394 = vmatpush1.bf16.msra.mxu1 %v5021_v42 }
 0x12e   : > { %2241 = vmatprep.subr.bf16.mxu0 %v4378_v0  ;;  %2395 = vmatprep.subr.bf16.mxu1 %v4378_v0 }
 0x12f   : > { %3632 = vmatprep.mubr.msk.bf16.mxu0 %vm560_vm0, %v4124_v40  ;;  %3657 = vmatprep.mubr.msk.bf16.mxu1 %vm560_vm0, %v4126_v41 }
 0x131   : > { %2242 = vmatpush1.bf16.msra.mxu0 %v5034_v45  ;;  %2396 = vmatpush1.bf16.msra.mxu1 %v5034_v45 }
 0x132   : > { %2243 = vmatprep.subr.bf16.mxu0 %v4378_v0  ;;  %2397 = vmatprep.subr.bf16.mxu1 %v4378_v0 }
 0x134   : > { %1986 = vmatmul.mubr.bf16.gmra.mrb[88].mxu0 %v4128_v43  ;;  %2130 = vmatmul.mubr.bf16.gmra.mrb[88].mxu1 %v4129_v44  ;;  %v4170_v43 = vld [vmem:[%s4583_s17 + $0xe0] ss:$8 sps:$4 sm:$0xff]  }
 0x135   : > { %2244 = vmatpush1.bf16.msra.mxu0 %v5045_v48  ;;  %2398 = vmatpush1.bf16.msra.mxu1 %v5045_v48  ;;  %v4171_v44 = vld [vmem:[%s4589_s15 + $0xe0] ss:$8 sps:$4 sm:$0xff]  }
 0x136   : > { %2245 = vmatprep.subr.bf16.mxu0 %v4378_v0  ;;  %2399 = vmatprep.subr.bf16.mxu1 %v4378_v0 }
 0x137   : > { %3633 = vmatprep.mubr.msk.bf16.mxu0 %vm560_vm0, %v4130_v46  ;;  %3658 = vmatprep.mubr.msk.bf16.mxu1 %vm560_vm0, %v4132_v47 }
 0x139   : > { %2246 = vmatpush1.bf16.msra.mxu0 %v5058_v51  ;;  %2400 = vmatpush1.bf16.msra.mxu1 %v5058_v51 }
 0x13a   : > { %2247 = vmatprep.subr.bf16.mxu0 %v4378_v0  ;;  %2401 = vmatprep.subr.bf16.mxu1 %v4378_v0 }
 0x13c   : > { %1994 = vmatmul.mubr.bf16.gmra.mrb[92].mxu0 %v4134_v49  ;;  %2138 = vmatmul.mubr.bf16.gmra.mrb[92].mxu1 %v4135_v50 }
 0x13d   : > { %2248 = vmatpush1.bf16.msra.mxu0 %v5069_v54  ;;  %2402 = vmatpush1.bf16.msra.mxu1 %v5069_v54 }
 0x13e   : > { %2249 = vmatprep.subr.bf16.mxu0 %v4378_v0  ;;  %2403 = vmatprep.subr.bf16.mxu1 %v4378_v0 }
 0x13f   : > { %3634 = vmatprep.mubr.msk.bf16.mxu0 %vm560_vm0, %v4136_v52  ;;  %3659 = vmatprep.mubr.msk.bf16.mxu1 %vm560_vm0, %v4138_v53  ;;  %v4174_v53 = vld [vmem:[%s4632_s29 + $0xf4] ss:$8 sps:$4 sm:$0xff]  }
 0x141   : > { %2250 = vmatpush1.bf16.msra.mxu0 %v5082_v57  ;;  %2404 = vmatpush1.bf16.msra.mxu1 %v5082_v57 }
 0x142   : > { %2251 = vmatprep.subr.bf16.mxu0 %v4378_v0  ;;  %2405 = vmatprep.subr.bf16.mxu1 %v4378_v0 }
 0x144   : > { %2002 = vmatmul.mubr.bf16.gmra.mrb[96].mxu0 %v4140_v55  ;;  %2146 = vmatmul.mubr.bf16.gmra.mrb[96].mxu1 %v4141_v56  ;;  %v4177_v55 = vld [vmem:[%s4637_s19 + $0xf4] ss:$8 sps:$4 sm:$0xff]  }
 0x145   : > { %2252 = vmatpush1.bf16.msra.mxu0 %v5093_v60  ;;  %2406 = vmatpush1.bf16.msra.mxu1 %v5093_v60 }
 0x146   : > { %2253 = vmatprep.subr.bf16.mxu0 %v4378_v0  ;;  %2407 = vmatprep.subr.bf16.mxu1 %v4378_v0 }
 0x147   : > { %3680 = vmatprep.mubr.msk.bf16.mxu0 %vm560_vm0, %v4144_v58  ;;  %3705 = vmatprep.mubr.msk.bf16.mxu1 %vm560_vm0, %v4147_v59 }
 0x149   : > { %2254 = vmatpush1.bf16.msra.mxu0 %v4704_v13  ;;  %2408 = vmatpush1.bf16.msra.mxu1 %v4704_v13 }
 0x14a   : > { %2614 = vmatprep.subr.bf16.mxu0 %v4378_v0  ;;  %2758 = vmatprep.subr.bf16.mxu1 %v4378_v0 }
 0x14c   : > { %2268 = vmatmul.mubr.bf16.vlgmr.msra.gmra.mrb[100].mxu0 %v4142_v61  ;;  %2422 = vmatmul.mubr.bf16.vlgmr.msra.gmra.mrb[100].mxu1 %v4145_v62 }
 0x14d   : > { %2615 = vmatpush1.bf16.msra.mxu0 %v4997_v36  ;;  %2759 = vmatpush1.bf16.msra.mxu1 %v4997_v36 }
 0x14e   : > { %2616 = vmatprep.subr.bf16.mxu0 %v4378_v0  ;;  %2760 = vmatprep.subr.bf16.mxu1 %v4378_v0 }
 0x14f   : > { %3681 = vmatprep.mubr.msk.bf16.mxu0 %vm560_vm0, %v4148_v63  ;;  %3706 = vmatprep.mubr.msk.bf16.mxu1 %vm560_vm0, %v4150_v5  ;;  %v4172_v63 = vld [vmem:[%s4632_s29 + $0xf0] ss:$8 sps:$4 sm:$0xff]  }
 0x150   : > { %v4175_v5 = vld [vmem:[%s4637_s19 + $0xf0] ss:$8 sps:$4 sm:$0xff]  }
 0x151   : > { %2617 = vmatpush1.bf16.msra.mxu0 %v5010_v39  ;;  %2761 = vmatpush1.bf16.msra.mxu1 %v5010_v39 }
 0x152   : > { %2618 = vmatprep.subr.bf16.mxu0 %v4378_v0  ;;  %2762 = vmatprep.subr.bf16.mxu1 %v4378_v0 }
 0x154   : > { %2276 = vmatmul.mubr.bf16.gmra.mrb[104].mxu0 %v4152_v6  ;;  %2430 = vmatmul.mubr.bf16.gmra.mrb[104].mxu1 %v4153_v12 }
 0x155   : > { %2619 = vmatpush1.bf16.msra.mxu0 %v5021_v42  ;;  %2763 = vmatpush1.bf16.msra.mxu1 %v5021_v42 }
 0x156   : > { %2620 = vmatprep.subr.bf16.mxu0 %v4378_v0  ;;  %2764 = vmatprep.subr.bf16.mxu1 %v4378_v0 }
 0x157   : > { %v5127_v16 = vpop.f32.mrb[0].mxu0  ;;  %v5129_v17 = vpop.f32.mrb[0].mxu1  ;;  %3682 = vmatprep.mubr.msk.bf16.mxu0 %vm560_vm0, %v4154_v14  ;;  %3707 = vmatprep.mubr.msk.bf16.mxu1 %vm560_vm0, %v4156_v15 }
 0x158   : > { %v796_v18 = vmax.f32 %v5127_v16, %v5129_v17  ;;  %v616_v19 = vpop.f32.mrb[1].mxu0  ;;  %v759_v20 = vpop.f32.mrb[1].mxu1 }
 0x159   : > { %v5137_v23 = vpop.f32.mrb[2].mxu0  ;;  %v5139_v24 = vpop.f32.mrb[2].mxu1  ;;  %2621 = vmatpush1.bf16.msra.mxu0 %v5034_v45  ;;  %2765 = vmatpush1.bf16.msra.mxu1 %v5034_v45  ;;  %v4178_v20 = vld [vmem:[%s4632_s29 + $0x104] ss:$8 sps:$4 sm:$0xff]  }
 0x15a   : > { %v797_v25 = vmax.f32 %v5137_v23, %v5139_v24  ;;  %v619_v26 = vpop.f32.mrb[3].mxu0  ;;  %v762_v1 = vpop.f32.mrb[3].mxu1  ;;  %2622 = vmatprep.subr.bf16.mxu0 %v4378_v0  ;;  %2766 = vmatprep.subr.bf16.mxu1 %v4378_v0 }
 0x15c   : > { %2284 = vmatmul.mubr.bf16.gmra.mrb[108].mxu0 %v4158_v21  ;;  %2438 = vmatmul.mubr.bf16.gmra.mrb[108].mxu1 %v4159_v22  ;;  %v4180_v21 = vld [vmem:[%s4637_s19 + $0x104] ss:$8 sps:$4 sm:$0xff]  }
 0x15d   : > { %2623 = vmatpush1.bf16.msra.mxu0 %v5045_v48  ;;  %2767 = vmatpush1.bf16.msra.mxu1 %v5045_v48 }
 0x15e   : > { %2624 = vmatprep.subr.bf16.mxu0 %v4378_v0  ;;  %2768 = vmatprep.subr.bf16.mxu1 %v4378_v0 }
 0x15f   : > { %v5153_v28 = vpop.f32.mrb[4].mxu0  ;;  %v5155_v3 = vpop.f32.mrb[4].mxu1  ;;  %3683 = vmatprep.mubr.msk.bf16.mxu0 %vm560_vm0, %v4160_v27  ;;  %3708 = vmatprep.mubr.msk.bf16.mxu1 %vm560_vm0, %v4162_v2 }
 0x160   : > { %v798_v29 = vmax.f32 %v5153_v28, %v5155_v3  ;;  %v624_v4 = vpop.f32.mrb[5].mxu0  ;;  %v767_v30 = vpop.f32.mrb[5].mxu1 }
 0x161   : > { %v5163_v8 = vpop.f32.mrb[6].mxu0  ;;  %v5165_v32 = vpop.f32.mrb[6].mxu1  ;;  %2625 = vmatpush1.bf16.msra.mxu0 %v5058_v51  ;;  %2769 = vmatpush1.bf16.msra.mxu1 %v5058_v51  ;;  %v4183_v4 = vld [vmem:[%s4637_s19 + $0x100] ss:$8 sps:$4 sm:$0xff]  }
 0x162   : > { %v799_v9 = vmax.f32 %v5163_v8, %v5165_v32  ;;  %v627_v33 = vpop.f32.mrb[7].mxu0  ;;  %v770_v10 = vpop.f32.mrb[7].mxu1  ;;  %2626 = vmatprep.subr.bf16.mxu0 %v4378_v0  ;;  %2770 = vmatprep.subr.bf16.mxu1 %v4378_v0 }
 0x164   : > { %2292 = vmatmul.mubr.bf16.gmra.mrb[112].mxu0 %v4164_v7  ;;  %2446 = vmatmul.mubr.bf16.gmra.mrb[112].mxu1 %v4165_v31 }
 0x165   : > { %2627 = vmatpush1.bf16.msra.mxu0 %v5069_v54  ;;  %2771 = vmatpush1.bf16.msra.mxu1 %v5069_v54 }
 0x166   : > { %2628 = vmatprep.subr.bf16.mxu0 %v4378_v0  ;;  %2772 = vmatprep.subr.bf16.mxu1 %v4378_v0 }
 0x167   : > { %v5179_v35 = vpop.f32.mrb[8].mxu0  ;;  %v5181_v37 = vpop.f32.mrb[8].mxu1  ;;  %3684 = vmatprep.mubr.msk.bf16.mxu0 %vm560_vm0, %v4166_v34  ;;  %3709 = vmatprep.mubr.msk.bf16.mxu1 %vm560_vm0, %v4168_v11  ;;  %v4184_v34 = vld [vmem:[%s4632_s29 + $0x114] ss:$8 sps:$4 sm:$0xff]  }
 0x168   : > { %v800_v38 = vmax.f32 %v5179_v35, %v5181_v37  ;;  %v632_v40 = vpop.f32.mrb[9].mxu0  ;;  %v775_v41 = vpop.f32.mrb[9].mxu1  ;;  %v4186_v11 = vld [vmem:[%s4637_s19 + $0x114] ss:$8 sps:$4 sm:$0xff]  }
 0x169   : > { %v5189_v46 = vpop.f32.mrb[10].mxu0  ;;  %v5191_v47 = vpop.f32.mrb[10].mxu1  ;;  %2629 = vmatpush1.bf16.msra.mxu0 %v5082_v57  ;;  %2773 = vmatpush1.bf16.msra.mxu1 %v5082_v57 }
 0x16a   : > { %v801_v49 = vmax.f32 %v5189_v46, %v5191_v47  ;;  %v635_v50 = vpop.f32.mrb[11].mxu0  ;;  %v778_v52 = vpop.f32.mrb[11].mxu1  ;;  %2630 = vmatprep.subr.bf16.mxu0 %v4378_v0  ;;  %2774 = vmatprep.subr.bf16.mxu1 %v4378_v0 }
 0x16b   : > { %v4189_v50 = vld [vmem:[%s4637_s19 + $0x110] ss:$8 sps:$4 sm:$0xff]   ;;  %v5269_v52 = vld [vmem:[%s5732_s5] ss:$0 sm:$0xff] }
 0x16c   : > { %2300 = vmatmul.mubr.bf16.gmra.mrb[116].mxu0 %v4170_v43  ;;  %2454 = vmatmul.mubr.bf16.gmra.mrb[116].mxu1 %v4171_v44 }
 0x16d   : > { %2631 = vmatpush1.bf16.msra.mxu0 %v5093_v60  ;;  %2775 = vmatpush1.bf16.msra.mxu1 %v5093_v60 }
 0x16e   : > { %2632 = vmatprep.subr.bf16.mxu0 %v4378_v0  ;;  %2776 = vmatprep.subr.bf16.mxu1 %v4378_v0 }
 0x16f   : > { %v5205_v56 = vpop.f32.mrb[12].mxu0  ;;  %v5207_v58 = vpop.f32.mrb[12].mxu1  ;;  %3750 = vmatprep.mubr.msk.bf16.mxu0 %vm560_vm0, %v4174_v53  ;;  %3775 = vmatprep.mubr.msk.bf16.mxu1 %vm560_vm0, %v4177_v55 }
 0x170   : > { %v802_v59 = vmax.f32 %v5205_v56, %v5207_v58  ;;  %v640_v61 = vpop.f32.mrb[13].mxu0  ;;  %v783_v62 = vpop.f32.mrb[13].mxu1 }
 0x171   : > { %v5215_v6 = vpop.f32.mrb[14].mxu0  ;;  %v5217_v12 = vpop.f32.mrb[14].mxu1  ;;  %2633 = vmatpush1.bf16.msra.mxu0 %v4704_v13  ;;  %2777 = vmatpush1.bf16.msra.mxu1 %v4704_v13  ;;  %v4190_v62 = vld [vmem:[%s4632_s29 + $0x124] ss:$8 sps:$4 sm:$0xff]  }
 0x172   : > { %v803_v14 = vmax.f32 %v5215_v6, %v5217_v12  ;;  %v643_v15 = vpop.f32.mrb[15].mxu0  ;;  %v786_v19 = vpop.f32.mrb[15].mxu1  ;;  %2912 = vmatprep.subr.bf16.mxu0 %v4378_v0  ;;  %3066 = vmatprep.subr.bf16.mxu1 %v4378_v0 }
 0x174   : > { %2647 = vmatmul.mubr.bf16.vlgmr.msra.gmra.mrb[120].mxu0 %v4172_v63  ;;  %2791 = vmatmul.mubr.bf16.vlgmr.msra.gmra.mrb[120].mxu1 %v4175_v5  ;;  %v4192_v63 = vld [vmem:[%s4637_s19 + $0x124] ss:$8 sps:$4 sm:$0xff]  }
 0x175   : > { %2913 = vmatpush1.bf16.msra.mxu0 %v4997_v36  ;;  %3067 = vmatpush1.bf16.msra.mxu1 %v4997_v36  ;;  %v4182_v36 = vld [vmem:[%s4632_s29 + $0x100] ss:$8 sps:$4 sm:$0xff]  }
 0x176   : > { %2914 = vmatprep.subr.bf16.mxu0 %v4378_v0  ;;  %3068 = vmatprep.subr.bf16.mxu1 %v4378_v0 }
 0x177   : > { %v5231_v22 = vpop.f32.mrb[16].mxu0  ;;  %v5233_v26 = vpop.f32.mrb[16].mxu1  ;;  %3751 = vmatprep.mubr.msk.bf16.mxu0 %vm560_vm0, %v4178_v20  ;;  %3776 = vmatprep.mubr.msk.bf16.mxu1 %vm560_vm0, %v4180_v21 }
 0x178   : > { %v804_v1 = vmax.f32 %v5231_v22, %v5233_v26  ;;  %v648_v27 = vpop.f32.mrb[17].mxu0  ;;  %v791_v2 = vpop.f32.mrb[17].mxu1 }
 0x179   : > { %v5241_v30 = vpop.f32.mrb[18].mxu0  ;;  %v5243_v7 = vpop.f32.mrb[18].mxu1  ;;  %2915 = vmatpush1.bf16.msra.mxu0 %v5010_v39  ;;  %3069 = vmatpush1.bf16.msra.mxu1 %v5010_v39 }
 0x17a   : > { %v805_v31 = vmax.f32 %v5241_v30, %v5243_v7  ;;  %v651_v33 = vpop.f32.mrb[19].mxu0  ;;  %v794_v10 = vpop.f32.mrb[19].mxu1  ;;  %2916 = vmatprep.subr.bf16.mxu0 %v4378_v0  ;;  %3070 = vmatprep.subr.bf16.mxu1 %v4378_v0 }
 0x17c   : > { %2655 = vmatmul.mubr.bf16.gmra.mrb[124].mxu0 %v4182_v36  ;;  %2799 = vmatmul.mubr.bf16.gmra.mrb[124].mxu1 %v4183_v4  ;;  %v4195_v36 = vld [vmem:[%s4637_s19 + $0x120] ss:$8 sps:$4 sm:$0xff]  }
 0x17d   : > { %2917 = vmatpush1.bf16.msra.mxu0 %v5021_v42  ;;  %3071 = vmatpush1.bf16.msra.mxu1 %v5021_v42  ;;  %v4188_v42 = vld [vmem:[%s4632_s29 + $0x110] ss:$8 sps:$4 sm:$0xff]  }
 0x17e   : > { %2918 = vmatprep.subr.bf16.mxu0 %v4378_v0  ;;  %3072 = vmatprep.subr.bf16.mxu1 %v4378_v0 }
 0x17f   : > { %v910_v39 = vpop.f32.mrb[20].mxu0  ;;  %v1063_v40 = vpop.f32.mrb[20].mxu1  ;;  %3752 = vmatprep.mubr.msk.bf16.mxu0 %vm560_vm0, %v4184_v34  ;;  %3777 = vmatprep.mubr.msk.bf16.mxu1 %vm560_vm0, %v4186_v11  ;;  %v4196_v11 = vld [vmem:[%s4632_s29 + $0x134] ss:$8 sps:$4 sm:$0xff]  }
 0x180   : > { %v949_v41 = vmax.f32 %v796_v18, %v910_v39  ;;  %v912_v43 = vpop.f32.mrb[21].mxu0  ;;  %v1065_v44 = vpop.f32.mrb[21].mxu1  ;;  %v4198_v39 = vld [vmem:[%s4637_s19 + $0x134] ss:$8 sps:$4 sm:$0xff]  }
 0x181   : > { %v913_v53 = vpop.f32.mrb[22].mxu0  ;;  %v1066_v55 = vpop.f32.mrb[22].mxu1  ;;  %2919 = vmatpush1.bf16.msra.mxu0 %v5034_v45  ;;  %3073 = vmatpush1.bf16.msra.mxu1 %v5034_v45  ;;  %v4200_v43 = vld [vmem:[%s4632_s29 + $0x130] ss:$8 sps:$4 sm:$0xff]  }
 0x182   : > { %v1102_v16 = vmax.f32 %v949_v41, %v1063_v40  ;;  %v950_v17 = vmax.f32 %v797_v25, %v913_v53  ;;  %v915_v18 = vpop.f32.mrb[23].mxu0  ;;  %v1068_v61 = vpop.f32.mrb[23].mxu1  ;;  %2920 = vmatprep.subr.bf16.mxu0 %v4378_v0  ;;  %3074 = vmatprep.subr.bf16.mxu1 %v4378_v0 }
 0x184   : > { %v1118_v5 = vadd.f32 %v5269_v52, %v1102_v16  ;;  %v1103_v15 = vmax.f32 %v950_v17, %v1066_v55  ;;  %2663 = vmatmul.mubr.bf16.gmra.mrb[128].mxu0 %v4188_v42  ;;  %2807 = vmatmul.mubr.bf16.gmra.mrb[128].mxu1 %v4189_v50  ;;  %v4201_v55 = vld [vmem:[%s4637_s19 + $0x130] ss:$8 sps:$4 sm:$0xff]  }
 0x185   : > { %2921 = vmatpush1.bf16.msra.mxu0 %v5045_v48  ;;  %3075 = vmatpush1.bf16.msra.mxu1 %v5045_v48  ;;  %v4194_v48 = vld [vmem:[%s4632_s29 + $0x120] ss:$8 sps:$4 sm:$0xff]  }
 0x186   : > { %v1128_v45 = vmax.f32 %v1118_v5, 0.0  ;;  %v1119_v23 = vadd.f32 %v5269_v52, %v1103_v15  ;;  %2922 = vmatprep.subr.bf16.mxu0 %v4378_v0  ;;  %3076 = vmatprep.subr.bf16.mxu1 %v4378_v0 }
 0x187   : > { %v918_v24 = vpop.f32.mrb[24].mxu0  ;;  %v1071_v25 = vpop.f32.mrb[24].mxu1  ;;  %3753 = vmatprep.mubr.msk.bf16.mxu0 %vm560_vm0, %v4190_v62  ;;  %3778 = vmatprep.mubr.msk.bf16.mxu1 %vm560_vm0, %v4192_v63  ;;  %v4204_v62 = vld [vmem:[%s4583_s17 + $0xf4] ss:$8 sps:$4 sm:$0xff]  }
 0x188   : > { %v3852_v19 = vpack.c.bf16 %v1128_v45, %v1128_v45  ;;  %v1129_v20 = vmax.f32 %v1119_v23, 0.0  ;;  %v951_v21 = vmax.f32 %v798_v29, %v918_v24  ;;  %v920_v27 = vpop.f32.mrb[25].mxu0  ;;  %v1073_v2 = vpop.f32.mrb[25].mxu1  ;;  %v4207_v63 = vld [vmem:[%s4589_s15 + $0xf4] ss:$8 sps:$4 sm:$0xff]  }
 0x189   : > { %v921_v4 = vpop.f32.mrb[26].mxu0  ;;  %v1074_v33 = vpop.f32.mrb[26].mxu1  ;;  %2923 = vmatpush1.bf16.msra.mxu0 %v5058_v51  ;;  %3077 = vmatpush1.bf16.msra.mxu1 %v5058_v51  ;;  %v4202_v45 = vld [vmem:[%s4583_s17 + $0xf0] ss:$8 sps:$4 sm:$0xff]   ;;  %v4210_v27 = vld [vmem:[%s4589_s15 + $0x104] ss:$8 sps:$4 sm:$0xff]  }
 0x18a   : > { %1179 = vst.msk [vmem:[%s5289_s13] sm:$0xf] %vm1178_vm2, %v3852_v19  ;;  %v3853_v10 = vpack.c.bf16 %v1129_v20, %v1129_v20  ;;  %v1104_v34 = vmax.f32 %v951_v21, %v1071_v25  ;;  %v952_v28 = vmax.f32 %v799_v9, %v921_v4  ;;  %v923_v3 = vpop.f32.mrb[27].mxu0  ;;  %v1076_v29 = vpop.f32.mrb[27].mxu1  ;;  %2924 = vmatprep.subr.bf16.mxu0 %v4378_v0  ;;  %v4208_v21 = vld [vmem:[%s4583_s17 + $0x104] ss:$8 sps:$4 sm:$0xff]  }
 0x18b   : > { %3078 = vmatprep.subr.bf16.mxu1 %v4378_v0 }
 0x18c   : > { %1180 = vst.msk [vmem:[%s5289_s13 + $0x4] sm:$0xf] %vm1178_vm2, %v3853_v10  ;;  %v1120_v51 = vadd.f32 %v5269_v52, %v1104_v34  ;;  %v1105_v40 = vmax.f32 %v952_v28, %v1074_v33  ;;  %2671 = vmatmul.mubr.bf16.gmra.mrb[132].mxu0 %v4194_v48  ;;  %2815 = vmatmul.mubr.bf16.gmra.mrb[132].mxu1 %v4195_v36  ;;  %v4212_v10 = vld [vmem:[%s4583_s17 + $0x100] ss:$8 sps:$4 sm:$0xff]  }
 0x18d   : > { %2925 = vmatpush1.bf16.msra.mxu0 %v5069_v54  ;;  %3079 = vmatpush1.bf16.msra.mxu1 %v5069_v54 }
 0x18e   : > { %v1130_v8 = vmax.f32 %v1120_v51, 0.0  ;;  %v1121_v32 = vadd.f32 %v5269_v52, %v1105_v40  ;;  %2926 = vmatprep.subr.bf16.mxu0 %v4378_v0  ;;  %3080 = vmatprep.subr.bf16.mxu1 %v4378_v0 }
 0x18f   : > { %v926_v9 = vpop.f32.mrb[28].mxu0  ;;  %v1079_v41 = vpop.f32.mrb[28].mxu1  ;;  %3754 = vmatprep.mubr.msk.bf16.mxu0 %vm560_vm0, %v4196_v11  ;;  %3779 = vmatprep.mubr.msk.bf16.mxu1 %vm560_vm0, %v4198_v39  ;;  %v4213_v39 = vld [vmem:[%s4589_s15 + $0x100] ss:$8 sps:$4 sm:$0xff]  }
 0x190   : > { %v3854_v44 = vpack.c.bf16 %v1130_v8, %v1130_v8  ;;  %v1131_v42 = vmax.f32 %v1121_v32, 0.0  ;;  %v953_v54 = vmax.f32 %v800_v38, %v926_v9  ;;  %v928_v50 = vpop.f32.mrb[29].mxu0  ;;  %v1081_v53 = vpop.f32.mrb[29].mxu1  ;;  %v4214_v8 = vld [vmem:[%s4583_s17 + $0x114] ss:$8 sps:$4 sm:$0xff]  }
 0x191   : > { %v929_v16 = vpop.f32.mrb[30].mxu0  ;;  %v1082_v17 = vpop.f32.mrb[30].mxu1  ;;  %2927 = vmatpush1.bf16.msra.mxu0 %v5082_v57  ;;  %3081 = vmatpush1.bf16.msra.mxu1 %v5082_v57  ;;  %v4216_v32 = vld [vmem:[%s4589_s15 + $0x114] ss:$8 sps:$4 sm:$0xff]  }
 0x192   : > { %1181 = vst.msk [vmem:[%s5289_s13 + $0x8] sm:$0xf] %vm1178_vm2, %v3854_v44  ;;  %v3855_v18 = vpack.c.bf16 %v1131_v42, %v1131_v42  ;;  %v1106_v61 = vmax.f32 %v953_v54, %v1079_v41  ;;  %v954_v35 = vmax.f32 %v801_v49, %v929_v16  ;;  %v931_v37 = vpop.f32.mrb[31].mxu0  ;;  %v1084_v38 = vpop.f32.mrb[31].mxu1  ;;  %2928 = vmatprep.subr.bf16.mxu0 %v4378_v0  ;;  %v4218_v54 = vld [vmem:[%s4583_s17 + $0x110] ss:$8 sps:$4 sm:$0xff]  }
 0x193   : > { %3082 = vmatprep.subr.bf16.mxu1 %v4378_v0  ;;  %v4220_v37 = vld [vmem:[%s4583_s17 + $0x124] ss:$8 sps:$4 sm:$0xff]  }
 0x194   : > { %1182 = vst.msk [vmem:[%s5289_s13 + $0xc] sm:$0xf] %vm1178_vm2, %v3855_v18  ;;  %v1122_v57 = vadd.f32 %v5269_v52, %v1106_v61  ;;  %v1107_v5 = vmax.f32 %v954_v35, %v1082_v17  ;;  %2679 = vmatmul.mubr.bf16.gmra.mrb[136].mxu0 %v4200_v43  ;;  %2823 = vmatmul.mubr.bf16.gmra.mrb[136].mxu1 %v4201_v55  ;;  %v4219_v18 = vld [vmem:[%s4589_s15 + $0x110] ss:$8 sps:$4 sm:$0xff]   ;;  %v4222_v38 = vld [vmem:[%s4589_s15 + $0x124] ss:$8 sps:$4 sm:$0xff]  }
 0x195   : > { %2929 = vmatpush1.bf16.msra.mxu0 %v5093_v60  ;;  %3083 = vmatpush1.bf16.msra.mxu1 %v5093_v60 }
 0x196   : > { %v1132_v46 = vmax.f32 %v1122_v57, 0.0  ;;  %v1123_v47 = vadd.f32 %v5269_v52, %v1107_v5  ;;  %2930 = vmatprep.subr.bf16.mxu0 %v4378_v0  ;;  %3084 = vmatprep.subr.bf16.mxu1 %v4378_v0  ;;  %v4205_v0 = vld [vmem:[%s4589_s15 + $0xf0] ss:$8 sps:$4 sm:$0xff]  }
 0x197   : > { %v934_v49 = vpop.f32.mrb[32].mxu0  ;;  %v1087_v15 = vpop.f32.mrb[32].mxu1  ;;  %3800 = vmatprep.mubr.msk.bf16.mxu0 %vm560_vm0, %v4204_v62  ;;  %3825 = vmatprep.mubr.msk.bf16.mxu1 %vm560_vm0, %v4207_v63 }
 0x198   : > { %v3856_v23 = vpack.c.bf16 %v1132_v46, %v1132_v46  ;;  %v1133_v24 = vmax.f32 %v1123_v47, 0.0  ;;  %v955_v60 = vmax.f32 %v802_v59, %v934_v49  ;;  %v936_v25 = vpop.f32.mrb[33].mxu0  ;;  %v1089_v48 = vpop.f32.mrb[33].mxu1 }
 0x199   : > { %v937_v19 = vpop.f32.mrb[34].mxu0  ;;  %v1090_v20 = vpop.f32.mrb[34].mxu1  ;;  %2931 = vmatpush1.bf16.msra.mxu0 %v4704_v13  ;;  %3085 = vmatpush1.bf16.msra.mxu1 %v4704_v13  ;;  %v4226_v48 = vld [vmem:[%s4583_s17 + $0x134] ss:$8 sps:$4 sm:$0xff]  }
 0x19a   : > { %1183 = vst.msk [vmem:[%s5289_s13 + $0x10] sm:$0xf] %vm1178_vm2, %v3856_v23  ;;  %v3857_v2 = vpack.c.bf16 %v1133_v24, %v1133_v24  ;;  %v1108_v36 = vmax.f32 %v955_v60, %v1087_v15  ;;  %v956_v56 = vmax.f32 %v803_v14, %v937_v19  ;;  %v939_v58 = vpop.f32.mrb[35].mxu0  ;;  %v1092_v59 = vpop.f32.mrb[35].mxu1  ;;  %v4224_v23 = vld [vmem:[%s4583_s17 + $0x120] ss:$8 sps:$4 sm:$0xff]  }
 0x19b   : > { %v4225_v24 = vld [vmem:[%s4589_s15 + $0x120] ss:$8 sps:$4 sm:$0xff]   ;;  %v4230_v59 = vld [vmem:[%s4583_s17 + $0x130] ss:$8 sps:$4 sm:$0xff]  }
 0x19c   : > { %1184 = vst.msk [vmem:[%s5289_s13 + $0x14] sm:$0xf] %vm1178_vm2, %v3857_v2  ;;  %v1124_v4 = vadd.f32 %v5269_v52, %v1108_v36  ;;  %v1109_v33 = vmax.f32 %v956_v56, %v1090_v20  ;;  %2945 = vmatmul.mubr.bf16.vlgmr.msra.gmra.mrb[140].mxu0 %v4202_v45  ;;  %3099 = vmatmul.mubr.bf16.vlgmr.msra.gmra.mrb[140].mxu1 %v4205_v0  ;;  %v4228_v0 = vld [vmem:[%s4589_s15 + $0x134] ss:$8 sps:$4 sm:$0xff]  }
 0x19d   : > { %3801 = vmatprep.mubr.msk.bf16.mxu0 %vm560_vm0, %v4208_v21  ;;  %3826 = vmatprep.mubr.msk.bf16.mxu1 %vm560_vm0, %v4210_v27 }
 0x19e   : > { %v1134_v13 = vmax.f32 %v1124_v4, 0.0  ;;  %v1125_v6 = vadd.f32 %v5269_v52, %v1109_v33  ;;  %v4231_v4 = vld [vmem:[%s4589_s15 + $0x130] ss:$8 sps:$4 sm:$0xff]  }
 0x19f   : > { %v942_v12 = vpop.f32.mrb[36].mxu0  ;;  %v1095_v14 = vpop.f32.mrb[36].mxu1 }
 0x1a0   : > { %v3858_v34 = vpack.c.bf16 %v1134_v13, %v1134_v13  ;;  %v1135_v28 = vmax.f32 %v1125_v6, 0.0  ;;  %v957_v3 = vmax.f32 %v804_v1, %v942_v12  ;;  %v944_v29 = vpop.f32.mrb[37].mxu0  ;;  %v1097_v11 = vpop.f32.mrb[37].mxu1 }
 0x1a1   : > { %v945_v51 = vpop.f32.mrb[38].mxu0  ;;  %v1098_v40 = vpop.f32.mrb[38].mxu1 }
 0x1a2   : > { %1185 = vst.msk [vmem:[%s5289_s13 + $0x18] sm:$0xf] %vm1178_vm2, %v3858_v34  ;;  %v3859_v9 = vpack.c.bf16 %v1135_v28, %v1135_v28  ;;  %v1110_v41 = vmax.f32 %v957_v3, %v1095_v14  ;;  %v958_v43 = vmax.f32 %v805_v31, %v945_v51  ;;  %v947_v44 = vpop.f32.mrb[39].mxu0  ;;  %v1100_v42 = vpop.f32.mrb[39].mxu1 }
 0x1a4   : > { %1186 = vst.msk [vmem:[%s5289_s13 + $0x1c] sm:$0xf] %vm1178_vm2, %v3859_v9  ;;  %v1126_v22 = vadd.f32 %v5269_v52, %v1110_v41  ;;  %v1111_v26 = vmax.f32 %v958_v43, %v1098_v40  ;;  %2953 = vmatmul.mubr.bf16.gmra.mrb[144].mxu0 %v4212_v10  ;;  %3107 = vmatmul.mubr.bf16.gmra.mrb[144].mxu1 %v4213_v39 }
 0x1a5   : > { %3802 = vmatprep.mubr.msk.bf16.mxu0 %vm560_vm0, %v4214_v8  ;;  %3827 = vmatprep.mubr.msk.bf16.mxu1 %vm560_vm0, %v4216_v32 }
 0x1a6   : > { %v1136_v1 = vmax.f32 %v1126_v22, 0.0  ;;  %v1127_v30 = vadd.f32 %v5269_v52, %v1111_v26 }
 0x1a7   : > { %v5383_v7 = vpop.f32.mrb[40].mxu0  ;;  %v5385_v31 = vpop.f32.mrb[40].mxu1 }
 0x1a8   : > { %v3860_v50 = vpack.c.bf16 %v1136_v1, %v1136_v1  ;;  %v1137_v53 = vmax.f32 %v1127_v30, 0.0  ;;  %v1477_v55 = vmax.f32 %v5383_v7, %v5385_v31  ;;  %v1296_v16 = vpop.f32.mrb[41].mxu0  ;;  %v1440_v17 = vpop.f32.mrb[41].mxu1 }
 0x1a9   : > { %v5391_v61 = vpop.f32.mrb[42].mxu0  ;;  %v5393_v35 = vpop.f32.mrb[42].mxu1 }
 0x1aa   : > { %1187 = vst.msk [vmem:[%s5289_s13 + $0x20] sm:$0xf] %vm1178_vm2, %v3860_v50  ;;  %v3861_v62 = vpack.c.bf16 %v1137_v53, %v1137_v53  ;;  %v1478_v63 = vmax.f32 %v5391_v61, %v5393_v35  ;;  %v1299_v57 = vpop.f32.mrb[43].mxu0  ;;  %v1443_v5 = vpop.f32.mrb[43].mxu1 }
 0x1ac   : > { %1188 = vst.msk [vmem:[%s5289_s13 + $0x24] sm:$0xf] %vm1178_vm2, %v3861_v62  ;;  %2961 = vmatmul.mubr.bf16.gmra.mrb[148].mxu0 %v4218_v54  ;;  %3115 = vmatmul.mubr.bf16.gmra.mrb[148].mxu1 %v4219_v18 }
 0x1ad   : > { %3803 = vmatprep.mubr.msk.bf16.mxu0 %vm560_vm0, %v4220_v37  ;;  %3828 = vmatprep.mubr.msk.bf16.mxu1 %vm560_vm0, %v4222_v38 }
 0x1af   : > { %v5405_v46 = vpop.f32.mrb[44].mxu0  ;;  %v5407_v47 = vpop.f32.mrb[44].mxu1 }
 0x1b0   : > { %v1479_v49 = vmax.f32 %v5405_v46, %v5407_v47  ;;  %v1304_v15 = vpop.f32.mrb[45].mxu0  ;;  %v1448_v45 = vpop.f32.mrb[45].mxu1 }
 0x1b1   : > { %v5413_v60 = vpop.f32.mrb[46].mxu0  ;;  %v5415_v25 = vpop.f32.mrb[46].mxu1 }
 0x1b2   : > { %v1480_v19 = vmax.f32 %v5413_v60, %v5415_v25  ;;  %v1307_v20 = vpop.f32.mrb[47].mxu0  ;;  %v1451_v21 = vpop.f32.mrb[47].mxu1 }
 0x1b4   : > { %2969 = vmatmul.mubr.bf16.gmra.mrb[152].mxu0 %v4224_v23  ;;  %3123 = vmatmul.mubr.bf16.gmra.mrb[152].mxu1 %v4225_v24 }
 0x1b5   : > { %3804 = vmatprep.mubr.msk.bf16.mxu0 %vm560_vm0, %v4226_v48  ;;  %3829 = vmatprep.mubr.msk.bf16.mxu1 %vm560_vm0, %v4228_v0 }
 0x1b7   : > { %v5423_v27 = vpop.f32.mrb[48].mxu0  ;;  %v5425_v2 = vpop.f32.mrb[48].mxu1 }
 0x1b8   : > { %v1481_v36 = vmax.f32 %v5423_v27, %v5425_v2  ;;  %v1312_v56 = vpop.f32.mrb[49].mxu0  ;;  %v1456_v58 = vpop.f32.mrb[49].mxu1 }
 0x1b9   : > { %v5431_v33 = vpop.f32.mrb[50].mxu0  ;;  %v5433_v13 = vpop.f32.mrb[50].mxu1 }
 0x1ba   : > { %v1482_v6 = vmax.f32 %v5431_v33, %v5433_v13  ;;  %v1315_v12 = vpop.f32.mrb[51].mxu0  ;;  %v1459_v14 = vpop.f32.mrb[51].mxu1 }
 0x1bc   : > { %2977 = vmatmul.mubr.bf16.gmra.mrb[156].mxu0 %v4230_v59  ;;  %3131 = vmatmul.mubr.bf16.gmra.mrb[156].mxu1 %v4231_v4 }
 0x1bf   : > { %v5437_v10 = vpop.f32.mrb[52].mxu0  ;;  %v5439_v34 = vpop.f32.mrb[52].mxu1 }
 0x1c0   : > { %v1483_v28 = vmax.f32 %v5437_v10, %v5439_v34  ;;  %v1320_v3 = vpop.f32.mrb[53].mxu0  ;;  %v1464_v29 = vpop.f32.mrb[53].mxu1 }
 0x1c1   : > { %v5443_v11 = vpop.f32.mrb[54].mxu0  ;;  %v5445_v39 = vpop.f32.mrb[54].mxu1 }
 0x1c2   : > { %v1484_v51 = vmax.f32 %v5443_v11, %v5445_v39  ;;  %v1323_v40 = vpop.f32.mrb[55].mxu0  ;;  %v1467_v8 = vpop.f32.mrb[55].mxu1 }
 0x1c7   : > { %v5449_v32 = vpop.f32.mrb[56].mxu0  ;;  %v5451_v9 = vpop.f32.mrb[56].mxu1 }
 0x1c8   : > { %v1485_v41 = vmax.f32 %v5449_v32, %v5451_v9  ;;  %v1328_v43 = vpop.f32.mrb[57].mxu0  ;;  %v1472_v44 = vpop.f32.mrb[57].mxu1 }
 0x1c9   : > { %v5455_v42 = vpop.f32.mrb[58].mxu0  ;;  %v5457_v22 = vpop.f32.mrb[58].mxu1 }
 0x1ca   : > { %v1486_v26 = vmax.f32 %v5455_v42, %v5457_v22  ;;  %v1331_v1 = vpop.f32.mrb[59].mxu0  ;;  %v1475_v30 = vpop.f32.mrb[59].mxu1 }
 0x1cf   : > { %v1592_v54 = vpop.f32.mrb[60].mxu0  ;;  %v1746_v50 = vpop.f32.mrb[60].mxu1 }
 0x1d0   : > { %v1631_v53 = vmax.f32 %v1477_v55, %v1592_v54  ;;  %v1594_v16 = vpop.f32.mrb[61].mxu0  ;;  %v1748_v17 = vpop.f32.mrb[61].mxu1 }
 0x1d1   : > { %v1595_v18 = vpop.f32.mrb[62].mxu0  ;;  %v1749_v37 = vpop.f32.mrb[62].mxu1 }
 0x1d2   : > { %v1785_v38 = vmax.f32 %v1631_v53, %v1746_v50  ;;  %v1632_v62 = vmax.f32 %v1478_v63, %v1595_v18  ;;  %v1597_v57 = vpop.f32.mrb[63].mxu0  ;;  %v1751_v5 = vpop.f32.mrb[63].mxu1 }
 0x1d4   : > { %v1795_v15 = vadd.f32 %v5269_v52, %v1785_v38  ;;  %v1786_v45 = vmax.f32 %v1632_v62, %v1749_v37 }
 0x1d6   : > { %v1805_v23 = vmax.f32 %v1795_v15, 0.0  ;;  %v1796_v24 = vadd.f32 %v5269_v52, %v1786_v45 }
 0x1d7   : > { %v1600_v7 = vpop.f32.mrb[64].mxu0  ;;  %v1754_v31 = vpop.f32.mrb[64].mxu1 }
 0x1d8   : > { %v3862_v55 = vpack.c.bf16 %v1805_v23, %v1805_v23  ;;  %v1806_v48 = vmax.f32 %v1796_v24, 0.0  ;;  %v1633_v0 = vmax.f32 %v1479_v49, %v1600_v7  ;;  %v1602_v61 = vpop.f32.mrb[65].mxu0  ;;  %v1756_v35 = vpop.f32.mrb[65].mxu1 }
 0x1d9   : > { %v1603_v63 = vpop.f32.mrb[66].mxu0  ;;  %v1757_v20 = vpop.f32.mrb[66].mxu1 }
 0x1da   : > { %3600 = vst.msk [vmem:[%s5289_s13 + $0x28] sm:$0xf] %vm1178_vm2, %v3862_v55  ;;  %v3863_v21 = vpack.c.bf16 %v1806_v48, %v1806_v48  ;;  %v1787_v56 = vmax.f32 %v1633_v0, %v1754_v31  ;;  %v1634_v58 = vmax.f32 %v1480_v19, %v1603_v63  ;;  %v1605_v59 = vpop.f32.mrb[67].mxu0  ;;  %v1759_v4 = vpop.f32.mrb[67].mxu1 }
 0x1dc   : > { %3601 = vst.msk [vmem:[%s5289_s13 + $0x2c] sm:$0xf] %vm1178_vm2, %v3863_v21  ;;  %v1797_v46 = vadd.f32 %v5269_v52, %v1787_v56  ;;  %v1788_v47 = vmax.f32 %v1634_v58, %v1757_v20 }
 0x1de   : > { %v1807_v49 = vmax.f32 %v1797_v46, 0.0  ;;  %v1798_v12 = vadd.f32 %v5269_v52, %v1788_v47 }
 0x1df   : > { %v1608_v14 = vpop.f32.mrb[68].mxu0  ;;  %v1762_v3 = vpop.f32.mrb[68].mxu1 }
 0x1e0   : > { %v3864_v29 = vpack.c.bf16 %v1807_v49, %v1807_v49  ;;  %v1808_v40 = vmax.f32 %v1798_v12, 0.0  ;;  %v1635_v60 = vmax.f32 %v1481_v36, %v1608_v14  ;;  %v1610_v25 = vpop.f32.mrb[69].mxu0  ;;  %v1764_v19 = vpop.f32.mrb[69].mxu1 }
 0x1e1   : > { %v1611_v8 = vpop.f32.mrb[70].mxu0  ;;  %v1765_v43 = vpop.f32.mrb[70].mxu1 }
 0x1e2   : > { %3602 = vst.msk [vmem:[%s5289_s13 + $0x30] sm:$0xf] %vm1178_vm2, %v3864_v29  ;;  %v3865_v44 = vpack.c.bf16 %v1808_v40, %v1808_v40  ;;  %v1789_v1 = vmax.f32 %v1635_v60, %v1762_v3  ;;  %v1636_v30 = vmax.f32 %v1482_v6, %v1611_v8  ;;  %v1613_v54 = vpop.f32.mrb[71].mxu0  ;;  %v1767_v50 = vpop.f32.mrb[71].mxu1 }
 0x1e4   : > { %3603 = vst.msk [vmem:[%s5289_s13 + $0x34] sm:$0xf] %vm1178_vm2, %v3865_v44  ;;  %v1799_v27 = vadd.f32 %v5269_v52, %v1789_v1  ;;  %v1790_v2 = vmax.f32 %v1636_v30, %v1765_v43 }
 0x1e6   : > { %v1809_v36 = vmax.f32 %v1799_v27, 0.0  ;;  %v1800_v53 = vadd.f32 %v5269_v52, %v1790_v2 }
 0x1e7   : > { %v1616_v16 = vpop.f32.mrb[72].mxu0  ;;  %v1770_v17 = vpop.f32.mrb[72].mxu1 }
 0x1e8   : > { %v3866_v18 = vpack.c.bf16 %v1809_v36, %v1809_v36  ;;  %v1810_v37 = vmax.f32 %v1800_v53, 0.0  ;;  %v1637_v33 = vmax.f32 %v1483_v28, %v1616_v16  ;;  %v1618_v13 = vpop.f32.mrb[73].mxu0  ;;  %v1772_v6 = vpop.f32.mrb[73].mxu1 }
 0x1e9   : > { %v1619_v38 = vpop.f32.mrb[74].mxu0  ;;  %v1773_v62 = vpop.f32.mrb[74].mxu1 }
 0x1ea   : > { %3604 = vst.msk [vmem:[%s5289_s13 + $0x38] sm:$0xf] %vm1178_vm2, %v3866_v18  ;;  %v3867_v57 = vpack.c.bf16 %v1810_v37, %v1810_v37  ;;  %v1791_v5 = vmax.f32 %v1637_v33, %v1770_v17  ;;  %v1638_v15 = vmax.f32 %v1484_v51, %v1619_v38  ;;  %v1621_v45 = vpop.f32.mrb[75].mxu0  ;;  %v1775_v23 = vpop.f32.mrb[75].mxu1 }
 0x1ec   : > { %3605 = vst.msk [vmem:[%s5289_s13 + $0x3c] sm:$0xf] %vm1178_vm2, %v3867_v57  ;;  %v1801_v10 = vadd.f32 %v5269_v52, %v1791_v5  ;;  %v1792_v34 = vmax.f32 %v1638_v15, %v1773_v62 }
 0x1ee   : > { %v1811_v28 = vmax.f32 %v1801_v10, 0.0  ;;  %v1802_v24 = vadd.f32 %v5269_v52, %v1792_v34 }
 0x1ef   : > { %v1624_v7 = vpop.f32.mrb[76].mxu0  ;;  %v1778_v31 = vpop.f32.mrb[76].mxu1 }
 0x1f0   : > { %v3868_v55 = vpack.c.bf16 %v1811_v28, %v1811_v28  ;;  %v1812_v48 = vmax.f32 %v1802_v24, 0.0  ;;  %v1639_v11 = vmax.f32 %v1485_v41, %v1624_v7  ;;  %v1626_v39 = vpop.f32.mrb[77].mxu0  ;;  %v1780_v51 = vpop.f32.mrb[77].mxu1 }
 0x1f1   : > { %v1627_v0 = vpop.f32.mrb[78].mxu0  ;;  %v1781_v61 = vpop.f32.mrb[78].mxu1 }
 0x1f2   : > { %3606 = vst.msk [vmem:[%s5289_s13 + $0x40] sm:$0xf] %vm1178_vm2, %v3868_v55  ;;  %v3869_v35 = vpack.c.bf16 %v1812_v48, %v1812_v48  ;;  %v1793_v63 = vmax.f32 %v1639_v11, %v1778_v31  ;;  %v1640_v20 = vmax.f32 %v1486_v26, %v1627_v0  ;;  %v1629_v21 = vpop.f32.mrb[79].mxu0  ;;  %v1783_v56 = vpop.f32.mrb[79].mxu1 }
 0x1f4   : > { %3607 = vst.msk [vmem:[%s5289_s13 + $0x44] sm:$0xf] %vm1178_vm2, %v3869_v35  ;;  %v1803_v32 = vadd.f32 %v5269_v52, %v1793_v63  ;;  %v1794_v9 = vmax.f32 %v1640_v20, %v1781_v61 }
 0x1f6   : > { %v1813_v41 = vmax.f32 %v1803_v32, 0.0  ;;  %v1804_v58 = vadd.f32 %v5269_v52, %v1794_v9 }
 0x1f7   : > { %v1971_v59 = vpop.f32.mrb[80].mxu0  ;;  %v2115_v4 = vpop.f32.mrb[80].mxu1 }
 0x1f8   : > { %v3870_v46 = vpack.c.bf16 %v1813_v41, %v1813_v41  ;;  %v1814_v47 = vmax.f32 %v1804_v58, 0.0  ;;  %v2154_v49 = vmax.f32 %v1971_v59, %v2115_v4  ;;  %v1973_v12 = vpop.f32.mrb[81].mxu0  ;;  %v2117_v42 = vpop.f32.mrb[81].mxu1 }
 0x1f9   : > { %v1974_v22 = vpop.f32.mrb[82].mxu0  ;;  %v2118_v26 = vpop.f32.mrb[82].mxu1 }
 0x1fa   : > { %3608 = vst.msk [vmem:[%s5289_s13 + $0x48] sm:$0xf] %vm1178_vm2, %v3870_v46  ;;  %v3871_v14 = vpack.c.bf16 %v1814_v47, %v1814_v47  ;;  %v2155_v3 = vmax.f32 %v1974_v22, %v2118_v26  ;;  %v1976_v29 = vpop.f32.mrb[83].mxu0  ;;  %v2120_v40 = vpop.f32.mrb[83].mxu1 }
 0x1fc   : > { %3609 = vst.msk [vmem:[%s5289_s13 + $0x4c] sm:$0xf] %vm1178_vm2, %v3871_v14 }
 0x1ff   : > { %v1979_v60 = vpop.f32.mrb[84].mxu0  ;;  %v2123_v25 = vpop.f32.mrb[84].mxu1 }
 0x200   : > { %v2156_v19 = vmax.f32 %v1979_v60, %v2123_v25  ;;  %v1981_v8 = vpop.f32.mrb[85].mxu0  ;;  %v2125_v43 = vpop.f32.mrb[85].mxu1 }
 0x201   : > { %v5521_v44 = vpop.f32.mrb[86].mxu0  ;;  %v2126_v1 = vpop.f32.mrb[86].mxu1 }
 0x202   : > { %v2157_v30 = vmax.f32 %v5521_v44, %v2126_v1  ;;  %v1984_v54 = vpop.f32.mrb[87].mxu0  ;;  %v2128_v50 = vpop.f32.mrb[87].mxu1 }
 0x207   : > { %v5524_v27 = vpop.f32.mrb[88].mxu0  ;;  %v5526_v2 = vpop.f32.mrb[88].mxu1 }
 0x208   : > { %v2158_v36 = vmax.f32 %v5524_v27, %v5526_v2  ;;  %v1989_v53 = vpop.f32.mrb[89].mxu0  ;;  %v2133_v16 = vpop.f32.mrb[89].mxu1 }
 0x209   : > { %v5530_v17 = vpop.f32.mrb[90].mxu0  ;;  %v5532_v18 = vpop.f32.mrb[90].mxu1 }
 0x20a   : > { %v2159_v37 = vmax.f32 %v5530_v17, %v5532_v18  ;;  %v1992_v33 = vpop.f32.mrb[91].mxu0  ;;  %v2136_v13 = vpop.f32.mrb[91].mxu1 }
 0x20f   : > { %v5536_v6 = vpop.f32.mrb[92].mxu0  ;;  %v5538_v38 = vpop.f32.mrb[92].mxu1 }
 0x210   : > { %v2160_v62 = vmax.f32 %v5536_v6, %v5538_v38  ;;  %v1997_v57 = vpop.f32.mrb[93].mxu0  ;;  %v2141_v5 = vpop.f32.mrb[93].mxu1 }
 0x211   : > { %v5542_v15 = vpop.f32.mrb[94].mxu0  ;;  %v5544_v45 = vpop.f32.mrb[94].mxu1 }
 0x212   : > { %v2161_v23 = vmax.f32 %v5542_v15, %v5544_v45  ;;  %v2000_v10 = vpop.f32.mrb[95].mxu0  ;;  %v2144_v34 = vpop.f32.mrb[95].mxu1 }
 0x217   : > { %v5548_v28 = vpop.f32.mrb[96].mxu0  ;;  %v5550_v24 = vpop.f32.mrb[96].mxu1 }
 0x218   : > { %v2162_v7 = vmax.f32 %v5548_v28, %v5550_v24  ;;  %v2005_v31 = vpop.f32.mrb[97].mxu0  ;;  %v2149_v55 = vpop.f32.mrb[97].mxu1 }
 0x219   : > { %v5554_v48 = vpop.f32.mrb[98].mxu0  ;;  %v5556_v11 = vpop.f32.mrb[98].mxu1 }
 0x21a   : > { %v2163_v39 = vmax.f32 %v5554_v48, %v5556_v11  ;;  %v2008_v51 = vpop.f32.mrb[99].mxu0  ;;  %v2152_v0 = vpop.f32.mrb[99].mxu1 }
 0x21f   : > { %v2269_v61 = vpop.f32.mrb[100].mxu0  ;;  %v2423_v35 = vpop.f32.mrb[100].mxu1 }
 0x220   : > { %v2308_v63 = vmax.f32 %v2154_v49, %v2269_v61  ;;  %v2271_v20 = vpop.f32.mrb[101].mxu0  ;;  %v2425_v21 = vpop.f32.mrb[101].mxu1 }
 0x221   : > { %v2272_v56 = vpop.f32.mrb[102].mxu0  ;;  %v2426_v32 = vpop.f32.mrb[102].mxu1 }
 0x222   : > { %v2462_v9 = vmax.f32 %v2308_v63, %v2423_v35  ;;  %v2309_v41 = vmax.f32 %v2155_v3, %v2272_v56  ;;  %v2274_v58 = vpop.f32.mrb[103].mxu0  ;;  %v2428_v59 = vpop.f32.mrb[103].mxu1 }
 0x224   : > { %v2472_v4 = vadd.f32 %v5269_v52, %v2462_v9  ;;  %v2463_v46 = vmax.f32 %v2309_v41, %v2426_v32 }
 0x226   : > { %v2482_v47 = vmax.f32 %v2472_v4, 0.0  ;;  %v2473_v12 = vadd.f32 %v5269_v52, %v2463_v46 }
 0x227   : > { %v2277_v42 = vpop.f32.mrb[104].mxu0  ;;  %v2431_v22 = vpop.f32.mrb[104].mxu1 }
 0x228   : > { %v3872_v26 = vpack.c.bf16 %v2482_v47, %v2482_v47  ;;  %v2483_v49 = vmax.f32 %v2473_v12, 0.0  ;;  %v2310_v14 = vmax.f32 %v2156_v19, %v2277_v42  ;;  %v2279_v29 = vpop.f32.mrb[105].mxu0  ;;  %v2433_v40 = vpop.f32.mrb[105].mxu1 }
 0x229   : > { %v2280_v60 = vpop.f32.mrb[106].mxu0  ;;  %v2434_v25 = vpop.f32.mrb[106].mxu1 }
 0x22a   : > { %3720 = vst.msk [vmem:[%s5289_s13 + $0x50] sm:$0xf] %vm1178_vm2, %v3872_v26  ;;  %v3873_v3 = vpack.c.bf16 %v2483_v49, %v2483_v49  ;;  %v2464_v8 = vmax.f32 %v2310_v14, %v2431_v22  ;;  %v2311_v43 = vmax.f32 %v2157_v30, %v2280_v60  ;;  %v2282_v44 = vpop.f32.mrb[107].mxu0  ;;  %v2436_v1 = vpop.f32.mrb[107].mxu1 }
 0x22c   : > { %3721 = vst.msk [vmem:[%s5289_s13 + $0x54] sm:$0xf] %vm1178_vm2, %v3873_v3  ;;  %v2474_v54 = vadd.f32 %v5269_v52, %v2464_v8  ;;  %v2465_v50 = vmax.f32 %v2311_v43, %v2434_v25 }
 0x22e   : > { %v2484_v53 = vmax.f32 %v2474_v54, 0.0  ;;  %v2475_v19 = vadd.f32 %v5269_v52, %v2465_v50 }
 0x22f   : > { %v2285_v16 = vpop.f32.mrb[108].mxu0  ;;  %v2439_v33 = vpop.f32.mrb[108].mxu1 }
 0x230   : > { %v3874_v13 = vpack.c.bf16 %v2484_v53, %v2484_v53  ;;  %v2485_v57 = vmax.f32 %v2475_v19, 0.0  ;;  %v2312_v30 = vmax.f32 %v2158_v36, %v2285_v16  ;;  %v2287_v5 = vpop.f32.mrb[109].mxu0  ;;  %v2441_v10 = vpop.f32.mrb[109].mxu1 }
 0x231   : > { %v2288_v34 = vpop.f32.mrb[110].mxu0  ;;  %v2442_v31 = vpop.f32.mrb[110].mxu1 }
 0x232   : > { %3722 = vst.msk [vmem:[%s5289_s13 + $0x58] sm:$0xf] %vm1178_vm2, %v3874_v13  ;;  %v3875_v55 = vpack.c.bf16 %v2485_v57, %v2485_v57  ;;  %v2466_v51 = vmax.f32 %v2312_v30, %v2439_v33  ;;  %v2313_v0 = vmax.f32 %v2159_v37, %v2288_v34  ;;  %v2290_v61 = vpop.f32.mrb[111].mxu0  ;;  %v2444_v35 = vpop.f32.mrb[111].mxu1 }
 0x234   : > { %3723 = vst.msk [vmem:[%s5289_s13 + $0x5c] sm:$0xf] %vm1178_vm2, %v3875_v55  ;;  %v2476_v27 = vadd.f32 %v5269_v52, %v2466_v51  ;;  %v2467_v2 = vmax.f32 %v2313_v0, %v2442_v31 }
 0x236   : > { %v2486_v36 = vmax.f32 %v2476_v27, 0.0  ;;  %v2477_v63 = vadd.f32 %v5269_v52, %v2467_v2 }
 0x237   : > { %v2293_v20 = vpop.f32.mrb[112].mxu0  ;;  %v2447_v21 = vpop.f32.mrb[112].mxu1 }
 0x238   : > { %v3876_v56 = vpack.c.bf16 %v2486_v36, %v2486_v36  ;;  %v2487_v32 = vmax.f32 %v2477_v63, 0.0  ;;  %v2314_v17 = vmax.f32 %v2160_v62, %v2293_v20  ;;  %v2295_v18 = vpop.f32.mrb[113].mxu0  ;;  %v2449_v37 = vpop.f32.mrb[113].mxu1 }
 0x239   : > { %v2296_v9 = vpop.f32.mrb[114].mxu0  ;;  %v2450_v41 = vpop.f32.mrb[114].mxu1 }
 0x23a   : > { %3724 = vst.msk [vmem:[%s5289_s13 + $0x60] sm:$0xf] %vm1178_vm2, %v3876_v56  ;;  %v3877_v58 = vpack.c.bf16 %v2487_v32, %v2487_v32  ;;  %v2468_v59 = vmax.f32 %v2314_v17, %v2447_v21  ;;  %v2315_v4 = vmax.f32 %v2161_v23, %v2296_v9  ;;  %v2298_v46 = vpop.f32.mrb[115].mxu0  ;;  %v2452_v47 = vpop.f32.mrb[115].mxu1 }
 0x23c   : > { %3725 = vst.msk [vmem:[%s5289_s13 + $0x64] sm:$0xf] %vm1178_vm2, %v3877_v58  ;;  %v2478_v6 = vadd.f32 %v5269_v52, %v2468_v59  ;;  %v2469_v38 = vmax.f32 %v2315_v4, %v2450_v41 }
 0x23e   : > { %v2488_v62 = vmax.f32 %v2478_v6, 0.0  ;;  %v2479_v12 = vadd.f32 %v5269_v52, %v2469_v38 }
 0x23f   : > { %v2301_v42 = vpop.f32.mrb[116].mxu0  ;;  %v2455_v22 = vpop.f32.mrb[116].mxu1 }
 0x240   : > { %v3878_v26 = vpack.c.bf16 %v2488_v62, %v2488_v62  ;;  %v2489_v49 = vmax.f32 %v2479_v12, 0.0  ;;  %v2316_v15 = vmax.f32 %v2162_v7, %v2301_v42  ;;  %v2303_v45 = vpop.f32.mrb[117].mxu0  ;;  %v2457_v23 = vpop.f32.mrb[117].mxu1 }
 0x241   : > { %v2304_v14 = vpop.f32.mrb[118].mxu0  ;;  %v2458_v29 = vpop.f32.mrb[118].mxu1 }
 0x242   : > { %3726 = vst.msk [vmem:[%s5289_s13 + $0x68] sm:$0xf] %vm1178_vm2, %v3878_v26  ;;  %v3879_v40 = vpack.c.bf16 %v2489_v49, %v2489_v49  ;;  %v2470_v60 = vmax.f32 %v2316_v15, %v2455_v22  ;;  %v2317_v25 = vmax.f32 %v2163_v39, %v2304_v14  ;;  %v2306_v3 = vpop.f32.mrb[119].mxu0  ;;  %v2460_v8 = vpop.f32.mrb[119].mxu1 }
 0x244   : > { %3727 = vst.msk [vmem:[%s5289_s13 + $0x6c] sm:$0xf] %vm1178_vm2, %v3879_v40  ;;  %v2480_v28 = vadd.f32 %v5269_v52, %v2470_v60  ;;  %v2471_v24 = vmax.f32 %v2317_v25, %v2458_v29 }
 0x246   : > { %v2490_v7 = vmax.f32 %v2480_v28, 0.0  ;;  %v2481_v43 = vadd.f32 %v5269_v52, %v2471_v24 }
 0x247   : > { %v2648_v44 = vpop.f32.mrb[120].mxu0  ;;  %v2792_v1 = vpop.f32.mrb[120].mxu1 }
 0x248   : > { %v3880_v54 = vpack.c.bf16 %v2490_v7, %v2490_v7  ;;  %v2491_v50 = vmax.f32 %v2481_v43, 0.0  ;;  %v2831_v53 = vmax.f32 %v2648_v44, %v2792_v1  ;;  %v2650_v19 = vpop.f32.mrb[121].mxu0  ;;  %v2794_v48 = vpop.f32.mrb[121].mxu1  ;;  %v5653_v44 = vld [vmem:[%s5732_s5] ss:$0 sm:$0xff] }
 0x249   : > { %v2651_v11 = vpop.f32.mrb[122].mxu0  ;;  %v2795_v39 = vpop.f32.mrb[122].mxu1 }
 0x24a   : > { %3728 = vst.msk [vmem:[%s5289_s13 + $0x70] sm:$0xf] %vm1178_vm2, %v3880_v54  ;;  %v3881_v16 = vpack.c.bf16 %v2491_v50, %v2491_v50  ;;  %v2832_v33 = vmax.f32 %v2651_v11, %v2795_v39  ;;  %v2653_v13 = vpop.f32.mrb[123].mxu0  ;;  %v2797_v57 = vpop.f32.mrb[123].mxu1 }
 0x24c   : > { %3729 = vst.msk [vmem:[%s5289_s13 + $0x74] sm:$0xf] %vm1178_vm2, %v3881_v16 }
 0x24f   : > { %v2656_v30 = vpop.f32.mrb[124].mxu0  ;;  %v2800_v5 = vpop.f32.mrb[124].mxu1 }
 0x250   : > { %v2833_v52 = vmax.f32 %v2656_v30, %v2800_v5  ;;  %v2658_v10 = vpop.f32.mrb[125].mxu0  ;;  %v2802_v34 = vpop.f32.mrb[125].mxu1 }
 0x251   : > { %v5608_v31 = vpop.f32.mrb[126].mxu0  ;;  %v5610_v55 = vpop.f32.mrb[126].mxu1 }
 0x252   : > { %v2834_v51 = vmax.f32 %v5608_v31, %v5610_v55  ;;  %v2661_v0 = vpop.f32.mrb[127].mxu0  ;;  %v2805_v61 = vpop.f32.mrb[127].mxu1 }
 0x257   : > { %v5614_v35 = vpop.f32.mrb[128].mxu0  ;;  %v5616_v27 = vpop.f32.mrb[128].mxu1 }
 0x258   : > { %v2835_v2 = vmax.f32 %v5614_v35, %v5616_v27  ;;  %v2666_v36 = vpop.f32.mrb[129].mxu0  ;;  %v2810_v63 = vpop.f32.mrb[129].mxu1 }
 0x259   : > { %v5620_v20 = vpop.f32.mrb[130].mxu0  ;;  %v5622_v21 = vpop.f32.mrb[130].mxu1 }
 0x25a   : > { %v2836_v56 = vmax.f32 %v5620_v20, %v5622_v21  ;;  %v2669_v32 = vpop.f32.mrb[131].mxu0  ;;  %v2813_v17 = vpop.f32.mrb[131].mxu1 }
 0x25f   : > { %v5626_v18 = vpop.f32.mrb[132].mxu0  ;;  %v5628_v37 = vpop.f32.mrb[132].mxu1 }
 0x260   : > { %v2837_v9 = vmax.f32 %v5626_v18, %v5628_v37  ;;  %v2674_v41 = vpop.f32.mrb[133].mxu0  ;;  %v2818_v58 = vpop.f32.mrb[133].mxu1 }
 0x261   : > { %v5632_v59 = vpop.f32.mrb[134].mxu0  ;;  %v5634_v4 = vpop.f32.mrb[134].mxu1 }
 0x262   : > { %v2838_v46 = vmax.f32 %v5632_v59, %v5634_v4  ;;  %v2677_v47 = vpop.f32.mrb[135].mxu0  ;;  %v2821_v6 = vpop.f32.mrb[135].mxu1 }
 0x267   : > { %v5638_v38 = vpop.f32.mrb[136].mxu0  ;;  %v5640_v62 = vpop.f32.mrb[136].mxu1 }
 0x268   : > { %v2839_v12 = vmax.f32 %v5638_v38, %v5640_v62  ;;  %v2682_v42 = vpop.f32.mrb[137].mxu0  ;;  %v2826_v22 = vpop.f32.mrb[137].mxu1 }
 0x269   : > { %v5644_v26 = vpop.f32.mrb[138].mxu0  ;;  %v5646_v49 = vpop.f32.mrb[138].mxu1 }
 0x26a   : > { %v2840_v15 = vmax.f32 %v5644_v26, %v5646_v49  ;;  %v2685_v45 = vpop.f32.mrb[139].mxu0  ;;  %v2829_v23 = vpop.f32.mrb[139].mxu1 }
 0x26f   : > { %v2946_v14 = vpop.f32.mrb[140].mxu0  ;;  %v3100_v29 = vpop.f32.mrb[140].mxu1 }
 0x270   : > { %v2985_v40 = vmax.f32 %v2831_v53, %v2946_v14  ;;  %v2948_v60 = vpop.f32.mrb[141].mxu0  ;;  %v3102_v25 = vpop.f32.mrb[141].mxu1 }
 0x271   : > { %v2949_v3 = vpop.f32.mrb[142].mxu0  ;;  %v3103_v8 = vpop.f32.mrb[142].mxu1 }
 0x272   : > { %v3139_v28 = vmax.f32 %v2985_v40, %v3100_v29  ;;  %v2986_v24 = vmax.f32 %v2832_v33, %v2949_v3  ;;  %v2951_v7 = vpop.f32.mrb[143].mxu0  ;;  %v3105_v43 = vpop.f32.mrb[143].mxu1 }
 0x274   : > { %v3149_v1 = vadd.f32 %v5653_v44, %v3139_v28  ;;  %v3140_v54 = vmax.f32 %v2986_v24, %v3103_v8 }
 0x276   : > { %v3159_v50 = vmax.f32 %v3149_v1, 0.0  ;;  %v3150_v53 = vadd.f32 %v5653_v44, %v3140_v54 }
 0x277   : > { %v2954_v19 = vpop.f32.mrb[144].mxu0  ;;  %v3108_v48 = vpop.f32.mrb[144].mxu1 }
 0x278   : > { %v3882_v11 = vpack.c.bf16 %v3159_v50, %v3159_v50  ;;  %v3160_v39 = vmax.f32 %v3150_v53, 0.0  ;;  %v2987_v16 = vmax.f32 %v2833_v52, %v2954_v19  ;;  %v2956_v33 = vpop.f32.mrb[145].mxu0  ;;  %v3110_v13 = vpop.f32.mrb[145].mxu1 }
 0x279   : > { %v2957_v57 = vpop.f32.mrb[146].mxu0  ;;  %v3111_v30 = vpop.f32.mrb[146].mxu1 }
 0x27a   : > { %3840 = vst.msk [vmem:[%s5289_s13 + $0x78] sm:$0xf] %vm1178_vm2, %v3882_v11  ;;  %v3883_v5 = vpack.c.bf16 %v3160_v39, %v3160_v39  ;;  %v3141_v10 = vmax.f32 %v2987_v16, %v3108_v48  ;;  %v2988_v34 = vmax.f32 %v2834_v51, %v2957_v57  ;;  %v2959_v31 = vpop.f32.mrb[147].mxu0  ;;  %v3113_v55 = vpop.f32.mrb[147].mxu1 }
 0x27c   : > { %3841 = vst.msk [vmem:[%s5289_s13 + $0x7c] sm:$0xf] %vm1178_vm2, %v3883_v5  ;;  %v3151_v0 = vadd.f32 %v5653_v44, %v3141_v10  ;;  %v3142_v61 = vmax.f32 %v2988_v34, %v3111_v30 }
 0x27e   : > { %v3161_v36 = vmax.f32 %v3151_v0, 0.0  ;;  %v3152_v52 = vadd.f32 %v5653_v44, %v3142_v61 }
 0x27f   : > { %v2962_v63 = vpop.f32.mrb[148].mxu0  ;;  %v3116_v32 = vpop.f32.mrb[148].mxu1 }
 0x280   : > { %v3884_v17 = vpack.c.bf16 %v3161_v36, %v3161_v36  ;;  %v3162_v41 = vmax.f32 %v3152_v52, 0.0  ;;  %v2989_v51 = vmax.f32 %v2835_v2, %v2962_v63  ;;  %v2964_v58 = vpop.f32.mrb[149].mxu0  ;;  %v3118_v47 = vpop.f32.mrb[149].mxu1 }
 0x281   : > { %v2965_v6 = vpop.f32.mrb[150].mxu0  ;;  %v3119_v42 = vpop.f32.mrb[150].mxu1 }
 0x282   : > { %3842 = vst.msk [vmem:[%s5289_s13 + $0x80] sm:$0xf] %vm1178_vm2, %v3884_v17  ;;  %v3885_v22 = vpack.c.bf16 %v3162_v41, %v3162_v41  ;;  %v3143_v45 = vmax.f32 %v2989_v51, %v3116_v32  ;;  %v2990_v23 = vmax.f32 %v2836_v56, %v2965_v6  ;;  %v2967_v14 = vpop.f32.mrb[151].mxu0  ;;  %v3121_v29 = vpop.f32.mrb[151].mxu1 }
 0x284   : > { %3843 = vst.msk [vmem:[%s5289_s13 + $0x84] sm:$0xf] %vm1178_vm2, %v3885_v22  ;;  %v3153_v35 = vadd.f32 %v5653_v44, %v3143_v45  ;;  %v3144_v27 = vmax.f32 %v2990_v23, %v3119_v42 }
 0x286   : > { %v3163_v2 = vmax.f32 %v3153_v35, 0.0  ;;  %v3154_v40 = vadd.f32 %v5653_v44, %v3144_v27 }
 0x287   : > { %v2970_v60 = vpop.f32.mrb[152].mxu0  ;;  %v3124_v25 = vpop.f32.mrb[152].mxu1 }
 0x288   : > { %v3886_v3 = vpack.c.bf16 %v3163_v2, %v3163_v2  ;;  %v3164_v8 = vmax.f32 %v3154_v40, 0.0  ;;  %v2991_v20 = vmax.f32 %v2837_v9, %v2970_v60  ;;  %v2972_v21 = vpop.f32.mrb[153].mxu0  ;;  %v3126_v56 = vpop.f32.mrb[153].mxu1 }
 0x289   : > { %v2973_v28 = vpop.f32.mrb[154].mxu0  ;;  %v3127_v24 = vpop.f32.mrb[154].mxu1 }
 0x28a   : > { %3844 = vst.msk [vmem:[%s5289_s13 + $0x88] sm:$0xf] %vm1178_vm2, %v3886_v3  ;;  %v3887_v7 = vpack.c.bf16 %v3164_v8, %v3164_v8  ;;  %v3145_v43 = vmax.f32 %v2991_v20, %v3124_v25  ;;  %v2992_v1 = vmax.f32 %v2838_v46, %v2973_v28  ;;  %v2975_v54 = vpop.f32.mrb[155].mxu0  ;;  %v3129_v50 = vpop.f32.mrb[155].mxu1 }
 0x28c   : > { %3845 = vst.msk [vmem:[%s5289_s13 + $0x8c] sm:$0xf] %vm1178_vm2, %v3887_v7  ;;  %v3155_v18 = vadd.f32 %v5653_v44, %v3145_v43  ;;  %v3146_v37 = vmax.f32 %v2992_v1, %v3127_v24 }
 0x28e   : > { %v3165_v9 = vmax.f32 %v3155_v18, 0.0  ;;  %v3156_v53 = vadd.f32 %v5653_v44, %v3146_v37 }
 0x28f   : > { %v2978_v19 = vpop.f32.mrb[156].mxu0  ;;  %v3132_v48 = vpop.f32.mrb[156].mxu1 }
 0x290   : > { %v3888_v11 = vpack.c.bf16 %v3165_v9, %v3165_v9  ;;  %v3166_v39 = vmax.f32 %v3156_v53, 0.0  ;;  %v2993_v59 = vmax.f32 %v2839_v12, %v2978_v19  ;;  %v2980_v4 = vpop.f32.mrb[157].mxu0  ;;  %v3134_v46 = vpop.f32.mrb[157].mxu1 }
 0x291   : > { %v2981_v16 = vpop.f32.mrb[158].mxu0  ;;  %v3135_v33 = vpop.f32.mrb[158].mxu1 }
 0x292   : > { %3846 = vst.msk [vmem:[%s5289_s13 + $0x90] sm:$0xf] %vm1178_vm2, %v3888_v11  ;;  %v3889_v13 = vpack.c.bf16 %v3166_v39, %v3166_v39  ;;  %v3147_v57 = vmax.f32 %v2993_v59, %v3132_v48  ;;  %v2994_v30 = vmax.f32 %v2840_v15, %v2981_v16  ;;  %v2983_v5 = vpop.f32.mrb[159].mxu0  ;;  %v3137_v10 = vpop.f32.mrb[159].mxu1 }
 0x294   : > { %3847 = vst.msk [vmem:[%s5289_s13 + $0x94] sm:$0xf] %vm1178_vm2, %v3889_v13  ;;  %v3157_v38 = vadd.f32 %v5653_v44, %v3147_v57  ;;  %v3148_v62 = vmax.f32 %v2994_v30, %v3135_v33 }
 0x296   : > { %v3167_v12 = vmax.f32 %v3157_v38, 0.0  ;;  %v3158_v34 = vadd.f32 %v5653_v44, %v3148_v62 }
 0x298   : > { %v3890_v31 = vpack.c.bf16 %v3167_v12, %v3167_v12  ;;  %v3168_v55 = vmax.f32 %v3158_v34, 0.0 }
 0x29a   : > { %3848 = vst.msk [vmem:[%s5289_s13 + $0x98] sm:$0xf] %vm1178_vm2, %v3890_v31  ;;  %v3891_v0 = vpack.c.bf16 %v3168_v55, %v3168_v55 }
 0x29c   : > { %3849 = vst.msk [vmem:[%s5289_s13 + $0x9c] sm:$0xf] %vm1178_vm2, %v3891_v0 }
 0x29d PF: > { %s22_s28 = sadd.s32 1, %s4372_s28   ;;  %s5750_s29 = sld [smem:[#allocation8_spill]] }
 0x29e   : > { %p19_p5 = scmp.ge.s32.totalorder %s22_s28, 42   ;;  %s5751_s19 = sld [smem:[#allocation9_spill]] }
 0x29f   : > { %s5752_s21 = smov %s4348_s22  ;;  %s5753_s22 = smov %s4352_s23 }
 0x2a0   : > { %s5754_s23 = smov %s4483_s16  ;;  %s5755_s24 = smov %s4364_s26 }
 0x2a1   : > { %s5756_s25 = smov %s4368_s27  ;;  %21 = sbr.rel (!%p19_p5) target bundleno = 9 (0x9), region = 118 }
 0x2a3   : > { %s5757_s26 = smov %s5750_s29 }
 0x2a4   : > { %s5758_s27 = smov %s5751_s19 }
 0x2a8   :  { %3252 = vsyncpa [#allocation3], 1 }
 0x2a9   :  { %3254 = vsyncpa [#allocation3 + $0x1], 1 }
 0x2aa   :  { %3255 = vsyncpa [#allocation5], 1 }
 0x2ab   :  { %3257 = vsyncpa [#allocation5 + $0x1], 1 }

// kernel: cnn_forward.5
= control target key start
LH: loop header
LB: loop body
LE: loop exit
PB: predicated region body
PF: predicated region fallthrough
CT: control target
= control target key end

     0   :  { %12 = vsyncpa [#allocation4], 0  ;;  %s4577_s24 = smov 0   ;;  %s4984_s0 = inlined_call_operand.vmem [shape: bf16[2,102400], index: 0, kind: input, shape index: {}]   ;;  %s4985_s1 = inlined_call_operand.vmem [shape: bf16[102400,120], index: 1, kind: input, shape index: {}]   ;;  %s4986_s2 = inlined_call_operand.vmem [shape: f32[1,120], index: 2, kind: input, shape index: {}]   ;;  %s4987_s3 = inlined_call_operand.vmem [shape: bf16[120,84], index: 3, kind: input, shape index: {}]   ;;  %s4988_s4 = inlined_call_operand.vmem [shape: f32[1,84], index: 4, kind: input, shape index: {}]   ;;  %s4989_s5 = inlined_call_operand.vmem [shape: bf16[84,5], index: 5, kind: input, shape index: {}]   ;;  %s4990_s6 = inlined_call_operand.vmem [shape: f32[1,5], index: 6, kind: input, shape index: {}]   ;;  %s4991_s7 = inlined_call_operand.hbm [shape: f32[2,5], index: 7, kind: output, shape index: {}]  }
   0x1 LB: > { %s4583_s25 = sadd.s32 4294967295, %s4530_s24   ;;  %p3512_p0 = scmp.ge.s32.totalorder %s4530_s24, 1  ;;  %s4530_s24 = sphi %s4577_s24, %s18_s24  }
   0x2   : > { %p244_p1 = scmp.lt.s32.totalorder %s4530_s24, 26 }
   0x4   : > { %p245_p2 = pnand %p3512_p0, %p244_p1 }
   0x5   : > { %s3513_s26 = sshll.u32 (!%p245_p2), %s4583_s25, 5  ;;  %s3514_s27 = sshll.u32 (!%p245_p2), %s4583_s25, 9 }
   0x6   : > { %248 = sbr.rel (%p245_p2) target bundleno = 973 (0x3cd), region = 48  ;;  %p276_p3 = scmp.lt.s32.totalorder (!%p245_p2), %s3513_s26, 799 }
   0x7   : > { %p281_p4 = scmp.lt.s32.totalorder (!%p245_p2), %s3514_s27, 12799  ;;  %p3516_p5 = scmp.ne.s32.totalorder (!%p245_p2), %s4583_s25, 0 }
   0xd   : > { %s4993_s26 = smov (!%p276_p3, %s3513_s26), 799  ;;  %s4995_s27 = smov (!%p281_p4, %s3514_s27), 12799 }
   0xe   : > { %s4592_s30 = scalar_lea.vmem %s4984_s0, %s4993_s26  ;;  %s3515_s8 = sshll.u32 %s4995_s27, 2  ;;  %vm291_vm0 = vcmask (!%p3516_p5), 975872   ;;  %v4532_v0 = vmov (!%p3516_p5), 0.0  }
   0xf   : > { %s4597_s11 = scalar_lea.vmem %s4985_s1, %s3515_s8  ;;  %290 = sbr.rel (%p3516_p5) target bundleno = 22 (0x16), region = 52  ;;  %292 = vst.msk [vmem:[#allocation2] sm:$0x3] (!%p3516_p5), %vm291_vm0, %v4532_v0 }
  0x16 PF: > { %v4220_v1 = vld [vmem:[%s4597_s11 + $0x40] sm:$0xff]   ;;  %v4224_v5 = vld [vmem:[%s4597_s11 + $0x48] sm:$0xff]   ;;  %v4228_v9 = vld [vmem:[%s4597_s11 + $0x50] sm:$0xff]   ;;  %v818_v29 = vlaneseq  ;;  %v4533_v37 = vmov 1966171168   ;;  %vm3219_vm1 = vcmask 975872  }
  0x17   : > { %v4221_v2 = vld [vmem:[%s4597_s11 + $0xc0] sm:$0xff]   ;;  %3797 = vmatprep.subr.bf16.mxu0 %v4220_v1  ;;  %v4225_v6 = vld [vmem:[%s4597_s11 + $0xc8] sm:$0xff]   ;;  %v4229_v10 = vld [vmem:[%s4597_s11 + $0xd0] sm:$0xff]   ;;  %v816_v38 = vunpack.c.l.s4 %v4533_v37  ;;  %p3773_p6 = scmp.ne.s32.totalorder %s4583_s25, 24 }
  0x18   : > { %v4222_v3 = vld [vmem:[%s4597_s11] sm:$0xff]   ;;  %3819 = vmatprep.subr.bf16.mxu1 %v4221_v2  ;;  %v4226_v7 = vld [vmem:[%s4597_s11 + $0x8] sm:$0xff]   ;;  %v4230_v11 = vld [vmem:[%s4597_s11 + $0x10] sm:$0xff]   ;;  %v819_v34 = vshrl.u32 %v818_v29, 7  ;;  %vm4535_vm2 = vmmov (!%p3773_p6), 0   ;;  %vm3307_vm3 = vcmask (!%p3773_p6), 1043456  }
  0x19   : > { %v4223_v4 = vld [vmem:[%s4597_s11 + $0x80] sm:$0xff]   ;;  %3798 = vmatpush3.bf16.msra.mxu0 %v4222_v3  ;;  %v4227_v8 = vld [vmem:[%s4597_s11 + $0x88] sm:$0xff]   ;;  %v4231_v12 = vld [vmem:[%s4597_s11 + $0x90] sm:$0xff]   ;;  %v817_v41 = vunpack.c.0.s8 %v816_v38  ;;  %vm3303_vm4 = vcmask (!%p3773_p6), 982016   ;;  %vm3408_vm5 = vcmask (!%p3773_p6), 1041408   ;;  %vm3404_vm6 = vcmask (!%p3773_p6), 687104  }
  0x1a   : > { %3820 = vmatpush3.bf16.msra.mxu1 %v4223_v4  ;;  %3799 = vmatprep.subr.bf16.mxu0 %v4224_v5  ;;  %v4232_v13 = vld [vmem:[%s4597_s11 + $0x58] sm:$0xff]   ;;  %v4236_v17 = vld [vmem:[%s4597_s11 + $0x60] sm:$0xff]   ;;  %v4240_v21 = vld [vmem:[%s4597_s11 + $0x68] sm:$0xff]   ;;  %vm3452_vm7 = vcmask (!%p3773_p6), 33792  }
  0x1b   : > { %3821 = vmatprep.subr.bf16.mxu1 %v4225_v6  ;;  %v4233_v14 = vld [vmem:[%s4597_s11 + $0xd8] sm:$0xff]   ;;  %v4237_v18 = vld [vmem:[%s4597_s11 + $0xe0] sm:$0xff]   ;;  %v4241_v22 = vld [vmem:[%s4597_s11 + $0xe8] sm:$0xff]   ;;  %v4635_v42 = vsub.s32 %v817_v41, %v819_v34 }
  0x1c   : > { %v4234_v15 = vld [vmem:[%s4597_s11 + $0x18] sm:$0xff]   ;;  %v4238_v19 = vld [vmem:[%s4597_s11 + $0x20] sm:$0xff]   ;;  %v4242_v23 = vld [vmem:[%s4597_s11 + $0x28] sm:$0xff]  }
  0x1d   : > { %3800 = vmatpush3.bf16.msra.mxu0 %v4226_v7  ;;  %v4235_v16 = vld [vmem:[%s4597_s11 + $0x98] sm:$0xff]   ;;  %v4239_v20 = vld [vmem:[%s4597_s11 + $0xa0] sm:$0xff]   ;;  %v4243_v24 = vld [vmem:[%s4597_s11 + $0xa8] sm:$0xff]  }
  0x1e   : > { %3822 = vmatpush3.bf16.msra.mxu1 %v4227_v8  ;;  %3801 = vmatprep.subr.bf16.mxu0 %v4228_v9  ;;  %v4244_v25 = vld [vmem:[%s4597_s11 + $0x70] sm:$0xff]   ;;  %v4248_v30 = vld [vmem:[%s4597_s11 + $0x78] sm:$0xff]   ;;  %v294_v35 = vld [vmem:[%s4592_s30] sm:$0xff] }
  0x1f   : > { %3823 = vmatprep.subr.bf16.mxu1 %v4229_v10  ;;  %v4245_v26 = vld [vmem:[%s4597_s11 + $0xf0] sm:$0xff]   ;;  %v4249_v31 = vld [vmem:[%s4597_s11 + $0xf8] sm:$0xff]   ;;  %v4253_v36 = vld [vmem:[%s4597_s11 + $0x140] sm:$0xff]   ;;  %v814_v40 = vcombine.high %v294_v35, %v294_v35  ;;  %v821_v43 = vrot.slane %v294_v35, %v4635_v42 }
  0x20   : > { %v4246_v27 = vld [vmem:[%s4597_s11 + $0x30] sm:$0xff]   ;;  %v4250_v32 = vld [vmem:[%s4597_s11 + $0x38] sm:$0xff]   ;;  %v4254_v39 = vld [vmem:[%s4597_s11 + $0x1c0] sm:$0xff]  }
  0x21   : > { %3802 = vmatpush3.bf16.msra.mxu0 %v4230_v11  ;;  %v4247_v28 = vld [vmem:[%s4597_s11 + $0xb0] sm:$0xff]   ;;  %v4251_v33 = vld [vmem:[%s4597_s11 + $0xb8] sm:$0xff]   ;;  %v4639_v44 = vrot.slane %v814_v40, %v4635_v42  ;;  %v829_v45 = vcombine.high %v821_v43, %v821_v43  ;;  %v837_v46 = vrot.slane %v821_v43, %v4635_v42  ;;  %v4255_v48 = vld [vmem:[%s4597_s11 + $0x100] sm:$0xff]  }
  0x22   : > { %3824 = vmatpush3.bf16.msra.mxu1 %v4231_v12  ;;  %3803 = vmatprep.subr.bf16.mxu0 %v4232_v13  ;;  %v4256_v50 = vld [vmem:[%s4597_s11 + $0x180] sm:$0xff]   ;;  %v4257_v53 = vld [vmem:[%s4597_s11 + $0x148] sm:$0xff]   ;;  %v4261_v59 = vld [vmem:[%s4597_s11 + $0x150] sm:$0xff]  }
  0x23   : > { %3825 = vmatprep.subr.bf16.mxu1 %v4233_v14  ;;  %v830_v47 = vcombine.high %v4639_v44, %v4639_v44  ;;  %v851_v49 = vrot.slane %v829_v45, %v4635_v42  ;;  %v859_v52 = vcombine.high %v837_v46, %v837_v46  ;;  %v4258_v55 = vld [vmem:[%s4597_s11 + $0x1c8] sm:$0xff]   ;;  %v4262_v60 = vld [vmem:[%s4597_s11 + $0x1d0] sm:$0xff]   ;;  %v4265_v63 = vld [vmem:[%s4597_s11 + $0x158] sm:$0xff]  }
  0x24   : > { %v4259_v56 = vld [vmem:[%s4597_s11 + $0x108] sm:$0xff]   ;;  %v4263_v61 = vld [vmem:[%s4597_s11 + $0x110] sm:$0xff]   ;;  %v4266_v0 = vld [vmem:[%s4597_s11 + $0x1d8] sm:$0xff]  }
  0x25   : > { %3804 = vmatpush3.bf16.msra.mxu0 %v4234_v15  ;;  %v858_v51 = vrot.slane %v830_v47, %v4635_v42  ;;  %2610 = vmatprep.mubr.bf16.mxu0 %v851_v49  ;;  %v861_v54 = vcombine.high %v851_v49, %v851_v49  ;;  %v4260_v58 = vld [vmem:[%s4597_s11 + $0x188] sm:$0xff]   ;;  %v4264_v62 = vld [vmem:[%s4597_s11 + $0x190] sm:$0xff]   ;;  %v4267_v1 = vld [vmem:[%s4597_s11 + $0x118] sm:$0xff]  }
  0x26   : > { %3826 = vmatpush3.bf16.msra.mxu1 %v4235_v16  ;;  %3805 = vmatprep.subr.bf16.mxu0 %v4236_v17  ;;  %v4268_v2 = vld [vmem:[%s4597_s11 + $0x198] sm:$0xff]   ;;  %v4269_v3 = vld [vmem:[%s4597_s11 + $0x160] sm:$0xff]   ;;  %v4273_v7 = vld [vmem:[%s4597_s11 + $0x168] sm:$0xff]  }
  0x27   : > { %3827 = vmatprep.subr.bf16.mxu1 %v4237_v18  ;;  %v862_v57 = vcombine.high %v858_v51, %v858_v51  ;;  %2650 = vmatprep.mubr.bf16.mxu1 %v861_v54  ;;  %v4270_v4 = vld [vmem:[%s4597_s11 + $0x1e0] sm:$0xff]   ;;  %v4274_v8 = vld [vmem:[%s4597_s11 + $0x1e8] sm:$0xff]   ;;  %v4277_v11 = vld [vmem:[%s4597_s11 + $0x170] sm:$0xff]  }
  0x28   : > { %v4271_v5 = vld [vmem:[%s4597_s11 + $0x120] sm:$0xff]   ;;  %v4275_v9 = vld [vmem:[%s4597_s11 + $0x128] sm:$0xff]   ;;  %v4278_v12 = vld [vmem:[%s4597_s11 + $0x1f0] sm:$0xff]  }
  0x29   : > { %3806 = vmatpush3.bf16.msra.mxu0 %v4238_v19  ;;  %v4272_v6 = vld [vmem:[%s4597_s11 + $0x1a0] sm:$0xff]   ;;  %v4276_v10 = vld [vmem:[%s4597_s11 + $0x1a8] sm:$0xff]   ;;  %v4279_v13 = vld [vmem:[%s4597_s11 + $0x130] sm:$0xff]   ;;  %v844_v19 = vrot.slane %v4639_v44, %v4635_v42 }
  0x2a   : > { %3828 = vmatpush3.bf16.msra.mxu1 %v4239_v20  ;;  %3807 = vmatprep.subr.bf16.mxu0 %v4240_v21  ;;  %v4280_v14 = vld [vmem:[%s4597_s11 + $0x1b0] sm:$0xff]   ;;  %v4281_v15 = vld [vmem:[%s4597_s11 + $0x178] sm:$0xff]   ;;  %v4285_v20 = vld [vmem:[%s4597_s11 + $0x240] sm:$0xff]  }
  0x2b   : > { %3829 = vmatprep.subr.bf16.mxu1 %v4241_v22  ;;  %v4282_v16 = vld [vmem:[%s4597_s11 + $0x1f8] sm:$0xff]   ;;  %v4286_v21 = vld [vmem:[%s4597_s11 + $0x2c0] sm:$0xff]   ;;  %v4293_v29 = vld [vmem:[%s4597_s11 + $0x250] sm:$0xff]  }
  0x2c   : > { %v4283_v17 = vld [vmem:[%s4597_s11 + $0x138] sm:$0xff]   ;;  %v4287_v22 = vld [vmem:[%s4597_s11 + $0x200] sm:$0xff]   ;;  %v4305_v41 = vld [vmem:[%s4597_s11 + $0x268] sm:$0xff]  }
  0x2d   : > { %3808 = vmatpush3.bf16.msra.mxu0 %v4242_v23  ;;  %v4284_v18 = vld [vmem:[%s4597_s11 + $0x1b8] sm:$0xff]   ;;  %v4288_v23 = vld [vmem:[%s4597_s11 + $0x280] sm:$0xff]   ;;  %v4306_v43 = vld [vmem:[%s4597_s11 + $0x2e8] sm:$0xff]  }
  0x2e   : > { %3830 = vmatpush3.bf16.msra.mxu1 %v4243_v24  ;;  %3809 = vmatprep.subr.bf16.mxu0 %v4244_v25  ;;  %v860_v24 = vcombine.high %v844_v19, %v844_v19  ;;  %v4289_v25 = vld [vmem:[%s4597_s11 + $0x248] sm:$0xff]   ;;  %v4298_v34 = vld [vmem:[%s4597_s11 + $0x2d8] sm:$0xff]   ;;  %v4301_v37 = vld [vmem:[%s4597_s11 + $0x260] sm:$0xff]  }
  0x2f   : > { %3831 = vmatprep.subr.bf16.mxu1 %v4245_v26  ;;  %v4290_v26 = vld [vmem:[%s4597_s11 + $0x2c8] sm:$0xff]   ;;  %v4299_v35 = vld [vmem:[%s4597_s11 + $0x218] sm:$0xff]   ;;  %v4302_v38 = vld [vmem:[%s4597_s11 + $0x2e0] sm:$0xff]  }
  0x30   : > { %v4304_v40 = vld [vmem:[%s4597_s11 + $0x2a0] sm:$0xff]   ;;  %v4307_v44 = vld [vmem:[%s4597_s11 + $0x228] sm:$0xff]  }
  0x31   : > { %3810 = vmatpush3.bf16.msra.mxu0 %v4246_v27  ;;  %v4291_v27 = vld [vmem:[%s4597_s11 + $0x208] sm:$0xff]  }
  0x32   : > { %3832 = vmatpush3.bf16.msra.mxu1 %v4247_v28  ;;  %3811 = vmatprep.subr.bf16.mxu0 %v4248_v30  ;;  %v4292_v28 = vld [vmem:[%s4597_s11 + $0x288] sm:$0xff]   ;;  %v4294_v30 = vld [vmem:[%s4597_s11 + $0x2d0] sm:$0xff]  }
  0x33   : > { %3833 = vmatprep.subr.bf16.mxu1 %v4249_v31  ;;  %v4295_v31 = vld [vmem:[%s4597_s11 + $0x210] sm:$0xff]   ;;  %v4308_v45 = vld [vmem:[%s4597_s11 + $0x2a8] sm:$0xff]  }
  0x34   : > { %v295_v47 = vld [vmem:[%s4592_s30 + $0x8] sm:$0xff] }
  0x35   : > { %3812 = vmatpush3.bf16.msra.mxu0 %v4250_v32  ;;  %v4296_v32 = vld [vmem:[%s4597_s11 + $0x290] sm:$0xff]   ;;  %v870_v49 = vrot.slane %v295_v47, %v4635_v42 }
  0x36   : > { %3834 = vmatpush3.bf16.msra.mxu1 %v4251_v33  ;;  %3841 = vmatprep.subr.bf16.mxu0 %v4253_v36  ;;  %v4297_v33 = vld [vmem:[%s4597_s11 + $0x258] sm:$0xff]  }
  0x37   : > { %3863 = vmatprep.subr.bf16.mxu1 %v4254_v39  ;;  %v4300_v36 = vld [vmem:[%s4597_s11 + $0x298] sm:$0xff]   ;;  %v4303_v39 = vld [vmem:[%s4597_s11 + $0x220] sm:$0xff]  }
  0x38   : > { %2611 = vmatmul.mubr.bf16.vlgmr.msra.gmra.mrb[0].mxu0 %v837_v46  ;;  %v4309_v46 = vld [vmem:[%s4597_s11 + $0x270] sm:$0xff]  }
  0x39   : > { %3842 = vmatpush3.bf16.msra.mxu0 %v4255_v48  ;;  %2651 = vmatmul.mubr.bf16.vlgmr.msra.gmra.mrb[0].mxu1 %v859_v52  ;;  %v4310_v48 = vld [vmem:[%s4597_s11 + $0x2f0] sm:$0xff]  }
  0x3a   : > { %3843 = vmatprep.subr.bf16.mxu0 %v4257_v53  ;;  %3864 = vmatpush3.bf16.msra.mxu1 %v4256_v50  ;;  %v863_v50 = vcombine.high %v295_v47, %v295_v47  ;;  %v4312_v52 = vld [vmem:[%s4597_s11 + $0x2b0] sm:$0xff]   ;;  %v878_v53 = vcombine.high %v870_v49, %v870_v49 }
  0x3b   : > { %2690 = vmatprep.mubr.bf16.mxu0 %v858_v51  ;;  %3865 = vmatprep.subr.bf16.mxu1 %v4258_v55  ;;  %v4311_v51 = vld [vmem:[%s4597_s11 + $0x230] sm:$0xff]   ;;  %v4313_v55 = vld [vmem:[%s4597_s11 + $0x278] sm:$0xff]  }
  0x3c   : > { %2730 = vmatprep.mubr.bf16.mxu1 %v862_v57  ;;  %v4709_v54 = vrot.slane %v863_v50, %v4635_v42  ;;  %v900_v57 = vrot.slane %v878_v53, %v4635_v42  ;;  %v4360_v47 = vld [vmem:[%s4597_s11 + $0x410] sm:$0xff]   ;;  %v4363_v50 = vld [vmem:[%s4597_s11 + $0x4d8] sm:$0xff]   ;;  %v4366_v53 = vld [vmem:[%s4597_s11 + $0x460] sm:$0xff]  }
  0x3d   : > { %3844 = vmatpush3.bf16.msra.mxu0 %v4259_v56  ;;  %v4314_v56 = vld [vmem:[%s4597_s11 + $0x2f8] sm:$0xff]  }
  0x3e   : > { %3845 = vmatprep.subr.bf16.mxu0 %v4261_v59  ;;  %3866 = vmatpush3.bf16.msra.mxu1 %v4260_v58  ;;  %v879_v58 = vcombine.high %v4709_v54, %v4709_v54  ;;  %v4315_v59 = vld [vmem:[%s4597_s11 + $0x238] sm:$0xff]  }
  0x3f   : > { %3867 = vmatprep.subr.bf16.mxu1 %v4262_v60  ;;  %v4316_v60 = vld [vmem:[%s4597_s11 + $0x2b8] sm:$0xff]  }
  0x41   : > { %3846 = vmatpush3.bf16.msra.mxu0 %v4263_v61  ;;  %v910_v61 = vcombine.high %v900_v57, %v900_v57 }
  0x42   : > { %3847 = vmatprep.subr.bf16.mxu0 %v4265_v63  ;;  %3868 = vmatpush3.bf16.msra.mxu1 %v4264_v62  ;;  %v886_v62 = vrot.slane %v870_v49, %v4635_v42  ;;  %v4317_v63 = vld [vmem:[%s4597_s11 + $0x340] sm:$0xff]   ;;  %v4362_v49 = vld [vmem:[%s4597_s11 + $0x458] sm:$0xff]  }
  0x43   : > { %3869 = vmatprep.subr.bf16.mxu1 %v4266_v0  ;;  %v4318_v0 = vld [vmem:[%s4597_s11 + $0x3c0] sm:$0xff]  }
  0x45   : > { %3848 = vmatpush3.bf16.msra.mxu0 %v4267_v1  ;;  %v907_v1 = vrot.slane %v879_v58, %v4635_v42  ;;  %v4371_v58 = vld [vmem:[%s4597_s11 + $0x4e8] sm:$0xff]  }
  0x46   : > { %3849 = vmatprep.subr.bf16.mxu0 %v4269_v3  ;;  %3870 = vmatpush3.bf16.msra.mxu1 %v4268_v2  ;;  %v4319_v2 = vld [vmem:[%s4597_s11 + $0x300] sm:$0xff]  }
  0x47   : > { %3871 = vmatprep.subr.bf16.mxu1 %v4270_v4  ;;  %v4320_v3 = vld [vmem:[%s4597_s11 + $0x380] sm:$0xff]   ;;  %v908_v4 = vcombine.high %v886_v62, %v886_v62 }
  0x49   : > { %3850 = vmatpush3.bf16.msra.mxu0 %v4271_v5  ;;  %v4321_v5 = vld [vmem:[%s4597_s11 + $0x348] sm:$0xff]  }
  0x4a   : > { %3851 = vmatprep.subr.bf16.mxu0 %v4273_v7  ;;  %3872 = vmatpush3.bf16.msra.mxu1 %v4272_v6  ;;  %v4322_v6 = vld [vmem:[%s4597_s11 + $0x3c8] sm:$0xff]   ;;  %v911_v7 = vcombine.high %v907_v1, %v907_v1 }
  0x4b   : > { %3873 = vmatprep.subr.bf16.mxu1 %v4274_v8  ;;  %v4323_v8 = vld [vmem:[%s4597_s11 + $0x308] sm:$0xff]  }
  0x4d   : > { %3852 = vmatpush3.bf16.msra.mxu0 %v4275_v9  ;;  %v4324_v9 = vld [vmem:[%s4597_s11 + $0x388] sm:$0xff]  }
  0x4e   : > { %3853 = vmatprep.subr.bf16.mxu0 %v4277_v11  ;;  %3874 = vmatpush3.bf16.msra.mxu1 %v4276_v10  ;;  %v4325_v10 = vld [vmem:[%s4597_s11 + $0x350] sm:$0xff]  }
  0x4f   : > { %3875 = vmatprep.subr.bf16.mxu1 %v4278_v12  ;;  %v4326_v11 = vld [vmem:[%s4597_s11 + $0x3d0] sm:$0xff]  }
  0x50   : > { %v4327_v12 = vld [vmem:[%s4597_s11 + $0x310] sm:$0xff]  }
  0x51   : > { %3854 = vmatpush3.bf16.msra.mxu0 %v4279_v13  ;;  %v4328_v13 = vld [vmem:[%s4597_s11 + $0x390] sm:$0xff]  }
  0x52   : > { %3855 = vmatprep.subr.bf16.mxu0 %v4281_v15  ;;  %3876 = vmatpush3.bf16.msra.mxu1 %v4280_v14  ;;  %v4329_v14 = vld [vmem:[%s4597_s11 + $0x358] sm:$0xff]  }
  0x53   : > { %3877 = vmatprep.subr.bf16.mxu1 %v4282_v16  ;;  %v4330_v15 = vld [vmem:[%s4597_s11 + $0x3d8] sm:$0xff]  }
  0x54   : > { %v4331_v16 = vld [vmem:[%s4597_s11 + $0x318] sm:$0xff]  }
  0x55   : > { %3856 = vmatpush3.bf16.msra.mxu0 %v4283_v17  ;;  %v4332_v17 = vld [vmem:[%s4597_s11 + $0x398] sm:$0xff]  }
  0x56   : > { %3885 = vmatprep.subr.bf16.mxu0 %v4285_v20  ;;  %3878 = vmatpush3.bf16.msra.mxu1 %v4284_v18  ;;  %v4333_v18 = vld [vmem:[%s4597_s11 + $0x360] sm:$0xff]  }
  0x57   : > { %3907 = vmatprep.subr.bf16.mxu1 %v4286_v21  ;;  %v4335_v20 = vld [vmem:[%s4597_s11 + $0x320] sm:$0xff]  }
  0x58   : > { %2691 = vmatmul.mubr.bf16.vlgmr.msra.gmra.mrb[4].mxu0 %v844_v19  ;;  %v4334_v19 = vld [vmem:[%s4597_s11 + $0x3e0] sm:$0xff]  }
  0x59   : > { %3886 = vmatpush3.bf16.msra.mxu0 %v4287_v22  ;;  %2731 = vmatmul.mubr.bf16.vlgmr.msra.gmra.mrb[4].mxu1 %v860_v24  ;;  %v4336_v21 = vld [vmem:[%s4597_s11 + $0x3a0] sm:$0xff]   ;;  %v4337_v22 = vld [vmem:[%s4597_s11 + $0x368] sm:$0xff]  }
  0x5a   : > { %3887 = vmatprep.subr.bf16.mxu0 %v4289_v25  ;;  %3908 = vmatpush3.bf16.msra.mxu1 %v4288_v23  ;;  %v4338_v23 = vld [vmem:[%s4597_s11 + $0x3e8] sm:$0xff]  }
  0x5b   : > { %3909 = vmatprep.subr.bf16.mxu1 %v4290_v26  ;;  %2770 = vmatprep.mubr.bf16.mxu0 %v900_v57  ;;  %v4339_v24 = vld [vmem:[%s4597_s11 + $0x328] sm:$0xff]   ;;  %v4341_v26 = vld [vmem:[%s4597_s11 + $0x370] sm:$0xff]  }
  0x5c   : > { %2810 = vmatprep.mubr.bf16.mxu1 %v910_v61  ;;  %v4340_v25 = vld [vmem:[%s4597_s11 + $0x3a8] sm:$0xff]   ;;  %v4374_v61 = vld [vmem:[%s4597_s11 + $0x470] sm:$0xff]  }
  0x5d   : > { %3888 = vmatpush3.bf16.msra.mxu0 %v4291_v27  ;;  %v4342_v27 = vld [vmem:[%s4597_s11 + $0x3f0] sm:$0xff]   ;;  %v4370_v57 = vld [vmem:[%s4597_s11 + $0x468] sm:$0xff]  }
  0x5e   : > { %3889 = vmatprep.subr.bf16.mxu0 %v4293_v29  ;;  %3910 = vmatpush3.bf16.msra.mxu1 %v4292_v28  ;;  %v4343_v28 = vld [vmem:[%s4597_s11 + $0x330] sm:$0xff]  }
  0x5f   : > { %3911 = vmatprep.subr.bf16.mxu1 %v4294_v30  ;;  %v4344_v29 = vld [vmem:[%s4597_s11 + $0x3b0] sm:$0xff]   ;;  %v4345_v30 = vld [vmem:[%s4597_s11 + $0x378] sm:$0xff]  }
  0x61   : > { %3890 = vmatpush3.bf16.msra.mxu0 %v4295_v31  ;;  %v4346_v31 = vld [vmem:[%s4597_s11 + $0x3f8] sm:$0xff]  }
  0x62   : > { %3891 = vmatprep.subr.bf16.mxu0 %v4297_v33  ;;  %3912 = vmatpush3.bf16.msra.mxu1 %v4296_v32  ;;  %v4347_v32 = vld [vmem:[%s4597_s11 + $0x338] sm:$0xff]  }
  0x63   : > { %3913 = vmatprep.subr.bf16.mxu1 %v4298_v34  ;;  %v4348_v33 = vld [vmem:[%s4597_s11 + $0x3b8] sm:$0xff]   ;;  %v893_v34 = vrot.slane %v4709_v54, %v4635_v42  ;;  %v4367_v54 = vld [vmem:[%s4597_s11 + $0x4e0] sm:$0xff]  }
  0x65   : > { %3892 = vmatpush3.bf16.msra.mxu0 %v4299_v35  ;;  %v4350_v35 = vld [vmem:[%s4597_s11 + $0x440] sm:$0xff]  }
  0x66   : > { %3893 = vmatprep.subr.bf16.mxu0 %v4301_v37  ;;  %3914 = vmatpush3.bf16.msra.mxu1 %v4300_v36  ;;  %v4351_v36 = vld [vmem:[%s4597_s11 + $0x4c0] sm:$0xff]  }
  0x67   : > { %3915 = vmatprep.subr.bf16.mxu1 %v4302_v38  ;;  %v4352_v37 = vld [vmem:[%s4597_s11 + $0x400] sm:$0xff]  }
  0x68   : > { %v4353_v38 = vld [vmem:[%s4597_s11 + $0x480] sm:$0xff]  }
  0x69   : > { %3894 = vmatpush3.bf16.msra.mxu0 %v4303_v39  ;;  %v909_v39 = vcombine.high %v893_v34, %v893_v34 }
  0x6a   : > { %3895 = vmatprep.subr.bf16.mxu0 %v4305_v41  ;;  %3916 = vmatpush3.bf16.msra.mxu1 %v4304_v40  ;;  %v4354_v40 = vld [vmem:[%s4597_s11 + $0x448] sm:$0xff]  }
  0x6b   : > { %3917 = vmatprep.subr.bf16.mxu1 %v4306_v43  ;;  %v4355_v41 = vld [vmem:[%s4597_s11 + $0x4c8] sm:$0xff]  }
  0x6c   : > { %v4356_v43 = vld [vmem:[%s4597_s11 + $0x408] sm:$0xff]  }
  0x6d   : > { %3896 = vmatpush3.bf16.msra.mxu0 %v4307_v44  ;;  %v4357_v44 = vld [vmem:[%s4597_s11 + $0x488] sm:$0xff]  }
  0x6e   : > { %3897 = vmatprep.subr.bf16.mxu0 %v4309_v46  ;;  %3918 = vmatpush3.bf16.msra.mxu1 %v4308_v45  ;;  %v4358_v45 = vld [vmem:[%s4597_s11 + $0x450] sm:$0xff]  }
  0x6f   : > { %3919 = vmatprep.subr.bf16.mxu1 %v4310_v48  ;;  %v4359_v46 = vld [vmem:[%s4597_s11 + $0x4d0] sm:$0xff]  }
  0x70   : > { %v4361_v48 = vld [vmem:[%s4597_s11 + $0x490] sm:$0xff]  }
  0x71   : > { %3898 = vmatpush3.bf16.msra.mxu0 %v4311_v51  ;;  %v4364_v51 = vld [vmem:[%s4597_s11 + $0x418] sm:$0xff]  }
  0x72   : > { %3899 = vmatprep.subr.bf16.mxu0 %v4313_v55  ;;  %3920 = vmatpush3.bf16.msra.mxu1 %v4312_v52  ;;  %v4365_v52 = vld [vmem:[%s4597_s11 + $0x498] sm:$0xff]   ;;  %v4368_v55 = vld [vmem:[%s4597_s11 + $0x420] sm:$0xff]  }
  0x73   : > { %3921 = vmatprep.subr.bf16.mxu1 %v4314_v56  ;;  %v4369_v56 = vld [vmem:[%s4597_s11 + $0x4a0] sm:$0xff]  }
  0x75   : > { %3900 = vmatpush3.bf16.msra.mxu0 %v4315_v59  ;;  %v4372_v59 = vld [vmem:[%s4597_s11 + $0x428] sm:$0xff]  }
  0x76   : > { %3929 = vmatprep.subr.bf16.mxu0 %v4317_v63  ;;  %3922 = vmatpush3.bf16.msra.mxu1 %v4316_v60  ;;  %v4373_v60 = vld [vmem:[%s4597_s11 + $0x4a8] sm:$0xff]   ;;  %v4375_v63 = vld [vmem:[%s4597_s11 + $0x4f0] sm:$0xff]  }
  0x77   : > { %3951 = vmatprep.subr.bf16.mxu1 %v4318_v0 }
  0x78   : > { %2771 = vmatmul.mubr.bf16.vlgmr.msra.gmra.mrb[8].mxu0 %v886_v62  ;;  %v296_v62 = vld [vmem:[%s4592_s30 + $0x10] sm:$0xff] }
  0x79   : > { %3930 = vmatpush3.bf16.msra.mxu0 %v4319_v2  ;;  %2850 = vmatprep.mubr.bf16.mxu0 %v907_v1  ;;  %v919_v0 = vrot.slane %v296_v62, %v4635_v42  ;;  %v912_v1 = vcombine.high %v296_v62, %v296_v62  ;;  %v4376_v2 = vld [vmem:[%s4597_s11 + $0x430] sm:$0xff]  }
  0x7a   : > { %2811 = vmatmul.mubr.bf16.vlgmr.msra.gmra.mrb[8].mxu1 %v908_v4  ;;  %3931 = vmatprep.subr.bf16.mxu0 %v4321_v5  ;;  %v4425_v62 = vld [vmem:[%s4597_s11 + $0x610] sm:$0xff]  }
  0x7b   : > { %3952 = vmatpush3.bf16.msra.mxu1 %v4320_v3  ;;  %2890 = vmatprep.mubr.bf16.mxu1 %v911_v7  ;;  %v4377_v3 = vld [vmem:[%s4597_s11 + $0x4b0] sm:$0xff]   ;;  %v927_v4 = vcombine.high %v919_v0, %v919_v0  ;;  %v4785_v5 = vrot.slane %v912_v1, %v4635_v42  ;;  %v4379_v7 = vld [vmem:[%s4597_s11 + $0x4f8] sm:$0xff]  }
  0x7c   : > { %3953 = vmatprep.subr.bf16.mxu1 %v4322_v6  ;;  %v4378_v6 = vld [vmem:[%s4597_s11 + $0x478] sm:$0xff]  }
  0x7d   : > { %3932 = vmatpush3.bf16.msra.mxu0 %v4323_v8  ;;  %v949_v8 = vrot.slane %v927_v4, %v4635_v42  ;;  %v4428_v1 = vld [vmem:[%s4597_s11 + $0x6d8] sm:$0xff]   ;;  %v4431_v4 = vld [vmem:[%s4597_s11 + $0x660] sm:$0xff]  }
  0x7e   : > { %3933 = vmatprep.subr.bf16.mxu0 %v4325_v10  ;;  %v4380_v10 = vld [vmem:[%s4597_s11 + $0x438] sm:$0xff]  }
  0x7f   : > { %3954 = vmatpush3.bf16.msra.mxu1 %v4324_v9  ;;  %v928_v9 = vcombine.high %v4785_v5, %v4785_v5 }
  0x80   : > { %3955 = vmatprep.subr.bf16.mxu1 %v4326_v11  ;;  %v4381_v11 = vld [vmem:[%s4597_s11 + $0x4b8] sm:$0xff]  }
  0x81   : > { %3934 = vmatpush3.bf16.msra.mxu0 %v4327_v12  ;;  %v959_v12 = vcombine.high %v949_v8, %v949_v8 }
  0x82   : > { %3935 = vmatprep.subr.bf16.mxu0 %v4329_v14  ;;  %v4382_v14 = vld [vmem:[%s4597_s11 + $0x540] sm:$0xff]  }
  0x83   : > { %3956 = vmatpush3.bf16.msra.mxu1 %v4328_v13  ;;  %v935_v13 = vrot.slane %v919_v0, %v4635_v42  ;;  %v4427_v0 = vld [vmem:[%s4597_s11 + $0x658] sm:$0xff]  }
  0x84   : > { %3957 = vmatprep.subr.bf16.mxu1 %v4330_v15  ;;  %v4383_v15 = vld [vmem:[%s4597_s11 + $0x5c0] sm:$0xff]  }
  0x85   : > { %3936 = vmatpush3.bf16.msra.mxu0 %v4331_v16  ;;  %v956_v16 = vrot.slane %v928_v9, %v4635_v42  ;;  %v4436_v9 = vld [vmem:[%s4597_s11 + $0x6e8] sm:$0xff]  }
  0x86   : > { %3937 = vmatprep.subr.bf16.mxu0 %v4333_v18  ;;  %v4385_v18 = vld [vmem:[%s4597_s11 + $0x580] sm:$0xff]  }
  0x87   : > { %3958 = vmatpush3.bf16.msra.mxu1 %v4332_v17  ;;  %v4384_v17 = vld [vmem:[%s4597_s11 + $0x500] sm:$0xff]  }
  0x88   : > { %3959 = vmatprep.subr.bf16.mxu1 %v4334_v19  ;;  %v957_v19 = vcombine.high %v935_v13, %v935_v13 }
  0x89   : > { %3938 = vmatpush3.bf16.msra.mxu0 %v4335_v20  ;;  %v4386_v20 = vld [vmem:[%s4597_s11 + $0x548] sm:$0xff]  }
  0x8a   : > { %3939 = vmatprep.subr.bf16.mxu0 %v4337_v22  ;;  %v960_v22 = vcombine.high %v956_v16, %v956_v16 }
  0x8b   : > { %3960 = vmatpush3.bf16.msra.mxu1 %v4336_v21  ;;  %v4387_v21 = vld [vmem:[%s4597_s11 + $0x5c8] sm:$0xff]  }
  0x8c   : > { %3961 = vmatprep.subr.bf16.mxu1 %v4338_v23  ;;  %v4388_v23 = vld [vmem:[%s4597_s11 + $0x508] sm:$0xff]  }
  0x8d   : > { %3940 = vmatpush3.bf16.msra.mxu0 %v4339_v24  ;;  %v4389_v24 = vld [vmem:[%s4597_s11 + $0x588] sm:$0xff]  }
  0x8e   : > { %3941 = vmatprep.subr.bf16.mxu0 %v4341_v26  ;;  %v4391_v26 = vld [vmem:[%s4597_s11 + $0x5d0] sm:$0xff]  }
  0x8f   : > { %3962 = vmatpush3.bf16.msra.mxu1 %v4340_v25  ;;  %v4390_v25 = vld [vmem:[%s4597_s11 + $0x550] sm:$0xff]  }
  0x90   : > { %3963 = vmatprep.subr.bf16.mxu1 %v4342_v27  ;;  %v4392_v27 = vld [vmem:[%s4597_s11 + $0x510] sm:$0xff]  }
  0x91   : > { %3942 = vmatpush3.bf16.msra.mxu0 %v4343_v28  ;;  %v4393_v28 = vld [vmem:[%s4597_s11 + $0x590] sm:$0xff]  }
  0x92   : > { %3943 = vmatprep.subr.bf16.mxu0 %v4345_v30  ;;  %v4395_v30 = vld [vmem:[%s4597_s11 + $0x5d8] sm:$0xff]  }
  0x93   : > { %3964 = vmatpush3.bf16.msra.mxu1 %v4344_v29  ;;  %v4394_v29 = vld [vmem:[%s4597_s11 + $0x558] sm:$0xff]  }
  0x94   : > { %3965 = vmatprep.subr.bf16.mxu1 %v4346_v31  ;;  %v4396_v31 = vld [vmem:[%s4597_s11 + $0x518] sm:$0xff]  }
  0x95   : > { %3944 = vmatpush3.bf16.msra.mxu0 %v4347_v32  ;;  %v4397_v32 = vld [vmem:[%s4597_s11 + $0x598] sm:$0xff]  }
  0x96   : > { %3973 = vmatprep.subr.bf16.mxu0 %v4350_v35  ;;  %v4400_v35 = vld [vmem:[%s4597_s11 + $0x520] sm:$0xff]  }
  0x97   : > { %3966 = vmatpush3.bf16.msra.mxu1 %v4348_v33  ;;  %v4398_v33 = vld [vmem:[%s4597_s11 + $0x560] sm:$0xff]  }
  0x98   : > { %2851 = vmatmul.mubr.bf16.vlgmr.msra.gmra.mrb[12].mxu0 %v893_v34  ;;  %3995 = vmatprep.subr.bf16.mxu1 %v4351_v36  ;;  %v4399_v34 = vld [vmem:[%s4597_s11 + $0x5e0] sm:$0xff]  }
  0x99   : > { %3974 = vmatpush3.bf16.msra.mxu0 %v4352_v37  ;;  %2930 = vmatprep.mubr.bf16.mxu0 %v949_v8  ;;  %v4401_v36 = vld [vmem:[%s4597_s11 + $0x5a0] sm:$0xff]   ;;  %v4402_v37 = vld [vmem:[%s4597_s11 + $0x568] sm:$0xff]  }
  0x9a   : > { %2891 = vmatmul.mubr.bf16.vlgmr.msra.gmra.mrb[12].mxu1 %v909_v39  ;;  %3975 = vmatprep.subr.bf16.mxu0 %v4354_v40  ;;  %v4404_v39 = vld [vmem:[%s4597_s11 + $0x528] sm:$0xff]  }
  0x9b   : > { %3996 = vmatpush3.bf16.msra.mxu1 %v4353_v38  ;;  %2970 = vmatprep.mubr.bf16.mxu1 %v959_v12  ;;  %v4403_v38 = vld [vmem:[%s4597_s11 + $0x5e8] sm:$0xff]   ;;  %v4439_v12 = vld [vmem:[%s4597_s11 + $0x670] sm:$0xff]  }
  0x9c   : > { %3997 = vmatprep.subr.bf16.mxu1 %v4355_v41  ;;  %v4405_v40 = vld [vmem:[%s4597_s11 + $0x5a8] sm:$0xff]   ;;  %v4406_v41 = vld [vmem:[%s4597_s11 + $0x570] sm:$0xff]  }
  0x9d   : > { %3976 = vmatpush3.bf16.msra.mxu0 %v4356_v43  ;;  %v4407_v43 = vld [vmem:[%s4597_s11 + $0x5f0] sm:$0xff]   ;;  %v4435_v8 = vld [vmem:[%s4597_s11 + $0x668] sm:$0xff]  }
  0x9e   : > { %3977 = vmatprep.subr.bf16.mxu0 %v4358_v45  ;;  %v4409_v45 = vld [vmem:[%s4597_s11 + $0x5b0] sm:$0xff]  }
  0x9f   : > { %3998 = vmatpush3.bf16.msra.mxu1 %v4357_v44  ;;  %v4408_v44 = vld [vmem:[%s4597_s11 + $0x530] sm:$0xff]  }
  0xa0   : > { %3999 = vmatprep.subr.bf16.mxu1 %v4359_v46  ;;  %v4410_v46 = vld [vmem:[%s4597_s11 + $0x578] sm:$0xff]  }
  0xa1   : > { %3978 = vmatpush3.bf16.msra.mxu0 %v4360_v47  ;;  %v4411_v47 = vld [vmem:[%s4597_s11 + $0x5f8] sm:$0xff]  }
  0xa2   : > { %3979 = vmatprep.subr.bf16.mxu0 %v4362_v49  ;;  %v4413_v49 = vld [vmem:[%s4597_s11 + $0x5b8] sm:$0xff]  }
  0xa3   : > { %4000 = vmatpush3.bf16.msra.mxu1 %v4361_v48  ;;  %v4412_v48 = vld [vmem:[%s4597_s11 + $0x538] sm:$0xff]  }
  0xa4   : > { %4001 = vmatprep.subr.bf16.mxu1 %v4363_v50  ;;  %v942_v50 = vrot.slane %v4785_v5, %v4635_v42  ;;  %v4432_v5 = vld [vmem:[%s4597_s11 + $0x6e0] sm:$0xff]  }
  0xa5   : > { %3980 = vmatpush3.bf16.msra.mxu0 %v4364_v51  ;;  %v4415_v51 = vld [vmem:[%s4597_s11 + $0x640] sm:$0xff]  }
  0xa6   : > { %3981 = vmatprep.subr.bf16.mxu0 %v4366_v53  ;;  %v4417_v53 = vld [vmem:[%s4597_s11 + $0x600] sm:$0xff]  }
  0xa7   : > { %4002 = vmatpush3.bf16.msra.mxu1 %v4365_v52  ;;  %v4416_v52 = vld [vmem:[%s4597_s11 + $0x6c0] sm:$0xff]  }
  0xa8   : > { %4003 = vmatprep.subr.bf16.mxu1 %v4367_v54  ;;  %v4418_v54 = vld [vmem:[%s4597_s11 + $0x680] sm:$0xff]  }
  0xa9   : > { %3982 = vmatpush3.bf16.msra.mxu0 %v4368_v55  ;;  %v958_v55 = vcombine.high %v942_v50, %v942_v50 }
  0xaa   : > { %3983 = vmatprep.subr.bf16.mxu0 %v4370_v57  ;;  %v4420_v57 = vld [vmem:[%s4597_s11 + $0x6c8] sm:$0xff]  }
  0xab   : > { %4004 = vmatpush3.bf16.msra.mxu1 %v4369_v56  ;;  %v4419_v56 = vld [vmem:[%s4597_s11 + $0x648] sm:$0xff]  }
  0xac   : > { %4005 = vmatprep.subr.bf16.mxu1 %v4371_v58  ;;  %v4421_v58 = vld [vmem:[%s4597_s11 + $0x608] sm:$0xff]  }
  0xad   : > { %3984 = vmatpush3.bf16.msra.mxu0 %v4372_v59  ;;  %v4422_v59 = vld [vmem:[%s4597_s11 + $0x688] sm:$0xff]  }
  0xae   : > { %3985 = vmatprep.subr.bf16.mxu0 %v4374_v61  ;;  %v4424_v61 = vld [vmem:[%s4597_s11 + $0x6d0] sm:$0xff]  }
  0xaf   : > { %4006 = vmatpush3.bf16.msra.mxu1 %v4373_v60  ;;  %v4423_v60 = vld [vmem:[%s4597_s11 + $0x650] sm:$0xff]  }
  0xb0   : > { %4007 = vmatprep.subr.bf16.mxu1 %v4375_v63  ;;  %v4426_v63 = vld [vmem:[%s4597_s11 + $0x690] sm:$0xff]  }
  0xb1   : > { %3986 = vmatpush3.bf16.msra.mxu0 %v4376_v2  ;;  %v4429_v2 = vld [vmem:[%s4597_s11 + $0x618] sm:$0xff]  }
  0xb2   : > { %3987 = vmatprep.subr.bf16.mxu0 %v4378_v6  ;;  %v4433_v6 = vld [vmem:[%s4597_s11 + $0x620] sm:$0xff]  }
  0xb3   : > { %4008 = vmatpush3.bf16.msra.mxu1 %v4377_v3  ;;  %v4430_v3 = vld [vmem:[%s4597_s11 + $0x698] sm:$0xff]  }
  0xb4   : > { %4009 = vmatprep.subr.bf16.mxu1 %v4379_v7  ;;  %v4434_v7 = vld [vmem:[%s4597_s11 + $0x6a0] sm:$0xff]  }
  0xb5   : > { %3988 = vmatpush3.bf16.msra.mxu0 %v4380_v10  ;;  %v4437_v10 = vld [vmem:[%s4597_s11 + $0x628] sm:$0xff]  }
  0xb6   : > { %4017 = vmatprep.subr.bf16.mxu0 %v4382_v14  ;;  %v4440_v14 = vld [vmem:[%s4597_s11 + $0x6f0] sm:$0xff]  }
  0xb7   : > { %4010 = vmatpush3.bf16.msra.mxu1 %v4381_v11  ;;  %v4438_v11 = vld [vmem:[%s4597_s11 + $0x6a8] sm:$0xff]  }
  0xb8   : > { %2931 = vmatmul.mubr.bf16.vlgmr.msra.gmra.mrb[16].mxu0 %v935_v13  ;;  %4039 = vmatprep.subr.bf16.mxu1 %v4383_v15  ;;  %v297_v13 = vld [vmem:[%s4592_s30 + $0x18] sm:$0xff] }
  0xb9   : > { %4018 = vmatpush3.bf16.msra.mxu0 %v4384_v17  ;;  %3010 = vmatprep.mubr.bf16.mxu0 %v956_v16  ;;  %v968_v15 = vrot.slane %v297_v13, %v4635_v42  ;;  %v961_v16 = vcombine.high %v297_v13, %v297_v13  ;;  %v4441_v17 = vld [vmem:[%s4597_s11 + $0x630] sm:$0xff]  }
  0xba   : > { %2971 = vmatmul.mubr.bf16.vlgmr.msra.gmra.mrb[16].mxu1 %v957_v19  ;;  %4019 = vmatprep.subr.bf16.mxu0 %v4386_v20 }
  0xbb   : > { %4040 = vmatpush3.bf16.msra.mxu1 %v4385_v18  ;;  %3050 = vmatprep.mubr.bf16.mxu1 %v960_v22  ;;  %v4443_v18 = vld [vmem:[%s4597_s11 + $0x678] sm:$0xff]   ;;  %v976_v19 = vcombine.high %v968_v15, %v968_v15  ;;  %v4861_v20 = vrot.slane %v961_v16, %v4635_v42 }
  0xbc   : > { %4041 = vmatprep.subr.bf16.mxu1 %v4387_v21  ;;  %v4442_v21 = vld [vmem:[%s4597_s11 + $0x6b0] sm:$0xff]   ;;  %v4444_v22 = vld [vmem:[%s4597_s11 + $0x6f8] sm:$0xff]  }
  0xbd   : > { %4020 = vmatpush3.bf16.msra.mxu0 %v4388_v23  ;;  %v998_v23 = vrot.slane %v976_v19, %v4635_v42 }
  0xbe   : > { %4021 = vmatprep.subr.bf16.mxu0 %v4390_v25  ;;  %v4445_v25 = vld [vmem:[%s4597_s11 + $0x638] sm:$0xff]  }
  0xbf   : > { %4042 = vmatpush3.bf16.msra.mxu1 %v4389_v24  ;;  %v977_v24 = vcombine.high %v4861_v20, %v4861_v20 }
  0xc0   : > { %4043 = vmatprep.subr.bf16.mxu1 %v4391_v26  ;;  %v1008_v26 = vcombine.high %v998_v23, %v998_v23 }
  0xc1   : > { %4022 = vmatpush3.bf16.msra.mxu0 %v4392_v27  ;;  %v984_v27 = vrot.slane %v968_v15, %v4635_v42 }
  0xc2   : > { %4023 = vmatprep.subr.bf16.mxu0 %v4394_v29  ;;  %v4446_v29 = vld [vmem:[%s4597_s11 + $0x6b8] sm:$0xff]  }
  0xc3   : > { %4044 = vmatpush3.bf16.msra.mxu1 %v4393_v28  ;;  %v4447_v28 = vld [vmem:[%s4597_s11 + $0x740] sm:$0xff]  }
  0xc4   : > { %4045 = vmatprep.subr.bf16.mxu1 %v4395_v30  ;;  %v1005_v30 = vrot.slane %v977_v24, %v4635_v42 }
  0xc5   : > { %4024 = vmatpush3.bf16.msra.mxu0 %v4396_v31  ;;  %v4448_v31 = vld [vmem:[%s4597_s11 + $0x7c0] sm:$0xff]  }
  0xc6   : > { %4025 = vmatprep.subr.bf16.mxu0 %v4398_v33  ;;  %v1006_v33 = vcombine.high %v984_v27, %v984_v27 }
  0xc7   : > { %4046 = vmatpush3.bf16.msra.mxu1 %v4397_v32  ;;  %v4449_v32 = vld [vmem:[%s4597_s11 + $0x700] sm:$0xff]  }
  0xc8   : > { %4047 = vmatprep.subr.bf16.mxu1 %v4399_v34  ;;  %v4451_v34 = vld [vmem:[%s4597_s11 + $0x748] sm:$0xff]  }
  0xc9   : > { %4026 = vmatpush3.bf16.msra.mxu0 %v4400_v35  ;;  %v4450_v35 = vld [vmem:[%s4597_s11 + $0x780] sm:$0xff]  }
  0xca   : > { %4027 = vmatprep.subr.bf16.mxu0 %v4402_v37  ;;  %v4452_v37 = vld [vmem:[%s4597_s11 + $0x7c8] sm:$0xff]  }
  0xcb   : > { %4048 = vmatpush3.bf16.msra.mxu1 %v4401_v36  ;;  %v1009_v36 = vcombine.high %v1005_v30, %v1005_v30 }
  0xcc   : > { %4049 = vmatprep.subr.bf16.mxu1 %v4403_v38  ;;  %v4453_v38 = vld [vmem:[%s4597_s11 + $0x708] sm:$0xff]  }
  0xcd   : > { %4028 = vmatpush3.bf16.msra.mxu0 %v4404_v39  ;;  %v4455_v39 = vld [vmem:[%s4597_s11 + $0x750] sm:$0xff]  }
  0xce   : > { %4029 = vmatprep.subr.bf16.mxu0 %v4406_v41  ;;  %v4456_v41 = vld [vmem:[%s4597_s11 + $0x7d0] sm:$0xff]  }
  0xcf   : > { %4050 = vmatpush3.bf16.msra.mxu1 %v4405_v40  ;;  %v4454_v40 = vld [vmem:[%s4597_s11 + $0x788] sm:$0xff]  }
  0xd0   : > { %4051 = vmatprep.subr.bf16.mxu1 %v4407_v43  ;;  %v4457_v43 = vld [vmem:[%s4597_s11 + $0x710] sm:$0xff]  }
  0xd1   : > { %4030 = vmatpush3.bf16.msra.mxu0 %v4408_v44  ;;  %v4459_v44 = vld [vmem:[%s4597_s11 + $0x758] sm:$0xff]  }
  0xd2   : > { %4031 = vmatprep.subr.bf16.mxu0 %v4410_v46  ;;  %v4460_v46 = vld [vmem:[%s4597_s11 + $0x7d8] sm:$0xff]  }
  0xd3   : > { %4052 = vmatpush3.bf16.msra.mxu1 %v4409_v45  ;;  %v4458_v45 = vld [vmem:[%s4597_s11 + $0x790] sm:$0xff]  }
  0xd4   : > { %4053 = vmatprep.subr.bf16.mxu1 %v4411_v47  ;;  %v4461_v47 = vld [vmem:[%s4597_s11 + $0x718] sm:$0xff]  }
  0xd5   : > { %4032 = vmatpush3.bf16.msra.mxu0 %v4412_v48  ;;  %v4463_v48 = vld [vmem:[%s4597_s11 + $0x760] sm:$0xff]  }
  0xd6   : > { %4061 = vmatprep.subr.bf16.mxu0 %v4415_v51  ;;  %v4465_v51 = vld [vmem:[%s4597_s11 + $0x720] sm:$0xff]  }
  0xd7   : > { %4054 = vmatpush3.bf16.msra.mxu1 %v4413_v49  ;;  %v4462_v49 = vld [vmem:[%s4597_s11 + $0x798] sm:$0xff]  }
  0xd8   : > { %3011 = vmatmul.mubr.bf16.vlgmr.msra.gmra.mrb[20].mxu0 %v942_v50  ;;  %4083 = vmatprep.subr.bf16.mxu1 %v4416_v52  ;;  %v4464_v50 = vld [vmem:[%s4597_s11 + $0x7e0] sm:$0xff]   ;;  %v4467_v52 = vld [vmem:[%s4597_s11 + $0x768] sm:$0xff]  }
  0xd9   : > { %4062 = vmatpush3.bf16.msra.mxu0 %v4417_v53  ;;  %3090 = vmatprep.mubr.bf16.mxu0 %v998_v23  ;;  %v4466_v53 = vld [vmem:[%s4597_s11 + $0x7a0] sm:$0xff]  }
  0xda   : > { %3051 = vmatmul.mubr.bf16.vlgmr.msra.gmra.mrb[20].mxu1 %v958_v55  ;;  %4063 = vmatprep.subr.bf16.mxu0 %v4419_v56  ;;  %v4469_v55 = vld [vmem:[%s4597_s11 + $0x728] sm:$0xff]   ;;  %v4471_v56 = vld [vmem:[%s4597_s11 + $0x770] sm:$0xff]  }
  0xdb   : > { %4084 = vmatpush3.bf16.msra.mxu1 %v4418_v54  ;;  %3130 = vmatprep.mubr.bf16.mxu1 %v1008_v26  ;;  %v4468_v54 = vld [vmem:[%s4597_s11 + $0x7e8] sm:$0xff]  }
  0xdc   : > { %4085 = vmatprep.subr.bf16.mxu1 %v4420_v57 }
  0xdd   : > { %4064 = vmatpush3.bf16.msra.mxu0 %v4421_v58  ;;  %v4470_v58 = vld [vmem:[%s4597_s11 + $0x7a8] sm:$0xff]  }
  0xde   : > { %4065 = vmatprep.subr.bf16.mxu0 %v4423_v60  ;;  %v4472_v60 = vld [vmem:[%s4597_s11 + $0x7f0] sm:$0xff]  }
  0xdf   : > { %4086 = vmatpush3.bf16.msra.mxu1 %v4422_v59 }
  0xe0   : > { %4087 = vmatprep.subr.bf16.mxu1 %v4424_v61 }
  0xe1   : > { %4066 = vmatpush3.bf16.msra.mxu0 %v4425_v62 }
  0xe2   : > { %4067 = vmatprep.subr.bf16.mxu0 %v4427_v0  ;;  %v4473_v0 = vld [vmem:[%s4597_s11 + $0x730] sm:$0xff]  }
  0xe3   : > { %4088 = vmatpush3.bf16.msra.mxu1 %v4426_v63 }
  0xe4   : > { %4089 = vmatprep.subr.bf16.mxu1 %v4428_v1 }
  0xe5   : > { %4068 = vmatpush3.bf16.msra.mxu0 %v4429_v2 }
  0xe6   : > { %4069 = vmatprep.subr.bf16.mxu0 %v4431_v4 }
  0xe7   : > { %4090 = vmatpush3.bf16.msra.mxu1 %v4430_v3  ;;  %v4475_v3 = vld [vmem:[%s4597_s11 + $0x778] sm:$0xff]  }
  0xe8   : > { %4091 = vmatprep.subr.bf16.mxu1 %v4432_v5 }
  0xe9   : > { %4070 = vmatpush3.bf16.msra.mxu0 %v4433_v6  ;;  %v4474_v6 = vld [vmem:[%s4597_s11 + $0x7b0] sm:$0xff]  }
  0xea   : > { %4071 = vmatprep.subr.bf16.mxu0 %v4435_v8  ;;  %v4476_v8 = vld [vmem:[%s4597_s11 + $0x7f8] sm:$0xff]  }
  0xeb   : > { %4092 = vmatpush3.bf16.msra.mxu1 %v4434_v7 }
  0xec   : > { %4093 = vmatprep.subr.bf16.mxu1 %v4436_v9 }
  0xed   : > { %4072 = vmatpush3.bf16.msra.mxu0 %v4437_v10  ;;  %v4477_v10 = vld [vmem:[%s4597_s11 + $0x738] sm:$0xff]  }
  0xee   : > { %4073 = vmatprep.subr.bf16.mxu0 %v4439_v12  ;;  %v4478_v12 = vld [vmem:[%s4597_s11 + $0x7b8] sm:$0xff]  }
  0xef   : > { %4094 = vmatpush3.bf16.msra.mxu1 %v4438_v11  ;;  %v991_v11 = vrot.slane %v4861_v20, %v4635_v42 }
  0xf0   : > { %4095 = vmatprep.subr.bf16.mxu1 %v4440_v14 }
  0xf1   : > { %4074 = vmatpush3.bf16.msra.mxu0 %v4441_v17  ;;  %v1007_v13 = vcombine.high %v991_v11, %v991_v11 }
  0xf2   : > { %4075 = vmatprep.subr.bf16.mxu0 %v4443_v18 }
  0xf3   : > { %4096 = vmatpush3.bf16.msra.mxu1 %v4442_v21 }
  0xf4   : > { %4097 = vmatprep.subr.bf16.mxu1 %v4444_v22 }
  0xf5   : > { %4076 = vmatpush3.bf16.msra.mxu0 %v4445_v25 }
  0xf6   : > { %4105 = vmatprep.subr.bf16.mxu0 %v4447_v28 }
  0xf7   : > { %4098 = vmatpush3.bf16.msra.mxu1 %v4446_v29 }
  0xf8   : > { %3091 = vmatmul.mubr.bf16.vlgmr.msra.gmra.mrb[24].mxu0 %v984_v27  ;;  %4127 = vmatprep.subr.bf16.mxu1 %v4448_v31 }
  0xf9   : > { %4106 = vmatpush3.bf16.msra.mxu0 %v4449_v32  ;;  %3170 = vmatprep.mubr.bf16.mxu0 %v1005_v30 }
  0xfa   : > { %3131 = vmatmul.mubr.bf16.vlgmr.msra.gmra.mrb[24].mxu1 %v1006_v33  ;;  %4107 = vmatprep.subr.bf16.mxu0 %v4451_v34 }
  0xfb   : > { %4128 = vmatpush3.bf16.msra.mxu1 %v4450_v35  ;;  %3210 = vmatprep.mubr.bf16.mxu1 %v1009_v36 }
  0xfc   : > { %4129 = vmatprep.subr.bf16.mxu1 %v4452_v37 }
  0xfd   : > { %4108 = vmatpush3.bf16.msra.mxu0 %v4453_v38 }
  0xfe   : > { %4109 = vmatprep.subr.bf16.mxu0 %v4455_v39 }
  0xff   : > { %4130 = vmatpush3.bf16.msra.mxu1 %v4454_v40 }
 0x100   : > { %4131 = vmatprep.subr.bf16.mxu1 %v4456_v41 }
 0x101   : > { %4110 = vmatpush3.bf16.msra.mxu0 %v4457_v43 }
 0x102   : > { %4111 = vmatprep.subr.bf16.mxu0 %v4459_v44 }
 0x103   : > { %4132 = vmatpush3.bf16.msra.mxu1 %v4458_v45 }
 0x104   : > { %4133 = vmatprep.subr.bf16.mxu1 %v4460_v46 }
 0x105   : > { %4112 = vmatpush3.bf16.msra.mxu0 %v4461_v47 }
 0x106   : > { %4113 = vmatprep.subr.bf16.mxu0 %v4463_v48 }
 0x107   : > { %4134 = vmatpush3.bf16.msra.mxu1 %v4462_v49 }
 0x108   : > { %4135 = vmatprep.subr.bf16.mxu1 %v4464_v50 }
 0x109   : > { %4114 = vmatpush3.bf16.msra.mxu0 %v4465_v51 }
 0x10a   : > { %4115 = vmatprep.subr.bf16.mxu0 %v4467_v52 }
 0x10b   : > { %4136 = vmatpush3.bf16.msra.mxu1 %v4466_v53  ;;  %v3813_v57 = vpop.f32.mrb[0].mxu0 }
 0x10c   : > { %v3814_v59 = vpop.f32.mrb[1].mxu0  ;;  %4137 = vmatprep.subr.bf16.mxu1 %v4468_v54  ;;  %v3835_v61 = vpop.f32.mrb[0].mxu1 }
 0x10d   : > { %v3815_v62 = vadd.f32 %v3814_v59, %v3813_v57  ;;  %v3816_v63 = vpop.f32.mrb[2].mxu0  ;;  %4116 = vmatpush3.bf16.msra.mxu0 %v4469_v55  ;;  %v3836_v1 = vpop.f32.mrb[1].mxu1 }
 0x10e   : > { %v3817_v2 = vpop.f32.mrb[3].mxu0  ;;  %4117 = vmatprep.subr.bf16.mxu0 %v4471_v56  ;;  %v3837_v4 = vadd.f32 %v3836_v1, %v3835_v61  ;;  %v3838_v5 = vpop.f32.mrb[2].mxu1 }
 0x10f   : > { %4138 = vmatpush3.bf16.msra.mxu1 %v4470_v58  ;;  %v3839_v7 = vpop.f32.mrb[3].mxu1 }
 0x110   : > { %4139 = vmatprep.subr.bf16.mxu1 %v4472_v60  ;;  %v2653_v9 = vadd.f32 %v3837_v4, %v3815_v62 }
 0x111   : > { %4118 = vmatpush3.bf16.msra.mxu0 %v4473_v0 }
 0x112   : > { %4119 = vmatprep.subr.bf16.mxu0 %v4475_v3 }
 0x113   : > { %4140 = vmatpush3.bf16.msra.mxu1 %v4474_v6 }
 0x114   : > { %4141 = vmatprep.subr.bf16.mxu1 %v4476_v8 }
 0x115   : > { %4120 = vmatpush3.bf16.msra.mxu0 %v4477_v10 }
 0x117   : > { %4142 = vmatpush3.bf16.msra.mxu1 %v4478_v12 }
 0x118   : > { %3171 = vmatmul.mubr.bf16.vlgmr.msra.gmra.mrb[28].mxu0 %v991_v11 }
 0x11a   : > { %3211 = vmatmul.mubr.bf16.vlgmr.msra.gmra.mrb[28].mxu1 %v1007_v13 }
 0x12b   : > { %v3857_v14 = vpop.f32.mrb[4].mxu0 }
 0x12c   : > { %v3858_v15 = vpop.f32.mrb[5].mxu0  ;;  %v3879_v16 = vpop.f32.mrb[4].mxu1 }
 0x12d   : > { %v3859_v17 = vadd.f32 %v3858_v15, %v3857_v14  ;;  %v3860_v18 = vpop.f32.mrb[6].mxu0  ;;  %v3880_v19 = vpop.f32.mrb[5].mxu1 }
 0x12e   : > { %v3861_v21 = vpop.f32.mrb[7].mxu0  ;;  %v3881_v23 = vadd.f32 %v3880_v19, %v3879_v16  ;;  %v3882_v24 = vpop.f32.mrb[6].mxu1 }
 0x12f   : > { %v2693_v22 = vadd.f32 %v3859_v17, %v2653_v9  ;;  %v3883_v25 = vpop.f32.mrb[7].mxu1 }
 0x131   : > { %v2733_v42 = vadd.f32 %v3881_v23, %v2693_v22 }
 0x14b   : > { %v3901_v20 = vpop.f32.mrb[8].mxu0 }
 0x14c   : > { %v3902_v26 = vpop.f32.mrb[9].mxu0 }
 0x14d   : > { %v3923_v27 = vpop.f32.mrb[8].mxu1  ;;  %v3903_v28 = vadd.f32 %v3902_v26, %v3901_v20  ;;  %v3904_v29 = vpop.f32.mrb[10].mxu0 }
 0x14e   : > { %v3924_v30 = vpop.f32.mrb[9].mxu1  ;;  %v3905_v31 = vpop.f32.mrb[11].mxu0 }
 0x14f   : > { %v2773_v32 = vadd.f32 %v3903_v28, %v2733_v42  ;;  %v3925_v33 = vadd.f32 %v3924_v30, %v3923_v27  ;;  %v3926_v34 = vpop.f32.mrb[10].mxu1  ;;  %v293_v31 = vld [vmem:[#allocation2] sm:$0x3] }
 0x150   : > { %v3927_v35 = vpop.f32.mrb[11].mxu1 }
 0x151   : > { %v2813_v36 = vadd.f32 %v3925_v33, %v2773_v32  ;;  %v4480_v35 = vld [vmem:[%s4987_s3] sm:$0xff] (!%p3773_p6)  }
 0x16b   : > { %v3945_v37 = vpop.f32.mrb[12].mxu0 }
 0x16c   : > { %v3946_v38 = vpop.f32.mrb[13].mxu0 }
 0x16d   : > { %v3967_v39 = vpop.f32.mrb[12].mxu1  ;;  %v3947_v40 = vadd.f32 %v3946_v38, %v3945_v37  ;;  %v3948_v41 = vpop.f32.mrb[14].mxu0  ;;  %v4481_v37 = vld [vmem:[%s4987_s3 + $0x8] sm:$0xff] (!%p3773_p6)   ;;  %v4482_v38 = vld [vmem:[%s4987_s3 + $0x10] sm:$0xff] (!%p3773_p6)  }
 0x16e   : > { %v3968_v43 = vpop.f32.mrb[13].mxu1  ;;  %v3949_v44 = vpop.f32.mrb[15].mxu0  ;;  %v4489_v41 = vld [vmem:[%s4989_s5 + $0x8] sm:$0xff] (!%p3773_p6)  }
 0x16f   : > { %v2853_v45 = vadd.f32 %v3947_v40, %v2813_v36  ;;  %v3969_v46 = vadd.f32 %v3968_v43, %v3967_v39  ;;  %v3970_v47 = vpop.f32.mrb[14].mxu1  ;;  %v4534_v36 = vmov (!%p3773_p6), 0.0   ;;  %v4488_v39 = vld [vmem:[%s4989_s5] sm:$0xff] (!%p3773_p6)   ;;  %v4483_v40 = vld [vmem:[%s4987_s3 + $0x18] sm:$0xff] (!%p3773_p6)   ;;  %v4490_v44 = vld [vmem:[%s4989_s5 + $0x10] sm:$0xff] (!%p3773_p6)  }
 0x170   : > { %v3971_v48 = vpop.f32.mrb[15].mxu1  ;;  %4165 = vmatprep.subr.bf16.mxu0 (!%p3773_p6), %v4534_v36  ;;  %4185 = vmatprep.subr.bf16.mxu1 (!%p3773_p6), %v4534_v36  ;;  %v4484_v43 = vld [vmem:[%s4987_s3 + $0x20] sm:$0xff] (!%p3773_p6)  }
 0x171   : > { %v2893_v49 = vadd.f32 %v3969_v46, %v2853_v45  ;;  %4166 = vmatpush3.bf16.msra.mxu0 (!%p3773_p6), %v4480_v35  ;;  %4181 = vmatprep.mubr.msk.bf16.mxu0 (!%p3773_p6), %vm4535_vm2, %v4534_v36  ;;  %v4485_v45 = vld [vmem:[%s4987_s3 + $0x28] sm:$0xff] (!%p3773_p6)   ;;  %v3774_v47 = vld [vmem:[%s4986_s2] ss:$0 sm:$0xff] (!%p3773_p6)  ;;  %v4491_v48 = vld [vmem:[%s4989_s5 + $0x18] sm:$0xff] (!%p3773_p6)  }
 0x172   : > { %4167 = vmatprep.subr.bf16.mxu0 (!%p3773_p6), %v4534_v36  ;;  %4197 = vmatprep.mubr.msk.bf16.mxu1 (!%p3773_p6), %vm4535_vm2, %v4534_v36 }
 0x173   : > { %4186 = vmatpush3.bf16.msra.mxu1 (!%p3773_p6), %v4488_v39 }
 0x174   : > { %4187 = vmatprep.subr.bf16.mxu1 (!%p3773_p6), %v4534_v36 }
 0x175   : > { %4168 = vmatpush3.bf16.msra.mxu0 (!%p3773_p6), %v4481_v37 }
 0x176   : > { %4169 = vmatprep.subr.bf16.mxu0 (!%p3773_p6), %v4534_v36 }
 0x177   : > { %4188 = vmatpush3.bf16.msra.mxu1 (!%p3773_p6), %v4489_v41 }
 0x178   : > { %4189 = vmatprep.subr.bf16.mxu1 (!%p3773_p6), %v4534_v36 }
 0x179   : > { %4170 = vmatpush3.bf16.msra.mxu0 (!%p3773_p6), %v4482_v38 }
 0x17a   : > { %4171 = vmatprep.subr.bf16.mxu0 (!%p3773_p6), %v4534_v36 }
 0x17b   : > { %4190 = vmatpush3.bf16.msra.mxu1 (!%p3773_p6), %v4490_v44 }
 0x17c   : > { %4191 = vmatprep.subr.bf16.mxu1 (!%p3773_p6), %v4534_v36 }
 0x17d   : > { %4172 = vmatpush3.bf16.msra.mxu0 (!%p3773_p6), %v4483_v40 }
 0x17e   : > { %4173 = vmatprep.subr.bf16.mxu0 (!%p3773_p6), %v4534_v36 }
 0x17f   : > { %4192 = vmatpush3.bf16.msra.mxu1 (!%p3773_p6), %v4491_v48 }
 0x180   : > { %4193 = vmatprep.subr.bf16.mxu1 (!%p3773_p6), %v4534_v36 }
 0x181   : > { %4174 = vmatpush3.bf16.msra.mxu0 (!%p3773_p6), %v4484_v43 }
 0x182   : > { %4175 = vmatprep.subr.bf16.mxu0 (!%p3773_p6), %v4534_v36 }
 0x185   : > { %4176 = vmatpush3.bf16.msra.mxu0 (!%p3773_p6), %v4485_v45 }
 0x186   : > { %4177 = vmatprep.subr.bf16.mxu0 (!%p3773_p6), %v4534_v36 }
 0x18b   : > { %v3989_v50 = vpop.f32.mrb[16].mxu0 }
 0x18c   : > { %v3990_v51 = vpop.f32.mrb[17].mxu0 }
 0x18d   : > { %v4011_v52 = vpop.f32.mrb[16].mxu1  ;;  %v3991_v53 = vadd.f32 %v3990_v51, %v3989_v50  ;;  %v3992_v54 = vpop.f32.mrb[18].mxu0  ;;  %v4486_v50 = vld [vmem:[%s4987_s3 + $0x30] sm:$0xff] (!%p3773_p6)   ;;  %v4487_v51 = vld [vmem:[%s4987_s3 + $0x38] ss:$0 sps:$4 sm:$0xff] (!%p3773_p6)  }
 0x18e   : > { %v4012_v55 = vpop.f32.mrb[17].mxu1  ;;  %v3993_v56 = vpop.f32.mrb[19].mxu0  ;;  %4178 = vmatpush3.bf16.msra.mxu0 (!%p3773_p6), %v4486_v50 }
 0x18f   : > { %v2933_v57 = vadd.f32 %v3991_v53, %v2893_v49  ;;  %v4013_v58 = vadd.f32 %v4012_v55, %v4011_v52  ;;  %v4014_v59 = vpop.f32.mrb[18].mxu1  ;;  %4179 = vmatprep.subr.bf16.mxu0 (!%p3773_p6), %v4534_v36  ;;  %v3309_v53 = vsel (!%p3773_p6), %vm3307_vm3, %v4487_v51, 0  ;;  %v4492_v55 = vld [vmem:[%s4989_s5 + $0x20] sm:$0xff] (!%p3773_p6)   ;;  %v4493_v56 = vld [vmem:[%s4989_s5 + $0x28] ss:$0 sps:$4 sm:$0x33] (!%p3773_p6)  }
 0x190   : > { %v4015_v60 = vpop.f32.mrb[19].mxu1  ;;  %4194 = vmatpush3.bf16.msra.mxu1 (!%p3773_p6), %v4492_v55 }
 0x191   : > { %v2973_v61 = vadd.f32 %v4013_v58, %v2933_v57  ;;  %4195 = vmatprep.subr.bf16.mxu1 (!%p3773_p6), %v4534_v36  ;;  %v3410_v57 = vsel (!%p3773_p6), %vm3408_vm5, %v4493_v56, 0  ;;  %v3775_v58 = vld [vmem:[%s4988_s4] ss:$0 sm:$0xff] (!%p3773_p6) }
 0x192   : > { %4180 = vmatpush3.bf16.msra.mxu0 (!%p3773_p6), %v3309_v53 }
 0x194   : > { %4196 = vmatpush3.bf16.msra.mxu1 (!%p3773_p6), %v3410_v57 }
 0x1ab   : > { %v4033_v62 = vpop.f32.mrb[20].mxu0 }
 0x1ac   : > { %v4034_v63 = vpop.f32.mrb[21].mxu0 }
 0x1ad   : > { %v4055_v0 = vpop.f32.mrb[20].mxu1  ;;  %v4035_v1 = vadd.f32 %v4034_v63, %v4033_v62  ;;  %v4036_v2 = vpop.f32.mrb[22].mxu0 }
 0x1ae   : > { %v4056_v3 = vpop.f32.mrb[21].mxu1  ;;  %v4037_v4 = vpop.f32.mrb[23].mxu0  ;;  %v3785_v2 = vld [vmem:[%s4990_s6] ss:$0 sm:$0xff] (!%p3773_p6) }
 0x1af   : > { %v3013_v5 = vadd.f32 %v4035_v1, %v2973_v61  ;;  %v4057_v6 = vadd.f32 %v4056_v3, %v4055_v0  ;;  %v4058_v7 = vpop.f32.mrb[22].mxu1 }
 0x1b0   : > { %v4059_v8 = vpop.f32.mrb[23].mxu1 }
 0x1b1   : > { %v3053_v9 = vadd.f32 %v4057_v6, %v3013_v5 }
 0x1cb   : > { %v4077_v10 = vpop.f32.mrb[24].mxu0 }
 0x1cc   : > { %v4078_v11 = vpop.f32.mrb[25].mxu0 }
 0x1cd   : > { %v4099_v12 = vpop.f32.mrb[24].mxu1  ;;  %v4079_v13 = vadd.f32 %v4078_v11, %v4077_v10  ;;  %v4080_v14 = vpop.f32.mrb[26].mxu0 }
 0x1ce   : > { %v4100_v15 = vpop.f32.mrb[25].mxu1  ;;  %v4081_v16 = vpop.f32.mrb[27].mxu0 }
 0x1cf   : > { %v3093_v17 = vadd.f32 %v4079_v13, %v3053_v9  ;;  %v4101_v18 = vadd.f32 %v4100_v15, %v4099_v12  ;;  %v4102_v19 = vpop.f32.mrb[26].mxu1 }
 0x1d0   : > { %v4103_v21 = vpop.f32.mrb[27].mxu1 }
 0x1d1   : > { %v3133_v22 = vadd.f32 %v4101_v18, %v3093_v17 }
 0x1eb   : > { %v4121_v23 = vpop.f32.mrb[28].mxu0 }
 0x1ec   : > { %v4122_v24 = vpop.f32.mrb[29].mxu0 }
 0x1ed   : > { %v4143_v25 = vpop.f32.mrb[28].mxu1  ;;  %v4123_v42 = vadd.f32 %v4122_v24, %v4121_v23  ;;  %v4124_v20 = vpop.f32.mrb[30].mxu0 }
 0x1ee   : > { %v4144_v26 = vpop.f32.mrb[29].mxu1  ;;  %v4125_v27 = vpop.f32.mrb[31].mxu0 }
 0x1ef   : > { %v3173_v28 = vadd.f32 %v4123_v42, %v3133_v22  ;;  %v4145_v29 = vadd.f32 %v4144_v26, %v4143_v25  ;;  %v4146_v30 = vpop.f32.mrb[30].mxu1  ;;  %3224 = sbr.rel (%p3773_p6) target bundleno = 948 (0x3b4), region = 56 }
 0x1f0   : > { %v4147_v32 = vpop.f32.mrb[31].mxu1 }
 0x1f1   : > { %v3213_v33 = vadd.f32 %v4145_v29, %v3173_v28 }
 0x1f3   : > { %v3218_v34 = vadd.f32 %v3213_v33, %v293_v31 }
 0x1f5   : > { %3220 = vst.msk [vmem:[#allocation2] sm:$0x3] %vm3219_vm1, %v3218_v34 }
 0x1fc   : > { %v3225_v46 = vld [vmem:[#allocation2] sm:$0x3] }
 0x1fd   : > { %v3233_v49 = vadd.f32 %v3774_v47, %v3225_v46 }
 0x1ff   : > { %v3234_v52 = vmax.f32 %v3233_v49, 0.0 }
 0x201   : > { %v3235_v54 = vpack.c.bf16 %v3234_v52, %v3234_v52 }
 0x203   : > { %4182 = vmatmul.mubr.msk.bf16.vlgmr.msra.gmra.mrb[0].mxu0 %vm3303_vm4, %v3235_v54 }
 0x2d6   : > { %v3345_v59 = vpop.f32.mrb[0].mxu0 }
 0x2d7   : > { %v3346_v60 = vadd.f32 %v3775_v58, %v3345_v59  ;;  %v4183_v61 = vpop.f32.mrb[1].mxu0 }
 0x2d8   : > { %v3348_v62 = vpop.f32.mrb[2].mxu0 }
 0x2d9   : > { %v3351_v63 = vmax.f32 %v3346_v60, 0.0  ;;  %v4184_v0 = vpop.f32.mrb[3].mxu0 }
 0x2db   : > { %v3352_v1 = vpack.c.bf16 %v3351_v63, %v3351_v63 }
 0x2dd   : > { %4198 = vmatmul.mubr.msk.bf16.vlgmr.msra.gmra.mrb[0].mxu1 %vm3404_vm6, %v3352_v1 }
 0x3b0   : > { %v3446_v3 = vpop.f32.mrb[0].mxu1 }
 0x3b1   : > { %v3447_v4 = vadd.f32 %v3785_v2, %v3446_v3  ;;  %v4199_v5 = vpop.f32.mrb[1].mxu1 }
 0x3b2   : > { %v3449_v6 = vpop.f32.mrb[2].mxu1 }
 0x3b3   : > { %3453 = vst.msk [vmem:[#allocation3] sm:$0x3] %vm3452_vm7, %v3447_v4  ;;  %v4200_v7 = vpop.f32.mrb[3].mxu1 }
 0x3b4 PF: > { %p4205_p7 = scmp.eq.s32.totalorder %s4583_s25, 24  ;;  %s4536_s27 = smov [#allocation3]  }
 0x3b5   : > { %s3461_s28 = sshll.u32 %s4536_s27, 4  ;;  %s3462_s28 = int_to_ptr.vmem [resolvable:$true] %s3461_s28 }
 0x3b6   : > { %s4494_s29 = scalar_lea.vmem %s3462_s28, 32  ;;  %p4501_p11 = scmp.lt.s32.totalorder %s3462_s28, %s3462_s28 }
 0x3b7   : > { %p4495_p8 = scmp.ne.s32.totalorder %s3462_s28, %s4494_s29  ;;  %p4502_p12 = scmp.lt.s32.totalorder %s4494_s29, %s4494_s29 }
 0x3b9   : > { %p4496_p9 = pnand %p4495_p8, %p4205_p7  ;;  %p4503_p13 = por %p4502_p12, %p4501_p11 }
 0x3bb   : > { %p4497_p10 = pneg %p4496_p9 }
 0x3bd   : > { %p4504_p0 = pnand %p4503_p13, %p4497_p10 }
 0x3bf   : > { %4507 = shalt.err (!%p4504_p0)
}
 0x3c0   : > { %s4508_s9 = scalar_lea.hbm %s4991_s7, 32 }
 0x3c1   : > { %p4509_p1 = scmp.ne.s32.totalorder %s4991_s7, %s4508_s9  ;;  %p4514_p4 = scmp.lt.u32.totalorder %s4508_s9, %s4991_s7 }
 0x3c3   : > { %p4510_p2 = pnand %p4509_p1, %p4205_p7 }
 0x3c5   : > { %p4511_p3 = pneg %p4510_p2 }
 0x3c7   : > { %p4516_p5 = pnand %p4514_p4, %p4511_p3 }
 0x3c9   : > { %4519 = shalt.err (!%p4516_p5)
}
 0x3ca   : > { %4202 = dma.vmem_to_hbm [thread:$0]  (%p4205_p7), %s3462_s28, 32, %s4991_s7, [#allocation4]  }
 0x3cb   : > { %4525 = dma.done.wait (%p4205_p7), [#allocation4], 32  }
 0x3cc   : > { %4527 = vsyncadd (%p4205_p7), [#allocation4], 4294967264 }
 0x3cd PF: > { %s18_s24 = sadd.s32 1, %s4530_s24  }
 0x3ce   : > { %p15_p6 = scmp.ge.s32.totalorder %s18_s24, 27  }
 0x3d0   :  { %17 = sbr.rel (!%p15_p6) target bundleno = 1 (0x1), region = 86 }
 0x3d7   :  { %3474 = vsyncpa [#allocation4], 1 }
 0x3d8   :  { %3476 = vsyncpa [#allocation4 + $0x1], 1 }

</bundles_post_ra>
